<compile_context>
chip_gen: v5e
topology: v5e:2x2
jax: 0.10.0
libtpu: 0.0.40
codegen_flags: <defaults>
</compile_context>

<pallas_src>
from collections import OrderedDict

import numpy as np
import jax
import jax.numpy as jnp
from jax.experimental import pallas as pl
from jax.experimental.pallas import tpu as pltpu


_TAPS = tuple((dy, dx) for dy in (-1, 0, 1) for dx in (-1, 0, 1))


# ---------------------------------------------------------------------------
# Structural constants (numpy, built once at setup; all linear-ish in tokens).
# Token order everywhere: token = b * (H*W) + i * W + j  (batch folded in).
# ---------------------------------------------------------------------------
def _conv_masks(h, w, batch):
    """(9, 1, B*h*w) 0/1 masks: tap (dy,dx) in-bounds at token (b,i,j)."""
    n = batch * h * w
    m = np.zeros((9, 1, n), np.float32)
    for k, (dy, dx) in enumerate(_TAPS):
        for b in range(batch):
            for i in range(h):
                for j in range(w):
                    if 0 <= i + dy < h and 0 <= j + dx < w:
                        m[k, 0, b * h * w + i * w + j] = 1.0
    return m


def _merge_select_t(h, w, batch):
    """(4, B*h*w, B*(h//2)*(w//2)) 2x2-neighbourhood gather matrices."""
    ho, wo = h // 2, w // 2
    m = np.zeros((4, batch * h * w, batch * ho * wo), np.float32)
    for k, (dy, dx) in enumerate(((0, 0), (0, 1), (1, 0), (1, 1))):
        for b in range(batch):
            for i in range(ho):
                for j in range(wo):
                    src = b * h * w + (2 * i + dy) * w + (2 * j + dx)
                    dst = b * ho * wo + i * wo + j
                    m[k, src, dst] = 1.0
    return m


def _upsample_t(hf, wf, hc, wc, batch):
    """(B*hc*wc, B*hf*wf) nearest-neighbour upsample (coarse -> fine tokens)."""
    sh, sw = hf // hc, wf // wc
    m = np.zeros((batch * hc * wc, batch * hf * wf), np.float32)
    for b in range(batch):
        for i in range(hf):
            for j in range(wf):
                m[b * hc * wc + (i // sh) * wc + (j // sw),
                  b * hf * wf + i * wf + j] = 1.0
    return m


def _pool_t(h, w, batch):
    """max_pool2d(kernel=1, stride=2) == stride-2 subsample, per image."""
    ho, wo = -(-h // 2), -(-w // 2)
    m = np.zeros((batch * h * w, batch * ho * wo), np.float32)
    for b in range(batch):
        for i in range(ho):
            for j in range(wo):
                m[b * h * w + (2 * i) * w + (2 * j),
                  b * ho * wo + i * wo + j] = 1.0
    return m


# ---------------------------------------------------------------------------
# Synthetic parameters (natural layout, like the PyTorch module would hold).
# ---------------------------------------------------------------------------
def _dense(key, fan_in, fan_out, scale=0.05):
    kw, kb = jax.random.split(key)
    return (jax.random.normal(kw, (fan_in, fan_out), jnp.float32) * scale,
            jax.random.normal(kb, (fan_out,), jnp.float32) * scale)


def init_params(key, in_ch=3, patch=2, embed_dim=32, out_channels=32):
    keys = iter(jax.random.split(key, 32))
    dims = [embed_dim, 2 * embed_dim, 4 * embed_dim, 8 * embed_dim]

    pw, pb = _dense(next(keys), patch * patch * in_ch, embed_dim)
    params = {"patch_embed": {"w": pw, "b": pb}, "stages": [], "merges": []}
    for d in dims:
        w1, b1 = _dense(next(keys), d, d)
        w2, b2 = _dense(next(keys), d, d)
        params["stages"].append({"w1": w1, "b1": b1, "w2": w2, "b2": b2})
    for d in dims[:-1]:
        mw, mb = _dense(next(keys), 4 * d, 2 * d)
        params["merges"].append({"w": mw, "b": mb})

    inner_w, inner_b, layer_w, layer_b = [], [], [], []
    for d in dims:                                  # in_channels_list
        iw, ib = _dense(next(keys), d, out_channels)
        inner_w.append(iw)
        inner_b.append(ib)
        lw, lb = _dense(next(keys), 9 * out_channels, out_channels)
        layer_w.append(lw.reshape(3, 3, out_channels, out_channels))
        layer_b.append(lb)
    params["fpn"] = {"inner_w": inner_w, "inner_b": inner_b,
                     "layer_w": layer_w, "layer_b": layer_b}
    return params


# ---------------------------------------------------------------------------
# Build the fused forward: packs weights once, emits one grid-less pallas_call.
# ---------------------------------------------------------------------------
def build_forward(params, *, batch, in_ch, height, width, patch=2, out_channels=32):
    bf = jnp.bfloat16
    C = out_channels
    embed = params["patch_embed"]["w"].shape[1]
    dims = [embed, 2 * embed, 4 * embed, 8 * embed]
    cp = patch * patch * in_ch

    h0, w0 = height // patch, width // patch
    hs = [h0 >> l for l in range(4)]
    ws = [w0 >> l for l in range(4)]
    ts = [hs[l] * ws[l] for l in range(4)]
    ns = [batch * t for t in ts]                       # batch folded into lanes
    h_pool, w_pool = -(-hs[3] // 2), -(-ws[3] // 2)
    n_pool = batch * h_pool * w_pool
    total = sum(ns) + n_pool
    total_pad = max(128, -(-total // 128) * 128)       # lane-dense output slab

    # ---- per-level 3x3-conv tap metadata ------------------------------------
    masks_np = [_conv_masks(hs[l], ws[l], batch) for l in range(4)]
    tap_state, active = [], []
    for l in range(4):
        st = []
        for k, (dy, dx) in enumerate(_TAPS):
            off = dy * ws[l] + dx
            col = masks_np[l][k, 0]
            if (not col.any()) or abs(off) >= ns[l]:
                st.append("zero")
            elif col.all():
                st.append("full")
            else:
                st.append("mask")
        tap_state.append(st)
        active.append(tuple(k for k in range(9) if st[k] != "zero"))

    # ---- pack weights into kernel (transposed, channel-major) layout --------
    names, arrays = [], []

    def add(name, arr):
        names.append(name)
        arrays.append(arr)

    def col(b):                                        # bias as f32 (C, 1) column
        return jnp.asarray(b, jnp.float32).reshape(-1, 1)

    pe = params["patch_embed"]
    add("pe_w", jnp.asarray(np.asarray(pe["w"]).T, bf))
    add("pe_b", col(pe["b"]))
    for s in range(4):
        st = params["stages"][s]
        add(f"st{s}_w1", jnp.asarray(np.asarray(st["w1"]).T, bf))
        add(f"st{s}_b1", col(st["b1"]))
        add(f"st{s}_w2", jnp.asarray(np.asarray(st["w2"]).T, bf))
        add(f"st{s}_b2", col(st["b2"]))
    for s in range(3):
        mg = params["merges"][s]
        # TODO(synk): neighbour order ((0,0),(0,1),(1,0),(1,1)) is self-consistent
        # here but differs from torchvision PatchMerging if real weights are loaded.
        add(f"mg{s}_w", jnp.asarray(np.asarray(mg["w"]).T, bf))        # (2d, 4d)
        add(f"mg{s}_b", col(mg["b"]))
        add(f"mg{s}_sel", jnp.asarray(_merge_select_t(hs[s], ws[s], batch), bf))
    fpn = params["fpn"]
    for l in range(4):
        add(f"in{l}_w", jnp.asarray(np.asarray(fpn["inner_w"][l]).T, bf))
        add(f"in{l}_b", col(fpn["inner_b"][l]))
        wl = np.asarray(fpn["layer_w"][l])             # (3, 3, C_in, C_out)
        blocks = []
        for k in active[l]:
            dy, dx = _TAPS[k]
            blocks.append(wl[dy + 1, dx + 1].T)        # (C_out, C_in)
        add(f"lay{l}_w", jnp.asarray(np.concatenate(blocks, axis=1), bf))
        add(f"lay{l}_b", col(fpn["layer_b"][l]))
        if any(tap_state[l][k] == "mask" for k in range(9)):
            add(f"mask{l}", jnp.asarray(masks_np[l], bf))
    for l in range(3):
        add(f"up{l}", jnp.asarray(
            _upsample_t(hs[l], ws[l], hs[l + 1], ws[l + 1], batch), bf))
    add("pool", jnp.asarray(_pool_t(hs[3], ws[3], batch), bf))

    kernel_names = ("x",) + tuple(names)
    n_in = len(kernel_names)

    # ---- advisory cost estimate ----------------------------------------------
    def dflops(m, k, n):
        return 2 * m * k * n

    fl = dflops(embed, cp, ns[0])
    for s in range(4):
        fl += 2 * dflops(dims[s], dims[s], ns[s])
        if s < 3:
            fl += 4 * dflops(dims[s], ns[s], ns[s + 1])
            fl += dflops(dims[s + 1], 4 * dims[s], ns[s + 1])
    for l in range(4):
        fl += dflops(C, dims[l], ns[l])
        fl += dflops(C, len(active[l]) * C, ns[l])
    for l in range(3):
        fl += dflops(C, ns[l + 1], ns[l])
    fl += dflops(C, ns[3], n_pool)
    transc = sum(dims[s] * ns[s] for s in range(4))
    bytes_acc = (cp * ns[0] * 2
                 + sum(int(a.size) * int(a.dtype.itemsize) for a in arrays)
                 + C * total_pad * 4)
    cost = pl.CostEstimate(flops=int(fl), transcendentals=int(transc),
                           bytes_accessed=int(bytes_acc))

    # ---- the fused kernel (no grid: whole batch in one shot) -----------------
    def kernel(*refs):
        g = dict(zip(kernel_names, refs[:n_in]))
        out_ref = refs[n_in]

        def mxu(a, b):                                 # bf16 x bf16, f32 accum
            return jnp.dot(a, b, preferred_element_type=jnp.float32)

        # -------- backbone: channel-major tokens (C, B*T) --------------------
        t = mxu(g["pe_w"][...], g["x"][...]) + g["pe_b"][...]        # patch embed
        feats_bf = []
        for s in range(4):
            # TODO(synk): real Swin stages use windowed self-attention + LN; the
            # spec does not define the backbone, so a residual MLP stage stands in.
            tb = t.astype(bf)
            h = jax.nn.gelu(mxu(g[f"st{s}_w1"][...], tb) + g[f"st{s}_b1"][...],
                            approximate=True)
            # TODO(synk): PyTorch nn.GELU defaults to exact erf; tanh approx here.
            h = mxu(g[f"st{s}_w2"][...], h.astype(bf)) + g[f"st{s}_b2"][...]
            t = t + h
            tb = t.astype(bf)
            feats_bf.append(tb)
            if s < 3:
                # patch merging: gather 4 sub-grids, stack on channels, ONE wide-K matmul
                sel = g[f"mg{s}_sel"]
                gathered = jnp.concatenate(
                    [mxu(tb, sel[k]).astype(bf) for k in range(4)], axis=0)
                t = mxu(g[f"mg{s}_w"][...], gathered) + g[f"mg{s}_b"][...]

        # -------- FPN: lateral 1x1 + nearest top-down add --------------------
        inner_bf = [None] * 4
        top = mxu(g["in3_w"][...], feats_bf[3]) + g["in3_b"][...]
        inner_bf[3] = top.astype(bf)
        for l in (2, 1, 0):
            lat = mxu(g[f"in{l}_w"][...], feats_bf[l]) + g[f"in{l}_b"][...]
            lat = lat + mxu(inner_bf[l + 1], g[f"up{l}"][...])
            inner_bf[l] = lat.astype(bf)

        # -------- FPN 3x3 convs: zero-fill lane shifts + masks, fused wide-K --
        results = []
        for l in range(4):
            n, w = ns[l], ws[l]
            ib = inner_bf[l]
            blocks = []
            for k in active[l]:
                dy, dx = _TAPS[k]
                off = dy * w + dx
                if off == 0:
                    sh = ib
                elif off > 0:
                    sh = jnp.concatenate(
                        [ib[:, off:], jnp.zeros((C, off), bf)], axis=1)
                else:
                    sh = jnp.concatenate(
                        [jnp.zeros((C, -off), bf), ib[:, :off]], axis=1)
                if tap_state[l][k] == "mask":
                    sh = sh * g[f"mask{l}"][k]
                blocks.append(sh)
            stacked = blocks[0] if len(blocks) == 1 else jnp.concatenate(blocks, axis=0)
            results.append(mxu(g[f"lay{l}_w"][...], stacked) + g[f"lay{l}_b"][...])

        # -------- LastLevelMaxPool (kernel 1, stride 2) == stride-2 subsample -
        # TODO(synk): replace this tiny bf16 selection matmul with a strided lane
        # subsample when the spatial extent makes the selection matrix non-trivial.
        pooled = mxu(results[3].astype(bf), g["pool"][...])

        # -------- one lane-dense output slab (single full-width store) --------
        parts = results + [pooled]
        if total_pad > total:
            parts.append(jnp.zeros((C, total_pad - total), jnp.float32))
        out_ref[...] = jnp.concatenate(parts, axis=1)

    call = pl.pallas_call(
        kernel,
        out_shape=jax.ShapeDtypeStruct((C, total_pad), jnp.float32),
        cost_estimate=cost,
    )

    # ---- wrapper: patchify + slab slicing (tiny XLA glue) ---------------------
    seg_off, off = [], 0
    for n in ns + [n_pool]:
        seg_off.append(off)
        off += n
    level_shapes = [(hs[l], ws[l]) for l in range(4)] + [(h_pool, w_pool)]

    def forward(x_nchw):
        assert x_nchw.shape[0] == batch
        # NCHW -> (p*p*C_in, B*T0); token = b*T0 + i*w0 + j (batch folded in lanes)
        # TODO(synk): at large resolutions fold this packing into the kernel's
        # input load (Element index map) to avoid the extra HBM round trip.
        xt = x_nchw.reshape(batch, in_ch, h0, patch, w0, patch)
        xt = jnp.transpose(xt, (1, 3, 5, 0, 2, 4)).reshape(cp, batch * ts[0])
        slab = call(xt.astype(bf), *arrays)

        od = OrderedDict()
        for key, off0, (oh, ow) in zip(["0", "1", "2", "3", "pool"],
                                       seg_off, level_shapes):
            seg = slab[:, off0:off0 + batch * oh * ow]          # (C, B*oh*ow)
            od[key] = jnp.transpose(seg.reshape(C, batch, oh, ow), (1, 0, 2, 3))
        return od

    return jax.jit(forward)


if __name__ == "__main__":
    key = jax.random.PRNGKey(0)
    kx, kp = jax.random.split(key)

    x = jax.random.normal(kx, (2, 3, 16, 16), jnp.float32)          # NCHW input
    params = init_params(kp, in_ch=3, patch=2, embed_dim=32, out_channels=32)

    fwd = build_forward(params, batch=2, in_ch=3, height=16, width=16,
                        patch=2, out_channels=32)
    out = jax.block_until_ready(fwd(x))

    expected = {"0": (2, 32, 8, 8), "1": (2, 32, 4, 4), "2": (2, 32, 2, 2),
                "3": (2, 32, 1, 1), "pool": (2, 32, 1, 1)}
    for k, shp in expected.items():
        assert out[k].shape == shp, (k, out[k].shape, shp)
        assert bool(jnp.all(jnp.isfinite(out[k]))), k
    print("KERNEL_OK")
</pallas_src>

<mosaic_0001>
module attributes {stable_mosaic.version = 11 : i64} {
  func.func @kernel(%arg0: memref<12x128xbf16, #tpu.memory_space<vmem>>, %arg1: memref<32x12xbf16, #tpu.memory_space<vmem>>, %arg2: memref<32x1xf32, #tpu.memory_space<vmem>>, %arg3: memref<32x32xbf16, #tpu.memory_space<vmem>>, %arg4: memref<32x1xf32, #tpu.memory_space<vmem>>, %arg5: memref<32x32xbf16, #tpu.memory_space<vmem>>, %arg6: memref<32x1xf32, #tpu.memory_space<vmem>>, %arg7: memref<64x64xbf16, #tpu.memory_space<vmem>>, %arg8: memref<64x1xf32, #tpu.memory_space<vmem>>, %arg9: memref<64x64xbf16, #tpu.memory_space<vmem>>, %arg10: memref<64x1xf32, #tpu.memory_space<vmem>>, %arg11: memref<128x128xbf16, #tpu.memory_space<vmem>>, %arg12: memref<128x1xf32, #tpu.memory_space<vmem>>, %arg13: memref<128x128xbf16, #tpu.memory_space<vmem>>, %arg14: memref<128x1xf32, #tpu.memory_space<vmem>>, %arg15: memref<256x256xbf16, #tpu.memory_space<vmem>>, %arg16: memref<256x1xf32, #tpu.memory_space<vmem>>, %arg17: memref<256x256xbf16, #tpu.memory_space<vmem>>, %arg18: memref<256x1xf32, #tpu.memory_space<vmem>>, %arg19: memref<64x128xbf16, #tpu.memory_space<vmem>>, %arg20: memref<64x1xf32, #tpu.memory_space<vmem>>, %arg21: memref<4x128x32xbf16, #tpu.memory_space<vmem>>, %arg22: memref<128x256xbf16, #tpu.memory_space<vmem>>, %arg23: memref<128x1xf32, #tpu.memory_space<vmem>>, %arg24: memref<4x32x8xbf16, #tpu.memory_space<vmem>>, %arg25: memref<256x512xbf16, #tpu.memory_space<vmem>>, %arg26: memref<256x1xf32, #tpu.memory_space<vmem>>, %arg27: memref<4x8x2xbf16, #tpu.memory_space<vmem>>, %arg28: memref<32x32xbf16, #tpu.memory_space<vmem>>, %arg29: memref<32x1xf32, #tpu.memory_space<vmem>>, %arg30: memref<32x288xbf16, #tpu.memory_space<vmem>>, %arg31: memref<32x1xf32, #tpu.memory_space<vmem>>, %arg32: memref<9x1x128xbf16, #tpu.memory_space<vmem>>, %arg33: memref<32x64xbf16, #tpu.memory_space<vmem>>, %arg34: memref<32x1xf32, #tpu.memory_space<vmem>>, %arg35: memref<32x288xbf16, #tpu.memory_space<vmem>>, %arg36: memref<32x1xf32, #tpu.memory_space<vmem>>, %arg37: memref<9x1x32xbf16, #tpu.memory_space<vmem>>, %arg38: memref<32x128xbf16, #tpu.memory_space<vmem>>, %arg39: memref<32x1xf32, #tpu.memory_space<vmem>>, %arg40: memref<32x288xbf16, #tpu.memory_space<vmem>>, %arg41: memref<32x1xf32, #tpu.memory_space<vmem>>, %arg42: memref<9x1x8xbf16, #tpu.memory_space<vmem>>, %arg43: memref<32x256xbf16, #tpu.memory_space<vmem>>, %arg44: memref<32x1xf32, #tpu.memory_space<vmem>>, %arg45: memref<32x32xbf16, #tpu.memory_space<vmem>>, %arg46: memref<32x1xf32, #tpu.memory_space<vmem>>, %arg47: memref<32x128xbf16, #tpu.memory_space<vmem>>, %arg48: memref<8x32xbf16, #tpu.memory_space<vmem>>, %arg49: memref<2x8xbf16, #tpu.memory_space<vmem>>, %arg50: memref<2x2xbf16, #tpu.memory_space<vmem>>, %arg51: memref<32x256xf32, #tpu.memory_space<vmem>>) attributes {dimension_semantics = [], scalar_prefetch = 0 : i64, scratch_operands = 0 : i64, tpu.core_type = #tpu.core_type<tc>} {
    %c0 = arith.constant 0 : index
    %c0_0 = arith.constant 0 : index
    %0 = vector.load %arg1[%c0, %c0_0] : memref<32x12xbf16, #tpu.memory_space<vmem>>, vector<32x12xbf16>
    %c0_1 = arith.constant 0 : index
    %c0_2 = arith.constant 0 : index
    %1 = vector.load %arg0[%c0_1, %c0_2] : memref<12x128xbf16, #tpu.memory_space<vmem>>, vector<12x128xbf16>
    %cst = arith.constant dense<0.000000e+00> : vector<32x128xf32>
    %2 = tpu.matmul %0, %1, %cst {dimension_numbers = #tpu.dot_dimension_numbers<[1], [0], [0], [1], [0, 0, 1, 1], [], []>} : vector<32x12xbf16>, vector<12x128xbf16>, vector<32x128xf32> -> vector<32x128xf32>
    %c0_3 = arith.constant 0 : index
    %c0_4 = arith.constant 0 : index
    %3 = vector.load %arg2[%c0_3, %c0_4] : memref<32x1xf32, #tpu.memory_space<vmem>>, vector<32x1xf32>
    %4 = vector.broadcast %3 : vector<32x1xf32> to vector<32x128xf32>
    %5 = arith.addf %2, %4 : vector<32x128xf32>
    %6 = arith.truncf %5 : vector<32x128xf32> to vector<32x128xbf16>
    %c0_5 = arith.constant 0 : index
    %c0_6 = arith.constant 0 : index
    %7 = vector.load %arg3[%c0_5, %c0_6] : memref<32x32xbf16, #tpu.memory_space<vmem>>, vector<32x32xbf16>
    %cst_7 = arith.constant dense<0.000000e+00> : vector<32x128xf32>
    %8 = tpu.matmul %7, %6, %cst_7 {dimension_numbers = #tpu.dot_dimension_numbers<[1], [0], [0], [1], [0, 0, 1, 1], [], []>} : vector<32x32xbf16>, vector<32x128xbf16>, vector<32x128xf32> -> vector<32x128xf32>
    %c0_8 = arith.constant 0 : index
    %c0_9 = arith.constant 0 : index
    %9 = vector.load %arg4[%c0_8, %c0_9] : memref<32x1xf32, #tpu.memory_space<vmem>>, vector<32x1xf32>
    %10 = vector.broadcast %9 : vector<32x1xf32> to vector<32x128xf32>
    %11 = arith.addf %8, %10 : vector<32x128xf32>
    %12 = arith.mulf %11, %11 : vector<32x128xf32>
    %13 = arith.mulf %11, %12 : vector<32x128xf32>
    %cst_10 = arith.constant 4.471500e-02 : f32
    %14 = vector.broadcast %cst_10 : f32 to vector<32x128xf32>
    %15 = arith.mulf %14, %13 : vector<32x128xf32>
    %16 = arith.addf %11, %15 : vector<32x128xf32>
    %cst_11 = arith.constant 0.797884583 : f32
    %17 = vector.broadcast %cst_11 : f32 to vector<32x128xf32>
    %18 = arith.mulf %17, %16 : vector<32x128xf32>
    %19 = math.tanh %18 : vector<32x128xf32>
    %cst_12 = arith.constant 1.000000e+00 : f32
    %20 = vector.broadcast %cst_12 : f32 to vector<32x128xf32>
    %21 = arith.addf %20, %19 : vector<32x128xf32>
    %cst_13 = arith.constant 5.000000e-01 : f32
    %22 = vector.broadcast %cst_13 : f32 to vector<32x128xf32>
    %23 = arith.mulf %22, %21 : vector<32x128xf32>
    %24 = arith.mulf %11, %23 : vector<32x128xf32>
    %c0_14 = arith.constant 0 : index
    %c0_15 = arith.constant 0 : index
    %25 = vector.load %arg5[%c0_14, %c0_15] : memref<32x32xbf16, #tpu.memory_space<vmem>>, vector<32x32xbf16>
    %26 = arith.truncf %24 : vector<32x128xf32> to vector<32x128xbf16>
    %cst_16 = arith.constant dense<0.000000e+00> : vector<32x128xf32>
    %27 = tpu.matmul %25, %26, %cst_16 {dimension_numbers = #tpu.dot_dimension_numbers<[1], [0], [0], [1], [0, 0, 1, 1], [], []>} : vector<32x32xbf16>, vector<32x128xbf16>, vector<32x128xf32> -> vector<32x128xf32>
    %c0_17 = arith.constant 0 : index
    %c0_18 = arith.constant 0 : index
    %28 = vector.load %arg6[%c0_17, %c0_18] : memref<32x1xf32, #tpu.memory_space<vmem>>, vector<32x1xf32>
    %29 = vector.broadcast %28 : vector<32x1xf32> to vector<32x128xf32>
    %30 = arith.addf %27, %29 : vector<32x128xf32>
    %31 = arith.addf %5, %30 : vector<32x128xf32>
    %32 = arith.truncf %31 : vector<32x128xf32> to vector<32x128xbf16>
    %c0_19 = arith.constant 0 : index
    %c0_20 = arith.constant 0 : index
    %c0_21 = arith.constant 0 : index
    %33 = vector.load %arg21[%c0_19, %c0_20, %c0_21] : memref<4x128x32xbf16, #tpu.memory_space<vmem>>, vector<1x128x32xbf16>
    %34 = vector.shape_cast %33 : vector<1x128x32xbf16> to vector<128x32xbf16>
    %cst_22 = arith.constant dense<0.000000e+00> : vector<32x32xf32>
    %35 = tpu.matmul %32, %34, %cst_22 {dimension_numbers = #tpu.dot_dimension_numbers<[1], [0], [0], [1], [0, 0, 1, 1], [], []>} : vector<32x128xbf16>, vector<128x32xbf16>, vector<32x32xf32> -> vector<32x32xf32>
    %36 = arith.truncf %35 : vector<32x32xf32> to vector<32x32xbf16>
    %c1 = arith.constant 1 : index
    %c0_23 = arith.constant 0 : index
    %c0_24 = arith.constant 0 : index
    %37 = vector.load %arg21[%c1, %c0_23, %c0_24] : memref<4x128x32xbf16, #tpu.memory_space<vmem>>, vector<1x128x32xbf16>
    %38 = vector.shape_cast %37 : vector<1x128x32xbf16> to vector<128x32xbf16>
    %cst_25 = arith.constant dense<0.000000e+00> : vector<32x32xf32>
    %39 = tpu.matmul %32, %38, %cst_25 {dimension_numbers = #tpu.dot_dimension_numbers<[1], [0], [0], [1], [0, 0, 1, 1], [], []>} : vector<32x128xbf16>, vector<128x32xbf16>, vector<32x32xf32> -> vector<32x32xf32>
    %40 = arith.truncf %39 : vector<32x32xf32> to vector<32x32xbf16>
    %c2 = arith.constant 2 : index
    %c0_26 = arith.constant 0 : index
    %c0_27 = arith.constant 0 : index
    %41 = vector.load %arg21[%c2, %c0_26, %c0_27] : memref<4x128x32xbf16, #tpu.memory_space<vmem>>, vector<1x128x32xbf16>
    %42 = vector.shape_cast %41 : vector<1x128x32xbf16> to vector<128x32xbf16>
    %cst_28 = arith.constant dense<0.000000e+00> : vector<32x32xf32>
    %43 = tpu.matmul %32, %42, %cst_28 {dimension_numbers = #tpu.dot_dimension_numbers<[1], [0], [0], [1], [0, 0, 1, 1], [], []>} : vector<32x128xbf16>, vector<128x32xbf16>, vector<32x32xf32> -> vector<32x32xf32>
    %44 = arith.truncf %43 : vector<32x32xf32> to vector<32x32xbf16>
    %c3 = arith.constant 3 : index
    %c0_29 = arith.constant 0 : index
    %c0_30 = arith.constant 0 : index
    %45 = vector.load %arg21[%c3, %c0_29, %c0_30] : memref<4x128x32xbf16, #tpu.memory_space<vmem>>, vector<1x128x32xbf16>
    %46 = vector.shape_cast %45 : vector<1x128x32xbf16> to vector<128x32xbf16>
    %cst_31 = arith.constant dense<0.000000e+00> : vector<32x32xf32>
    %47 = tpu.matmul %32, %46, %cst_31 {dimension_numbers = #tpu.dot_dimension_numbers<[1], [0], [0], [1], [0, 0, 1, 1], [], []>} : vector<32x128xbf16>, vector<128x32xbf16>, vector<32x32xf32> -> vector<32x32xf32>
    %48 = arith.truncf %47 : vector<32x32xf32> to vector<32x32xbf16>
    %49 = tpu.concatenate %36, %40, %44, %48 in 0 : vector<32x32xbf16>, vector<32x32xbf16>, vector<32x32xbf16>, vector<32x32xbf16> -> vector<128x32xbf16>
    %c0_32 = arith.constant 0 : index
    %c0_33 = arith.constant 0 : index
    %50 = vector.load %arg19[%c0_32, %c0_33] : memref<64x128xbf16, #tpu.memory_space<vmem>>, vector<64x128xbf16>
    %cst_34 = arith.constant dense<0.000000e+00> : vector<64x32xf32>
    %51 = tpu.matmul %50, %49, %cst_34 {dimension_numbers = #tpu.dot_dimension_numbers<[1], [0], [0], [1], [0, 0, 1, 1], [], []>} : vector<64x128xbf16>, vector<128x32xbf16>, vector<64x32xf32> -> vector<64x32xf32>
    %c0_35 = arith.constant 0 : index
    %c0_36 = arith.constant 0 : index
    %52 = vector.load %arg20[%c0_35, %c0_36] : memref<64x1xf32, #tpu.memory_space<vmem>>, vector<64x1xf32>
    %53 = vector.broadcast %52 : vector<64x1xf32> to vector<64x32xf32>
    %54 = arith.addf %51, %53 : vector<64x32xf32>
    %55 = arith.truncf %54 : vector<64x32xf32> to vector<64x32xbf16>
    %c0_37 = arith.constant 0 : index
    %c0_38 = arith.constant 0 : index
    %56 = vector.load %arg7[%c0_37, %c0_38] : memref<64x64xbf16, #tpu.memory_space<vmem>>, vector<64x64xbf16>
    %cst_39 = arith.constant dense<0.000000e+00> : vector<64x32xf32>
    %57 = tpu.matmul %56, %55, %cst_39 {dimension_numbers = #tpu.dot_dimension_numbers<[1], [0], [0], [1], [0, 0, 1, 1], [], []>} : vector<64x64xbf16>, vector<64x32xbf16>, vector<64x32xf32> -> vector<64x32xf32>
    %c0_40 = arith.constant 0 : index
    %c0_41 = arith.constant 0 : index
    %58 = vector.load %arg8[%c0_40, %c0_41] : memref<64x1xf32, #tpu.memory_space<vmem>>, vector<64x1xf32>
    %59 = vector.broadcast %58 : vector<64x1xf32> to vector<64x32xf32>
    %60 = arith.addf %57, %59 : vector<64x32xf32>
    %61 = arith.mulf %60, %60 : vector<64x32xf32>
    %62 = arith.mulf %60, %61 : vector<64x32xf32>
    %cst_42 = arith.constant 4.471500e-02 : f32
    %63 = vector.broadcast %cst_42 : f32 to vector<64x32xf32>
    %64 = arith.mulf %63, %62 : vector<64x32xf32>
    %65 = arith.addf %60, %64 : vector<64x32xf32>
    %cst_43 = arith.constant 0.797884583 : f32
    %66 = vector.broadcast %cst_43 : f32 to vector<64x32xf32>
    %67 = arith.mulf %66, %65 : vector<64x32xf32>
    %68 = math.tanh %67 : vector<64x32xf32>
    %cst_44 = arith.constant 1.000000e+00 : f32
    %69 = vector.broadcast %cst_44 : f32 to vector<64x32xf32>
    %70 = arith.addf %69, %68 : vector<64x32xf32>
    %cst_45 = arith.constant 5.000000e-01 : f32
    %71 = vector.broadcast %cst_45 : f32 to vector<64x32xf32>
    %72 = arith.mulf %71, %70 : vector<64x32xf32>
    %73 = arith.mulf %60, %72 : vector<64x32xf32>
    %c0_46 = arith.constant 0 : index
    %c0_47 = arith.constant 0 : index
    %74 = vector.load %arg9[%c0_46, %c0_47] : memref<64x64xbf16, #tpu.memory_space<vmem>>, vector<64x64xbf16>
    %75 = arith.truncf %73 : vector<64x32xf32> to vector<64x32xbf16>
    %cst_48 = arith.constant dense<0.000000e+00> : vector<64x32xf32>
    %76 = tpu.matmul %74, %75, %cst_48 {dimension_numbers = #tpu.dot_dimension_numbers<[1], [0], [0], [1], [0, 0, 1, 1], [], []>} : vector<64x64xbf16>, vector<64x32xbf16>, vector<64x32xf32> -> vector<64x32xf32>
    %c0_49 = arith.constant 0 : index
    %c0_50 = arith.constant 0 : index
    %77 = vector.load %arg10[%c0_49, %c0_50] : memref<64x1xf32, #tpu.memory_space<vmem>>, vector<64x1xf32>
    %78 = vector.broadcast %77 : vector<64x1xf32> to vector<64x32xf32>
    %79 = arith.addf %76, %78 : vector<64x32xf32>
    %80 = arith.addf %54, %79 : vector<64x32xf32>
    %81 = arith.truncf %80 : vector<64x32xf32> to vector<64x32xbf16>
    %c0_51 = arith.constant 0 : index
    %c0_52 = arith.constant 0 : index
    %c0_53 = arith.constant 0 : index
    %82 = vector.load %arg24[%c0_51, %c0_52, %c0_53] : memref<4x32x8xbf16, #tpu.memory_space<vmem>>, vector<1x32x8xbf16>
    %83 = vector.shape_cast %82 : vector<1x32x8xbf16> to vector<32x8xbf16>
    %cst_54 = arith.constant dense<0.000000e+00> : vector<64x8xf32>
    %84 = tpu.matmul %81, %83, %cst_54 {dimension_numbers = #tpu.dot_dimension_numbers<[1], [0], [0], [1], [0, 0, 1, 1], [], []>} : vector<64x32xbf16>, vector<32x8xbf16>, vector<64x8xf32> -> vector<64x8xf32>
    %85 = arith.truncf %84 : vector<64x8xf32> to vector<64x8xbf16>
    %c1_55 = arith.constant 1 : index
    %c0_56 = arith.constant 0 : index
    %c0_57 = arith.constant 0 : index
    %86 = vector.load %arg24[%c1_55, %c0_56, %c0_57] : memref<4x32x8xbf16, #tpu.memory_space<vmem>>, vector<1x32x8xbf16>
    %87 = vector.shape_cast %86 : vector<1x32x8xbf16> to vector<32x8xbf16>
    %cst_58 = arith.constant dense<0.000000e+00> : vector<64x8xf32>
    %88 = tpu.matmul %81, %87, %cst_58 {dimension_numbers = #tpu.dot_dimension_numbers<[1], [0], [0], [1], [0, 0, 1, 1], [], []>} : vector<64x32xbf16>, vector<32x8xbf16>, vector<64x8xf32> -> vector<64x8xf32>
    %89 = arith.truncf %88 : vector<64x8xf32> to vector<64x8xbf16>
    %c2_59 = arith.constant 2 : index
    %c0_60 = arith.constant 0 : index
    %c0_61 = arith.constant 0 : index
    %90 = vector.load %arg24[%c2_59, %c0_60, %c0_61] : memref<4x32x8xbf16, #tpu.memory_space<vmem>>, vector<1x32x8xbf16>
    %91 = vector.shape_cast %90 : vector<1x32x8xbf16> to vector<32x8xbf16>
    %cst_62 = arith.constant dense<0.000000e+00> : vector<64x8xf32>
    %92 = tpu.matmul %81, %91, %cst_62 {dimension_numbers = #tpu.dot_dimension_numbers<[1], [0], [0], [1], [0, 0, 1, 1], [], []>} : vector<64x32xbf16>, vector<32x8xbf16>, vector<64x8xf32> -> vector<64x8xf32>
    %93 = arith.truncf %92 : vector<64x8xf32> to vector<64x8xbf16>
    %c3_63 = arith.constant 3 : index
    %c0_64 = arith.constant 0 : index
    %c0_65 = arith.constant 0 : index
    %94 = vector.load %arg24[%c3_63, %c0_64, %c0_65] : memref<4x32x8xbf16, #tpu.memory_space<vmem>>, vector<1x32x8xbf16>
    %95 = vector.shape_cast %94 : vector<1x32x8xbf16> to vector<32x8xbf16>
    %cst_66 = arith.constant dense<0.000000e+00> : vector<64x8xf32>
    %96 = tpu.matmul %81, %95, %cst_66 {dimension_numbers = #tpu.dot_dimension_numbers<[1], [0], [0], [1], [0, 0, 1, 1], [], []>} : vector<64x32xbf16>, vector<32x8xbf16>, vector<64x8xf32> -> vector<64x8xf32>
    %97 = arith.truncf %96 : vector<64x8xf32> to vector<64x8xbf16>
    %98 = tpu.concatenate %85, %89, %93, %97 in 0 : vector<64x8xbf16>, vector<64x8xbf16>, vector<64x8xbf16>, vector<64x8xbf16> -> vector<256x8xbf16>
    %c0_67 = arith.constant 0 : index
    %c0_68 = arith.constant 0 : index
    %99 = vector.load %arg22[%c0_67, %c0_68] : memref<128x256xbf16, #tpu.memory_space<vmem>>, vector<128x256xbf16>
    %cst_69 = arith.constant dense<0.000000e+00> : vector<128x8xf32>
    %100 = tpu.matmul %99, %98, %cst_69 {dimension_numbers = #tpu.dot_dimension_numbers<[1], [0], [0], [1], [0, 0, 1, 1], [], []>} : vector<128x256xbf16>, vector<256x8xbf16>, vector<128x8xf32> -> vector<128x8xf32>
    %c0_70 = arith.constant 0 : index
    %c0_71 = arith.constant 0 : index
    %101 = vector.load %arg23[%c0_70, %c0_71] : memref<128x1xf32, #tpu.memory_space<vmem>>, vector<128x1xf32>
    %102 = vector.broadcast %101 : vector<128x1xf32> to vector<128x8xf32>
    %103 = arith.addf %100, %102 : vector<128x8xf32>
    %104 = arith.truncf %103 : vector<128x8xf32> to vector<128x8xbf16>
    %c0_72 = arith.constant 0 : index
    %c0_73 = arith.constant 0 : index
    %105 = vector.load %arg11[%c0_72, %c0_73] : memref<128x128xbf16, #tpu.memory_space<vmem>>, vector<128x128xbf16>
    %cst_74 = arith.constant dense<0.000000e+00> : vector<128x8xf32>
    %106 = tpu.matmul %105, %104, %cst_74 {dimension_numbers = #tpu.dot_dimension_numbers<[1], [0], [0], [1], [0, 0, 1, 1], [], []>} : vector<128x128xbf16>, vector<128x8xbf16>, vector<128x8xf32> -> vector<128x8xf32>
    %c0_75 = arith.constant 0 : index
    %c0_76 = arith.constant 0 : index
    %107 = vector.load %arg12[%c0_75, %c0_76] : memref<128x1xf32, #tpu.memory_space<vmem>>, vector<128x1xf32>
    %108 = vector.broadcast %107 : vector<128x1xf32> to vector<128x8xf32>
    %109 = arith.addf %106, %108 : vector<128x8xf32>
    %110 = arith.mulf %109, %109 : vector<128x8xf32>
    %111 = arith.mulf %109, %110 : vector<128x8xf32>
    %cst_77 = arith.constant 4.471500e-02 : f32
    %112 = vector.broadcast %cst_77 : f32 to vector<128x8xf32>
    %113 = arith.mulf %112, %111 : vector<128x8xf32>
    %114 = arith.addf %109, %113 : vector<128x8xf32>
    %cst_78 = arith.constant 0.797884583 : f32
    %115 = vector.broadcast %cst_78 : f32 to vector<128x8xf32>
    %116 = arith.mulf %115, %114 : vector<128x8xf32>
    %117 = math.tanh %116 : vector<128x8xf32>
    %cst_79 = arith.constant 1.000000e+00 : f32
    %118 = vector.broadcast %cst_79 : f32 to vector<128x8xf32>
    %119 = arith.addf %118, %117 : vector<128x8xf32>
    %cst_80 = arith.constant 5.000000e-01 : f32
    %120 = vector.broadcast %cst_80 : f32 to vector<128x8xf32>
    %121 = arith.mulf %120, %119 : vector<128x8xf32>
    %122 = arith.mulf %109, %121 : vector<128x8xf32>
    %c0_81 = arith.constant 0 : index
    %c0_82 = arith.constant 0 : index
    %123 = vector.load %arg13[%c0_81, %c0_82] : memref<128x128xbf16, #tpu.memory_space<vmem>>, vector<128x128xbf16>
    %124 = arith.truncf %122 : vector<128x8xf32> to vector<128x8xbf16>
    %cst_83 = arith.constant dense<0.000000e+00> : vector<128x8xf32>
    %125 = tpu.matmul %123, %124, %cst_83 {dimension_numbers = #tpu.dot_dimension_numbers<[1], [0], [0], [1], [0, 0, 1, 1], [], []>} : vector<128x128xbf16>, vector<128x8xbf16>, vector<128x8xf32> -> vector<128x8xf32>
    %c0_84 = arith.constant 0 : index
    %c0_85 = arith.constant 0 : index
    %126 = vector.load %arg14[%c0_84, %c0_85] : memref<128x1xf32, #tpu.memory_space<vmem>>, vector<128x1xf32>
    %127 = vector.broadcast %126 : vector<128x1xf32> to vector<128x8xf32>
    %128 = arith.addf %125, %127 : vector<128x8xf32>
    %129 = arith.addf %103, %128 : vector<128x8xf32>
    %130 = arith.truncf %129 : vector<128x8xf32> to vector<128x8xbf16>
    %c0_86 = arith.constant 0 : index
    %c0_87 = arith.constant 0 : index
    %c0_88 = arith.constant 0 : index
    %131 = vector.load %arg27[%c0_86, %c0_87, %c0_88] : memref<4x8x2xbf16, #tpu.memory_space<vmem>>, vector<1x8x2xbf16>
    %132 = vector.shape_cast %131 : vector<1x8x2xbf16> to vector<8x2xbf16>
    %cst_89 = arith.constant dense<0.000000e+00> : vector<128x2xf32>
    %133 = tpu.matmul %130, %132, %cst_89 {dimension_numbers = #tpu.dot_dimension_numbers<[1], [0], [0], [1], [0, 0, 1, 1], [], []>} : vector<128x8xbf16>, vector<8x2xbf16>, vector<128x2xf32> -> vector<128x2xf32>
    %134 = arith.truncf %133 : vector<128x2xf32> to vector<128x2xbf16>
    %c1_90 = arith.constant 1 : index
    %c0_91 = arith.constant 0 : index
    %c0_92 = arith.constant 0 : index
    %135 = vector.load %arg27[%c1_90, %c0_91, %c0_92] : memref<4x8x2xbf16, #tpu.memory_space<vmem>>, vector<1x8x2xbf16>
    %136 = vector.shape_cast %135 : vector<1x8x2xbf16> to vector<8x2xbf16>
    %cst_93 = arith.constant dense<0.000000e+00> : vector<128x2xf32>
    %137 = tpu.matmul %130, %136, %cst_93 {dimension_numbers = #tpu.dot_dimension_numbers<[1], [0], [0], [1], [0, 0, 1, 1], [], []>} : vector<128x8xbf16>, vector<8x2xbf16>, vector<128x2xf32> -> vector<128x2xf32>
    %138 = arith.truncf %137 : vector<128x2xf32> to vector<128x2xbf16>
    %c2_94 = arith.constant 2 : index
    %c0_95 = arith.constant 0 : index
    %c0_96 = arith.constant 0 : index
    %139 = vector.load %arg27[%c2_94, %c0_95, %c0_96] : memref<4x8x2xbf16, #tpu.memory_space<vmem>>, vector<1x8x2xbf16>
    %140 = vector.shape_cast %139 : vector<1x8x2xbf16> to vector<8x2xbf16>
    %cst_97 = arith.constant dense<0.000000e+00> : vector<128x2xf32>
    %141 = tpu.matmul %130, %140, %cst_97 {dimension_numbers = #tpu.dot_dimension_numbers<[1], [0], [0], [1], [0, 0, 1, 1], [], []>} : vector<128x8xbf16>, vector<8x2xbf16>, vector<128x2xf32> -> vector<128x2xf32>
    %142 = arith.truncf %141 : vector<128x2xf32> to vector<128x2xbf16>
    %c3_98 = arith.constant 3 : index
    %c0_99 = arith.constant 0 : index
    %c0_100 = arith.constant 0 : index
    %143 = vector.load %arg27[%c3_98, %c0_99, %c0_100] : memref<4x8x2xbf16, #tpu.memory_space<vmem>>, vector<1x8x2xbf16>
    %144 = vector.shape_cast %143 : vector<1x8x2xbf16> to vector<8x2xbf16>
    %cst_101 = arith.constant dense<0.000000e+00> : vector<128x2xf32>
    %145 = tpu.matmul %130, %144, %cst_101 {dimension_numbers = #tpu.dot_dimension_numbers<[1], [0], [0], [1], [0, 0, 1, 1], [], []>} : vector<128x8xbf16>, vector<8x2xbf16>, vector<128x2xf32> -> vector<128x2xf32>
    %146 = arith.truncf %145 : vector<128x2xf32> to vector<128x2xbf16>
    %147 = tpu.concatenate %134, %138, %142, %146 in 0 : vector<128x2xbf16>, vector<128x2xbf16>, vector<128x2xbf16>, vector<128x2xbf16> -> vector<512x2xbf16>
    %c0_102 = arith.constant 0 : index
    %c0_103 = arith.constant 0 : index
    %148 = vector.load %arg25[%c0_102, %c0_103] : memref<256x512xbf16, #tpu.memory_space<vmem>>, vector<256x512xbf16>
    %cst_104 = arith.constant dense<0.000000e+00> : vector<256x2xf32>
    %149 = tpu.matmul %148, %147, %cst_104 {dimension_numbers = #tpu.dot_dimension_numbers<[1], [0], [0], [1], [0, 0, 1, 1], [], []>} : vector<256x512xbf16>, vector<512x2xbf16>, vector<256x2xf32> -> vector<256x2xf32>
    %c0_105 = arith.constant 0 : index
    %c0_106 = arith.constant 0 : index
    %150 = vector.load %arg26[%c0_105, %c0_106] : memref<256x1xf32, #tpu.memory_space<vmem>>, vector<256x1xf32>
    %151 = vector.broadcast %150 : vector<256x1xf32> to vector<256x2xf32>
    %152 = arith.addf %149, %151 : vector<256x2xf32>
    %153 = arith.truncf %152 : vector<256x2xf32> to vector<256x2xbf16>
    %c0_107 = arith.constant 0 : index
    %c0_108 = arith.constant 0 : index
    %154 = vector.load %arg15[%c0_107, %c0_108] : memref<256x256xbf16, #tpu.memory_space<vmem>>, vector<256x256xbf16>
    %cst_109 = arith.constant dense<0.000000e+00> : vector<256x2xf32>
    %155 = tpu.matmul %154, %153, %cst_109 {dimension_numbers = #tpu.dot_dimension_numbers<[1], [0], [0], [1], [0, 0, 1, 1], [], []>} : vector<256x256xbf16>, vector<256x2xbf16>, vector<256x2xf32> -> vector<256x2xf32>
    %c0_110 = arith.constant 0 : index
    %c0_111 = arith.constant 0 : index
    %156 = vector.load %arg16[%c0_110, %c0_111] : memref<256x1xf32, #tpu.memory_space<vmem>>, vector<256x1xf32>
    %157 = vector.broadcast %156 : vector<256x1xf32> to vector<256x2xf32>
    %158 = arith.addf %155, %157 : vector<256x2xf32>
    %159 = arith.mulf %158, %158 : vector<256x2xf32>
    %160 = arith.mulf %158, %159 : vector<256x2xf32>
    %cst_112 = arith.constant 4.471500e-02 : f32
    %161 = vector.broadcast %cst_112 : f32 to vector<256x2xf32>
    %162 = arith.mulf %161, %160 : vector<256x2xf32>
    %163 = arith.addf %158, %162 : vector<256x2xf32>
    %cst_113 = arith.constant 0.797884583 : f32
    %164 = vector.broadcast %cst_113 : f32 to vector<256x2xf32>
    %165 = arith.mulf %164, %163 : vector<256x2xf32>
    %166 = math.tanh %165 : vector<256x2xf32>
    %cst_114 = arith.constant 1.000000e+00 : f32
    %167 = vector.broadcast %cst_114 : f32 to vector<256x2xf32>
    %168 = arith.addf %167, %166 : vector<256x2xf32>
    %cst_115 = arith.constant 5.000000e-01 : f32
    %169 = vector.broadcast %cst_115 : f32 to vector<256x2xf32>
    %170 = arith.mulf %169, %168 : vector<256x2xf32>
    %171 = arith.mulf %158, %170 : vector<256x2xf32>
    %c0_116 = arith.constant 0 : index
    %c0_117 = arith.constant 0 : index
    %172 = vector.load %arg17[%c0_116, %c0_117] : memref<256x256xbf16, #tpu.memory_space<vmem>>, vector<256x256xbf16>
    %173 = arith.truncf %171 : vector<256x2xf32> to vector<256x2xbf16>
    %cst_118 = arith.constant dense<0.000000e+00> : vector<256x2xf32>
    %174 = tpu.matmul %172, %173, %cst_118 {dimension_numbers = #tpu.dot_dimension_numbers<[1], [0], [0], [1], [0, 0, 1, 1], [], []>} : vector<256x256xbf16>, vector<256x2xbf16>, vector<256x2xf32> -> vector<256x2xf32>
    %c0_119 = arith.constant 0 : index
    %c0_120 = arith.constant 0 : index
    %175 = vector.load %arg18[%c0_119, %c0_120] : memref<256x1xf32, #tpu.memory_space<vmem>>, vector<256x1xf32>
    %176 = vector.broadcast %175 : vector<256x1xf32> to vector<256x2xf32>
    %177 = arith.addf %174, %176 : vector<256x2xf32>
    %178 = arith.addf %152, %177 : vector<256x2xf32>
    %179 = arith.truncf %178 : vector<256x2xf32> to vector<256x2xbf16>
    %c0_121 = arith.constant 0 : index
    %c0_122 = arith.constant 0 : index
    %180 = vector.load %arg43[%c0_121, %c0_122] : memref<32x256xbf16, #tpu.memory_space<vmem>>, vector<32x256xbf16>
    %cst_123 = arith.constant dense<0.000000e+00> : vector<32x2xf32>
    %181 = tpu.matmul %180, %179, %cst_123 {dimension_numbers = #tpu.dot_dimension_numbers<[1], [0], [0], [1], [0, 0, 1, 1], [], []>} : vector<32x256xbf16>, vector<256x2xbf16>, vector<32x2xf32> -> vector<32x2xf32>
    %c0_124 = arith.constant 0 : index
    %c0_125 = arith.constant 0 : index
    %182 = vector.load %arg44[%c0_124, %c0_125] : memref<32x1xf32, #tpu.memory_space<vmem>>, vector<32x1xf32>
    %183 = vector.broadcast %182 : vector<32x1xf32> to vector<32x2xf32>
    %184 = arith.addf %181, %183 : vector<32x2xf32>
    %185 = arith.truncf %184 : vector<32x2xf32> to vector<32x2xbf16>
    %c0_126 = arith.constant 0 : index
    %c0_127 = arith.constant 0 : index
    %186 = vector.load %arg38[%c0_126, %c0_127] : memref<32x128xbf16, #tpu.memory_space<vmem>>, vector<32x128xbf16>
    %cst_128 = arith.constant dense<0.000000e+00> : vector<32x8xf32>
    %187 = tpu.matmul %186, %130, %cst_128 {dimension_numbers = #tpu.dot_dimension_numbers<[1], [0], [0], [1], [0, 0, 1, 1], [], []>} : vector<32x128xbf16>, vector<128x8xbf16>, vector<32x8xf32> -> vector<32x8xf32>
    %c0_129 = arith.constant 0 : index
    %c0_130 = arith.constant 0 : index
    %188 = vector.load %arg39[%c0_129, %c0_130] : memref<32x1xf32, #tpu.memory_space<vmem>>, vector<32x1xf32>
    %189 = vector.broadcast %188 : vector<32x1xf32> to vector<32x8xf32>
    %190 = arith.addf %187, %189 : vector<32x8xf32>
    %c0_131 = arith.constant 0 : index
    %c0_132 = arith.constant 0 : index
    %191 = vector.load %arg49[%c0_131, %c0_132] : memref<2x8xbf16, #tpu.memory_space<vmem>>, vector<2x8xbf16>
    %cst_133 = arith.constant dense<0.000000e+00> : vector<32x8xf32>
    %192 = tpu.matmul %185, %191, %cst_133 {dimension_numbers = #tpu.dot_dimension_numbers<[1], [0], [0], [1], [0, 0, 1, 1], [], []>} : vector<32x2xbf16>, vector<2x8xbf16>, vector<32x8xf32> -> vector<32x8xf32>
    %193 = arith.addf %190, %192 : vector<32x8xf32>
    %194 = arith.truncf %193 : vector<32x8xf32> to vector<32x8xbf16>
    %c0_134 = arith.constant 0 : index
    %c0_135 = arith.constant 0 : index
    %195 = vector.load %arg33[%c0_134, %c0_135] : memref<32x64xbf16, #tpu.memory_space<vmem>>, vector<32x64xbf16>
    %cst_136 = arith.constant dense<0.000000e+00> : vector<32x32xf32>
    %196 = tpu.matmul %195, %81, %cst_136 {dimension_numbers = #tpu.dot_dimension_numbers<[1], [0], [0], [1], [0, 0, 1, 1], [], []>} : vector<32x64xbf16>, vector<64x32xbf16>, vector<32x32xf32> -> vector<32x32xf32>
    %c0_137 = arith.constant 0 : index
    %c0_138 = arith.constant 0 : index
    %197 = vector.load %arg34[%c0_137, %c0_138] : memref<32x1xf32, #tpu.memory_space<vmem>>, vector<32x1xf32>
    %198 = vector.broadcast %197 : vector<32x1xf32> to vector<32x32xf32>
    %199 = arith.addf %196, %198 : vector<32x32xf32>
    %c0_139 = arith.constant 0 : index
    %c0_140 = arith.constant 0 : index
    %200 = vector.load %arg48[%c0_139, %c0_140] : memref<8x32xbf16, #tpu.memory_space<vmem>>, vector<8x32xbf16>
    %cst_141 = arith.constant dense<0.000000e+00> : vector<32x32xf32>
    %201 = tpu.matmul %194, %200, %cst_141 {dimension_numbers = #tpu.dot_dimension_numbers<[1], [0], [0], [1], [0, 0, 1, 1], [], []>} : vector<32x8xbf16>, vector<8x32xbf16>, vector<32x32xf32> -> vector<32x32xf32>
    %202 = arith.addf %199, %201 : vector<32x32xf32>
    %203 = arith.truncf %202 : vector<32x32xf32> to vector<32x32xbf16>
    %c0_142 = arith.constant 0 : index
    %c0_143 = arith.constant 0 : index
    %204 = vector.load %arg28[%c0_142, %c0_143] : memref<32x32xbf16, #tpu.memory_space<vmem>>, vector<32x32xbf16>
    %cst_144 = arith.constant dense<0.000000e+00> : vector<32x128xf32>
    %205 = tpu.matmul %204, %32, %cst_144 {dimension_numbers = #tpu.dot_dimension_numbers<[1], [0], [0], [1], [0, 0, 1, 1], [], []>} : vector<32x32xbf16>, vector<32x128xbf16>, vector<32x128xf32> -> vector<32x128xf32>
    %c0_145 = arith.constant 0 : index
    %c0_146 = arith.constant 0 : index
    %206 = vector.load %arg29[%c0_145, %c0_146] : memref<32x1xf32, #tpu.memory_space<vmem>>, vector<32x1xf32>
    %207 = vector.broadcast %206 : vector<32x1xf32> to vector<32x128xf32>
    %208 = arith.addf %205, %207 : vector<32x128xf32>
    %c0_147 = arith.constant 0 : index
    %c0_148 = arith.constant 0 : index
    %209 = vector.load %arg47[%c0_147, %c0_148] : memref<32x128xbf16, #tpu.memory_space<vmem>>, vector<32x128xbf16>
    %cst_149 = arith.constant dense<0.000000e+00> : vector<32x128xf32>
    %210 = tpu.matmul %203, %209, %cst_149 {dimension_numbers = #tpu.dot_dimension_numbers<[1], [0], [0], [1], [0, 0, 1, 1], [], []>} : vector<32x32xbf16>, vector<32x128xbf16>, vector<32x128xf32> -> vector<32x128xf32>
    %211 = arith.addf %208, %210 : vector<32x128xf32>
    %212 = arith.truncf %211 : vector<32x128xf32> to vector<32x128xbf16>
    %cst_150 = arith.constant 0.000000e+00 : bf16
    %213 = vector.broadcast %cst_150 : bf16 to vector<32x9xbf16>
    %214 = vector.extract_strided_slice %212 {offsets = [0, 0], sizes = [32, 119], strides = [1, 1]} : vector<32x128xbf16> to vector<32x119xbf16>
    %215 = tpu.concatenate %213, %214 in 1 : vector<32x9xbf16>, vector<32x119xbf16> -> vector<32x128xbf16>
    %c0_151 = arith.constant 0 : index
    %c0_152 = arith.constant 0 : index
    %c0_153 = arith.constant 0 : index
    %216 = vector.load %arg32[%c0_151, %c0_152, %c0_153] : memref<9x1x128xbf16, #tpu.memory_space<vmem>>, vector<1x1x128xbf16>
    %217 = vector.shape_cast %216 : vector<1x1x128xbf16> to vector<1x128xbf16>
    %218 = vector.broadcast %217 : vector<1x128xbf16> to vector<32x128xbf16>
    %219 = arith.mulf %215, %218 : vector<32x128xbf16>
    %cst_154 = arith.constant 0.000000e+00 : bf16
    %220 = vector.broadcast %cst_154 : bf16 to vector<32x8xbf16>
    %221 = vector.extract_strided_slice %212 {offsets = [0, 0], sizes = [32, 120], strides = [1, 1]} : vector<32x128xbf16> to vector<32x120xbf16>
    %222 = tpu.concatenate %220, %221 in 1 : vector<32x8xbf16>, vector<32x120xbf16> -> vector<32x128xbf16>
    %c1_155 = arith.constant 1 : index
    %c0_156 = arith.constant 0 : index
    %c0_157 = arith.constant 0 : index
    %223 = vector.load %arg32[%c1_155, %c0_156, %c0_157] : memref<9x1x128xbf16, #tpu.memory_space<vmem>>, vector<1x1x128xbf16>
    %224 = vector.shape_cast %223 : vector<1x1x128xbf16> to vector<1x128xbf16>
    %225 = vector.broadcast %224 : vector<1x128xbf16> to vector<32x128xbf16>
    %226 = arith.mulf %222, %225 : vector<32x128xbf16>
    %cst_158 = arith.constant 0.000000e+00 : bf16
    %227 = vector.broadcast %cst_158 : bf16 to vector<32x7xbf16>
    %228 = vector.extract_strided_slice %212 {offsets = [0, 0], sizes = [32, 121], strides = [1, 1]} : vector<32x128xbf16> to vector<32x121xbf16>
    %229 = tpu.concatenate %227, %228 in 1 : vector<32x7xbf16>, vector<32x121xbf16> -> vector<32x128xbf16>
    %c2_159 = arith.constant 2 : index
    %c0_160 = arith.constant 0 : index
    %c0_161 = arith.constant 0 : index
    %230 = vector.load %arg32[%c2_159, %c0_160, %c0_161] : memref<9x1x128xbf16, #tpu.memory_space<vmem>>, vector<1x1x128xbf16>
    %231 = vector.shape_cast %230 : vector<1x1x128xbf16> to vector<1x128xbf16>
    %232 = vector.broadcast %231 : vector<1x128xbf16> to vector<32x128xbf16>
    %233 = arith.mulf %229, %232 : vector<32x128xbf16>
    %cst_162 = arith.constant 0.000000e+00 : bf16
    %234 = vector.broadcast %cst_162 : bf16 to vector<32x1xbf16>
    %235 = vector.extract_strided_slice %212 {offsets = [0, 0], sizes = [32, 127], strides = [1, 1]} : vector<32x128xbf16> to vector<32x127xbf16>
    %236 = tpu.concatenate %234, %235 in 1 : vector<32x1xbf16>, vector<32x127xbf16> -> vector<32x128xbf16>
    %c3_163 = arith.constant 3 : index
    %c0_164 = arith.constant 0 : index
    %c0_165 = arith.constant 0 : index
    %237 = vector.load %arg32[%c3_163, %c0_164, %c0_165] : memref<9x1x128xbf16, #tpu.memory_space<vmem>>, vector<1x1x128xbf16>
    %238 = vector.shape_cast %237 : vector<1x1x128xbf16> to vector<1x128xbf16>
    %239 = vector.broadcast %238 : vector<1x128xbf16> to vector<32x128xbf16>
    %240 = arith.mulf %236, %239 : vector<32x128xbf16>
    %241 = vector.extract_strided_slice %212 {offsets = [0, 1], sizes = [32, 127], strides = [1, 1]} : vector<32x128xbf16> to vector<32x127xbf16>
    %cst_166 = arith.constant 0.000000e+00 : bf16
    %242 = vector.broadcast %cst_166 : bf16 to vector<32x1xbf16>
    %243 = tpu.concatenate %241, %242 in 1 : vector<32x127xbf16>, vector<32x1xbf16> -> vector<32x128xbf16>
    %c5 = arith.constant 5 : index
    %c0_167 = arith.constant 0 : index
    %c0_168 = arith.constant 0 : index
    %244 = vector.load %arg32[%c5, %c0_167, %c0_168] : memref<9x1x128xbf16, #tpu.memory_space<vmem>>, vector<1x1x128xbf16>
    %245 = vector.shape_cast %244 : vector<1x1x128xbf16> to vector<1x128xbf16>
    %246 = vector.broadcast %245 : vector<1x128xbf16> to vector<32x128xbf16>
    %247 = arith.mulf %243, %246 : vector<32x128xbf16>
    %248 = vector.extract_strided_slice %212 {offsets = [0, 7], sizes = [32, 121], strides = [1, 1]} : vector<32x128xbf16> to vector<32x121xbf16>
    %cst_169 = arith.constant 0.000000e+00 : bf16
    %249 = vector.broadcast %cst_169 : bf16 to vector<32x7xbf16>
    %250 = tpu.concatenate %248, %249 in 1 : vector<32x121xbf16>, vector<32x7xbf16> -> vector<32x128xbf16>
    %c6 = arith.constant 6 : index
    %c0_170 = arith.constant 0 : index
    %c0_171 = arith.constant 0 : index
    %251 = vector.load %arg32[%c6, %c0_170, %c0_171] : memref<9x1x128xbf16, #tpu.memory_space<vmem>>, vector<1x1x128xbf16>
    %252 = vector.shape_cast %251 : vector<1x1x128xbf16> to vector<1x128xbf16>
    %253 = vector.broadcast %252 : vector<1x128xbf16> to vector<32x128xbf16>
    %254 = arith.mulf %250, %253 : vector<32x128xbf16>
    %255 = vector.extract_strided_slice %212 {offsets = [0, 8], sizes = [32, 120], strides = [1, 1]} : vector<32x128xbf16> to vector<32x120xbf16>
    %cst_172 = arith.constant 0.000000e+00 : bf16
    %256 = vector.broadcast %cst_172 : bf16 to vector<32x8xbf16>
    %257 = tpu.concatenate %255, %256 in 1 : vector<32x120xbf16>, vector<32x8xbf16> -> vector<32x128xbf16>
    %c7 = arith.constant 7 : index
    %c0_173 = arith.constant 0 : index
    %c0_174 = arith.constant 0 : index
    %258 = vector.load %arg32[%c7, %c0_173, %c0_174] : memref<9x1x128xbf16, #tpu.memory_space<vmem>>, vector<1x1x128xbf16>
    %259 = vector.shape_cast %258 : vector<1x1x128xbf16> to vector<1x128xbf16>
    %260 = vector.broadcast %259 : vector<1x128xbf16> to vector<32x128xbf16>
    %261 = arith.mulf %257, %260 : vector<32x128xbf16>
    %262 = vector.extract_strided_slice %212 {offsets = [0, 9], sizes = [32, 119], strides = [1, 1]} : vector<32x128xbf16> to vector<32x119xbf16>
    %cst_175 = arith.constant 0.000000e+00 : bf16
    %263 = vector.broadcast %cst_175 : bf16 to vector<32x9xbf16>
    %264 = tpu.concatenate %262, %263 in 1 : vector<32x119xbf16>, vector<32x9xbf16> -> vector<32x128xbf16>
    %c8 = arith.constant 8 : index
    %c0_176 = arith.constant 0 : index
    %c0_177 = arith.constant 0 : index
    %265 = vector.load %arg32[%c8, %c0_176, %c0_177] : memref<9x1x128xbf16, #tpu.memory_space<vmem>>, vector<1x1x128xbf16>
    %266 = vector.shape_cast %265 : vector<1x1x128xbf16> to vector<1x128xbf16>
    %267 = vector.broadcast %266 : vector<1x128xbf16> to vector<32x128xbf16>
    %268 = arith.mulf %264, %267 : vector<32x128xbf16>
    %269 = tpu.concatenate %219, %226, %233, %240, %212, %247, %254, %261, %268 in 0 : vector<32x128xbf16>, vector<32x128xbf16>, vector<32x128xbf16>, vector<32x128xbf16>, vector<32x128xbf16>, vector<32x128xbf16>, vector<32x128xbf16>, vector<32x128xbf16>, vector<32x128xbf16> -> vector<288x128xbf16>
    %c0_178 = arith.constant 0 : index
    %c0_179 = arith.constant 0 : index
    %270 = vector.load %arg30[%c0_178, %c0_179] : memref<32x288xbf16, #tpu.memory_space<vmem>>, vector<32x288xbf16>
    %cst_180 = arith.constant dense<0.000000e+00> : vector<32x128xf32>
    %271 = tpu.matmul %270, %269, %cst_180 {dimension_numbers = #tpu.dot_dimension_numbers<[1], [0], [0], [1], [0, 0, 1, 1], [], []>} : vector<32x288xbf16>, vector<288x128xbf16>, vector<32x128xf32> -> vector<32x128xf32>
    %c0_181 = arith.constant 0 : index
    %c0_182 = arith.constant 0 : index
    %272 = vector.load %arg31[%c0_181, %c0_182] : memref<32x1xf32, #tpu.memory_space<vmem>>, vector<32x1xf32>
    %273 = vector.broadcast %272 : vector<32x1xf32> to vector<32x128xf32>
    %274 = arith.addf %271, %273 : vector<32x128xf32>
    %cst_183 = arith.constant 0.000000e+00 : bf16
    %275 = vector.broadcast %cst_183 : bf16 to vector<32x5xbf16>
    %276 = vector.extract_strided_slice %203 {offsets = [0, 0], sizes = [32, 27], strides = [1, 1]} : vector<32x32xbf16> to vector<32x27xbf16>
    %277 = tpu.concatenate %275, %276 in 1 : vector<32x5xbf16>, vector<32x27xbf16> -> vector<32x32xbf16>
    %c0_184 = arith.constant 0 : index
    %c0_185 = arith.constant 0 : index
    %c0_186 = arith.constant 0 : index
    %278 = vector.load %arg37[%c0_184, %c0_185, %c0_186] : memref<9x1x32xbf16, #tpu.memory_space<vmem>>, vector<1x1x32xbf16>
    %279 = vector.shape_cast %278 : vector<1x1x32xbf16> to vector<1x32xbf16>
    %280 = vector.broadcast %279 : vector<1x32xbf16> to vector<32x32xbf16>
    %281 = arith.mulf %277, %280 : vector<32x32xbf16>
    %cst_187 = arith.constant 0.000000e+00 : bf16
    %282 = vector.broadcast %cst_187 : bf16 to vector<32x4xbf16>
    %283 = vector.extract_strided_slice %203 {offsets = [0, 0], sizes = [32, 28], strides = [1, 1]} : vector<32x32xbf16> to vector<32x28xbf16>
    %284 = tpu.concatenate %282, %283 in 1 : vector<32x4xbf16>, vector<32x28xbf16> -> vector<32x32xbf16>
    %c1_188 = arith.constant 1 : index
    %c0_189 = arith.constant 0 : index
    %c0_190 = arith.constant 0 : index
    %285 = vector.load %arg37[%c1_188, %c0_189, %c0_190] : memref<9x1x32xbf16, #tpu.memory_space<vmem>>, vector<1x1x32xbf16>
    %286 = vector.shape_cast %285 : vector<1x1x32xbf16> to vector<1x32xbf16>
    %287 = vector.broadcast %286 : vector<1x32xbf16> to vector<32x32xbf16>
    %288 = arith.mulf %284, %287 : vector<32x32xbf16>
    %cst_191 = arith.constant 0.000000e+00 : bf16
    %289 = vector.broadcast %cst_191 : bf16 to vector<32x3xbf16>
    %290 = vector.extract_strided_slice %203 {offsets = [0, 0], sizes = [32, 29], strides = [1, 1]} : vector<32x32xbf16> to vector<32x29xbf16>
    %291 = tpu.concatenate %289, %290 in 1 : vector<32x3xbf16>, vector<32x29xbf16> -> vector<32x32xbf16>
    %c2_192 = arith.constant 2 : index
    %c0_193 = arith.constant 0 : index
    %c0_194 = arith.constant 0 : index
    %292 = vector.load %arg37[%c2_192, %c0_193, %c0_194] : memref<9x1x32xbf16, #tpu.memory_space<vmem>>, vector<1x1x32xbf16>
    %293 = vector.shape_cast %292 : vector<1x1x32xbf16> to vector<1x32xbf16>
    %294 = vector.broadcast %293 : vector<1x32xbf16> to vector<32x32xbf16>
    %295 = arith.mulf %291, %294 : vector<32x32xbf16>
    %cst_195 = arith.constant 0.000000e+00 : bf16
    %296 = vector.broadcast %cst_195 : bf16 to vector<32x1xbf16>
    %297 = vector.extract_strided_slice %203 {offsets = [0, 0], sizes = [32, 31], strides = [1, 1]} : vector<32x32xbf16> to vector<32x31xbf16>
    %298 = tpu.concatenate %296, %297 in 1 : vector<32x1xbf16>, vector<32x31xbf16> -> vector<32x32xbf16>
    %c3_196 = arith.constant 3 : index
    %c0_197 = arith.constant 0 : index
    %c0_198 = arith.constant 0 : index
    %299 = vector.load %arg37[%c3_196, %c0_197, %c0_198] : memref<9x1x32xbf16, #tpu.memory_space<vmem>>, vector<1x1x32xbf16>
    %300 = vector.shape_cast %299 : vector<1x1x32xbf16> to vector<1x32xbf16>
    %301 = vector.broadcast %300 : vector<1x32xbf16> to vector<32x32xbf16>
    %302 = arith.mulf %298, %301 : vector<32x32xbf16>
    %303 = vector.extract_strided_slice %203 {offsets = [0, 1], sizes = [32, 31], strides = [1, 1]} : vector<32x32xbf16> to vector<32x31xbf16>
    %cst_199 = arith.constant 0.000000e+00 : bf16
    %304 = vector.broadcast %cst_199 : bf16 to vector<32x1xbf16>
    %305 = tpu.concatenate %303, %304 in 1 : vector<32x31xbf16>, vector<32x1xbf16> -> vector<32x32xbf16>
    %c5_200 = arith.constant 5 : index
    %c0_201 = arith.constant 0 : index
    %c0_202 = arith.constant 0 : index
    %306 = vector.load %arg37[%c5_200, %c0_201, %c0_202] : memref<9x1x32xbf16, #tpu.memory_space<vmem>>, vector<1x1x32xbf16>
    %307 = vector.shape_cast %306 : vector<1x1x32xbf16> to vector<1x32xbf16>
    %308 = vector.broadcast %307 : vector<1x32xbf16> to vector<32x32xbf16>
    %309 = arith.mulf %305, %308 : vector<32x32xbf16>
    %310 = vector.extract_strided_slice %203 {offsets = [0, 3], sizes = [32, 29], strides = [1, 1]} : vector<32x32xbf16> to vector<32x29xbf16>
    %cst_203 = arith.constant 0.000000e+00 : bf16
    %311 = vector.broadcast %cst_203 : bf16 to vector<32x3xbf16>
    %312 = tpu.concatenate %310, %311 in 1 : vector<32x29xbf16>, vector<32x3xbf16> -> vector<32x32xbf16>
    %c6_204 = arith.constant 6 : index
    %c0_205 = arith.constant 0 : index
    %c0_206 = arith.constant 0 : index
    %313 = vector.load %arg37[%c6_204, %c0_205, %c0_206] : memref<9x1x32xbf16, #tpu.memory_space<vmem>>, vector<1x1x32xbf16>
    %314 = vector.shape_cast %313 : vector<1x1x32xbf16> to vector<1x32xbf16>
    %315 = vector.broadcast %314 : vector<1x32xbf16> to vector<32x32xbf16>
    %316 = arith.mulf %312, %315 : vector<32x32xbf16>
    %317 = vector.extract_strided_slice %203 {offsets = [0, 4], sizes = [32, 28], strides = [1, 1]} : vector<32x32xbf16> to vector<32x28xbf16>
    %cst_207 = arith.constant 0.000000e+00 : bf16
    %318 = vector.broadcast %cst_207 : bf16 to vector<32x4xbf16>
    %319 = tpu.concatenate %317, %318 in 1 : vector<32x28xbf16>, vector<32x4xbf16> -> vector<32x32xbf16>
    %c7_208 = arith.constant 7 : index
    %c0_209 = arith.constant 0 : index
    %c0_210 = arith.constant 0 : index
    %320 = vector.load %arg37[%c7_208, %c0_209, %c0_210] : memref<9x1x32xbf16, #tpu.memory_space<vmem>>, vector<1x1x32xbf16>
    %321 = vector.shape_cast %320 : vector<1x1x32xbf16> to vector<1x32xbf16>
    %322 = vector.broadcast %321 : vector<1x32xbf16> to vector<32x32xbf16>
    %323 = arith.mulf %319, %322 : vector<32x32xbf16>
    %324 = vector.extract_strided_slice %203 {offsets = [0, 5], sizes = [32, 27], strides = [1, 1]} : vector<32x32xbf16> to vector<32x27xbf16>
    %cst_211 = arith.constant 0.000000e+00 : bf16
    %325 = vector.broadcast %cst_211 : bf16 to vector<32x5xbf16>
    %326 = tpu.concatenate %324, %325 in 1 : vector<32x27xbf16>, vector<32x5xbf16> -> vector<32x32xbf16>
    %c8_212 = arith.constant 8 : index
    %c0_213 = arith.constant 0 : index
    %c0_214 = arith.constant 0 : index
    %327 = vector.load %arg37[%c8_212, %c0_213, %c0_214] : memref<9x1x32xbf16, #tpu.memory_space<vmem>>, vector<1x1x32xbf16>
    %328 = vector.shape_cast %327 : vector<1x1x32xbf16> to vector<1x32xbf16>
    %329 = vector.broadcast %328 : vector<1x32xbf16> to vector<32x32xbf16>
    %330 = arith.mulf %326, %329 : vector<32x32xbf16>
    %331 = tpu.concatenate %281, %288, %295, %302, %203, %309, %316, %323, %330 in 0 : vector<32x32xbf16>, vector<32x32xbf16>, vector<32x32xbf16>, vector<32x32xbf16>, vector<32x32xbf16>, vector<32x32xbf16>, vector<32x32xbf16>, vector<32x32xbf16>, vector<32x32xbf16> -> vector<288x32xbf16>
    %c0_215 = arith.constant 0 : index
    %c0_216 = arith.constant 0 : index
    %332 = vector.load %arg35[%c0_215, %c0_216] : memref<32x288xbf16, #tpu.memory_space<vmem>>, vector<32x288xbf16>
    %cst_217 = arith.constant dense<0.000000e+00> : vector<32x32xf32>
    %333 = tpu.matmul %332, %331, %cst_217 {dimension_numbers = #tpu.dot_dimension_numbers<[1], [0], [0], [1], [0, 0, 1, 1], [], []>} : vector<32x288xbf16>, vector<288x32xbf16>, vector<32x32xf32> -> vector<32x32xf32>
    %c0_218 = arith.constant 0 : index
    %c0_219 = arith.constant 0 : index
    %334 = vector.load %arg36[%c0_218, %c0_219] : memref<32x1xf32, #tpu.memory_space<vmem>>, vector<32x1xf32>
    %335 = vector.broadcast %334 : vector<32x1xf32> to vector<32x32xf32>
    %336 = arith.addf %333, %335 : vector<32x32xf32>
    %cst_220 = arith.constant 0.000000e+00 : bf16
    %337 = vector.broadcast %cst_220 : bf16 to vector<32x3xbf16>
    %338 = vector.extract_strided_slice %194 {offsets = [0, 0], sizes = [32, 5], strides = [1, 1]} : vector<32x8xbf16> to vector<32x5xbf16>
    %339 = tpu.concatenate %337, %338 in 1 : vector<32x3xbf16>, vector<32x5xbf16> -> vector<32x8xbf16>
    %c0_221 = arith.constant 0 : index
    %c0_222 = arith.constant 0 : index
    %c0_223 = arith.constant 0 : index
    %340 = vector.load %arg42[%c0_221, %c0_222, %c0_223] : memref<9x1x8xbf16, #tpu.memory_space<vmem>>, vector<1x1x8xbf16>
    %341 = vector.shape_cast %340 : vector<1x1x8xbf16> to vector<1x8xbf16>
    %342 = vector.broadcast %341 : vector<1x8xbf16> to vector<32x8xbf16>
    %343 = arith.mulf %339, %342 : vector<32x8xbf16>
    %cst_224 = arith.constant 0.000000e+00 : bf16
    %344 = vector.broadcast %cst_224 : bf16 to vector<32x2xbf16>
    %345 = vector.extract_strided_slice %194 {offsets = [0, 0], sizes = [32, 6], strides = [1, 1]} : vector<32x8xbf16> to vector<32x6xbf16>
    %346 = tpu.concatenate %344, %345 in 1 : vector<32x2xbf16>, vector<32x6xbf16> -> vector<32x8xbf16>
    %c1_225 = arith.constant 1 : index
    %c0_226 = arith.constant 0 : index
    %c0_227 = arith.constant 0 : index
    %347 = vector.load %arg42[%c1_225, %c0_226, %c0_227] : memref<9x1x8xbf16, #tpu.memory_space<vmem>>, vector<1x1x8xbf16>
    %348 = vector.shape_cast %347 : vector<1x1x8xbf16> to vector<1x8xbf16>
    %349 = vector.broadcast %348 : vector<1x8xbf16> to vector<32x8xbf16>
    %350 = arith.mulf %346, %349 : vector<32x8xbf16>
    %cst_228 = arith.constant 0.000000e+00 : bf16
    %351 = vector.broadcast %cst_228 : bf16 to vector<32x1xbf16>
    %352 = vector.extract_strided_slice %194 {offsets = [0, 0], sizes = [32, 7], strides = [1, 1]} : vector<32x8xbf16> to vector<32x7xbf16>
    %353 = tpu.concatenate %351, %352 in 1 : vector<32x1xbf16>, vector<32x7xbf16> -> vector<32x8xbf16>
    %c2_229 = arith.constant 2 : index
    %c0_230 = arith.constant 0 : index
    %c0_231 = arith.constant 0 : index
    %354 = vector.load %arg42[%c2_229, %c0_230, %c0_231] : memref<9x1x8xbf16, #tpu.memory_space<vmem>>, vector<1x1x8xbf16>
    %355 = vector.shape_cast %354 : vector<1x1x8xbf16> to vector<1x8xbf16>
    %356 = vector.broadcast %355 : vector<1x8xbf16> to vector<32x8xbf16>
    %357 = arith.mulf %353, %356 : vector<32x8xbf16>
    %cst_232 = arith.constant 0.000000e+00 : bf16
    %358 = vector.broadcast %cst_232 : bf16 to vector<32x1xbf16>
    %359 = vector.extract_strided_slice %194 {offsets = [0, 0], sizes = [32, 7], strides = [1, 1]} : vector<32x8xbf16> to vector<32x7xbf16>
    %360 = tpu.concatenate %358, %359 in 1 : vector<32x1xbf16>, vector<32x7xbf16> -> vector<32x8xbf16>
    %c3_233 = arith.constant 3 : index
    %c0_234 = arith.constant 0 : index
    %c0_235 = arith.constant 0 : index
    %361 = vector.load %arg42[%c3_233, %c0_234, %c0_235] : memref<9x1x8xbf16, #tpu.memory_space<vmem>>, vector<1x1x8xbf16>
    %362 = vector.shape_cast %361 : vector<1x1x8xbf16> to vector<1x8xbf16>
    %363 = vector.broadcast %362 : vector<1x8xbf16> to vector<32x8xbf16>
    %364 = arith.mulf %360, %363 : vector<32x8xbf16>
    %365 = vector.extract_strided_slice %194 {offsets = [0, 1], sizes = [32, 7], strides = [1, 1]} : vector<32x8xbf16> to vector<32x7xbf16>
    %cst_236 = arith.constant 0.000000e+00 : bf16
    %366 = vector.broadcast %cst_236 : bf16 to vector<32x1xbf16>
    %367 = tpu.concatenate %365, %366 in 1 : vector<32x7xbf16>, vector<32x1xbf16> -> vector<32x8xbf16>
    %c5_237 = arith.constant 5 : index
    %c0_238 = arith.constant 0 : index
    %c0_239 = arith.constant 0 : index
    %368 = vector.load %arg42[%c5_237, %c0_238, %c0_239] : memref<9x1x8xbf16, #tpu.memory_space<vmem>>, vector<1x1x8xbf16>
    %369 = vector.shape_cast %368 : vector<1x1x8xbf16> to vector<1x8xbf16>
    %370 = vector.broadcast %369 : vector<1x8xbf16> to vector<32x8xbf16>
    %371 = arith.mulf %367, %370 : vector<32x8xbf16>
    %372 = vector.extract_strided_slice %194 {offsets = [0, 1], sizes = [32, 7], strides = [1, 1]} : vector<32x8xbf16> to vector<32x7xbf16>
    %cst_240 = arith.constant 0.000000e+00 : bf16
    %373 = vector.broadcast %cst_240 : bf16 to vector<32x1xbf16>
    %374 = tpu.concatenate %372, %373 in 1 : vector<32x7xbf16>, vector<32x1xbf16> -> vector<32x8xbf16>
    %c6_241 = arith.constant 6 : index
    %c0_242 = arith.constant 0 : index
    %c0_243 = arith.constant 0 : index
    %375 = vector.load %arg42[%c6_241, %c0_242, %c0_243] : memref<9x1x8xbf16, #tpu.memory_space<vmem>>, vector<1x1x8xbf16>
    %376 = vector.shape_cast %375 : vector<1x1x8xbf16> to vector<1x8xbf16>
    %377 = vector.broadcast %376 : vector<1x8xbf16> to vector<32x8xbf16>
    %378 = arith.mulf %374, %377 : vector<32x8xbf16>
    %379 = vector.extract_strided_slice %194 {offsets = [0, 2], sizes = [32, 6], strides = [1, 1]} : vector<32x8xbf16> to vector<32x6xbf16>
    %cst_244 = arith.constant 0.000000e+00 : bf16
    %380 = vector.broadcast %cst_244 : bf16 to vector<32x2xbf16>
    %381 = tpu.concatenate %379, %380 in 1 : vector<32x6xbf16>, vector<32x2xbf16> -> vector<32x8xbf16>
    %c7_245 = arith.constant 7 : index
    %c0_246 = arith.constant 0 : index
    %c0_247 = arith.constant 0 : index
    %382 = vector.load %arg42[%c7_245, %c0_246, %c0_247] : memref<9x1x8xbf16, #tpu.memory_space<vmem>>, vector<1x1x8xbf16>
    %383 = vector.shape_cast %382 : vector<1x1x8xbf16> to vector<1x8xbf16>
    %384 = vector.broadcast %383 : vector<1x8xbf16> to vector<32x8xbf16>
    %385 = arith.mulf %381, %384 : vector<32x8xbf16>
    %386 = vector.extract_strided_slice %194 {offsets = [0, 3], sizes = [32, 5], strides = [1, 1]} : vector<32x8xbf16> to vector<32x5xbf16>
    %cst_248 = arith.constant 0.000000e+00 : bf16
    %387 = vector.broadcast %cst_248 : bf16 to vector<32x3xbf16>
    %388 = tpu.concatenate %386, %387 in 1 : vector<32x5xbf16>, vector<32x3xbf16> -> vector<32x8xbf16>
    %c8_249 = arith.constant 8 : index
    %c0_250 = arith.constant 0 : index
    %c0_251 = arith.constant 0 : index
    %389 = vector.load %arg42[%c8_249, %c0_250, %c0_251] : memref<9x1x8xbf16, #tpu.memory_space<vmem>>, vector<1x1x8xbf16>
    %390 = vector.shape_cast %389 : vector<1x1x8xbf16> to vector<1x8xbf16>
    %391 = vector.broadcast %390 : vector<1x8xbf16> to vector<32x8xbf16>
    %392 = arith.mulf %388, %391 : vector<32x8xbf16>
    %393 = tpu.concatenate %343, %350, %357, %364, %194, %371, %378, %385, %392 in 0 : vector<32x8xbf16>, vector<32x8xbf16>, vector<32x8xbf16>, vector<32x8xbf16>, vector<32x8xbf16>, vector<32x8xbf16>, vector<32x8xbf16>, vector<32x8xbf16>, vector<32x8xbf16> -> vector<288x8xbf16>
    %c0_252 = arith.constant 0 : index
    %c0_253 = arith.constant 0 : index
    %394 = vector.load %arg40[%c0_252, %c0_253] : memref<32x288xbf16, #tpu.memory_space<vmem>>, vector<32x288xbf16>
    %cst_254 = arith.constant dense<0.000000e+00> : vector<32x8xf32>
    %395 = tpu.matmul %394, %393, %cst_254 {dimension_numbers = #tpu.dot_dimension_numbers<[1], [0], [0], [1], [0, 0, 1, 1], [], []>} : vector<32x288xbf16>, vector<288x8xbf16>, vector<32x8xf32> -> vector<32x8xf32>
    %c0_255 = arith.constant 0 : index
    %c0_256 = arith.constant 0 : index
    %396 = vector.load %arg41[%c0_255, %c0_256] : memref<32x1xf32, #tpu.memory_space<vmem>>, vector<32x1xf32>
    %397 = vector.broadcast %396 : vector<32x1xf32> to vector<32x8xf32>
    %398 = arith.addf %395, %397 : vector<32x8xf32>
    %c0_257 = arith.constant 0 : index
    %c0_258 = arith.constant 0 : index
    %399 = vector.load %arg45[%c0_257, %c0_258] : memref<32x32xbf16, #tpu.memory_space<vmem>>, vector<32x32xbf16>
    %cst_259 = arith.constant dense<0.000000e+00> : vector<32x2xf32>
    %400 = tpu.matmul %399, %185, %cst_259 {dimension_numbers = #tpu.dot_dimension_numbers<[1], [0], [0], [1], [0, 0, 1, 1], [], []>} : vector<32x32xbf16>, vector<32x2xbf16>, vector<32x2xf32> -> vector<32x2xf32>
    %c0_260 = arith.constant 0 : index
    %c0_261 = arith.constant 0 : index
    %401 = vector.load %arg46[%c0_260, %c0_261] : memref<32x1xf32, #tpu.memory_space<vmem>>, vector<32x1xf32>
    %402 = vector.broadcast %401 : vector<32x1xf32> to vector<32x2xf32>
    %403 = arith.addf %400, %402 : vector<32x2xf32>
    %404 = arith.truncf %403 : vector<32x2xf32> to vector<32x2xbf16>
    %c0_262 = arith.constant 0 : index
    %c0_263 = arith.constant 0 : index
    %405 = vector.load %arg50[%c0_262, %c0_263] : memref<2x2xbf16, #tpu.memory_space<vmem>>, vector<2x2xbf16>
    %cst_264 = arith.constant dense<0.000000e+00> : vector<32x2xf32>
    %406 = tpu.matmul %404, %405, %cst_264 {dimension_numbers = #tpu.dot_dimension_numbers<[1], [0], [0], [1], [0, 0, 1, 1], [], []>} : vector<32x2xbf16>, vector<2x2xbf16>, vector<32x2xf32> -> vector<32x2xf32>
    %cst_265 = arith.constant 0.000000e+00 : f32
    %407 = vector.broadcast %cst_265 : f32 to vector<32x84xf32>
    %408 = tpu.concatenate %274, %336, %398, %403, %406, %407 in 1 : vector<32x128xf32>, vector<32x32xf32>, vector<32x8xf32>, vector<32x2xf32>, vector<32x2xf32>, vector<32x84xf32> -> vector<32x256xf32>
    %c0_266 = arith.constant 0 : index
    %c0_267 = arith.constant 0 : index
    %409 = vector.load %arg51[%c0_266, %c0_267] : memref<32x256xf32, #tpu.memory_space<vmem>>, vector<32x256xf32>
    tpu.vector_store %arg51[%c0_266, %c0_267], %408 {strides = array<i32>} : memref<32x256xf32, #tpu.memory_space<vmem>>, vector<32x256xf32>,
    return
  }
}

</mosaic_0001>

<bundles_post_ra>
// kernel: forward.1
= control target key start
LH: loop header
LB: loop body
LE: loop exit
PB: predicated region body
PF: predicated region fallthrough
CT: control target
= control target key end

     0   :  { %s10797_s6 = smov 1   ;;  %s10798_s10 = smov 2   ;;  %s14064_s0 = inlined_call_operand.smem [shape: u32[52], index: -1, kind: input, shape index: {}] }
   0x1   :  { %s10923_s5 = sld [smem:[%s14064_s0]]   ;;  %s10799_s14 = smov 3  }
   0x2   :  { %s10928_s9 = sld [smem:[%s14064_s0 + %s10797_s6]]   ;;  %s10800_s18 = smov 4  }
   0x3   :  { %s10933_s13 = sld [smem:[%s14064_s0 + %s10798_s10]]   ;;  %s10801_s22 = smov 5  }
   0x4   :  { %s10938_s17 = sld [smem:[%s14064_s0 + %s10799_s14]]   ;;  %s10802_s26 = smov 6  }
   0x5   :  { %s10943_s21 = sld [smem:[%s14064_s0 + %s10800_s18]]   ;;  %s10803_s30 = smov 7  }
   0x6   :  { %s10948_s25 = sld [smem:[%s14064_s0 + %s10801_s22]]   ;;  %s10804_s4 = smov 8  }
   0x7   :  { %14151 = sst [smem:[#allocation88_spill]] %s10923_s5  ;;  %s10805_s10 = smov 9  }
   0x8   :  { %14152 = sst [smem:[#allocation89_spill]] %s10928_s9  ;;  %s10806_s15 = smov 10  }
   0x9   :  { %s10953_s29 = sld [smem:[%s14064_s0 + %s10802_s26]]   ;;  %s10807_s20 = smov 11  }
   0xa   :  { %14153 = sst [smem:[#allocation90_spill]] %s10938_s17  ;;  %s10808_s26 = smov 12  }
   0xb   :  { %s10958_s3 = sld [smem:[%s14064_s0 + %s10803_s30]]   ;;  %s10809_s1 = smov 13  }
   0xc   :  { %14154 = sst [smem:[#allocation91_spill]] %s10948_s25  ;;  %s10810_s7 = smov 14  }
   0xd   :  { %s10963_s8 = sld [smem:[%s14064_s0 + %s10804_s4]]   ;;  %s10812_s22 = smov 16  }
   0xe   :  { %s10968_s14 = sld [smem:[%s14064_s0 + %s10805_s10]]   ;;  %s10813_s28 = smov 17  }
   0xf   :  { %s10973_s19 = sld [smem:[%s14064_s0 + %s10806_s15]]   ;;  %s10811_s15 = smov 15  }
  0x10   :  { %s10978_s24 = sld [smem:[%s14064_s0 + %s10807_s20]]  }
  0x11   :  { %14155 = sst [smem:[#allocation92_spill]] %s10958_s3 }
  0x12   :  { %s10983_s30 = sld [smem:[%s14064_s0 + %s10808_s26]]  }
  0x13   :  { %s10988_s6 = sld [smem:[%s14064_s0 + %s10809_s1]]  }
  0x14   :  { %14156 = sst [smem:[#allocation93_spill]] %s10968_s14 }
  0x15   :  { %s10993_s12 = sld [smem:[%s14064_s0 + %s10810_s7]]   ;;  %s10814_s7 = smov 18  }
  0x16   :  { %14157 = sst [smem:[#allocation94_spill]] %s10978_s24 }
  0x17   :  { %s10998_s20 = sld [smem:[%s14064_s0 + %s10811_s15]]   ;;  %s10815_s15 = smov 19  }
  0x18   :  { %s11003_s27 = sld [smem:[%s14064_s0 + %s10812_s22]]   ;;  %s10816_s22 = smov 20  }
  0x19   :  { %14158 = sst [smem:[#allocation95_spill]] %s10988_s6 }
  0x1a   :  { %s11008_s4 = sld [smem:[%s14064_s0 + %s10813_s28]]   ;;  %s10817_s28 = smov 21  }
  0x1b   :  { %s11013_s5 = sld [smem:[%s14064_s0 + %s10814_s7]]   ;;  %s10818_s7 = smov 22  }
  0x1c   :  { %s11023_s6 = sld [smem:[%s14064_s0 + %s10816_s22]]   ;;  %s10820_s22 = smov 24  }
  0x1d   :  { %14159 = sst [smem:[#allocation96_spill]] %s10998_s20 }
  0x1e   :  { %s11018_s20 = sld [smem:[%s14064_s0 + %s10815_s15]]   ;;  %s10819_s15 = smov 23  }
  0x1f   :  { %s11033_s24 = sld [smem:[%s14064_s0 + %s10818_s7]]   ;;  %s10822_s7 = smov 26  }
  0x20   :  { %14160 = sst [smem:[#allocation97_spill]] %s11008_s4 }
  0x21   :  { %s11028_s4 = sld [smem:[%s14064_s0 + %s10817_s28]]   ;;  %s10821_s28 = smov 25  }
  0x22   :  { %s11043_s14 = sld [smem:[%s14064_s0 + %s10820_s22]]   ;;  %s10824_s22 = smov 28  }
  0x23   :  { %s11063_s3 = sld [smem:[%s14064_s0 + %s10824_s22]]   ;;  %s10828_s22 = smov 32  }
  0x24   :  { %14161 = sst [smem:[#allocation98_spill]] %s11018_s20 }
  0x25   :  { %14163 = sst [smem:[#allocation100_spill]] %s11033_s24 }
  0x26   :  { %s11038_s20 = sld [smem:[%s14064_s0 + %s10819_s15]]   ;;  %s10823_s15 = smov 27  }
  0x27   :  { %14162 = sst [smem:[#allocation99_spill]] %s11028_s4 }
  0x28   :  { %s11048_s4 = sld [smem:[%s14064_s0 + %s10821_s28]]   ;;  %s10825_s28 = smov 29  }
  0x29   :  { %s11053_s24 = sld [smem:[%s14064_s0 + %s10822_s7]]   ;;  %s10826_s7 = smov 30  }
  0x2a   :  { %s11083_s25 = sld [smem:[%s14064_s0 + %s10828_s22]]   ;;  %s10832_s22 = smov 36  }
  0x2b   :  { %s11103_s9 = sld [smem:[%s14064_s0 + %s10832_s22]]   ;;  %s10836_s22 = smov 40  }
  0x2c   :  { %14164 = sst [smem:[#allocation101_spill]] %s11038_s20 }
  0x2d   :  { %s11058_s20 = sld [smem:[%s14064_s0 + %s10823_s15]]   ;;  %s10827_s15 = smov 31  }
  0x2e   :  { %14165 = sst [smem:[#allocation102_spill]] %s11048_s4 }
  0x2f   :  { %14166 = sst [smem:[#allocation103_spill]] %s11053_s24 }
  0x30   :  { %s11068_s4 = sld [smem:[%s14064_s0 + %s10825_s28]]   ;;  %s10829_s28 = smov 33  }
  0x31   :  { %s11073_s24 = sld [smem:[%s14064_s0 + %s10826_s7]]   ;;  %s10830_s7 = smov 34  }
  0x32   :  { %s11093_s17 = sld [smem:[%s14064_s0 + %s10830_s7]]   ;;  %s10834_s7 = smov 38  }
  0x33   :  { %14167 = sst [smem:[#allocation104_spill]] %s11058_s20 }
  0x34   :  { %s11078_s20 = sld [smem:[%s14064_s0 + %s10827_s15]]   ;;  %s10831_s15 = smov 35  }
  0x35   :  { %14173 = sst [smem:[#allocation110_spill]] %s11103_s9 }
  0x36   :  { %14168 = sst [smem:[#allocation105_spill]] %s11068_s4 }
  0x37   :  { %s11088_s4 = sld [smem:[%s14064_s0 + %s10829_s28]]   ;;  %s10833_s28 = smov 37  }
  0x38   :  { %14171 = sst [smem:[#allocation108_spill]] %s11093_s17 }
  0x39   :  { %s11113_s17 = sld [smem:[%s14064_s0 + %s10834_s7]]   ;;  %s10838_s7 = smov 42  }
  0x3a   :  { %14169 = sst [smem:[#allocation106_spill]] %s11078_s20 }
  0x3b   :  { %s11098_s20 = sld [smem:[%s14064_s0 + %s10831_s15]]   ;;  %s10835_s15 = smov 39  }
  0x3c   :  { %s11123_s9 = sld [smem:[%s14064_s0 + %s10836_s22]]   ;;  %s10840_s22 = smov 44  }
  0x3d   :  { %14170 = sst [smem:[#allocation107_spill]] %s11088_s4 }
  0x3e   :  { %s11108_s4 = sld [smem:[%s14064_s0 + %s10833_s28]]   ;;  %s10837_s28 = smov 41  }
  0x3f   :  { %14175 = sst [smem:[#allocation112_spill]] %s11113_s17 }
  0x40   :  { %s11133_s17 = sld [smem:[%s14064_s0 + %s10838_s7]]   ;;  %s10842_s7 = smov 46  }
  0x41   :  { %14172 = sst [smem:[#allocation109_spill]] %s11098_s20 }
  0x42   :  { %s11118_s20 = sld [smem:[%s14064_s0 + %s10835_s15]]   ;;  %s10839_s15 = smov 43  }
  0x43   :  { %14177 = sst [smem:[#allocation114_spill]] %s11123_s9 }
  0x44   :  { %14174 = sst [smem:[#allocation111_spill]] %s11108_s4 }
  0x45   :  { %s11128_s4 = sld [smem:[%s14064_s0 + %s10837_s28]]   ;;  %s10841_s28 = smov 45  }
  0x46   :  { %14179 = sst [smem:[#allocation116_spill]] %s11133_s17 }
  0x47   :  { %s11143_s9 = sld [smem:[%s14064_s0 + %s10840_s22]]   ;;  %s10844_s22 = smov 48  }
  0x48   :  { %14176 = sst [smem:[#allocation113_spill]] %s11118_s20 }
  0x49   :  { %s11138_s20 = sld [smem:[%s14064_s0 + %s10839_s15]]   ;;  %s10843_s15 = smov 47  }
  0x4a   :  { %s11153_s17 = sld [smem:[%s14064_s0 + %s10842_s7]]   ;;  %s10846_s7 = smov 50  }
  0x4b   :  { %14178 = sst [smem:[#allocation115_spill]] %s11128_s4 }
  0x4c   :  { %s11148_s4 = sld [smem:[%s14064_s0 + %s10841_s28]]   ;;  %s10845_s28 = smov 49  }
  0x4d   :  { %14181 = sst [smem:[#allocation118_spill]] %s11143_s9 }
  0x4e   :  { %s11163_s9 = sld [smem:[%s14064_s0 + %s10844_s22]]  }
  0x4f   :  { %14180 = sst [smem:[#allocation117_spill]] %s11138_s20 }
  0x50   :  { %14183 = sst [smem:[#allocation120_spill]] %s11153_s17 }
  0x51   :  { %s11158_s20 = sld [smem:[%s14064_s0 + %s10843_s15]]   ;;  %s10847_s15 = smov 51  }
  0x52   :  { %14182 = sst [smem:[#allocation119_spill]] %s11148_s4 }
  0x53   :  { %s11168_s4 = sld [smem:[%s14064_s0 + %s10845_s28]]  }
  0x54   :  { %s11173_s17 = sld [smem:[%s14064_s0 + %s10846_s7]]  }
  0x57   :  { %14184 = sst [smem:[#allocation121_spill]] %s11158_s20 }
  0x58   :  { %s11178_s20 = sld [smem:[%s14064_s0 + %s10847_s15]]  }
  0x59   :  { %108 = vsyncpa [#allocation3], 0 }
  0x5a   :  { %109 = vsyncpa [#allocation5], 0 }
  0x5b   :  { %110 = vsyncpa [#allocation8], 0 }
  0x5c   :  { %111 = vsyncpa [#allocation11], 0 }
  0x5d   :  { %112 = vsyncpa [#allocation14], 0 }
  0x5e   :  { %113 = vsyncpa [#allocation17], 0 }
  0x5f   :  { %114 = vsyncpa [#allocation20], 0 }
  0x60   :  { %115 = vsyncpa [#allocation23], 0 }
  0x61   :  { %116 = vsyncpa [#allocation26], 0 }
  0x62   :  { %117 = vsyncpa [#allocation29], 0 }
  0x63   :  { %118 = vsyncpa [#allocation32], 0 }
  0x64   :  { %119 = vsyncpa [#allocation35], 0 }
  0x65   :  { %120 = vsyncpa [#allocation38], 0 }
  0x66   :  { %121 = vsyncpa [#allocation41], 0 }
  0x67   :  { %122 = vsyncpa [#allocation44], 0 }
  0x68   :  { %123 = vsyncpa [#allocation47], 0 }
  0x69   :  { %124 = vsyncpa [#allocation50], 0 }
  0x6a   :  { %125 = vsyncpa [#allocation53], 0 }
  0x6b   :  { %126 = vsyncpa [#allocation56], 0 }
  0x6c   :  { %127 = vsyncpa [#allocation59], 0 }
  0x6d   :  { %128 = vsyncpa [#allocation62], 0  ;;  %s149_s0 = sshll.u32 %s10933_s13, 4  ;;  %s150_s0 = int_to_ptr.hbm [resolvable:$true] %s149_s0 }
  0x6e   :  { %129 = vsyncpa [#allocation65], 0  ;;  %s10848_s22 = smov [#allocation4]   ;;  %s175_s26 = sshll.u32 %s10943_s21, 4  ;;  %s176_s26 = int_to_ptr.hbm [resolvable:$true] %s175_s26 }
  0x6f   :  { %s151_s23 = sshll.u32 %s10848_s22, 4  ;;  %s9745_s28 = sshra.s32 %s150_s0, 4  ;;  %s152_s23 = int_to_ptr.vmem [resolvable:$true] %s151_s23  ;;  %s9746_s28 = int_to_ptr.hbm [resolvable:$true] %s9745_s28 }
  0x70   :  { %s9747_s1 = scalar_lea.hbm %s9746_s28, 32  ;;  %s9749_s2 = scalar_lea.hbm %s10933_s13, 32 }
  0x71   :  { %p9748_p0 = scmp.ne.s32.totalorder %s9746_s28, %s9747_s1  ;;  %p9750_p1 = scmp.lt.s32.totalorder %s9746_s28, %s10933_s13 }
  0x72   :  { %p9751_p2 = scmp.lt.s32.totalorder %s9749_s2, %s9747_s1 }
  0x74   :  { %p9752_p3 = por %p9751_p2, %p9750_p1 }
  0x76   :  { %p9753_p4 = pnand %p9752_p3, %p9748_p0 }
  0x78   :  { %9756 = shalt.err (!%p9753_p4)
}
  0x79   :  { %s10849_s7 = smov 128   ;;  %s10850_s10 = smov 8  }
  0x7a   :  { %157 = dma.hbm_to_vmem [thread:$0]  %s150_s0, 512, %s152_s23, [#allocation5], %s10849_s7, %s10849_s7, %s10850_s10  }
  0x7b   :  { %s10851_s11 = smov [#allocation7]   ;;  %s201_s16 = sshll.u32 %s10953_s29, 4  ;;  %s11188_s16 = int_to_ptr.hbm [resolvable:$true] %s201_s16 }
  0x7c   :  { %s177_s15 = sshll.u32 %s10851_s11, 4  ;;  %s9769_s13 = sshra.s32 %s176_s26, 4  ;;  %s178_s15 = int_to_ptr.vmem [resolvable:$true] %s177_s15  ;;  %s9770_s13 = int_to_ptr.hbm [resolvable:$true] %s9769_s13 }
  0x7d   :  { %s9771_s18 = scalar_lea.hbm %s9770_s13, 32  ;;  %s9773_s22 = scalar_lea.hbm %s10943_s21, 32 }
  0x7e   :  { %p9772_p5 = scmp.ne.s32.totalorder %s9770_s13, %s9771_s18  ;;  %p9774_p6 = scmp.lt.s32.totalorder %s9770_s13, %s10943_s21 }
  0x7f   :  { %p9775_p7 = scmp.lt.s32.totalorder %s9773_s22, %s9771_s18 }
  0x81   :  { %p9776_p8 = por %p9775_p7, %p9774_p6 }
  0x83   :  { %p9777_p9 = pnand %p9776_p8, %p9772_p5 }
  0x85   :  { %9780 = shalt.err (!%p9777_p9)
}
  0x86   :  { %183 = dma.hbm_to_vmem [thread:$0]  %s176_s26, 512, %s178_s15, [#allocation8], %s10849_s7, %s10849_s7, %s10850_s10  }
  0x87   :  { %s227_s0 = sshll.u32 %s10963_s8, 4  ;;  %s10852_s23 = smov [#allocation10]   ;;  %s11196_s0 = int_to_ptr.hbm [resolvable:$true] %s227_s0 }
  0x88   :  { %s203_s28 = sshll.u32 %s10852_s23, 4  ;;  %s9793_s1 = sshra.s32 %s11188_s16, 4  ;;  %s204_s28 = int_to_ptr.vmem [resolvable:$true] %s203_s28  ;;  %s9794_s1 = int_to_ptr.hbm [resolvable:$true] %s9793_s1 }
  0x89   :  { %s9795_s21 = scalar_lea.hbm %s9794_s1, 32  ;;  %s9797_s2 = scalar_lea.hbm %s10953_s29, 32 }
  0x8a   :  { %p9796_p10 = scmp.ne.s32.totalorder %s9794_s1, %s9795_s21  ;;  %p9798_p11 = scmp.lt.s32.totalorder %s9794_s1, %s10953_s29 }
  0x8b   :  { %p9799_p12 = scmp.lt.s32.totalorder %s9797_s2, %s9795_s21 }
  0x8d   :  { %p9800_p13 = por %p9799_p12, %p9798_p11 }
  0x8f   :  { %p9801_p0 = pnand %p9800_p13, %p9796_p10 }
  0x91   :  { %9804 = shalt.err (!%p9801_p0)
}
  0x92   :  { %209 = dma.hbm_to_vmem [thread:$0]  %s11188_s16, 512, %s204_s28, [#allocation11], %s10849_s7, %s10849_s7, %s10850_s10  }
  0x93   :  { %s10853_s26 = smov [#allocation13]   ;;  %s253_s15 = sshll.u32 %s10973_s19, 4  ;;  %s11206_s15 = int_to_ptr.hbm [resolvable:$true] %s253_s15 }
  0x94   :  { %s229_s11 = sshll.u32 %s10853_s26, 4  ;;  %s9817_s29 = sshra.s32 %s11196_s0, 4  ;;  %s230_s11 = int_to_ptr.vmem [resolvable:$true] %s229_s11  ;;  %s9818_s29 = int_to_ptr.hbm [resolvable:$true] %s9817_s29 }
  0x95   :  { %s9819_s13 = scalar_lea.hbm %s9818_s29, 64  ;;  %s9821_s18 = scalar_lea.hbm %s10963_s8, 64 }
  0x96   :  { %p9820_p1 = scmp.ne.s32.totalorder %s9818_s29, %s9819_s13  ;;  %p9822_p2 = scmp.lt.s32.totalorder %s9818_s29, %s10963_s8 }
  0x97   :  { %p9823_p3 = scmp.lt.s32.totalorder %s9821_s18, %s9819_s13 }
  0x99   :  { %p9824_p4 = por %p9823_p3, %p9822_p2 }
  0x9b   :  { %p9825_p5 = pnand %p9824_p4, %p9820_p1 }
  0x9d   :  { %9828 = shalt.err (!%p9825_p5)
}
  0x9e   :  { %235 = dma.hbm_to_vmem [thread:$0]  %s11196_s0, 1024, %s230_s11, [#allocation14], %s10849_s7, %s10849_s7, %s10850_s10  }
  0x9f   :  { %s279_s16 = sshll.u32 %s10983_s30, 4  ;;  %s10854_s22 = smov [#allocation16]   ;;  %s11216_s16 = int_to_ptr.hbm [resolvable:$true] %s279_s16 }
  0xa0   :  { %s255_s23 = sshll.u32 %s10854_s22, 4  ;;  %s9841_s8 = sshra.s32 %s11206_s15, 4  ;;  %s256_s23 = int_to_ptr.vmem [resolvable:$true] %s255_s23  ;;  %s9842_s8 = int_to_ptr.hbm [resolvable:$true] %s9841_s8 }
  0xa1   :  { %s9843_s28 = scalar_lea.hbm %s9842_s8, 64  ;;  %s9845_s1 = scalar_lea.hbm %s10973_s19, 64 }
  0xa2   :  { %p9844_p6 = scmp.ne.s32.totalorder %s9842_s8, %s9843_s28  ;;  %p9846_p7 = scmp.lt.s32.totalorder %s9842_s8, %s10973_s19 }
  0xa3   :  { %p9847_p8 = scmp.lt.s32.totalorder %s9845_s1, %s9843_s28 }
  0xa5   :  { %p9848_p9 = por %p9847_p8, %p9846_p7 }
  0xa7   :  { %p9849_p10 = pnand %p9848_p9, %p9844_p6 }
  0xa9   :  { %9852 = shalt.err (!%p9849_p10)
}
  0xaa   :  { %261 = dma.hbm_to_vmem [thread:$0]  %s11206_s15, 1024, %s256_s23, [#allocation17], %s10849_s7, %s10849_s7, %s10850_s10  }
  0xab   :  { %s10855_s0 = smov [#allocation19]   ;;  %s305_s2 = sshll.u32 %s10993_s12, 4  ;;  %s11226_s2 = int_to_ptr.hbm [resolvable:$true] %s305_s2 }
  0xac   :  { %s281_s21 = sshll.u32 %s10855_s0, 4  ;;  %s9865_s19 = sshra.s32 %s11216_s16, 4  ;;  %s282_s21 = int_to_ptr.vmem [resolvable:$true] %s281_s21  ;;  %s9866_s19 = int_to_ptr.hbm [resolvable:$true] %s9865_s19 }
  0xad   :  { %s9867_s26 = scalar_lea.hbm %s9866_s19, 128  ;;  %s9869_s11 = scalar_lea.hbm %s10983_s30, 128 }
  0xae   :  { %p9868_p11 = scmp.ne.s32.totalorder %s9866_s19, %s9867_s26  ;;  %p9870_p12 = scmp.lt.s32.totalorder %s9866_s19, %s10983_s30 }
  0xaf   :  { %p9871_p13 = scmp.lt.s32.totalorder %s9869_s11, %s9867_s26 }
  0xb1   :  { %p9872_p0 = por %p9871_p13, %p9870_p12 }
  0xb3   :  { %p9873_p1 = pnand %p9872_p0, %p9868_p11 }
  0xb5   :  { %9876 = shalt.err (!%p9873_p1)
}
  0xb6   :  { %287 = dma.hbm_to_vmem [thread:$0]  %s11216_s16, 2048, %s282_s21, [#allocation20], %s10849_s7, %s10849_s7, %s10850_s10  }
  0xb7   :  { %s331_s15 = sshll.u32 %s11003_s27, 4  ;;  %s10856_s29 = smov [#allocation22]   ;;  %s11236_s15 = int_to_ptr.hbm [resolvable:$true] %s331_s15 }
  0xb8   :  { %s307_s13 = sshll.u32 %s10856_s29, 4  ;;  %s9889_s30 = sshra.s32 %s11226_s2, 4  ;;  %s308_s13 = int_to_ptr.vmem [resolvable:$true] %s307_s13  ;;  %s9890_s30 = int_to_ptr.hbm [resolvable:$true] %s9889_s30 }
  0xb9   :  { %s9891_s18 = scalar_lea.hbm %s9890_s30, 128  ;;  %s9893_s22 = scalar_lea.hbm %s10993_s12, 128 }
  0xba   :  { %p9892_p2 = scmp.ne.s32.totalorder %s9890_s30, %s9891_s18  ;;  %p9894_p3 = scmp.lt.s32.totalorder %s9890_s30, %s10993_s12 }
  0xbb   :  { %p9895_p4 = scmp.lt.s32.totalorder %s9893_s22, %s9891_s18 }
  0xbd   :  { %p9896_p5 = por %p9895_p4, %p9894_p3 }
  0xbf   :  { %p9897_p6 = pnand %p9896_p5, %p9892_p2 }
  0xc1   :  { %9900 = shalt.err (!%p9897_p6)
}
  0xc2   :  { %313 = dma.hbm_to_vmem [thread:$0]  %s11226_s2, 2048, %s308_s13, [#allocation23], %s10849_s7, %s10849_s7, %s10850_s10  }
  0xc3   :  { %s10857_s16 = smov [#allocation25]   ;;  %s357_s8 = sshll.u32 %s11013_s5, 4  ;;  %s11246_s8 = int_to_ptr.hbm [resolvable:$true] %s357_s8 }
  0xc4   :  { %s333_s23 = sshll.u32 %s10857_s16, 4  ;;  %s9913_s12 = sshra.s32 %s11236_s15, 4  ;;  %s334_s23 = int_to_ptr.vmem [resolvable:$true] %s333_s23  ;;  %s9914_s12 = int_to_ptr.hbm [resolvable:$true] %s9913_s12 }
  0xc5   :  { %s9915_s28 = scalar_lea.hbm %s9914_s12, 256  ;;  %s9917_s1 = scalar_lea.hbm %s11003_s27, 256 }
  0xc6   :  { %p9916_p7 = scmp.ne.s32.totalorder %s9914_s12, %s9915_s28  ;;  %p9918_p8 = scmp.lt.s32.totalorder %s9914_s12, %s11003_s27 }
  0xc7   :  { %p9919_p9 = scmp.lt.s32.totalorder %s9917_s1, %s9915_s28 }
  0xc9   :  { %p9920_p10 = por %p9919_p9, %p9918_p8 }
  0xcb   :  { %p9921_p11 = pnand %p9920_p10, %p9916_p7 }
  0xcd   :  { %9924 = shalt.err (!%p9921_p11)
}
  0xce   :  { %339 = dma.hbm_to_vmem [thread:$0]  %s11236_s15, 4096, %s334_s23, [#allocation26], %s10849_s7, %s10849_s7, %s10850_s10  }
  0xcf   :  { %s383_s0 = sshll.u32 %s11023_s6, 4  ;;  %s10858_s21 = smov [#allocation28]   ;;  %s11256_s0 = int_to_ptr.hbm [resolvable:$true] %s383_s0 }
  0xd0   :  { %s359_s2 = sshll.u32 %s10858_s21, 4  ;;  %s9937_s27 = sshra.s32 %s11246_s8, 4  ;;  %s360_s2 = int_to_ptr.vmem [resolvable:$true] %s359_s2  ;;  %s9938_s27 = int_to_ptr.hbm [resolvable:$true] %s9937_s27 }
  0xd1   :  { %s9939_s19 = scalar_lea.hbm %s9938_s27, 256  ;;  %s9941_s26 = scalar_lea.hbm %s11013_s5, 256 }
  0xd2   :  { %p9940_p12 = scmp.ne.s32.totalorder %s9938_s27, %s9939_s19  ;;  %p9942_p13 = scmp.lt.s32.totalorder %s9938_s27, %s11013_s5 }
  0xd3   :  { %p9943_p0 = scmp.lt.s32.totalorder %s9941_s26, %s9939_s19 }
  0xd5   :  { %p9944_p1 = por %p9943_p0, %p9942_p13 }
  0xd7   :  { %p9945_p2 = pnand %p9944_p1, %p9940_p12 }
  0xd9   :  { %9948 = shalt.err (!%p9945_p2)
}
  0xda   :  { %365 = dma.hbm_to_vmem [thread:$0]  %s11246_s8, 4096, %s360_s2, [#allocation29], %s10849_s7, %s10849_s7, %s10850_s10  }
  0xdb   :  { %s10859_s11 = smov [#allocation31]   ;;  %s9961_s29 = sshra.s32 %s11256_s0, 4  ;;  %s9962_s29 = int_to_ptr.hbm [resolvable:$true] %s9961_s29 }
  0xdc   :  { %s385_s15 = sshll.u32 %s10859_s11, 4  ;;  %s9963_s13 = scalar_lea.hbm %s9962_s29, 64  ;;  %s386_s15 = int_to_ptr.vmem [resolvable:$true] %s385_s15 }
  0xdd   :  { %p9964_p3 = scmp.ne.s32.totalorder %s9962_s29, %s9963_s13  ;;  %s9965_s5 = scalar_lea.hbm %s11023_s6, 64 }
  0xde   :  { %p9966_p4 = scmp.lt.s32.totalorder %s9962_s29, %s11023_s6  ;;  %p9967_p5 = scmp.lt.s32.totalorder %s9965_s5, %s9963_s13 }
  0xe0   :  { %p9968_p6 = por %p9967_p5, %p9966_p4 }
  0xe2   :  { %p9969_p7 = pnand %p9968_p6, %p9964_p3 }
  0xe4   :  { %9972 = shalt.err (!%p9969_p7)
}
  0xe5   :  { %391 = dma.hbm_to_vmem [thread:$0]  %s11256_s0, 1024, %s386_s15, [#allocation32], %s10849_s7, %s10849_s7, %s10850_s10  }
  0xe6   :  { %s413_s30 = sshll.u32 %s11043_s14, 4  ;;  %s10860_s18 = smov [#allocation34]   ;;  %s414_s30 = int_to_ptr.hbm [resolvable:$true] %s413_s30 }
  0xe7   :  { %s415_s22 = sshll.u32 %s10860_s18, 4  ;;  %s443_s16 = sshll.u32 %s11063_s3, 4  ;;  %s416_s22 = int_to_ptr.vmem [resolvable:$true] %s415_s22  ;;  %s444_s16 = int_to_ptr.hbm [resolvable:$true] %s443_s16 }
  0xe8   :  { %s9985_s6 = sshra.s32 %s414_s30, 4  ;;  %s9989_s8 = scalar_lea.hbm %s11043_s14, 64  ;;  %s9986_s6 = int_to_ptr.hbm [resolvable:$true] %s9985_s6 }
  0xe9   :  { %s9987_s23 = scalar_lea.hbm %s9986_s6, 64  ;;  %p9990_p9 = scmp.lt.s32.totalorder %s9986_s6, %s11043_s14 }
  0xea   :  { %p9988_p8 = scmp.ne.s32.totalorder %s9986_s6, %s9987_s23  ;;  %p9991_p10 = scmp.lt.s32.totalorder %s9989_s8, %s9987_s23 }
  0xec   :  { %p9992_p11 = por %p9991_p10, %p9990_p9 }
  0xee   :  { %p9993_p12 = pnand %p9992_p11, %p9988_p8 }
  0xf0   :  { %9996 = shalt.err (!%p9993_p12)
}
  0xf1   :  { %s10861_s12 = smov 64   ;;  %s10862_s28 = smov 4  }
  0xf2   :  { %421 = dma.hbm_to_vmem [thread:$0]  %s414_s30, 1024, %s416_s22, [#allocation35], %s10861_s12, %s10861_s12, %s10862_s28  }
  0xf3   :  { %s10863_s1 = smov [#allocation37]   ;;  %s469_s21 = sshll.u32 %s11073_s24, 4  ;;  %s11280_s21 = int_to_ptr.hbm [resolvable:$true] %s469_s21 }
  0xf4   :  { %s445_s0 = sshll.u32 %s10863_s1, 4  ;;  %s10009_s14 = sshra.s32 %s444_s16, 4  ;;  %s446_s0 = int_to_ptr.vmem [resolvable:$true] %s445_s0  ;;  %s10010_s14 = int_to_ptr.hbm [resolvable:$true] %s10009_s14 }
  0xf5   :  { %s10011_s2 = scalar_lea.hbm %s10010_s14, 16  ;;  %s10013_s27 = scalar_lea.hbm %s11063_s3, 16 }
  0xf6   :  { %p10012_p13 = scmp.ne.s32.totalorder %s10010_s14, %s10011_s2  ;;  %p10014_p0 = scmp.lt.s32.totalorder %s10010_s14, %s11063_s3 }
  0xf7   :  { %p10015_p1 = scmp.lt.s32.totalorder %s10013_s27, %s10011_s2 }
  0xf9   :  { %p10016_p2 = por %p10015_p1, %p10014_p0 }
  0xfb   :  { %p10017_p3 = pnand %p10016_p2, %p10012_p13 }
  0xfd   :  { %10020 = shalt.err (!%p10017_p3)
}
  0xfe   :  { %451 = dma.hbm_to_vmem [thread:$0]  %s444_s16, 256, %s446_s0, [#allocation38], %s10861_s12, %s10861_s12, %s10862_s28  }
  0xff   :  { %s10864_s19 = smov [#allocation40]   ;;  %s495_s11 = sshll.u32 %s11083_s25, 4  ;;  %s496_s11 = int_to_ptr.hbm [resolvable:$true] %s495_s11 }
 0x100   :  { %s471_s26 = sshll.u32 %s10864_s19, 4  ;;  %s10033_s15 = sshra.s32 %s11280_s21, 4  ;;  %s472_s26 = int_to_ptr.vmem [resolvable:$true] %s471_s26  ;;  %s10034_s15 = int_to_ptr.hbm [resolvable:$true] %s10033_s15 }
 0x101   :  { %s10035_s29 = scalar_lea.hbm %s10034_s15, 48  ;;  %s10037_s3 = scalar_lea.hbm %s11073_s24, 48 }
 0x102   :  { %p10036_p4 = scmp.ne.s32.totalorder %s10034_s15, %s10035_s29  ;;  %p10038_p5 = scmp.lt.s32.totalorder %s10034_s15, %s11073_s24 }
 0x103   :  { %p10039_p6 = scmp.lt.s32.totalorder %s10037_s3, %s10035_s29 }
 0x105   :  { %p10040_p7 = por %p10039_p6, %p10038_p5 }
 0x107   :  { %p10041_p8 = pnand %p10040_p7, %p10036_p4 }
 0x109   :  { %10044 = shalt.err (!%p10041_p8)
}
 0x10a   :  { %s10865_s13 = smov 192   ;;  %s10866_s5 = smov 12  }
 0x10b   :  { %477 = dma.hbm_to_vmem [thread:$0]  %s11280_s21, 768, %s472_s26, [#allocation41], %s10865_s13, %s10865_s13, %s10866_s5  }
 0x10c   :  { %s10867_s30 = smov [#allocation43]   ;;  %s10057_s22 = sshra.s32 %s496_s11, 4  ;;  %s10058_s22 = int_to_ptr.hbm [resolvable:$true] %s10057_s22 }
 0x10d   :  { %s497_s18 = sshll.u32 %s10867_s30, 4  ;;  %s10059_s24 = scalar_lea.hbm %s10058_s22, 9  ;;  %s498_s18 = int_to_ptr.vmem [resolvable:$true] %s497_s18 }
 0x10e   :  { %p10060_p9 = scmp.ne.s32.totalorder %s10058_s22, %s10059_s24  ;;  %s10061_s16 = scalar_lea.hbm %s11083_s25, 9 }
 0x10f   :  { %p10062_p10 = scmp.lt.s32.totalorder %s10058_s22, %s11083_s25  ;;  %p10063_p11 = scmp.lt.s32.totalorder %s10061_s16, %s10059_s24 }
 0x111   :  { %p10064_p12 = por %p10063_p11, %p10062_p10 }
 0x113   :  { %p10065_p13 = pnand %p10064_p12, %p10060_p9 }
 0x115   :  { %10068 = shalt.err (!%p10065_p13)
}
 0x116   :  { %s10868_s6 = smov 16   ;;  %s14185_s23 = sld [smem:[#allocation108_spill]] }
 0x117   :  { %s14186_s8 = sld [smem:[#allocation110_spill]]  ;;  %s10869_s1 = smov 1  }
 0x118   :  { %503 = dma.hbm_to_vmem [thread:$0]  %s496_s11, 144, %s498_s18, [#allocation44], %s10868_s6, %s10868_s6, %s10869_s1  }
 0x119   :  { %s10870_s21 = smov [#allocation46]  }
 0x11a   :  { %s523_s14 = sshll.u32 %s10870_s21, 4  ;;  %s524_s14 = int_to_ptr.vmem [resolvable:$true] %s523_s14 }
 0x11c   :  { %s521_s0 = sshll.u32 %s14185_s23, 4  ;;  %s10085_s19 = scalar_lea.hbm %s14185_s23, 32  ;;  %s522_s0 = int_to_ptr.hbm [resolvable:$true] %s521_s0 }
 0x11d   :  { %s547_s25 = sshll.u32 %s14186_s8, 4  ;;  %s10081_s2 = sshra.s32 %s522_s0, 4  ;;  %s10082_s2 = int_to_ptr.hbm [resolvable:$true] %s10081_s2  ;;  %s548_s25 = int_to_ptr.hbm [resolvable:$true] %s547_s25 }
 0x11e   :  { %s10083_s27 = scalar_lea.hbm %s10082_s2, 32  ;;  %p10086_p1 = scmp.lt.s32.totalorder %s10082_s2, %s14185_s23 }
 0x11f   :  { %p10084_p0 = scmp.ne.s32.totalorder %s10082_s2, %s10083_s27  ;;  %p10087_p2 = scmp.lt.s32.totalorder %s10085_s19, %s10083_s27 }
 0x121   :  { %p10088_p3 = por %p10087_p2, %p10086_p1 }
 0x123   :  { %p10089_p4 = pnand %p10088_p3, %p10084_p0 }
 0x125   :  { %10092 = shalt.err (!%p10089_p4)
}
 0x126   :  { %s14187_s26 = sld [smem:[#allocation112_spill]]  ;;  %s10871_s11 = smov [#allocation49]  }
 0x127   :  { %529 = dma.hbm_to_vmem [thread:$0]  %s522_s0, 512, %s524_s14, [#allocation47], %s10849_s7, %s10849_s7, %s10850_s10  }
 0x128   :  { %s549_s15 = sshll.u32 %s10871_s11, 4  ;;  %s10105_s3 = sshra.s32 %s548_s25, 4  ;;  %s550_s15 = int_to_ptr.vmem [resolvable:$true] %s549_s15  ;;  %s10106_s3 = int_to_ptr.hbm [resolvable:$true] %s10105_s3 }
 0x129   :  { %s10107_s30 = scalar_lea.hbm %s10106_s3, 32  ;;  %s10109_s18 = scalar_lea.hbm %s14186_s8, 32 }
 0x12a   :  { %p10108_p5 = scmp.ne.s32.totalorder %s10106_s3, %s10107_s30  ;;  %p10110_p6 = scmp.lt.s32.totalorder %s10106_s3, %s14186_s8 }
 0x12b   :  { %p10111_p7 = scmp.lt.s32.totalorder %s10109_s18, %s10107_s30 }
 0x12c   :  { %s573_s29 = sshll.u32 %s14187_s26, 4  ;;  %s11308_s29 = int_to_ptr.hbm [resolvable:$true] %s573_s29 }
 0x12d   :  { %p10112_p8 = por %p10111_p7, %p10110_p6 }
 0x12f   :  { %p10113_p9 = pnand %p10112_p8, %p10108_p5 }
 0x131   :  { %10116 = shalt.err (!%p10113_p9)
}
 0x132   :  { %s14188_s22 = sld [smem:[#allocation114_spill]]  ;;  %s10872_s16 = smov [#allocation52]  }
 0x133   :  { %555 = dma.hbm_to_vmem [thread:$0]  %s548_s25, 512, %s550_s15, [#allocation50], %s10849_s7, %s10849_s7, %s10850_s10  }
 0x134   :  { %s575_s23 = sshll.u32 %s10872_s16, 4  ;;  %s10129_s0 = sshra.s32 %s11308_s29, 4  ;;  %s576_s23 = int_to_ptr.vmem [resolvable:$true] %s575_s23  ;;  %s10130_s0 = int_to_ptr.hbm [resolvable:$true] %s10129_s0 }
 0x135   :  { %s10131_s8 = scalar_lea.hbm %s10130_s0, 16  ;;  %s10133_s21 = scalar_lea.hbm %s14187_s26, 16 }
 0x136   :  { %p10132_p10 = scmp.ne.s32.totalorder %s10130_s0, %s10131_s8  ;;  %p10134_p11 = scmp.lt.s32.totalorder %s10130_s0, %s14187_s26 }
 0x137   :  { %p10135_p12 = scmp.lt.s32.totalorder %s10133_s21, %s10131_s8 }
 0x138   :  { %s599_s24 = sshll.u32 %s14188_s22, 4  ;;  %s11316_s24 = int_to_ptr.hbm [resolvable:$true] %s599_s24 }
 0x139   :  { %p10136_p13 = por %p10135_p12, %p10134_p11 }
 0x13b   :  { %p10137_p0 = pnand %p10136_p13, %p10132_p10 }
 0x13d   :  { %10140 = shalt.err (!%p10137_p0)
}
 0x13e   :  { %s14189_s14 = sld [smem:[#allocation117_spill]]  ;;  %s10873_s25 = smov [#allocation55]  }
 0x13f   :  { %581 = dma.hbm_to_vmem [thread:$0]  %s11308_s29, 256, %s576_s23, [#allocation53], %s10861_s12, %s10861_s12, %s10862_s28  }
 0x140   :  { %s601_s2 = sshll.u32 %s10873_s25, 4  ;;  %s10153_s19 = sshra.s32 %s11316_s24, 4  ;;  %s602_s2 = int_to_ptr.vmem [resolvable:$true] %s601_s2  ;;  %s10154_s19 = int_to_ptr.hbm [resolvable:$true] %s10153_s19 }
 0x141   :  { %s10155_s26 = scalar_lea.hbm %s10154_s19, 48  ;;  %s10157_s11 = scalar_lea.hbm %s14188_s22, 48 }
 0x142   :  { %p10156_p1 = scmp.ne.s32.totalorder %s10154_s19, %s10155_s26  ;;  %p10158_p2 = scmp.lt.s32.totalorder %s10154_s19, %s14188_s22 }
 0x143   :  { %p10159_p3 = scmp.lt.s32.totalorder %s10157_s11, %s10155_s26 }
 0x144   :  { %s627_s27 = sshll.u32 %s14189_s14, 4  ;;  %s11326_s27 = int_to_ptr.hbm [resolvable:$true] %s627_s27 }
 0x145   :  { %p10160_p4 = por %p10159_p3, %p10158_p2 }
 0x147   :  { %p10161_p5 = pnand %p10160_p4, %p10156_p1 }
 0x149   :  { %10164 = shalt.err (!%p10161_p5)
}
 0x14a   :  { %s14190_s15 = sld [smem:[#allocation119_spill]]  ;;  %s10874_s3 = smov [#allocation58]  }
 0x14b   :  { %607 = dma.hbm_to_vmem [thread:$0]  %s11316_s24, 768, %s602_s2, [#allocation56], %s10865_s13, %s10865_s13, %s10866_s5  }
 0x14c   :  { %s629_s30 = sshll.u32 %s10874_s3, 4  ;;  %s10177_s18 = sshra.s32 %s11326_s27, 4  ;;  %s630_s30 = int_to_ptr.vmem [resolvable:$true] %s629_s30  ;;  %s10178_s18 = int_to_ptr.hbm [resolvable:$true] %s10177_s18 }
 0x14d   :  { %s10179_s22 = scalar_lea.hbm %s10178_s18, 32  ;;  %s10181_s16 = scalar_lea.hbm %s14189_s14, 32 }
 0x14e   :  { %p10180_p6 = scmp.ne.s32.totalorder %s10178_s18, %s10179_s22  ;;  %p10182_p7 = scmp.lt.s32.totalorder %s10178_s18, %s14189_s14 }
 0x14f   :  { %p10183_p8 = scmp.lt.s32.totalorder %s10181_s16, %s10179_s22 }
 0x150   :  { %s653_s29 = sshll.u32 %s14190_s15, 4  ;;  %s11336_s29 = int_to_ptr.hbm [resolvable:$true] %s653_s29 }
 0x151   :  { %p10184_p9 = por %p10183_p8, %p10182_p7 }
 0x153   :  { %p10185_p10 = pnand %p10184_p9, %p10180_p6 }
 0x155   :  { %10188 = shalt.err (!%p10185_p10)
}
 0x156   :  { %s14191_s24 = sld [smem:[#allocation89_spill]]  ;;  %s10875_s23 = smov [#allocation61]  }
 0x157   :  { %635 = dma.hbm_to_vmem [thread:$0]  %s11326_s27, 512, %s630_s30, [#allocation59], %s10849_s7, %s10849_s7, %s10850_s10  }
 0x158   :  { %s655_s0 = sshll.u32 %s10875_s23, 4  ;;  %s10201_s21 = sshra.s32 %s11336_s29, 4  ;;  %s656_s0 = int_to_ptr.vmem [resolvable:$true] %s655_s0  ;;  %s10202_s21 = int_to_ptr.hbm [resolvable:$true] %s10201_s21 }
 0x159   :  { %s10203_s14 = scalar_lea.hbm %s10202_s21, 16  ;;  %s10205_s25 = scalar_lea.hbm %s14190_s15, 16 }
 0x15a   :  { %p10204_p11 = scmp.ne.s32.totalorder %s10202_s21, %s10203_s14  ;;  %p10206_p12 = scmp.lt.s32.totalorder %s10202_s21, %s14190_s15 }
 0x15b   :  { %p10207_p13 = scmp.lt.s32.totalorder %s10205_s25, %s10203_s14 }
 0x15c   :  { %s136_s8 = sshll.u32 %s14191_s24, 4  ;;  %s11346_s8 = int_to_ptr.hbm [resolvable:$true] %s136_s8 }
 0x15d   :  { %p10208_p0 = por %p10207_p13, %p10206_p12 }
 0x15f   :  { %p10209_p1 = pnand %p10208_p0, %p10204_p11 }
 0x161   :  { %10212 = shalt.err (!%p10209_p1)
}
 0x162   :  { %s14192_s2 = sld [smem:[#allocation90_spill]]  ;;  %s10876_s19 = smov [#allocation2]  }
 0x163   :  { %661 = dma.hbm_to_vmem [thread:$0]  %s11336_s29, 256, %s656_s0, [#allocation62], %s10861_s12, %s10861_s12, %s10862_s28  }
 0x164   :  { %s138_s26 = sshll.u32 %s10876_s19, 4  ;;  %s10225_s11 = sshra.s32 %s11346_s8, 4  ;;  %s139_s26 = int_to_ptr.vmem [resolvable:$true] %s138_s26  ;;  %s10226_s11 = int_to_ptr.hbm [resolvable:$true] %s10225_s11 }
 0x165   :  { %s10227_s15 = scalar_lea.hbm %s10226_s11, 16  ;;  %s10229_s3 = scalar_lea.hbm %s14191_s24, 16 }
 0x166   :  { %p10228_p2 = scmp.ne.s32.totalorder %s10226_s11, %s10227_s15  ;;  %p10230_p3 = scmp.lt.s32.totalorder %s10226_s11, %s14191_s24 }
 0x167   :  { %p10231_p4 = scmp.lt.s32.totalorder %s10229_s3, %s10227_s15 }
 0x168   :  { %s162_s27 = sshll.u32 %s14192_s2, 4  ;;  %s11356_s27 = int_to_ptr.hbm [resolvable:$true] %s162_s27 }
 0x169   :  { %p10232_p5 = por %p10231_p4, %p10230_p3 }
 0x16b   :  { %p10233_p6 = pnand %p10232_p5, %p10228_p2 }
 0x16d   :  { %10236 = shalt.err (!%p10233_p6)
}
 0x16e   :  { %s14193_s29 = sld [smem:[#allocation91_spill]]  ;;  %s10877_s30 = smov [#allocation6]  }
 0x16f   :  { %144 = dma.hbm_to_vmem [thread:$0]  %s11346_s8, 256, %s139_s26, [#allocation3], %s10861_s12, %s10861_s12, %s10862_s28  }
 0x170   :  { %s164_s18 = sshll.u32 %s10877_s30, 4  ;;  %s10249_s16 = sshra.s32 %s11356_s27, 4  ;;  %s165_s18 = int_to_ptr.vmem [resolvable:$true] %s164_s18  ;;  %s10250_s16 = int_to_ptr.hbm [resolvable:$true] %s10249_s16 }
 0x171   :  { %s10251_s24 = scalar_lea.hbm %s10250_s16, 16  ;;  %s10253_s23 = scalar_lea.hbm %s14192_s2, 16 }
 0x172   :  { %p10252_p7 = scmp.ne.s32.totalorder %s10250_s16, %s10251_s24  ;;  %p10254_p8 = scmp.lt.s32.totalorder %s10250_s16, %s14192_s2 }
 0x173   :  { %p10255_p9 = scmp.lt.s32.totalorder %s10253_s23, %s10251_s24 }
 0x174   :  { %s188_s22 = sshll.u32 %s14193_s29, 4  ;;  %s11366_s22 = int_to_ptr.hbm [resolvable:$true] %s188_s22 }
 0x175   :  { %p10256_p10 = por %p10255_p9, %p10254_p8 }
 0x177   :  { %p10257_p11 = pnand %p10256_p10, %p10252_p7 }
 0x179   :  { %10260 = shalt.err (!%p10257_p11)
}
 0x17a   :  { %s14194_s0 = sld [smem:[#allocation92_spill]]  ;;  %s10878_s21 = smov [#allocation9]  }
 0x17b   :  { %170 = dma.hbm_to_vmem [thread:$0]  %s11356_s27, 256, %s165_s18, [#allocation5], %s10861_s12, %s10861_s12, %s10862_s28  }
 0x17c   :  { %s190_s14 = sshll.u32 %s10878_s21, 4  ;;  %s10273_s25 = sshra.s32 %s11366_s22, 4  ;;  %s191_s14 = int_to_ptr.vmem [resolvable:$true] %s190_s14  ;;  %s10274_s25 = int_to_ptr.hbm [resolvable:$true] %s10273_s25 }
 0x17d   :  { %s10275_s2 = scalar_lea.hbm %s10274_s25, 16  ;;  %s10277_s19 = scalar_lea.hbm %s14193_s29, 16 }
 0x17e   :  { %p10276_p12 = scmp.ne.s32.totalorder %s10274_s25, %s10275_s2  ;;  %p10278_p13 = scmp.lt.s32.totalorder %s10274_s25, %s14193_s29 }
 0x17f   :  { %p10279_p0 = scmp.lt.s32.totalorder %s10277_s19, %s10275_s2 }
 0x180   :  { %s214_s8 = sshll.u32 %s14194_s0, 4  ;;  %s11376_s8 = int_to_ptr.hbm [resolvable:$true] %s214_s8 }
 0x181   :  { %p10280_p1 = por %p10279_p0, %p10278_p13 }
 0x183   :  { %p10281_p2 = pnand %p10280_p1, %p10276_p12 }
 0x185   :  { %10284 = shalt.err (!%p10281_p2)
}
 0x186   :  { %s14195_s27 = sld [smem:[#allocation93_spill]]  ;;  %s10879_s26 = smov [#allocation12]  }
 0x187   :  { %196 = dma.hbm_to_vmem [thread:$0]  %s11366_s22, 256, %s191_s14, [#allocation8], %s10861_s12, %s10861_s12, %s10862_s28  }
 0x188   :  { %s216_s11 = sshll.u32 %s10879_s26, 4  ;;  %s10297_s3 = sshra.s32 %s11376_s8, 4  ;;  %s217_s11 = int_to_ptr.vmem [resolvable:$true] %s216_s11  ;;  %s10298_s3 = int_to_ptr.hbm [resolvable:$true] %s10297_s3 }
 0x189   :  { %s10299_s29 = scalar_lea.hbm %s10298_s3, 32  ;;  %s10301_s30 = scalar_lea.hbm %s14194_s0, 32 }
 0x18a   :  { %p10300_p3 = scmp.ne.s32.totalorder %s10298_s3, %s10299_s29  ;;  %p10302_p4 = scmp.lt.s32.totalorder %s10298_s3, %s14194_s0 }
 0x18b   :  { %p10303_p5 = scmp.lt.s32.totalorder %s10301_s30, %s10299_s29 }
 0x18c   :  { %s240_s15 = sshll.u32 %s14195_s27, 4  ;;  %s11386_s15 = int_to_ptr.hbm [resolvable:$true] %s240_s15 }
 0x18d   :  { %p10304_p6 = por %p10303_p5, %p10302_p4 }
 0x18f   :  { %p10305_p7 = pnand %p10304_p6, %p10300_p3 }
 0x191   :  { %10308 = shalt.err (!%p10305_p7)
}
 0x192   :  { %s14196_s18 = sld [smem:[#allocation94_spill]]  ;;  %s10880_s16 = smov [#allocation15]  }
 0x193   :  { %222 = dma.hbm_to_vmem [thread:$0]  %s11376_s8, 512, %s217_s11, [#allocation11], %s10861_s12, %s10861_s12, %s10862_s28  }
 0x194   :  { %s242_s24 = sshll.u32 %s10880_s16, 4  ;;  %s10321_s23 = sshra.s32 %s11386_s15, 4  ;;  %s243_s24 = int_to_ptr.vmem [resolvable:$true] %s242_s24  ;;  %s10322_s23 = int_to_ptr.hbm [resolvable:$true] %s10321_s23 }
 0x195   :  { %s10323_s0 = scalar_lea.hbm %s10322_s23, 32  ;;  %s10325_s21 = scalar_lea.hbm %s14195_s27, 32 }
 0x196   :  { %p10324_p8 = scmp.ne.s32.totalorder %s10322_s23, %s10323_s0  ;;  %p10326_p9 = scmp.lt.s32.totalorder %s10322_s23, %s14195_s27 }
 0x197   :  { %p10327_p10 = scmp.lt.s32.totalorder %s10325_s21, %s10323_s0 }
 0x198   :  { %s266_s22 = sshll.u32 %s14196_s18, 4  ;;  %s11396_s22 = int_to_ptr.hbm [resolvable:$true] %s266_s22 }
 0x199   :  { %p10328_p11 = por %p10327_p10, %p10326_p9 }
 0x19b   :  { %p10329_p12 = pnand %p10328_p11, %p10324_p8 }
 0x19d   :  { %10332 = shalt.err (!%p10329_p12)
}
 0x19e   :  { %s14197_s8 = sld [smem:[#allocation95_spill]]  ;;  %s10881_s14 = smov [#allocation18]  }
 0x19f   :  { %248 = dma.hbm_to_vmem [thread:$0]  %s11386_s15, 512, %s243_s24, [#allocation14], %s10861_s12, %s10861_s12, %s10862_s28  }
 0x1a0   :  { %s268_s25 = sshll.u32 %s10881_s14, 4  ;;  %s10345_s19 = sshra.s32 %s11396_s22, 4  ;;  %s269_s25 = int_to_ptr.vmem [resolvable:$true] %s268_s25  ;;  %s10346_s19 = int_to_ptr.hbm [resolvable:$true] %s10345_s19 }
 0x1a1   :  { %s10347_s27 = scalar_lea.hbm %s10346_s19, 64  ;;  %s10349_s26 = scalar_lea.hbm %s14196_s18, 64 }
 0x1a2   :  { %p10348_p13 = scmp.ne.s32.totalorder %s10346_s19, %s10347_s27  ;;  %p10350_p0 = scmp.lt.s32.totalorder %s10346_s19, %s14196_s18 }
 0x1a3   :  { %p10351_p1 = scmp.lt.s32.totalorder %s10349_s26, %s10347_s27 }
 0x1a4   :  { %s292_s2 = sshll.u32 %s14197_s8, 4  ;;  %s11406_s2 = int_to_ptr.hbm [resolvable:$true] %s292_s2 }
 0x1a5   :  { %p10352_p2 = por %p10351_p1, %p10350_p0 }
 0x1a7   :  { %p10353_p3 = pnand %p10352_p2, %p10348_p13 }
 0x1a9   :  { %10356 = shalt.err (!%p10353_p3)
}
 0x1aa   :  { %s14198_s11 = sld [smem:[#allocation96_spill]]  ;;  %s10882_s3 = smov [#allocation21]  }
 0x1ab   :  { %274 = dma.hbm_to_vmem [thread:$0]  %s11396_s22, 1024, %s269_s25, [#allocation17], %s10861_s12, %s10861_s12, %s10862_s28  }
 0x1ac   :  { %s294_s29 = sshll.u32 %s10882_s3, 4  ;;  %s10369_s30 = sshra.s32 %s11406_s2, 4  ;;  %s295_s29 = int_to_ptr.vmem [resolvable:$true] %s294_s29  ;;  %s10370_s30 = int_to_ptr.hbm [resolvable:$true] %s10369_s30 }
 0x1ad   :  { %s10371_s18 = scalar_lea.hbm %s10370_s30, 64  ;;  %s10373_s16 = scalar_lea.hbm %s14197_s8, 64 }
 0x1ae   :  { %p10372_p4 = scmp.ne.s32.totalorder %s10370_s30, %s10371_s18  ;;  %p10374_p5 = scmp.lt.s32.totalorder %s10370_s30, %s14197_s8 }
 0x1af   :  { %p10375_p6 = scmp.lt.s32.totalorder %s10373_s16, %s10371_s18 }
 0x1b0   :  { %s318_s15 = sshll.u32 %s14198_s11, 4  ;;  %s11416_s15 = int_to_ptr.hbm [resolvable:$true] %s318_s15 }
 0x1b1   :  { %p10376_p7 = por %p10375_p6, %p10374_p5 }
 0x1b3   :  { %p10377_p8 = pnand %p10376_p7, %p10372_p4 }
 0x1b5   :  { %10380 = shalt.err (!%p10377_p8)
}
 0x1b6   :  { %s14199_s22 = sld [smem:[#allocation97_spill]]  ;;  %s10883_s24 = smov [#allocation24]  }
 0x1b7   :  { %300 = dma.hbm_to_vmem [thread:$0]  %s11406_s2, 1024, %s295_s29, [#allocation20], %s10861_s12, %s10861_s12, %s10862_s28  }
 0x1b8   :  { %s320_s23 = sshll.u32 %s10883_s24, 4  ;;  %s10393_s21 = sshra.s32 %s11416_s15, 4  ;;  %s321_s23 = int_to_ptr.vmem [resolvable:$true] %s320_s23  ;;  %s10394_s21 = int_to_ptr.hbm [resolvable:$true] %s10393_s21 }
 0x1b9   :  { %s10395_s8 = scalar_lea.hbm %s10394_s21, 256  ;;  %s10397_s14 = scalar_lea.hbm %s14198_s11, 256 }
 0x1ba   :  { %p10396_p9 = scmp.ne.s32.totalorder %s10394_s21, %s10395_s8  ;;  %p10398_p10 = scmp.lt.s32.totalorder %s10394_s21, %s14198_s11 }
 0x1bb   :  { %p10399_p11 = scmp.lt.s32.totalorder %s10397_s14, %s10395_s8 }
 0x1bc   :  { %s344_s0 = sshll.u32 %s14199_s22, 4  ;;  %s11426_s0 = int_to_ptr.hbm [resolvable:$true] %s344_s0 }
 0x1bd   :  { %p10400_p12 = por %p10399_p11, %p10398_p10 }
 0x1bf   :  { %p10401_p13 = pnand %p10400_p12, %p10396_p9 }
 0x1c1   :  { %10404 = shalt.err (!%p10401_p13)
}
 0x1c2   :  { %s14200_s25 = sld [smem:[#allocation98_spill]]  ;;  %s10884_s19 = smov [#allocation27]  }
 0x1c3   :  { %326 = dma.hbm_to_vmem [thread:$0]  %s11416_s15, 4096, %s321_s23, [#allocation23], %s10849_s7, %s10849_s7, %s10850_s10  }
 0x1c4   :  { %s346_s27 = sshll.u32 %s10884_s19, 4  ;;  %s10417_s26 = sshra.s32 %s11426_s0, 4  ;;  %s347_s27 = int_to_ptr.vmem [resolvable:$true] %s346_s27  ;;  %s10418_s26 = int_to_ptr.hbm [resolvable:$true] %s10417_s26 }
 0x1c5   :  { %s10419_s11 = scalar_lea.hbm %s10418_s26, 256  ;;  %s10421_s3 = scalar_lea.hbm %s14199_s22, 256 }
 0x1c6   :  { %p10420_p0 = scmp.ne.s32.totalorder %s10418_s26, %s10419_s11  ;;  %p10422_p1 = scmp.lt.s32.totalorder %s10418_s26, %s14199_s22 }
 0x1c7   :  { %p10423_p2 = scmp.lt.s32.totalorder %s10421_s3, %s10419_s11 }
 0x1c8   :  { %s370_s2 = sshll.u32 %s14200_s25, 4  ;;  %s11436_s2 = int_to_ptr.hbm [resolvable:$true] %s370_s2 }
 0x1c9   :  { %p10424_p3 = por %p10423_p2, %p10422_p1 }
 0x1cb   :  { %p10425_p4 = pnand %p10424_p3, %p10420_p0 }
 0x1cd   :  { %10428 = shalt.err (!%p10425_p4)
}
 0x1ce   :  { %s14201_s15 = sld [smem:[#allocation100_spill]]  ;;  %s10885_s29 = smov [#allocation30]  }
 0x1cf   :  { %352 = dma.hbm_to_vmem [thread:$0]  %s11426_s0, 4096, %s347_s27, [#allocation26], %s10849_s7, %s10849_s7, %s10850_s10  }
 0x1d0   :  { %s372_s30 = sshll.u32 %s10885_s29, 4  ;;  %s10441_s16 = sshra.s32 %s11436_s2, 4  ;;  %s373_s30 = int_to_ptr.vmem [resolvable:$true] %s372_s30  ;;  %s10442_s16 = int_to_ptr.hbm [resolvable:$true] %s10441_s16 }
 0x1d1   :  { %s10443_s22 = scalar_lea.hbm %s10442_s16, 32  ;;  %s10445_s24 = scalar_lea.hbm %s14200_s25, 32 }
 0x1d2   :  { %p10444_p5 = scmp.ne.s32.totalorder %s10442_s16, %s10443_s22  ;;  %p10446_p6 = scmp.lt.s32.totalorder %s10442_s16, %s14200_s25 }
 0x1d3   :  { %p10447_p7 = scmp.lt.s32.totalorder %s10445_s24, %s10443_s22 }
 0x1d4   :  { %s398_s18 = sshll.u32 %s14201_s15, 4  ;;  %s11446_s18 = int_to_ptr.hbm [resolvable:$true] %s398_s18 }
 0x1d5   :  { %p10448_p8 = por %p10447_p7, %p10446_p6 }
 0x1d7   :  { %p10449_p9 = pnand %p10448_p8, %p10444_p5 }
 0x1d9   :  { %10452 = shalt.err (!%p10449_p9)
}
 0x1da   :  { %s14202_s23 = sld [smem:[#allocation104_spill]]  ;;  %s10886_s21 = smov [#allocation33]  }
 0x1db   :  { %378 = dma.hbm_to_vmem [thread:$0]  %s11436_s2, 512, %s373_s30, [#allocation29], %s10861_s12, %s10861_s12, %s10862_s28  }
 0x1dc   :  { %s400_s8 = sshll.u32 %s10886_s21, 4  ;;  %s10465_s14 = sshra.s32 %s11446_s18, 4  ;;  %s401_s8 = int_to_ptr.vmem [resolvable:$true] %s400_s8  ;;  %s10466_s14 = int_to_ptr.hbm [resolvable:$true] %s10465_s14 }
 0x1dd   :  { %s10467_s25 = scalar_lea.hbm %s10466_s14, 128  ;;  %s10469_s19 = scalar_lea.hbm %s14201_s15, 128 }
 0x1de   :  { %p10468_p10 = scmp.ne.s32.totalorder %s10466_s14, %s10467_s25  ;;  %p10470_p11 = scmp.lt.s32.totalorder %s10466_s14, %s14201_s15 }
 0x1df   :  { %p10471_p12 = scmp.lt.s32.totalorder %s10469_s19, %s10467_s25 }
 0x1e0   :  { %s430_s0 = sshll.u32 %s14202_s23, 4  ;;  %s11456_s0 = int_to_ptr.hbm [resolvable:$true] %s430_s0 }
 0x1e1   :  { %p10472_p13 = por %p10471_p12, %p10470_p11 }
 0x1e3   :  { %p10473_p0 = pnand %p10472_p13, %p10468_p10 }
 0x1e5   :  { %10476 = shalt.err (!%p10473_p0)
}
 0x1e6   :  { %s14203_s2 = sld [smem:[#allocation105_spill]]  ;;  %s10887_s27 = smov [#allocation36]  }
 0x1e7   :  { %406 = dma.hbm_to_vmem [thread:$0]  %s11446_s18, 2048, %s401_s8, [#allocation32], %s10849_s7, %s10849_s7, %s10850_s10  }
 0x1e8   :  { %s432_s26 = sshll.u32 %s10887_s27, 4  ;;  %s10489_s3 = sshra.s32 %s11456_s0, 4  ;;  %s433_s26 = int_to_ptr.vmem [resolvable:$true] %s432_s26  ;;  %s10490_s3 = int_to_ptr.hbm [resolvable:$true] %s10489_s3 }
 0x1e9   :  { %s10491_s15 = scalar_lea.hbm %s10490_s3, 16  ;;  %s10493_s29 = scalar_lea.hbm %s14202_s23, 16 }
 0x1ea   :  { %p10492_p1 = scmp.ne.s32.totalorder %s10490_s3, %s10491_s15  ;;  %p10494_p2 = scmp.lt.s32.totalorder %s10490_s3, %s14202_s23 }
 0x1eb   :  { %p10495_p3 = scmp.lt.s32.totalorder %s10493_s29, %s10491_s15 }
 0x1ec   :  { %s456_s11 = sshll.u32 %s14203_s2, 4  ;;  %s11466_s11 = int_to_ptr.hbm [resolvable:$true] %s456_s11 }
 0x1ed   :  { %p10496_p4 = por %p10495_p3, %p10494_p2 }
 0x1ef   :  { %p10497_p5 = pnand %p10496_p4, %p10492_p1 }
 0x1f1   :  { %10500 = shalt.err (!%p10497_p5)
}
 0x1f2   :  { %s14204_s30 = sld [smem:[#allocation106_spill]]  ;;  %s10888_s16 = smov [#allocation39]  }
 0x1f3   :  { %438 = dma.hbm_to_vmem [thread:$0]  %s11456_s0, 256, %s433_s26, [#allocation35], %s10861_s12, %s10861_s12, %s10862_s28  }
 0x1f4   :  { %s458_s22 = sshll.u32 %s10888_s16, 4  ;;  %s10513_s24 = sshra.s32 %s11466_s11, 4  ;;  %s459_s22 = int_to_ptr.vmem [resolvable:$true] %s458_s22  ;;  %s10514_s24 = int_to_ptr.hbm [resolvable:$true] %s10513_s24 }
 0x1f5   :  { %s10515_s23 = scalar_lea.hbm %s10514_s24, 32  ;;  %s10517_s21 = scalar_lea.hbm %s14203_s2, 32 }
 0x1f6   :  { %p10516_p6 = scmp.ne.s32.totalorder %s10514_s24, %s10515_s23  ;;  %p10518_p7 = scmp.lt.s32.totalorder %s10514_s24, %s14203_s2 }
 0x1f7   :  { %p10519_p8 = scmp.lt.s32.totalorder %s10517_s21, %s10515_s23 }
 0x1f8   :  { %s482_s18 = sshll.u32 %s14204_s30, 4  ;;  %s11476_s18 = int_to_ptr.hbm [resolvable:$true] %s482_s18 }
 0x1f9   :  { %p10520_p9 = por %p10519_p8, %p10518_p7 }
 0x1fb   :  { %p10521_p10 = pnand %p10520_p9, %p10516_p6 }
 0x1fd   :  { %10524 = shalt.err (!%p10521_p10)
}
 0x1fe   :  { %s14205_s0 = sld [smem:[#allocation107_spill]]  ;;  %s10889_s8 = smov [#allocation42]  }
 0x1ff   :  { %464 = dma.hbm_to_vmem [thread:$0]  %s11466_s11, 512, %s459_s22, [#allocation38], %s10849_s7, %s10849_s7, %s10850_s10  }
 0x200   :  { %s484_s14 = sshll.u32 %s10889_s8, 4  ;;  %s10537_s19 = sshra.s32 %s11476_s18, 4  ;;  %s485_s14 = int_to_ptr.vmem [resolvable:$true] %s484_s14  ;;  %s10538_s19 = int_to_ptr.hbm [resolvable:$true] %s10537_s19 }
 0x201   :  { %s10539_s2 = scalar_lea.hbm %s10538_s19, 32  ;;  %s10541_s27 = scalar_lea.hbm %s14204_s30, 32 }
 0x202   :  { %p10540_p11 = scmp.ne.s32.totalorder %s10538_s19, %s10539_s2  ;;  %p10542_p12 = scmp.lt.s32.totalorder %s10538_s19, %s14204_s30 }
 0x203   :  { %p10543_p13 = scmp.lt.s32.totalorder %s10541_s27, %s10539_s2 }
 0x204   :  { %s508_s25 = sshll.u32 %s14205_s0, 4  ;;  %s11486_s25 = int_to_ptr.hbm [resolvable:$true] %s508_s25 }
 0x205   :  { %p10544_p0 = por %p10543_p13, %p10542_p12 }
 0x207   :  { %p10545_p1 = pnand %p10544_p0, %p10540_p11 }
 0x209   :  { %10548 = shalt.err (!%p10545_p1)
}
 0x20a   :  { %s14206_s26 = sld [smem:[#allocation109_spill]]  ;;  %s10890_s3 = smov [#allocation45]  }
 0x20b   :  { %490 = dma.hbm_to_vmem [thread:$0]  %s11476_s18, 512, %s485_s14, [#allocation41], %s10849_s7, %s10849_s7, %s10850_s10  }
 0x20c   :  { %s510_s15 = sshll.u32 %s10890_s3, 4  ;;  %s10561_s29 = sshra.s32 %s11486_s25, 4  ;;  %s511_s15 = int_to_ptr.vmem [resolvable:$true] %s510_s15  ;;  %s10562_s29 = int_to_ptr.hbm [resolvable:$true] %s10561_s29 }
 0x20d   :  { %s10563_s30 = scalar_lea.hbm %s10562_s29, 16  ;;  %s10565_s16 = scalar_lea.hbm %s14205_s0, 16 }
 0x20e   :  { %p10564_p2 = scmp.ne.s32.totalorder %s10562_s29, %s10563_s30  ;;  %p10566_p3 = scmp.lt.s32.totalorder %s10562_s29, %s14205_s0 }
 0x20f   :  { %p10567_p4 = scmp.lt.s32.totalorder %s10565_s16, %s10563_s30 }
 0x210   :  { %s534_s11 = sshll.u32 %s14206_s26, 4  ;;  %s11496_s11 = int_to_ptr.hbm [resolvable:$true] %s534_s11 }
 0x211   :  { %p10568_p5 = por %p10567_p4, %p10566_p3 }
 0x213   :  { %p10569_p6 = pnand %p10568_p5, %p10564_p2 }
 0x215   :  { %10572 = shalt.err (!%p10569_p6)
}
 0x216   :  { %s14207_s18 = sld [smem:[#allocation111_spill]]  ;;  %s10891_s22 = smov [#allocation48]  }
 0x217   :  { %516 = dma.hbm_to_vmem [thread:$0]  %s11486_s25, 256, %s511_s15, [#allocation44], %s10861_s12, %s10861_s12, %s10862_s28  }
 0x218   :  { %s536_s24 = sshll.u32 %s10891_s22, 4  ;;  %s10585_s21 = sshra.s32 %s11496_s11, 4  ;;  %s537_s24 = int_to_ptr.vmem [resolvable:$true] %s536_s24  ;;  %s10586_s21 = int_to_ptr.hbm [resolvable:$true] %s10585_s21 }
 0x219   :  { %s10587_s0 = scalar_lea.hbm %s10586_s21, 48  ;;  %s10589_s8 = scalar_lea.hbm %s14206_s26, 48 }
 0x21a   :  { %p10588_p7 = scmp.ne.s32.totalorder %s10586_s21, %s10587_s0  ;;  %p10590_p8 = scmp.lt.s32.totalorder %s10586_s21, %s14206_s26 }
 0x21b   :  { %p10591_p9 = scmp.lt.s32.totalorder %s10589_s8, %s10587_s0 }
 0x21c   :  { %s560_s23 = sshll.u32 %s14207_s18, 4  ;;  %s11506_s23 = int_to_ptr.hbm [resolvable:$true] %s560_s23 }
 0x21d   :  { %p10592_p10 = por %p10591_p9, %p10590_p8 }
 0x21f   :  { %p10593_p11 = pnand %p10592_p10, %p10588_p7 }
 0x221   :  { %10596 = shalt.err (!%p10593_p11)
}
 0x222   :  { %s14208_s14 = sld [smem:[#allocation113_spill]]  ;;  %s10892_s19 = smov [#allocation51]  }
 0x223   :  { %542 = dma.hbm_to_vmem [thread:$0]  %s11496_s11, 768, %s537_s24, [#allocation47], %s10865_s13, %s10865_s13, %s10866_s5  }
 0x224   :  { %s562_s2 = sshll.u32 %s10892_s19, 4  ;;  %s10609_s27 = sshra.s32 %s11506_s23, 4  ;;  %s563_s2 = int_to_ptr.vmem [resolvable:$true] %s562_s2  ;;  %s10610_s27 = int_to_ptr.hbm [resolvable:$true] %s10609_s27 }
 0x225   :  { %s10611_s26 = scalar_lea.hbm %s10610_s27, 9  ;;  %s10613_s3 = scalar_lea.hbm %s14207_s18, 9 }
 0x226   :  { %p10612_p12 = scmp.ne.s32.totalorder %s10610_s27, %s10611_s26  ;;  %p10614_p13 = scmp.lt.s32.totalorder %s10610_s27, %s14207_s18 }
 0x227   :  { %p10615_p0 = scmp.lt.s32.totalorder %s10613_s3, %s10611_s26 }
 0x228   :  { %s586_s25 = sshll.u32 %s14208_s14, 4  ;;  %s11516_s25 = int_to_ptr.hbm [resolvable:$true] %s586_s25 }
 0x229   :  { %p10616_p1 = por %p10615_p0, %p10614_p13 }
 0x22b   :  { %p10617_p2 = pnand %p10616_p1, %p10612_p12 }
 0x22d   :  { %10620 = shalt.err (!%p10617_p2)
}
 0x22e   :  { %s14209_s13 = sld [smem:[#allocation115_spill]]  ;;  %s10893_s5 = smov [#allocation54]  }
 0x22f   :  { %568 = dma.hbm_to_vmem [thread:$0]  %s11506_s23, 144, %s563_s2, [#allocation50], %s10868_s6, %s10868_s6, %s10869_s1  }
 0x230   :  { %s588_s11 = sshll.u32 %s10893_s5, 4  ;;  %s10633_s29 = sshra.s32 %s11516_s25, 4  ;;  %s589_s11 = int_to_ptr.vmem [resolvable:$true] %s588_s11  ;;  %s10634_s29 = int_to_ptr.hbm [resolvable:$true] %s10633_s29 }
 0x231   :  { %s10635_s30 = scalar_lea.hbm %s10634_s29, 32  ;;  %s10637_s16 = scalar_lea.hbm %s14208_s14, 32 }
 0x232   :  { %p10636_p3 = scmp.ne.s32.totalorder %s10634_s29, %s10635_s30  ;;  %p10638_p4 = scmp.lt.s32.totalorder %s10634_s29, %s14208_s14 }
 0x233   :  { %p10639_p5 = scmp.lt.s32.totalorder %s10637_s16, %s10635_s30 }
 0x234   :  { %s612_s15 = sshll.u32 %s14209_s13, 4  ;;  %s11526_s15 = int_to_ptr.hbm [resolvable:$true] %s612_s15 }
 0x235   :  { %p10640_p6 = por %p10639_p5, %p10638_p4 }
 0x237   :  { %p10641_p7 = pnand %p10640_p6, %p10636_p3 }
 0x239   :  { %10644 = shalt.err (!%p10641_p7)
}
 0x23a   :  { %s14210_s6 = sld [smem:[#allocation118_spill]]  ;;  %s10894_s22 = smov [#allocation57]  }
 0x23b   :  { %594 = dma.hbm_to_vmem [thread:$0]  %s11516_s25, 512, %s589_s11, [#allocation53], %s10849_s7, %s10849_s7, %s10850_s10  }
 0x23c   :  { %s614_s24 = sshll.u32 %s10894_s22, 4  ;;  %s10657_s23 = sshra.s32 %s11526_s15, 4  ;;  %s615_s24 = int_to_ptr.vmem [resolvable:$true] %s614_s24  ;;  %s10658_s23 = int_to_ptr.hbm [resolvable:$true] %s10657_s23 }
 0x23d   :  { %s10659_s21 = scalar_lea.hbm %s10658_s23, 32  ;;  %s10661_s0 = scalar_lea.hbm %s14209_s13, 32 }
 0x23e   :  { %p10660_p8 = scmp.ne.s32.totalorder %s10658_s23, %s10659_s21  ;;  %p10662_p9 = scmp.lt.s32.totalorder %s10658_s23, %s14209_s13 }
 0x23f   :  { %p10663_p10 = scmp.lt.s32.totalorder %s10661_s0, %s10659_s21 }
 0x240   :  { %s640_s18 = sshll.u32 %s14210_s6, 4  ;;  %s11536_s18 = int_to_ptr.hbm [resolvable:$true] %s640_s18 }
 0x241   :  { %p10664_p11 = por %p10663_p10, %p10662_p9 }
 0x243   :  { %p10665_p12 = pnand %p10664_p11, %p10660_p8 }
 0x245   :  { %10668 = shalt.err (!%p10665_p12)
}
 0x246   :  { %s14211_s8 = sld [smem:[#allocation121_spill]]  ;;  %s10895_s14 = smov [#allocation60]  }
 0x247   :  { %620 = dma.hbm_to_vmem [thread:$0]  %s11526_s15, 512, %s615_s24, [#allocation56], %s10849_s7, %s10849_s7, %s10850_s10  }
 0x248   :  { %s642_s25 = sshll.u32 %s10895_s14, 4  ;;  %s10681_s2 = sshra.s32 %s11536_s18, 4  ;;  %s643_s25 = int_to_ptr.vmem [resolvable:$true] %s642_s25  ;;  %s10682_s2 = int_to_ptr.hbm [resolvable:$true] %s10681_s2 }
 0x249   :  { %s10683_s27 = scalar_lea.hbm %s10682_s2, 32  ;;  %s10685_s26 = scalar_lea.hbm %s14210_s6, 32 }
 0x24a   :  { %p10684_p13 = scmp.ne.s32.totalorder %s10682_s2, %s10683_s27  ;;  %p10686_p0 = scmp.lt.s32.totalorder %s10682_s2, %s14210_s6 }
 0x24b   :  { %p10687_p1 = scmp.lt.s32.totalorder %s10685_s26, %s10683_s27 }
 0x24c   :  { %s668_s19 = sshll.u32 %s14211_s8, 4  ;;  %s11546_s19 = int_to_ptr.hbm [resolvable:$true] %s668_s19 }
 0x24d   :  { %p10688_p2 = por %p10687_p1, %p10686_p0 }
 0x24f   :  { %p10689_p3 = pnand %p10688_p2, %p10684_p13 }
 0x251   :  { %10692 = shalt.err (!%p10689_p3)
}
 0x252   :  { %648 = dma.hbm_to_vmem [thread:$0]  %s11536_s18, 512, %s643_s25, [#allocation59], %s10849_s7, %s10849_s7, %s10850_s10  }
 0x253   :  { %s684_s3 = sshll.u32 %s11168_s4, 4  ;;  %s10896_s13 = smov [#allocation63]   ;;  %s685_s3 = int_to_ptr.hbm [resolvable:$true] %s684_s3 }
 0x254   :  { %s670_s5 = sshll.u32 %s10896_s13, 4  ;;  %s10705_s11 = sshra.s32 %s11546_s19, 4  ;;  %s671_s5 = int_to_ptr.vmem [resolvable:$true] %s670_s5  ;;  %s10706_s11 = int_to_ptr.hbm [resolvable:$true] %s10705_s11 }
 0x255   :  { %s10707_s15 = scalar_lea.hbm %s10706_s11, 16  ;;  %s10709_s29 = scalar_lea.hbm %s14211_s8, 16 }
 0x256   :  { %p10708_p4 = scmp.ne.s32.totalorder %s10706_s11, %s10707_s15  ;;  %p10710_p5 = scmp.lt.s32.totalorder %s10706_s11, %s14211_s8 }
 0x257   :  { %p10711_p6 = scmp.lt.s32.totalorder %s10709_s29, %s10707_s15 }
 0x259   :  { %p10712_p7 = por %p10711_p6, %p10710_p5 }
 0x25b   :  { %p10713_p8 = pnand %p10712_p7, %p10708_p4 }
 0x25d   :  { %10716 = shalt.err (!%p10713_p8)
}
 0x25e   :  { %676 = dma.hbm_to_vmem [thread:$0]  %s11546_s19, 256, %s671_s5, [#allocation62], %s10861_s12, %s10861_s12, %s10862_s28  }
 0x25f   :  { %s10897_s7 = smov [#allocation64]   ;;  %s10729_s16 = sshra.s32 %s685_s3, 4  ;;  %s10730_s16 = int_to_ptr.hbm [resolvable:$true] %s10729_s16 }
 0x260   :  { %s686_s30 = sshll.u32 %s10897_s7, 4  ;;  %s10731_s6 = scalar_lea.hbm %s10730_s16, 1  ;;  %s687_s30 = int_to_ptr.vmem [resolvable:$true] %s686_s30 }
 0x261   :  { %p10732_p9 = scmp.ne.s32.totalorder %s10730_s16, %s10731_s6  ;;  %s10733_s18 = scalar_lea.hbm %s11168_s4, 1 }
 0x262   :  { %p10734_p10 = scmp.lt.s32.totalorder %s10730_s16, %s11168_s4  ;;  %p10735_p11 = scmp.lt.s32.totalorder %s10733_s18, %s10731_s6 }
 0x264   :  { %p10736_p12 = por %p10735_p11, %p10734_p10 }
 0x266   :  { %p10737_p13 = pnand %p10736_p12, %p10732_p9 }
 0x268   :  { %10740 = shalt.err (!%p10737_p13)
}
 0x269   :  { %689 = dma.hbm_to_vmem [thread:$0]  %s685_s3, 16, %s687_s30, [#allocation65]  }
 0x26a   :  { %10753 = dma.done.wait [#allocation3], 256  }
 0x26b   :  { %10754 = vsyncadd [#allocation3], 4294967040 }
 0x26c   :  { %10755 = dma.done.wait [#allocation5], 768  }
 0x26d   :  { %10756 = vsyncadd [#allocation5], 4294966528 }
 0x26e   :  { %10757 = dma.done.wait [#allocation8], 768  }
 0x26f   :  { %10758 = vsyncadd [#allocation8], 4294966528 }
 0x270   :  { %10759 = dma.done.wait [#allocation11], 1024  }
 0x271   :  { %10760 = vsyncadd [#allocation11], 4294966272 }
 0x272   :  { %10761 = dma.done.wait [#allocation14], 1536  }
 0x273   :  { %10762 = vsyncadd [#allocation14], 4294965760 }
 0x274   :  { %10763 = dma.done.wait [#allocation17], 2048  }
 0x275   :  { %10764 = vsyncadd [#allocation17], 4294965248 }
 0x276   :  { %10765 = dma.done.wait [#allocation20], 3072  }
 0x277   :  { %10766 = vsyncadd [#allocation20], 4294964224 }
 0x278   :  { %10767 = dma.done.wait [#allocation23], 6144  }
 0x279   :  { %10768 = vsyncadd [#allocation23], 4294961152 }
 0x27a   :  { %10769 = dma.done.wait [#allocation26], 8192  }
 0x27b   :  { %10770 = vsyncadd [#allocation26], 4294959104 }
 0x27c   :  { %10771 = dma.done.wait [#allocation29], 4608  }
 0x27d   :  { %10772 = vsyncadd [#allocation29], 4294962688 }
 0x27e   :  { %10773 = dma.done.wait [#allocation32], 3072  }
 0x27f   :  { %10774 = vsyncadd [#allocation32], 4294964224 }
 0x280   :  { %10775 = dma.done.wait [#allocation35], 1280  }
 0x281   :  { %10776 = vsyncadd [#allocation35], 4294966016 }
 0x282   :  { %10777 = dma.done.wait [#allocation38], 768  }
 0x283   :  { %10778 = vsyncadd [#allocation38], 4294966528 }
 0x284   :  { %10779 = dma.done.wait [#allocation41], 1280  }
 0x285   :  { %10780 = vsyncadd [#allocation41], 4294966016 }
 0x286   :  { %10781 = dma.done.wait [#allocation44], 400  }
 0x287   :  { %10782 = vsyncadd [#allocation44], 4294966896 }
 0x288   :  { %10783 = dma.done.wait [#allocation47], 1280  }
 0x289   :  { %10784 = vsyncadd [#allocation47], 4294966016 }
 0x28a   :  { %10785 = dma.done.wait [#allocation50], 656  }
 0x28b   :  { %10786 = vsyncadd [#allocation50], 4294966640 }
 0x28c   :  { %10787 = dma.done.wait [#allocation53], 768  }
 0x28d   :  { %10788 = vsyncadd [#allocation53], 4294966528 }
 0x28e   :  { %10789 = dma.done.wait [#allocation56], 1280  }
 0x28f   :  { %10790 = vsyncadd [#allocation56], 4294966016 }
 0x290   :  { %10791 = dma.done.wait [#allocation59], 1024  }
 0x291   :  { %10792 = vsyncadd [#allocation59], 4294966272 }
 0x292   :  { %10793 = dma.done.wait [#allocation62], 512  }
 0x293   :  { %10794 = vsyncadd [#allocation62], 4294966784 }
 0x294   :  { %10795 = dma.done.wait [#allocation65], 16  }
 0x295   :  { %10796 = vsyncadd [#allocation65], 4294967280  ;;  %s14212_s4 = sld [smem:[#allocation88_spill]]  ;;  %v10898_v0 = vmov 0   ;;  %v944_v1 = vld [vmem:[#allocation7 + $0x10] sm:$0xff]  ;;  %v869_v2 = vld [vmem:[#allocation4 + $0x10] sm:$0xff] }
 0x296   :  { %9624 = vset.pattern.permute.xlu2 %v10898_v0  ;;  %9623 = vset.pattern.permute.xlu1 %v10898_v0  ;;  %v867_v3 = vld [vmem:[#allocation4] sm:$0xff]  ;;  %vm913_vm0 = vcmask 1045504   ;;  %v9245_v8 = vld [vmem:[#allocation2] sm:$0xff]  ;;  %vm906_vm1 = vcmask 97280   ;;  %v945_v9 = vld [vmem:[#allocation7 + $0x18] sm:$0xff]  ;;  %s14213_s12 = sld [smem:[#allocation101_spill]] }
 0x297   :  { %9622 = vset.pattern.permute.xlu0 %v10898_v0  ;;  %958 = vperm.xlu2 %9624, %v944_v1   ;;  %v870_v10 = vld [vmem:[#allocation4 + $0x18] sm:$0xff]  ;;  %v868_v11 = vld [vmem:[#allocation4 + $0x8] sm:$0xff]  ;;  %v1044_v12 = vld [vmem:[#allocation10] sm:$0xff]  ;;  %vm976_vm2 = vcmask 261120   ;;  %s14214_s22 = sld [smem:[#allocation103_spill]]  ;;  %vm1697_vm3 = vcmask 523264  }
 0x298   :  { %883 = vperm.xlu0 %9622, %v869_v2   ;;  %873 = vperm.xlu1 %9623, %v867_v3   ;;  %v942_v13 = vld [vmem:[#allocation7] sm:$0xff]  ;;  %v943_v14 = vld [vmem:[#allocation7 + $0x8] sm:$0xff]  ;;  %v1045_v17 = vld [vmem:[#allocation10 + $0x8] sm:$0xff]  ;;  %s14215_s24 = sld [smem:[#allocation99_spill]]  ;;  %vm3185_vm4 = vcmask 1043456   ;;  %vm3160_vm5 = vcmask 64512  }
 0x299   :  { %v9246_v15 = vld [vmem:[#allocation2 + $0x8] sm:$0xff]  ;;  %v1046_v18 = vld [vmem:[#allocation10 + $0x10] sm:$0xff]  ;;  %v1520_v19 = vld [vmem:[#allocation31 + $0x20] sm:$0xff]  ;;  %s14272_s23 = sld [smem:[#allocation102_spill]]  ;;  %vm6235_vm6 = vcmask 1040384   ;;  %vm6228_vm7 = vcmask 15360  }
 0x29a   :  { %v1047_v16 = vld [vmem:[#allocation10 + $0x18] sm:$0xff]  ;;  %v1522_v20 = vld [vmem:[#allocation31 + $0x30] sm:$0xff]  ;;  %v1521_v23 = vld [vmem:[#allocation31 + $0x28] sm:$0xff]  ;;  %s10900_s21 = smov 127   ;;  %s10901_s0 = smov 121   ;;  %vm6691_vm8 = vcmask 982016  }
 0x29b   :  { %v8114_v4 = vld [vmem:[%s14212_s4] sm:$0xf]  ;;  %v9247_v5 = vld [vmem:[%s14212_s4] sm:$0x30]  ;;  %v1523_v21 = vld [vmem:[#allocation31 + $0x38] sm:$0xff]  ;;  %s10902_s8 = smov 123  }
 0x29c   :  { %v8115_v6 = vor.u32 %v9247_v5, %v8114_v4  ;;  %v1519_v22 = vld [vmem:[#allocation31 + $0x18] sm:$0xff]  ;;  %v1518_v24 = vld [vmem:[#allocation31 + $0x10] sm:$0xff]  ;;  %v1516_v26 = vld [vmem:[#allocation31] sm:$0xff]  ;;  %s10903_s14 = smov 7   ;;  %s10904_s25 = smov 119   ;;  %vm6631_vm9 = vcmask 1039360  }
 0x29d   :  { %v1635_v25 = vld [vmem:[#allocation13 + $0x30] sm:$0xff]  ;;  %v1517_v27 = vld [vmem:[#allocation31 + $0x8] sm:$0xff]  ;;  %v1636_v29 = vld [vmem:[#allocation13 + $0x38] sm:$0xff]  ;;  %s10905_s19 = smov 9   ;;  %s10906_s2 = smov 124   ;;  %vm7182_vm10 = vcmask 220160  }
 0x29e   :  { %v915_v7 = vsel %vm913_vm0, %v8115_v6, 0  ;;  %v1634_v28 = vld [vmem:[#allocation13 + $0x28] sm:$0xff]  ;;  %v1633_v30 = vld [vmem:[#allocation13 + $0x20] sm:$0xff]  ;;  %v1631_v32 = vld [vmem:[#allocation13 + $0x10] sm:$0xff]  ;;  %s10907_s27 = smov 125   ;;  %s10908_s26 = smov 3  }
 0x29f   :  { %924 = vmatpush.bf16.msra.mxu0 %v915_v7  ;;  %963 = vperm.xlu2 %9624, %v945_v9   ;;  %v1629_v31 = vld [vmem:[#allocation13] sm:$0xff]  ;;  %v1632_v33 = vld [vmem:[#allocation13 + $0x18] sm:$0xff]  ;;  %v1824_v34 = vld [vmem:[#allocation16 + $0x8] sm:$0xff]  ;;  %s14369_s3 = sld [smem:[#allocation120_spill]]  ;;  %vm6661_vm11 = vcmask 990208   ;;  %vm6721_vm12 = vcmask 973824  }
 0x2a0   :  { %888 = vperm.xlu0 %9622, %v870_v10   ;;  %878 = vperm.xlu1 %9623, %v868_v11   ;;  %v1630_v35 = vld [vmem:[#allocation13 + $0x8] sm:$0xff]  ;;  %v1823_v36 = vld [vmem:[#allocation16] sm:$0xff]  ;;  %v1825_v38 = vld [vmem:[#allocation16 + $0x10] sm:$0xff]  ;;  %s14370_s13 = sld [smem:[#allocation116_spill]]  ;;  %vm6571_vm13 = vcmask 56320   ;;  %vm6601_vm14 = vcmask 7168  }
 0x2a1   :  { %v1827_v37 = vld [vmem:[#allocation16 + $0x20] sm:$0xff]  ;;  %v1826_v39 = vld [vmem:[#allocation16 + $0x18] sm:$0xff]  ;;  %v1828_v41 = vld [vmem:[#allocation16 + $0x28] sm:$0xff]  ;;  %vm6512_vm15 = vcmask 72704   ;;  %vm7122_vm0 = vcmask 236544   ;;  %s10913_s5 = smov 32  }
 0x2a2   :  { %8116 = vmatmul.msk.bf16.vlgmr.msra.gmra.mxu0 %vm906_vm1, %v9245_v8  ;;  %v1830_v40 = vld [vmem:[#allocation16 + $0x38] sm:$0xff]  ;;  %v1829_v42 = vld [vmem:[#allocation16 + $0x30] sm:$0xff]  ;;  %v2297_v44 = vld [vmem:[%s14213_s12 + $0x70] sm:$0xff]  ;;  %s10914_s11 = smov 42  }
 0x2a3   :  { %v2295_v43 = vld [vmem:[%s14213_s12 + $0x60] sm:$0xff]  ;;  %v2298_v45 = vld [vmem:[%s14213_s12 + $0x78] sm:$0xff]  ;;  %v2296_v47 = vld [vmem:[%s14213_s12 + $0x68] sm:$0xff] }
 0x2a4   :  { %v2294_v46 = vld [vmem:[%s14213_s12 + $0x58] sm:$0xff]  ;;  %v2293_v48 = vld [vmem:[%s14213_s12 + $0x50] sm:$0xff]  ;;  %v2291_v50 = vld [vmem:[%s14213_s12 + $0x40] sm:$0xff] }
 0x2a5   :  { %v2289_v49 = vld [vmem:[%s14213_s12 + $0x30] sm:$0xff]  ;;  %v2292_v51 = vld [vmem:[%s14213_s12 + $0x48] sm:$0xff]  ;;  %v2290_v53 = vld [vmem:[%s14213_s12 + $0x38] sm:$0xff] }
 0x2a6   :  { %v2288_v52 = vld [vmem:[%s14213_s12 + $0x28] sm:$0xff]  ;;  %v2287_v54 = vld [vmem:[%s14213_s12 + $0x20] sm:$0xff]  ;;  %v2285_v56 = vld [vmem:[%s14213_s12 + $0x10] sm:$0xff] }
 0x2a7   :  { %1050 = vperm.xlu2 %9624, %v1044_v12   ;;  %v2283_v55 = vld [vmem:[%s14213_s12] sm:$0xff]  ;;  %v2286_v57 = vld [vmem:[%s14213_s12 + $0x18] sm:$0xff]  ;;  %v2596_v59 = vld [vmem:[#allocation19 + $0x78] sm:$0xff] }
 0x2a8   :  { %948 = vperm.xlu0 %9622, %v942_v13   ;;  %953 = vperm.xlu1 %9623, %v943_v14   ;;  %v2284_v60 = vld [vmem:[%s14213_s12 + $0x8] sm:$0xff]  ;;  %v2595_v61 = vld [vmem:[#allocation19 + $0x70] sm:$0xff]  ;;  %v2593_v0 = vld [vmem:[#allocation19 + $0x60] sm:$0xff] }
 0x2a9   :  { %v2591_v63 = vld [vmem:[#allocation19 + $0x50] sm:$0xff]  ;;  %v2594_v1 = vld [vmem:[#allocation19 + $0x68] sm:$0xff]  ;;  %v2592_v6 = vld [vmem:[#allocation19 + $0x58] sm:$0xff] }
 0x2aa   :  { %v2590_v5 = vld [vmem:[#allocation19 + $0x48] sm:$0xff]  ;;  %v2589_v7 = vld [vmem:[#allocation19 + $0x40] sm:$0xff]  ;;  %v2587_v13 = vld [vmem:[#allocation19 + $0x30] sm:$0xff] }
 0x2ab   :  { %v2585_v12 = vld [vmem:[#allocation19 + $0x20] sm:$0xff] }
 0x2af   :  { %1065 = vperm.xlu2 %9624, %v1047_v16  }
 0x2b0   :  { %1055 = vperm.xlu0 %9622, %v1045_v17   ;;  %1060 = vperm.xlu1 %9623, %v1046_v18  }
 0x2b2   :  { %8117 = vmatmul.msk.bf16.gmra.mxu0 %vm906_vm1, %v9246_v15  ;;  %v2588_v15 = vld [vmem:[#allocation19 + $0x38] sm:$0xff]  ;;  %vm7003_vm1 = vcmask 31744  }
 0x2b7   :  { %1546 = vperm.xlu2 %9624, %v1520_v19  }
 0x2b8   :  { %1556 = vperm.xlu0 %9622, %v1522_v20   ;;  %1561 = vperm.xlu1 %9623, %v1523_v21   ;;  %v9248_v20 = vld [vmem:[#allocation6] sm:$0xff]  ;;  %v2584_v21 = vld [vmem:[#allocation19 + $0x18] sm:$0xff] }
 0x2bf   :  { %1541 = vperm.xlu2 %9624, %v1519_v22   ;;  %v2586_v22 = vld [vmem:[#allocation19 + $0x28] sm:$0xff] }
 0x2c0   :  { %1551 = vperm.xlu0 %9622, %v1521_v23   ;;  %1536 = vperm.xlu1 %9623, %v1518_v24   ;;  %v2583_v23 = vld [vmem:[#allocation19 + $0x10] sm:$0xff]  ;;  %v2942_v24 = vld [vmem:[#allocation22] sm:$0xff] }
 0x2c7   :  { %1669 = vperm.xlu2 %9624, %v1635_v25   ;;  %v2581_v25 = vld [vmem:[#allocation19] sm:$0xff] }
 0x2c8   :  { %1526 = vperm.xlu0 %9622, %v1516_v26   ;;  %1531 = vperm.xlu1 %9623, %v1517_v27   ;;  %v2582_v26 = vld [vmem:[#allocation19 + $0x8] sm:$0xff] }
 0x2c9   :  { %v9249_v27 = vld [vmem:[#allocation6 + $0x8] sm:$0xff] }
 0x2cf   :  { %1664 = vperm.xlu2 %9624, %v1634_v28   ;;  %v2945_v28 = vld [vmem:[#allocation22 + $0x18] sm:$0xff] }
 0x2d0   :  { %1674 = vperm.xlu0 %9622, %v1636_v29   ;;  %1659 = vperm.xlu1 %9623, %v1633_v30   ;;  %v2943_v29 = vld [vmem:[#allocation22 + $0x8] sm:$0xff]  ;;  %v2944_v30 = vld [vmem:[#allocation22 + $0x10] sm:$0xff] }
 0x2d7   :  { %1639 = vperm.xlu2 %9624, %v1629_v31   ;;  %v2948_v31 = vld [vmem:[#allocation22 + $0x30] sm:$0xff] }
 0x2d8   :  { %1649 = vperm.xlu0 %9622, %v1631_v32   ;;  %1654 = vperm.xlu1 %9623, %v1632_v33   ;;  %v2946_v32 = vld [vmem:[#allocation22 + $0x20] sm:$0xff]  ;;  %v2947_v33 = vld [vmem:[#allocation22 + $0x28] sm:$0xff] }
 0x2df   :  { %1838 = vperm.xlu2 %9624, %v1824_v34   ;;  %v2951_v34 = vld [vmem:[#allocation22 + $0x48] sm:$0xff] }
 0x2e0   :  { %1644 = vperm.xlu0 %9622, %v1630_v35   ;;  %1833 = vperm.xlu1 %9623, %v1823_v36   ;;  %v2949_v35 = vld [vmem:[#allocation22 + $0x38] sm:$0xff]  ;;  %v2950_v36 = vld [vmem:[#allocation22 + $0x40] sm:$0xff] }
 0x2e7   :  { %1853 = vperm.xlu2 %9624, %v1827_v37   ;;  %v2954_v37 = vld [vmem:[#allocation22 + $0x60] sm:$0xff] }
 0x2e8   :  { %1843 = vperm.xlu0 %9622, %v1825_v38   ;;  %1848 = vperm.xlu1 %9623, %v1826_v39   ;;  %v2952_v38 = vld [vmem:[#allocation22 + $0x50] sm:$0xff]  ;;  %v2953_v39 = vld [vmem:[#allocation22 + $0x58] sm:$0xff] }
 0x2ef   :  { %1868 = vperm.xlu2 %9624, %v1830_v40   ;;  %v2957_v40 = vld [vmem:[#allocation22 + $0x78] sm:$0xff] }
 0x2f0   :  { %1858 = vperm.xlu0 %9622, %v1828_v41   ;;  %1863 = vperm.xlu1 %9623, %v1829_v42   ;;  %v2955_v41 = vld [vmem:[#allocation22 + $0x68] sm:$0xff]  ;;  %v2956_v42 = vld [vmem:[#allocation22 + $0x70] sm:$0xff] }
 0x2f7   :  { %2361 = vperm.xlu2 %9624, %v2295_v43   ;;  %v3750_v43 = vld [vmem:[%s14214_s22 + $0xf0] sm:$0xff] }
 0x2f8   :  { %2371 = vperm.xlu0 %9622, %v2297_v44   ;;  %2376 = vperm.xlu1 %9623, %v2298_v45   ;;  %v3734_v44 = vld [vmem:[%s14214_s22 + $0x70] sm:$0xff]  ;;  %v3735_v45 = vld [vmem:[%s14214_s22 + $0x78] sm:$0xff] }
 0x2ff   :  { %2356 = vperm.xlu2 %9624, %v2294_v46   ;;  %v3733_v46 = vld [vmem:[%s14214_s22 + $0x68] sm:$0xff] }
 0x300   :  { %2366 = vperm.xlu0 %9622, %v2296_v47   ;;  %2351 = vperm.xlu1 %9623, %v2293_v48   ;;  %v3751_v47 = vld [vmem:[%s14214_s22 + $0xf8] sm:$0xff]  ;;  %v3732_v48 = vld [vmem:[%s14214_s22 + $0x60] sm:$0xff] }
 0x307   :  { %2331 = vperm.xlu2 %9624, %v2289_v49   ;;  %v3730_v49 = vld [vmem:[%s14214_s22 + $0x50] sm:$0xff] }
 0x308   :  { %2341 = vperm.xlu0 %9622, %v2291_v50   ;;  %2346 = vperm.xlu1 %9623, %v2292_v51   ;;  %v3748_v50 = vld [vmem:[%s14214_s22 + $0xe0] sm:$0xff]  ;;  %v3749_v51 = vld [vmem:[%s14214_s22 + $0xe8] sm:$0xff] }
 0x30a   :  { %v884_v2 = vpop.permute.xlu0 %883  ;;  %v874_v3 = vpop.permute.xlu1 %873 }
 0x30f   :  { %2326 = vperm.xlu2 %9624, %v2288_v52   ;;  %v3747_v52 = vld [vmem:[%s14214_s22 + $0xd8] sm:$0xff] }
 0x310   :  { %2336 = vperm.xlu0 %9622, %v2290_v53   ;;  %2321 = vperm.xlu1 %9623, %v2287_v54   ;;  %v3731_v53 = vld [vmem:[%s14214_s22 + $0x58] sm:$0xff]  ;;  %v3746_v54 = vld [vmem:[%s14214_s22 + $0xd0] sm:$0xff] }
 0x312   :  { %v889_v8 = vpop.permute.xlu0 %888  ;;  %v879_v14 = vpop.permute.xlu1 %878 }
 0x317   :  { %2301 = vperm.xlu2 %9624, %v2283_v55   ;;  %v3744_v55 = vld [vmem:[%s14214_s22 + $0xc0] sm:$0xff] }
 0x318   :  { %2311 = vperm.xlu0 %9622, %v2285_v56   ;;  %2316 = vperm.xlu1 %9623, %v2286_v57   ;;  %v3728_v56 = vld [vmem:[%s14214_s22 + $0x40] sm:$0xff]  ;;  %v3729_v57 = vld [vmem:[%s14214_s22 + $0x48] sm:$0xff] }
 0x31f   :  { %v926_v58 = vpop.f32.mrf.mxu0  ;;  %2674 = vperm.xlu2 %9624, %v2596_v59   ;;  %v3745_v59 = vld [vmem:[%s14214_s22 + $0xc8] sm:$0xff] }
 0x320   :  { %2306 = vperm.xlu0 %9622, %v2284_v60   ;;  %2669 = vperm.xlu1 %9623, %v2595_v61   ;;  %v11593_v18 = vadd.f32 %v926_v58, %v874_v3  ;;  %v3727_v58 = vld [vmem:[%s14214_s22 + $0x38] sm:$0xff]  ;;  %v3726_v60 = vld [vmem:[%s14214_s22 + $0x30] sm:$0xff]  ;;  %v3724_v61 = vld [vmem:[%s14214_s22 + $0x20] sm:$0xff] }
 0x321   :  { %v3738_v3 = vld [vmem:[%s14214_s22 + $0x90] sm:$0xff] }
 0x327   :  { %v928_v62 = vpop.f32.mrf.mxu0  ;;  %2649 = vperm.xlu2 %9624, %v2591_v63   ;;  %v3743_v63 = vld [vmem:[%s14214_s22 + $0xb8] sm:$0xff] }
 0x328   :  { %2659 = vperm.xlu0 %9622, %v2593_v0   ;;  %2664 = vperm.xlu1 %9623, %v2594_v1   ;;  %v11589_v16 = vadd.f32 %v928_v62, %v879_v14  ;;  %v3742_v62 = vld [vmem:[%s14214_s22 + $0xb0] sm:$0xff]  ;;  %v3741_v0 = vld [vmem:[%s14214_s22 + $0xa8] sm:$0xff]  ;;  %v954_v14 = vpop.permute.xlu1 %953 }
 0x329   :  { %v3725_v1 = vld [vmem:[%s14214_s22 + $0x28] sm:$0xff] }
 0x32a   :  { %v936_v19 = vpack.c.bf16 %v11589_v16, %v11593_v18 }
 0x32f   :  { %v931_v4 = vpop.f32.mrf.mxu0  ;;  %2644 = vperm.xlu2 %9624, %v2590_v5   ;;  %v3723_v5 = vld [vmem:[%s14214_s22 + $0x18] sm:$0xff] }
 0x330   :  { %2654 = vperm.xlu0 %9622, %v2592_v6   ;;  %2639 = vperm.xlu1 %9623, %v2589_v7   ;;  %v11585_v10 = vadd.f32 %v931_v4, %v884_v2  ;;  %v3740_v2 = vld [vmem:[%s14214_s22 + $0xa0] sm:$0xff]  ;;  %v3722_v4 = vld [vmem:[%s14214_s22 + $0x10] sm:$0xff]  ;;  %v3721_v7 = vld [vmem:[%s14214_s22 + $0x8] sm:$0xff] }
 0x337   :  { %v933_v9 = vpop.f32.mrf.mxu0  ;;  %2619 = vperm.xlu2 %9624, %v2585_v12  }
 0x338   :  { %v11587_v11 = vadd.f32 %v933_v9, %v889_v8  ;;  %2629 = vperm.xlu0 %9622, %v2587_v13   ;;  %2634 = vperm.xlu1 %9623, %v2588_v15   ;;  %v3739_v8 = vld [vmem:[%s14214_s22 + $0x98] sm:$0xff]  ;;  %v3720_v9 = vld [vmem:[%s14214_s22] sm:$0xff] }
 0x339   :  { %v4650_v13 = vld [vmem:[#allocation25 + $0x70] sm:$0xff] }
 0x33a   :  { %v937_v17 = vpack.c.bf16 %v11587_v11, %v11585_v10  ;;  %v3736_v15 = vld [vmem:[%s14214_s22 + $0x80] sm:$0xff] }
 0x33c   :  { %989 = vmatpush.bf16.msra.mxu1 %v937_v17  ;;  %v3737_v17 = vld [vmem:[%s14214_s22 + $0x88] sm:$0xff] }
 0x33f   :  { %2614 = vperm.xlu2 %9624, %v2584_v21  }
 0x340   :  { %990 = vmatpush.bf16.msra.mxu1 %v936_v19  ;;  %2624 = vperm.xlu0 %9622, %v2586_v22   ;;  %v959_v22 = vpop.permute.xlu2 %958 }
 0x341   :  { %2609 = vperm.xlu1 %9623, %v2583_v23  }
 0x343   :  { %8126 = vmatmul.msk.bf16.vlgmr.msra.gmra.mxu1 %vm976_vm2, %v9248_v20  ;;  %v949_v20 = vpop.permute.xlu0 %948 }
 0x347   :  { %2960 = vperm.xlu2 %9624, %v2942_v24  }
 0x348   :  { %2599 = vperm.xlu0 %9622, %v2581_v25  }
 0x349   :  { %2604 = vperm.xlu1 %9623, %v2582_v26   ;;  %v4667_v26 = vld [vmem:[#allocation25 + $0xf8] sm:$0xff] }
 0x34f   :  { %2975 = vperm.xlu2 %9624, %v2945_v28   ;;  %v4651_v28 = vld [vmem:[#allocation25 + $0x78] sm:$0xff] }
 0x350   :  { %2965 = vperm.xlu0 %9622, %v2943_v29   ;;  %v4666_v29 = vld [vmem:[#allocation25 + $0xf0] sm:$0xff] }
 0x351   :  { %2970 = vperm.xlu1 %9623, %v2944_v30  }
 0x353   :  { %8127 = vmatmul.msk.bf16.gmra.mxu1 %vm976_vm2, %v9249_v27 }
 0x357   :  { %2990 = vperm.xlu2 %9624, %v2948_v31  }
 0x358   :  { %2980 = vperm.xlu0 %9622, %v2946_v32  }
 0x359   :  { %2985 = vperm.xlu1 %9623, %v2947_v33  }
 0x35f   :  { %3005 = vperm.xlu2 %9624, %v2951_v34  }
 0x360   :  { %2995 = vperm.xlu0 %9622, %v2949_v35  }
 0x361   :  { %3000 = vperm.xlu1 %9623, %v2950_v36   ;;  %v964_v36 = vpop.permute.xlu2 %963 }
 0x367   :  { %3020 = vperm.xlu2 %9624, %v2954_v37  }
 0x368   :  { %3010 = vperm.xlu0 %9622, %v2952_v38  }
 0x369   :  { %3015 = vperm.xlu1 %9623, %v2953_v39   ;;  %v4664_v39 = vld [vmem:[#allocation25 + $0xe0] sm:$0xff] }
 0x36f   :  { %3035 = vperm.xlu2 %9624, %v2957_v40  }
 0x370   :  { %3025 = vperm.xlu0 %9622, %v2955_v41   ;;  %v4648_v41 = vld [vmem:[#allocation25 + $0x60] sm:$0xff] }
 0x371   :  { %3030 = vperm.xlu1 %9623, %v2956_v42   ;;  %v4649_v42 = vld [vmem:[#allocation25 + $0x68] sm:$0xff] }
 0x377   :  { %3904 = vperm.xlu2 %9624, %v3750_v43  }
 0x378   :  { %3824 = vperm.xlu0 %9622, %v3734_v44  }
 0x379   :  { %3829 = vperm.xlu1 %9623, %v3735_v45  }
 0x37f   :  { %3819 = vperm.xlu2 %9624, %v3733_v46  }
 0x380   :  { %3909 = vperm.xlu0 %9622, %v3751_v47  }
 0x381   :  { %3814 = vperm.xlu1 %9623, %v3732_v48  }
 0x387   :  { %3804 = vperm.xlu2 %9624, %v3730_v49  }
 0x388   :  { %3894 = vperm.xlu0 %9622, %v3748_v50  }
 0x389   :  { %3899 = vperm.xlu1 %9623, %v3749_v51   ;;  %v4647_v51 = vld [vmem:[#allocation25 + $0x58] sm:$0xff] }
 0x38f   :  { %3889 = vperm.xlu2 %9624, %v3747_v52  }
 0x390   :  { %3809 = vperm.xlu0 %9622, %v3731_v53   ;;  %v4665_v53 = vld [vmem:[#allocation25 + $0xe8] sm:$0xff] }
 0x391   :  { %3884 = vperm.xlu1 %9623, %v3746_v54   ;;  %v4646_v54 = vld [vmem:[#allocation25 + $0x50] sm:$0xff] }
 0x397   :  { %3874 = vperm.xlu2 %9624, %v3744_v55  }
 0x398   :  { %3794 = vperm.xlu0 %9622, %v3728_v56  }
 0x399   :  { %3799 = vperm.xlu1 %9623, %v3729_v57  }
 0x39f   :  { %3789 = vperm.xlu2 %9624, %v3727_v58  }
 0x3a0   :  { %3879 = vperm.xlu0 %9622, %v3745_v59   ;;  %v4644_v59 = vld [vmem:[#allocation25 + $0x40] sm:$0xff] }
 0x3a1   :  { %3784 = vperm.xlu1 %9623, %v3726_v60  }
 0x3a7   :  { %3774 = vperm.xlu2 %9624, %v3724_v61   ;;  %v4662_v61 = vld [vmem:[#allocation25 + $0xd0] sm:$0xff] }
 0x3a8   :  { %3864 = vperm.xlu0 %9622, %v3742_v62   ;;  %v4663_v62 = vld [vmem:[#allocation25 + $0xd8] sm:$0xff] }
 0x3a9   :  { %3869 = vperm.xlu1 %9623, %v3743_v63  }
 0x3af   :  { %3859 = vperm.xlu2 %9624, %v3741_v0  }
 0x3b0   :  { %3779 = vperm.xlu0 %9622, %v3725_v1  }
 0x3b1   :  { %3854 = vperm.xlu1 %9623, %v3740_v2  }
 0x3b7   :  { %3844 = vperm.xlu2 %9624, %v3738_v3  }
 0x3b8   :  { %3764 = vperm.xlu0 %9622, %v3722_v4  }
 0x3b9   :  { %3769 = vperm.xlu1 %9623, %v3723_v5  }
 0x3bf   :  { %3759 = vperm.xlu2 %9624, %v3721_v7   ;;  %v4661_v7 = vld [vmem:[#allocation25 + $0xc8] sm:$0xff] }
 0x3c0   :  { %v992_v6 = vpop.f32.mrf.mxu1  ;;  %3849 = vperm.xlu0 %9622, %v3739_v8  }
 0x3c1   :  { %3754 = vperm.xlu1 %9623, %v3720_v9   ;;  %v11633_v21 = vadd.f32 %v992_v6, %v949_v20 }
 0x3c3   :  { %v1002_v24 = vmul.f32 %v11633_v21, %v11633_v21 }
 0x3c5   :  { %v1006_v32 = vmul.f32 %v1002_v24, %v11633_v21  ;;  %v4658_v24 = vld [vmem:[#allocation25 + $0xb0] sm:$0xff] }
 0x3c7   :  { %4740 = vperm.xlu2 %9624, %v4650_v13   ;;  %v1010_v37 = vmul.f32 0.044715, %v1006_v32  ;;  %v4660_v13 = vld [vmem:[#allocation25 + $0xc0] sm:$0xff]  ;;  %v4655_v32 = vld [vmem:[#allocation25 + $0x98] sm:$0xff] }
 0x3c8   :  { %v994_v12 = vpop.f32.mrf.mxu1  ;;  %3834 = vperm.xlu0 %9622, %v3736_v15  }
 0x3c9   :  { %v11631_v19 = vadd.f32 %v994_v12, %v954_v14  ;;  %3839 = vperm.xlu1 %9623, %v3737_v17   ;;  %v1014_v47 = vadd.f32 %v1010_v37, %v11633_v21  ;;  %v4645_v12 = vld [vmem:[#allocation25 + $0x48] sm:$0xff]  ;;  %v4636_v37 = vld [vmem:[#allocation25] sm:$0xff] }
 0x3cb   :  { %v1003_v23 = vmul.f32 %v11631_v19, %v11631_v19  ;;  %v1018_v52 = vmul.f32 0.7978846, %v1014_v47  ;;  %v5515_v47 = vld [vmem:[#allocation28 + $0x68] sm:$0xff] }
 0x3cd   :  { %v1007_v30 = vmul.f32 %v1003_v23, %v11631_v19  ;;  %v9250_v23 = vld [vmem:[#allocation9] sm:$0xff] }
 0x3cf   :  { %4825 = vperm.xlu2 %9624, %v4667_v26   ;;  %v1011_v34 = vmul.f32 0.044715, %v1007_v30  ;;  %v4643_v26 = vld [vmem:[#allocation25 + $0x38] sm:$0xff]  ;;  %v4638_v30 = vld [vmem:[#allocation25 + $0x10] sm:$0xff] }
 0x3d0   :  { %v997_v25 = vpop.f32.mrf.mxu1  ;;  %4745 = vperm.xlu0 %9622, %v4651_v28   ;;  %v4659_v28 = vld [vmem:[#allocation25 + $0xb8] sm:$0xff] }
 0x3d1   :  { %v998_v27 = vadd.f32 %v997_v25, %v959_v22  ;;  %4820 = vperm.xlu1 %9623, %v4666_v29   ;;  %v1015_v44 = vadd.f32 %v1011_v34, %v11631_v19  ;;  %v4642_v25 = vld [vmem:[#allocation25 + $0x30] sm:$0xff]  ;;  %v4640_v29 = vld [vmem:[#allocation25 + $0x20] sm:$0xff] }
 0x3d2   :  { %v4654_v34 = vld [vmem:[#allocation25 + $0x90] sm:$0xff] }
 0x3d3   :  { %v1004_v31 = vmul.f32 %v998_v27, %v998_v27  ;;  %v1019_v49 = vmul.f32 0.7978846, %v1015_v44  ;;  %v11653_v44 = vpop.permute.xlu1 %1060 }
 0x3d5   :  { %v1008_v33 = vmul.f32 %v1004_v31, %v998_v27  ;;  %v4657_v31 = vld [vmem:[#allocation25 + $0xa8] sm:$0xff] }
 0x3d7   :  { %v1012_v35 = vmul.f32 0.044715, %v1008_v33  ;;  %4810 = vperm.xlu2 %9624, %v4664_v39   ;;  %v4639_v33 = vld [vmem:[#allocation25 + $0x18] sm:$0xff] }
 0x3d8   :  { %v999_v38 = vpop.f32.mrf.mxu1  ;;  %4730 = vperm.xlu0 %9622, %v4648_v41   ;;  %v5517_v39 = vld [vmem:[#allocation28 + $0x78] sm:$0xff]  ;;  %v11649_v41 = vpop.permute.xlu0 %1055 }
 0x3d9   :  { %v1000_v40 = vadd.f32 %v999_v38, %v964_v36  ;;  %v1016_v43 = vadd.f32 %v1012_v35, %v998_v27  ;;  %4735 = vperm.xlu1 %9623, %v4649_v42   ;;  %v4652_v35 = vld [vmem:[#allocation25 + $0x80] sm:$0xff]  ;;  %v11647_v36 = vpop.permute.xlu2 %1050  ;;  %v4637_v38 = vld [vmem:[#allocation25 + $0x8] sm:$0xff]  ;;  %v5516_v42 = vld [vmem:[#allocation28 + $0x70] sm:$0xff] }
 0x3db   :  { %v1005_v45 = vmul.f32 %v1000_v40, %v1000_v40  ;;  %v1020_v46 = vmul.f32 0.7978846, %v1016_v43 }
 0x3dd   :  { %v1009_v48 = vmul.f32 %v1005_v45, %v1000_v40  ;;  %9625 = vtanh.f32 %v1020_v46  ;;  %v5512_v45 = vld [vmem:[#allocation28 + $0x50] sm:$0xff]  ;;  %v5514_v46 = vld [vmem:[#allocation28 + $0x60] sm:$0xff] }
 0x3de   :  { %9627 = vtanh.f32 %v1019_v49 }
 0x3df   :  { %v1013_v50 = vmul.f32 0.044715, %v1009_v48  ;;  %4725 = vperm.xlu2 %9624, %v4647_v51   ;;  %9629 = vtanh.f32 %v1018_v52  ;;  %v5511_v51 = vld [vmem:[#allocation28 + $0x48] sm:$0xff]  ;;  %v5513_v52 = vld [vmem:[#allocation28 + $0x58] sm:$0xff] }
 0x3e0   :  { %4815 = vperm.xlu0 %9622, %v4665_v53   ;;  %v11655_v48 = vpop.permute.xlu0 %1556  ;;  %v5510_v53 = vld [vmem:[#allocation28 + $0x40] sm:$0xff] }
 0x3e1   :  { %v1017_v55 = vadd.f32 %v1013_v50, %v1000_v40  ;;  %4720 = vperm.xlu1 %9623, %v4646_v54   ;;  %v11651_v43 = vpop.permute.xlu2 %1065  ;;  %v11659_v50 = vpop.permute.xlu1 %1561 }
 0x3e3   :  { %v1021_v56 = vmul.f32 0.7978846, %v1017_v55  ;;  %v9626_v57 = vpop.eup %9625 }
 0x3e4   :  { %v9628_v58 = vpop.eup %9627  ;;  %v1028_v60 = vadd.f32 1.0, %v9626_v57 }
 0x3e5   :  { %9631 = vtanh.f32 %v1021_v56  ;;  %v9630_v63 = vpop.eup %9629  ;;  %v1027_v1 = vadd.f32 1.0, %v9628_v58  ;;  %v5506_v56 = vld [vmem:[#allocation28 + $0x20] sm:$0xff]  ;;  %v5508_v58 = vld [vmem:[#allocation28 + $0x30] sm:$0xff] }
 0x3e6   :  { %v1032_v3 = vmul.f32 0.5, %v1028_v60  ;;  %v1026_v4 = vadd.f32 1.0, %v9630_v63  ;;  %v5507_v63 = vld [vmem:[#allocation28 + $0x28] sm:$0xff] }
 0x3e7   :  { %4710 = vperm.xlu2 %9624, %v4644_v59   ;;  %v1031_v6 = vmul.f32 0.5, %v1027_v1  ;;  %v5509_v59 = vld [vmem:[#allocation28 + $0x38] sm:$0xff] }
 0x3e8   :  { %4800 = vperm.xlu0 %9622, %v4662_v61   ;;  %v1036_v8 = vmul.f32 %v1032_v3, %v998_v27  ;;  %v1030_v14 = vmul.f32 0.5, %v1026_v4  ;;  %v4641_v27 = vld [vmem:[#allocation25 + $0x28] sm:$0xff]  ;;  %v11661_v54 = vpop.permute.xlu0 %1551  ;;  %v5505_v61 = vld [vmem:[#allocation28 + $0x18] sm:$0xff]  ;;  %v5502_v3 = vld [vmem:[#allocation28] sm:$0xff] }
 0x3e9   :  { %4805 = vperm.xlu1 %9623, %v4663_v62   ;;  %v1035_v17 = vmul.f32 %v1031_v6, %v11631_v19  ;;  %v9251_v19 = vld [vmem:[#allocation9 + $0x8] sm:$0xff]  ;;  %v11657_v49 = vpop.permute.xlu2 %1546  ;;  %v11665_v57 = vpop.permute.xlu1 %1536 }
 0x3ea   :  { %v1034_v20 = vmul.f32 %v1030_v14, %v11633_v21  ;;  %v4656_v21 = vld [vmem:[#allocation25 + $0xa0] sm:$0xff] }
 0x3eb   :  { %v9632_v0 = vpop.eup %9631  ;;  %v9258_v14 = vld [vmem:[%s14215_s24 + $0x30] sm:$0xff] }
 0x3ec   :  { %v1029_v2 = vadd.f32 1.0, %v9632_v0  ;;  %v1042_v22 = vpack.c.bf16 %v1035_v17, %v1034_v20  ;;  %v5504_v0 = vld [vmem:[#allocation28 + $0x10] sm:$0xff]  ;;  %v9266_v17 = vld [vmem:[%s14215_s24 + $0x70] sm:$0xff]  ;;  %v5533_v20 = vld [vmem:[#allocation28 + $0xf8] sm:$0xff] }
 0x3ee   :  { %v1033_v5 = vmul.f32 0.5, %v1029_v2  ;;  %v5532_v2 = vld [vmem:[#allocation28 + $0xf0] sm:$0xff] }
 0x3ef   :  { %4795 = vperm.xlu2 %9624, %v4661_v7  }
 0x3f0   :  { %v1037_v9 = vmul.f32 %v1033_v5, %v1000_v40  ;;  %4715 = vperm.xlu0 %9622, %v4645_v12   ;;  %v4653_v40 = vld [vmem:[#allocation25 + $0x88] sm:$0xff]  ;;  %v11667_v60 = vpop.permute.xlu0 %1526 }
 0x3f1   :  { %4790 = vperm.xlu1 %9623, %v4660_v13   ;;  %v11663_v55 = vpop.permute.xlu2 %1541  ;;  %v11671_v1 = vpop.permute.xlu1 %1531  ;;  %v5503_v5 = vld [vmem:[#allocation28 + $0x8] sm:$0xff] }
 0x3f2   :  { %v1043_v15 = vpack.c.bf16 %v1037_v9, %v1036_v8  ;;  %v9259_v8 = vld [vmem:[%s14215_s24 + $0x38] sm:$0xff] }
 0x3f3   :  { %v9267_v9 = vld [vmem:[%s14215_s24 + $0x78] sm:$0xff]  ;;  %1173 = vmatpush.bf16.msra.mxu3 %v9259_v8  ;;  %v5520_v8 = vld [vmem:[#allocation28 + $0x90] sm:$0xff] }
 0x3f4   :  { %1090 = vmatpush.bf16.msra.mxu2 %v1043_v15  ;;  %v9275_v12 = vld [vmem:[%s14215_s24 + $0xb8] sm:$0xff]  ;;  %1261 = vmatpush.bf16.msrb.mxu0 %v9267_v9  ;;  %v5522_v9 = vld [vmem:[#allocation28 + $0xa0] sm:$0xff] }
 0x3f5   :  { %v9283_v13 = vld [vmem:[%s14215_s24 + $0xf8] sm:$0xff]  ;;  %1349 = vmatpush.bf16.msrb.mxu1 %v9275_v12 }
 0x3f6   :  { %v5531_v15 = vld [vmem:[#allocation28 + $0xe8] sm:$0xff] }
 0x3f7   :  { %4780 = vperm.xlu2 %9624, %v4658_v24   ;;  %v9282_v24 = vld [vmem:[%s14215_s24 + $0xf0] sm:$0xff]  ;;  %1174 = vmatpush.bf16.msra.mxu3 %v9258_v14  ;;  %v9260_v14 = vld [vmem:[%s14215_s24 + $0x40] sm:$0xff] }
 0x3f8   :  { %1091 = vmatpush.bf16.msra.mxu2 %v1042_v22  ;;  %4700 = vperm.xlu0 %9622, %v4642_v25   ;;  %v11673_v4 = vpop.permute.xlu0 %1674  ;;  %v9274_v22 = vld [vmem:[%s14215_s24 + $0xb0] sm:$0xff] }
 0x3f9   :  { %4705 = vperm.xlu1 %9623, %v4643_v26   ;;  %v11669_v62 = vpop.permute.xlu2 %1669  ;;  %v11677_v7 = vpop.permute.xlu1 %1659  ;;  %1262 = vmatpush.bf16.msrb.mxu0 %v9266_v17  ;;  %v5523_v17 = vld [vmem:[#allocation28 + $0xa8] sm:$0xff] }
 0x3fa   :  { %1350 = vmatpush.bf16.msrb.mxu1 %v9274_v22 }
 0x3fb   :  { %8136 = vmatmul.msk.bf16.vlgmr.msra.gmra.mxu2 %vm976_vm2, %v9250_v23  ;;  %v5530_v23 = vld [vmem:[#allocation28 + $0xe0] sm:$0xff] }
 0x3fc   :  { %1437 = vmatpush.bf16.msrb.mxu2 %v9283_v13  ;;  %v9252_v13 = vld [vmem:[%s14215_s24] sm:$0xff] }
 0x3ff   :  { %4695 = vperm.xlu2 %9624, %v4641_v27   ;;  %v9257_v27 = vld [vmem:[%s14215_s24 + $0x28] sm:$0xff] }
 0x400   :  { %4785 = vperm.xlu0 %9622, %v4659_v28   ;;  %v11687_v25 = vpop.permute.xlu0 %1649  ;;  %v9265_v28 = vld [vmem:[%s14215_s24 + $0x68] sm:$0xff]  ;;  %1438 = vmatpush.bf16.msrb.mxu2 %v9282_v24 }
 0x401   :  { %4690 = vperm.xlu1 %9623, %v4640_v29   ;;  %v11675_v6 = vpop.permute.xlu2 %1664  ;;  %v9273_v29 = vld [vmem:[%s14215_s24 + $0xa8] sm:$0xff]  ;;  %1175 = vmatpush.bf16.msra.mxu3 %v9257_v27 }
 0x402   :  { %1263 = vmatpush.bf16.msrb.mxu0 %v9265_v28  ;;  %1351 = vmatpush.bf16.msrb.mxu1 %v9273_v29  ;;  %v5521_v24 = vld [vmem:[#allocation28 + $0x98] sm:$0xff]  ;;  %v5518_v28 = vld [vmem:[#allocation28 + $0x80] sm:$0xff] }
 0x407   :  { %4680 = vperm.xlu2 %9624, %v4638_v30   ;;  %v11695_v30 = vpop.permute.xlu1 %1654 }
 0x408   :  { %4770 = vperm.xlu0 %9622, %v4656_v21   ;;  %v9256_v21 = vld [vmem:[%s14215_s24 + $0x20] sm:$0xff] }
 0x409   :  { %4775 = vperm.xlu1 %9623, %v4657_v31   ;;  %v11689_v26 = vpop.permute.xlu2 %1639  ;;  %v5526_v31 = vld [vmem:[#allocation28 + $0xc0] sm:$0xff]  ;;  %1176 = vmatpush.bf16.msra.mxu3 %v9256_v21  ;;  %v6086_v21 = vld [vmem:[#allocation60 + $0x10] sm:$0xff] }
 0x40b   :  { %8137 = vmatmul.msk.bf16.gmra.mxu2 %vm976_vm2, %v9251_v19  ;;  %v9281_v19 = vld [vmem:[%s14215_s24 + $0xe8] sm:$0xff] }
 0x40c   :  { %1439 = vmatpush.bf16.msrb.mxu2 %v9281_v19 }
 0x40f   :  { %4765 = vperm.xlu2 %9624, %v4655_v32   ;;  %v9264_v32 = vld [vmem:[%s14215_s24 + $0x60] sm:$0xff] }
 0x410   :  { %4685 = vperm.xlu0 %9622, %v4639_v33   ;;  %v5528_v33 = vld [vmem:[#allocation28 + $0xd0] sm:$0xff]  ;;  %1264 = vmatpush.bf16.msrb.mxu0 %v9264_v32 }
 0x411   :  { %4760 = vperm.xlu1 %9623, %v4654_v34   ;;  %v9272_v34 = vld [vmem:[%s14215_s24 + $0xa0] sm:$0xff] }
 0x412   :  { %1352 = vmatpush.bf16.msrb.mxu1 %v9272_v34  ;;  %v6085_v32 = vld [vmem:[#allocation60 + $0x8] sm:$0xff] }
 0x417   :  { %4750 = vperm.xlu2 %9624, %v4652_v35   ;;  %v5529_v35 = vld [vmem:[#allocation28 + $0xd8] sm:$0xff] }
 0x418   :  { %4670 = vperm.xlu0 %9622, %v4636_v37   ;;  %v9280_v37 = vld [vmem:[%s14215_s24 + $0xe0] sm:$0xff] }
 0x419   :  { %4675 = vperm.xlu1 %9623, %v4637_v38   ;;  %v9255_v38 = vld [vmem:[%s14215_s24 + $0x18] sm:$0xff]  ;;  %1440 = vmatpush.bf16.msrb.mxu2 %v9280_v37 }
 0x41a   :  { %1177 = vmatpush.bf16.msra.mxu3 %v9255_v38  ;;  %v6173_v38 = vld [vmem:[#allocation54 + $0x8] sm:$0xff] }
 0x41f   :  { %5611 = vperm.xlu2 %9624, %v5517_v39   ;;  %v9263_v39 = vld [vmem:[%s14215_s24 + $0x58] sm:$0xff] }
 0x420   :  { %4755 = vperm.xlu0 %9622, %v4653_v40   ;;  %v9271_v40 = vld [vmem:[%s14215_s24 + $0x98] sm:$0xff]  ;;  %1265 = vmatpush.bf16.msrb.mxu0 %v9263_v39  ;;  %v6087_v39 = vld [vmem:[#allocation60 + $0x18] sm:$0xff] }
 0x421   :  { %5606 = vperm.xlu1 %9623, %v5516_v42   ;;  %v11704_v42 = vpop.permute.xlu0 %1644  ;;  %1353 = vmatpush.bf16.msrb.mxu1 %v9271_v40  ;;  %v6172_v40 = vld [vmem:[#allocation54] sm:$0xff] }
 0x427   :  { %5586 = vperm.xlu2 %9624, %v5512_v45   ;;  %v9279_v45 = vld [vmem:[%s14215_s24 + $0xd8] sm:$0xff] }
 0x428   :  { %5596 = vperm.xlu0 %9622, %v5514_v46   ;;  %v11707_v46 = vpop.permute.xlu2 %1838  ;;  %1441 = vmatpush.bf16.msrb.mxu2 %v9279_v45 }
 0x429   :  { %5601 = vperm.xlu1 %9623, %v5515_v47   ;;  %v5525_v47 = vld [vmem:[#allocation28 + $0xb8] sm:$0xff] }
 0x42f   :  { %5581 = vperm.xlu2 %9624, %v5511_v51   ;;  %v5527_v51 = vld [vmem:[#allocation28 + $0xc8] sm:$0xff] }
 0x430   :  { %5591 = vperm.xlu0 %9622, %v5513_v52   ;;  %v11709_v52 = vpop.permute.xlu1 %1833  ;;  %v11721_v12 = vpop.permute.xlu2 %1853 }
 0x431   :  { %5576 = vperm.xlu1 %9623, %v5510_v53   ;;  %v9254_v53 = vld [vmem:[%s14215_s24 + $0x10] sm:$0xff] }
 0x432   :  { %1178 = vmatpush.bf16.msra.mxu3 %v9254_v53 }
 0x437   :  { %5556 = vperm.xlu2 %9624, %v5506_v56   ;;  %v9262_v56 = vld [vmem:[%s14215_s24 + $0x50] sm:$0xff] }
 0x438   :  { %5566 = vperm.xlu0 %9622, %v5508_v58   ;;  %v9270_v58 = vld [vmem:[%s14215_s24 + $0x90] sm:$0xff]  ;;  %1266 = vmatpush.bf16.msrb.mxu0 %v9262_v56  ;;  %v11727_v22 = vpop.permute.xlu1 %1848  ;;  %v11731_v29 = vpop.permute.xlu2 %1868 }
 0x439   :  { %5571 = vperm.xlu1 %9623, %v5509_v59   ;;  %v5524_v59 = vld [vmem:[#allocation28 + $0xb0] sm:$0xff]  ;;  %1354 = vmatpush.bf16.msrb.mxu1 %v9270_v58 }
 0x43a   :  { %v6270_v58 = vld [vmem:[#allocation46] sm:$0xff] }
 0x43f   :  { %5551 = vperm.xlu2 %9624, %v5505_v61   ;;  %v9278_v61 = vld [vmem:[%s14215_s24 + $0xd0] sm:$0xff] }
 0x440   :  { %5561 = vperm.xlu0 %9622, %v5507_v63   ;;  %v9253_v63 = vld [vmem:[%s14215_s24 + $0x8] sm:$0xff]  ;;  %1442 = vmatpush.bf16.msrb.mxu2 %v9278_v61  ;;  %v11733_v19 = vpop.permute.xlu1 %1863  ;;  %v11737_v34 = vpop.permute.xlu2 %2361  ;;  %v6174_v61 = vld [vmem:[#allocation54 + $0x10] sm:$0xff] }
 0x441   :  { %5546 = vperm.xlu1 %9623, %v5504_v0   ;;  %v9261_v0 = vld [vmem:[%s14215_s24 + $0x48] sm:$0xff]  ;;  %1179 = vmatpush.bf16.msra.mxu3 %v9253_v63 }
 0x442   :  { %1267 = vmatpush.bf16.msrb.mxu0 %v9261_v0 }
 0x445   :  { %1180 = vmatpush.bf16.msra.mxu3 %v9252_v13 }
 0x446   :  { %1268 = vmatpush.bf16.msrb.mxu0 %v9260_v14 }
 0x447   :  { %5686 = vperm.xlu2 %9624, %v5532_v2   ;;  %v9269_v2 = vld [vmem:[%s14215_s24 + $0x88] sm:$0xff] }
 0x448   :  { %5536 = vperm.xlu0 %9622, %v5502_v3   ;;  %v9277_v3 = vld [vmem:[%s14215_s24 + $0xc8] sm:$0xff]  ;;  %1355 = vmatpush.bf16.msrb.mxu1 %v9269_v2  ;;  %v6175_v2 = vld [vmem:[#allocation54 + $0x18] sm:$0xff] }
 0x449   :  { %5541 = vperm.xlu1 %9623, %v5503_v5   ;;  %v11719_v5 = vpop.permute.xlu0 %1843  ;;  %1443 = vmatpush.bf16.msrb.mxu2 %v9277_v3 }
 0x44f   :  { %5681 = vperm.xlu2 %9624, %v5531_v15   ;;  %v9268_v15 = vld [vmem:[%s14215_s24 + $0x80] sm:$0xff] }
 0x450   :  { %5691 = vperm.xlu0 %9622, %v5533_v20   ;;  %v9276_v20 = vld [vmem:[%s14215_s24 + $0xc0] sm:$0xff]  ;;  %1356 = vmatpush.bf16.msrb.mxu1 %v9268_v15 }
 0x451   :  { %5676 = vperm.xlu1 %9623, %v5530_v23   ;;  %1444 = vmatpush.bf16.msrb.mxu2 %v9276_v20  ;;  %v5519_v23 = vld [vmem:[#allocation28 + $0x88] sm:$0xff]  ;;  %v11729_v27 = vpop.permute.xlu0 %1858  ;;  %v6380_v20 = vld [vmem:[#allocation39] sm:$0xff] }
 0x457   :  { %5656 = vperm.xlu2 %9624, %v5526_v31   ;;  %v6084_v31 = vld [vmem:[#allocation60] sm:$0xff] }
 0x458   :  { %5666 = vperm.xlu0 %9622, %v5528_v33  }
 0x459   :  { %5671 = vperm.xlu1 %9623, %v5529_v35   ;;  %v11735_v33 = vpop.permute.xlu0 %2371  ;;  %v11739_v35 = vpop.permute.xlu1 %2376 }
 0x45f   :  { %5651 = vperm.xlu2 %9624, %v5525_v47  }
 0x460   :  { %5661 = vperm.xlu0 %9622, %v5527_v51   ;;  %v11744_v51 = vpop.permute.xlu2 %2356 }
 0x461   :  { %5646 = vperm.xlu1 %9623, %v5524_v59   ;;  %v11741_v45 = vpop.permute.xlu0 %2366  ;;  %v11747_v59 = vpop.permute.xlu1 %2351 }
 0x467   :  { %5626 = vperm.xlu2 %9624, %v5520_v8  }
 0x468   :  { %5636 = vperm.xlu0 %9622, %v5522_v9   ;;  %v11759_v8 = vpop.permute.xlu2 %2331  ;;  %v6272_v9 = vld [vmem:[#allocation46 + $0x10] sm:$0xff] }
 0x469   :  { %5641 = vperm.xlu1 %9623, %v5523_v17   ;;  %v11761_v13 = vpop.permute.xlu1 %2346 }
 0x46a   :  { %14217 = vst [vmem:[#allocation123_spill] sm:$0xff] %v11761_v13 }
 0x46f   :  { %5621 = vperm.xlu2 %9624, %v5519_v23   ;;  %v6382_v23 = vld [vmem:[#allocation39 + $0x10] sm:$0xff] }
 0x470   :  { %5631 = vperm.xlu0 %9622, %v5521_v24  }
 0x471   :  { %5616 = vperm.xlu1 %9623, %v5518_v28  }
 0x477   :  { %6100 = vperm.xlu2 %9624, %v6086_v21  }
 0x478   :  { %6090 = vperm.xlu0 %9622, %v6084_v31   ;;  %v6383_v31 = vld [vmem:[#allocation39 + $0x18] sm:$0xff] }
 0x479   :  { %6095 = vperm.xlu1 %9623, %v6085_v32   ;;  %v11769_v32 = vpop.permute.xlu2 %2326 }
 0x47a   :  { %14219 = vst [vmem:[#allocation125_spill] sm:$0xff] %v11769_v32 }
 0x47e   :  { %v1093_v37 = vpop.f32.mrf.mxu2 }
 0x47f   :  { %6183 = vperm.xlu2 %9624, %v6173_v38   ;;  %v1094_v47 = vadd.f32 %v1093_v37, %v11647_v36  ;;  %v11773_v38 = vpop.permute.xlu1 %2321 }
 0x480   :  { %6105 = vperm.xlu0 %9622, %v6087_v39  }
 0x481   :  { %6178 = vperm.xlu1 %9623, %v6172_v40   ;;  %v1103_v63 = vadd.f32 %v1094_v47, %v11593_v18  ;;  %v6273_v18 = vld [vmem:[#allocation46 + $0x18] sm:$0xff] }
 0x486   :  { %v1095_v53 = vpop.f32.mrf.mxu2 }
 0x487   :  { %v1096_v56 = vadd.f32 %v1095_v53, %v11649_v41  ;;  %6276 = vperm.xlu2 %9624, %v6270_v58   ;;  %v11757_v41 = vpop.permute.xlu0 %2341 }
 0x488   :  { %6188 = vperm.xlu0 %9622, %v6174_v61  }
 0x489   :  { %v1104_v0 = vadd.f32 %v1096_v56, %v11589_v16  ;;  %6193 = vperm.xlu1 %9623, %v6175_v2   ;;  %v6271_v16 = vld [vmem:[#allocation46 + $0x8] sm:$0xff] }
 0x48b   :  { %v11751_v3 = vpack.c.bf16 %v1104_v0, %v1103_v63 }
 0x48d   :  { %14216 = vst [vmem:[#allocation122_spill] sm:$0xff] %v11751_v3  ;;  %1181 = vmatmul.bf16.vlgmr.msra.gmra.mxu3 %v11751_v3  ;;  %1269 = vmatmul.bf16.vlgmr.msrb.gmra.mxu0 %v11751_v3 }
 0x48e   :  { %1357 = vmatmul.bf16.vlgmr.msrb.gmra.mxu1 %v11751_v3  ;;  %1445 = vmatmul.bf16.vlgmr.msrb.gmra.mxu2 %v11751_v3  ;;  %v1098_v36 = vpop.f32.mrf.mxu2 }
 0x48f   :  { %6291 = vperm.xlu2 %9624, %v6273_v18   ;;  %v1099_v14 = vadd.f32 %v1098_v36, %v11653_v44  ;;  %v11765_v24 = vpop.permute.xlu0 %2336 }
 0x490   :  { %6281 = vperm.xlu0 %9622, %v6271_v16   ;;  %14218 = vst [vmem:[#allocation124_spill] sm:$0xff] %v11765_v24 }
 0x491   :  { %6286 = vperm.xlu1 %9623, %v6272_v9   ;;  %v1105_v28 = vadd.f32 %v1099_v14, %v11585_v10  ;;  %v6381_v10 = vld [vmem:[#allocation39 + $0x8] sm:$0xff] }
 0x496   :  { %v1100_v15 = vpop.f32.mrf.mxu2 }
 0x497   :  { %v1101_v17 = vadd.f32 %v1100_v15, %v11651_v43  ;;  %6386 = vperm.xlu2 %9624, %v6380_v20  }
 0x498   :  { %6396 = vperm.xlu0 %9622, %v6382_v23  }
 0x499   :  { %v1106_v21 = vadd.f32 %v1101_v17, %v11587_v11  ;;  %6401 = vperm.xlu1 %9623, %v6383_v31   ;;  %v11779_v11 = vpop.permute.xlu0 %2311 }
 0x49b   :  { %v11771_v37 = vpack.c.bf16 %v1106_v21, %v1105_v28 }
 0x49d   :  { %14220 = vst [vmem:[#allocation126_spill] sm:$0xff] %v11771_v37  ;;  %1186 = vmatmul.bf16.gmra.mxu3 %v11771_v37  ;;  %1274 = vmatmul.bf16.gmra.mxu0 %v11771_v37 }
 0x49e   :  { %1362 = vmatmul.bf16.gmra.mxu1 %v11771_v37  ;;  %1450 = vmatmul.bf16.gmra.mxu2 %v11771_v37 }
 0x4a0   :  { %6391 = vperm.xlu0 %9622, %v6381_v10  }
 0x50a   :  { %v1270_v39 = vpop.f32.mrf.mxu0 }
 0x50b   :  { %v1358_v43 = vpop.f32.mrf.mxu1 }
 0x50c   :  { %v1368_v24 = vpack.c.bf16 %v1358_v43, %v1358_v43 }
 0x510   :  { %v1182_v53 = vpop.f32.mrf.mxu3 }
 0x511   :  { %v1446_v44 = vpop.f32.mrf.mxu2 }
 0x512   :  { %v1272_v56 = vpop.f32.mrf.mxu0  ;;  %v1456_v14 = vpack.c.bf16 %v1446_v44, %v1446_v44 }
 0x513   :  { %v1360_v40 = vpop.f32.mrf.mxu1 }
 0x514   :  { %v1500_v21 = vunpack.c.l.b16 %v1456_v14  ;;  %v1369_v3 = vpack.c.bf16 %v1360_v40, %v1360_v40 }
 0x518   :  { %v1184_v63 = vpop.f32.mrf.mxu3 }
 0x519   :  { %v1448_v47 = vpop.f32.mrf.mxu2 }
 0x51a   :  { %v1275_v2 = vpop.f32.mrf.mxu0  ;;  %v1457_v18 = vpack.c.bf16 %v1448_v47, %v1448_v47  ;;  %v1489_v47 = vunpack.c.l.b16 %v1369_v3  ;;  %v1193_v3 = vpack.c.bf16 %v1184_v63, %v1184_v63  ;;  %v9287_v63 = vld [vmem:[#allocation30 + $0x18] sm:$0xff] }
 0x51b   :  { %v1363_v58 = vpop.f32.mrf.mxu1 }
 0x51c   :  { %v1501_v20 = vunpack.c.l.b16 %v1457_v18  ;;  %v1370_v31 = vpack.c.bf16 %v1363_v58, %v1363_v58  ;;  %v1282_v18 = vpack.c.bf16 %v1275_v2, %v1275_v2 }
 0x51e   :  { %v1504_v32 = vpack.c.b16 %v1501_v20, %v1500_v21  ;;  %v1490_v13 = vunpack.c.l.b16 %v1370_v31  ;;  %v1478_v40 = vunpack.c.l.b16 %v1282_v18  ;;  %v9284_v31 = vld [vmem:[#allocation30] sm:$0xff] }
 0x520   :  { %v1187_v10 = vpop.f32.mrf.mxu3 }
 0x521   :  { %v1451_v61 = vpop.f32.mrf.mxu2 }
 0x522   :  { %v1458_v0 = vpack.c.bf16 %v1451_v61, %v1451_v61  ;;  %v1277_v61 = vpop.f32.mrf.mxu0 }
 0x523   :  { %v1365_v9 = vpop.f32.mrf.mxu1  ;;  %v1283_v44 = vpack.c.bf16 %v1277_v61, %v1277_v61  ;;  %v9285_v61 = vld [vmem:[#allocation30 + $0x8] sm:$0xff] }
 0x524   :  { %v1502_v15 = vunpack.c.l.b16 %v1458_v0  ;;  %v1371_v23 = vpack.c.bf16 %v1365_v9, %v1365_v9 }
 0x525   :  { %v1479_v58 = vunpack.c.l.b16 %v1283_v44 }
 0x526   :  { %v1491_v37 = vunpack.c.l.b16 %v1371_v23 }
 0x527   :  { %v1481_v20 = vpack.c.b16 %v1479_v58, %v1478_v40 }
 0x528   :  { %v1493_v0 = vpack.c.b16 %v1491_v37, %v1490_v13  ;;  %v1189_v14 = vpop.f32.mrf.mxu3  ;;  %v1192_v37 = vpack.c.bf16 %v1182_v53, %v1182_v53 }
 0x529   :  { %v1453_v36 = vpop.f32.mrf.mxu2  ;;  %v1195_v43 = vpack.c.bf16 %v1189_v14, %v1189_v14 }
 0x52a   :  { %v1459_v16 = vpack.c.bf16 %v1453_v36, %v1453_v36  ;;  %v1488_v36 = vunpack.c.l.b16 %v1368_v24 }
 0x52b   :  { %v1467_v13 = vunpack.c.l.b16 %v1195_v43 }
 0x52c   :  { %v1503_v17 = vunpack.c.l.b16 %v1459_v16  ;;  %v1281_v16 = vpack.c.bf16 %v1272_v56, %v1272_v56  ;;  %v1492_v9 = vpack.c.b16 %v1489_v47, %v1488_v36  ;;  %v1465_v56 = vunpack.c.l.b16 %v1193_v3 }
 0x52e   :  { %v1505_v28 = vpack.c.b16 %v1503_v17, %v1502_v15  ;;  %v1280_v15 = vpack.c.bf16 %v1270_v39, %v1270_v39  ;;  %v1477_v17 = vunpack.c.l.b16 %v1281_v16  ;;  %v1464_v39 = vunpack.c.l.b16 %v1192_v37 }
 0x530   :  { %1588 = vmatpush.bf16.msra.mxu0 %v1505_v28  ;;  %9496 = vmatpush.bf16.msrb.mxu3 %v1505_v28  ;;  %v1476_v23 = vunpack.c.l.b16 %v1280_v15  ;;  %v1468_v21 = vpack.c.b16 %v1465_v56, %v1464_v39 }
 0x532   :  { %v1480_v24 = vpack.c.b16 %v1477_v17, %v1476_v23  ;;  %v9288_v23 = vld [vmem:[#allocation12] sm:$0xff] }
 0x534   :  { %1589 = vmatpush.bf16.msra.mxu0 %v1504_v32  ;;  %9497 = vmatpush.bf16.msrb.mxu3 %v1504_v32  ;;  %v1194_v32 = vpack.c.bf16 %v1187_v10, %v1187_v10  ;;  %v9286_v10 = vld [vmem:[#allocation30 + $0x10] sm:$0xff] }
 0x536   :  { %v1466_v2 = vunpack.c.l.b16 %v1194_v32  ;;  %v9291_v32 = vld [vmem:[#allocation12 + $0x18] sm:$0xff] }
 0x538   :  { %1590 = vmatpush.bf16.msra.mxu0 %v1493_v0  ;;  %9498 = vmatpush.bf16.msrb.mxu3 %v1493_v0  ;;  %v1469_v28 = vpack.c.b16 %v1467_v13, %v1466_v2 }
 0x53c   :  { %1591 = vmatpush.bf16.msra.mxu0 %v1492_v9  ;;  %9499 = vmatpush.bf16.msrb.mxu3 %v1492_v9 }
 0x540   :  { %1592 = vmatpush.bf16.msra.mxu0 %v1481_v20  ;;  %9500 = vmatpush.bf16.msrb.mxu3 %v1481_v20 }
 0x544   :  { %1593 = vmatpush.bf16.msra.mxu0 %v1480_v24  ;;  %9501 = vmatpush.bf16.msrb.mxu3 %v1480_v24 }
 0x548   :  { %1594 = vmatpush.bf16.msra.mxu0 %v1469_v28  ;;  %9502 = vmatpush.bf16.msrb.mxu3 %v1469_v28 }
 0x54c   :  { %1595 = vmatpush.bf16.msra.mxu0 %v1468_v21  ;;  %9503 = vmatpush.bf16.msrb.mxu3 %v1468_v21 }
 0x54f   :  { %1596 = vmatmul.bf16.vlgmr.msra.gmra.mxu0 %v9284_v31  ;;  %1601 = vmatmul.bf16.vlgmr.msrb.gmra.mxu3 %v9285_v61 }
 0x55f   :  { %1606 = vmatmul.bf16.gmra.mxu3 %v9286_v10 }
 0x56f   :  { %1611 = vmatmul.bf16.gmra.mxu3 %v9287_v63 }
 0x5cc   :  { %v1597_v18 = vpop.f32.mrf.mxu0 }
 0x5d2   :  { %v1602_v53 = vpop.f32.mrf.mxu3 }
 0x5d4   :  { %v1599_v43 = vpop.f32.mrf.mxu0 }
 0x5da   :  { %v1604_v47 = vpop.f32.mrf.mxu3 }
 0x5db   :  { %v11796_v17 = vadd.f32 %v1604_v47, %v11663_v55 }
 0x5e2   :  { %v1607_v44 = vpop.f32.mrf.mxu3 }
 0x5e3   :  { %v11793_v40 = vadd.f32 %v1607_v44, %v11657_v49  ;;  %v11809_v49 = vadd.f32 %v1597_v18, %v11667_v60 }
 0x5ea   :  { %v1609_v0 = vpop.f32.mrf.mxu3 }
 0x5eb   :  { %v11788_v14 = vadd.f32 %v1609_v0, %v11661_v54  ;;  %v11804_v54 = vadd.f32 %v1599_v43, %v11671_v1  ;;  %v9290_v1 = vld [vmem:[#allocation12 + $0x10] sm:$0xff] }
 0x5ed   :  { %v1617_v55 = vpack.c.bf16 %v11804_v54, %v11809_v49 }
 0x5f2   :  { %v1612_v36 = vpop.f32.mrf.mxu3 }
 0x5f3   :  { %v11782_v58 = vadd.f32 %v1612_v36, %v11655_v48  ;;  %v1619_v48 = vpack.c.bf16 %v11788_v14, %v11793_v40 }
 0x5fa   :  { %v1614_v16 = vpop.f32.mrf.mxu3 }
 0x5fb   :  { %v11785_v9 = vadd.f32 %v1614_v16, %v11659_v50  ;;  %v11801_v50 = vadd.f32 %v1602_v53, %v11665_v57  ;;  %v9289_v57 = vld [vmem:[#allocation12 + $0x8] sm:$0xff] }
 0x5fd   :  { %v1620_v15 = vpack.c.bf16 %v11785_v9, %v11782_v58  ;;  %v1618_v20 = vpack.c.bf16 %v11796_v17, %v11801_v50 }
 0x5ff   :  { %1714 = vmatpush.bf16.msrb.mxu0 %v1620_v15 }
 0x603   :  { %1715 = vmatpush.bf16.msrb.mxu0 %v1619_v48 }
 0x607   :  { %1716 = vmatpush.bf16.msrb.mxu0 %v1618_v20 }
 0x60b   :  { %1717 = vmatpush.bf16.msrb.mxu0 %v1617_v55 }
 0x60e   :  { %8346 = vmatmul.msk.bf16.vlgmr.msrb.gmra.mxu0 %vm1697_vm3, %v9288_v23 }
 0x61e   :  { %8347 = vmatmul.msk.bf16.gmra.mxu0 %vm1697_vm3, %v9289_v57 }
 0x62e   :  { %8348 = vmatmul.msk.bf16.gmra.mxu0 %vm1697_vm3, %v9290_v1 }
 0x63e   :  { %8349 = vmatmul.msk.bf16.gmra.mxu0 %vm1697_vm3, %v9291_v32 }
 0x68b   :  { %v1719_v60 = vpop.f32.mrf.mxu0 }
 0x68c   :  { %v11843_v53 = vadd.f32 %v1719_v60, %v11689_v26 }
 0x68e   :  { %v1739_v26 = vmul.f32 %v11843_v53, %v11843_v53 }
 0x690   :  { %v1747_v1 = vmul.f32 %v1739_v26, %v11843_v53 }
 0x693   :  { %v1721_v3 = vpop.f32.mrf.mxu0 }
 0x694   :  { %v11836_v63 = vadd.f32 %v1721_v3, %v11704_v42 }
 0x696   :  { %v1740_v42 = vmul.f32 %v11836_v63, %v11836_v63 }
 0x698   :  { %v1748_v20 = vmul.f32 %v1740_v42, %v11836_v63 }
 0x69b   :  { %v1724_v13 = vpop.f32.mrf.mxu0 }
 0x69c   :  { %v11829_v31 = vadd.f32 %v1724_v13, %v11687_v25 }
 0x69e   :  { %v1741_v25 = vmul.f32 %v11829_v31, %v11829_v31 }
 0x6a0   :  { %v1749_v18 = vmul.f32 %v1741_v25, %v11829_v31 }
 0x6a2   :  { %v1757_v32 = vmul.f32 0.044715, %v1749_v18 }
 0x6a3   :  { %v1726_v24 = vpop.f32.mrf.mxu0 }
 0x6a4   :  { %v11824_v39 = vadd.f32 %v1726_v24, %v11695_v30 }
 0x6a6   :  { %v1742_v10 = vmul.f32 %v11824_v39, %v11824_v39 }
 0x6a8   :  { %v1750_v0 = vmul.f32 %v1742_v10, %v11824_v39  ;;  %v1765_v10 = vadd.f32 %v1757_v32, %v11829_v31 }
 0x6aa   :  { %v1758_v48 = vmul.f32 0.044715, %v1750_v0  ;;  %v1773_v0 = vmul.f32 0.7978846, %v1765_v10 }
 0x6ab   :  { %v1729_v37 = vpop.f32.mrf.mxu0 }
 0x6ac   :  { %v11821_v28 = vadd.f32 %v1729_v37, %v11677_v7  ;;  %v1766_v24 = vadd.f32 %v1758_v48, %v11824_v39  ;;  %v1756_v37 = vmul.f32 0.044715, %v1748_v20 }
 0x6ae   :  { %v1743_v61 = vmul.f32 %v11821_v28, %v11821_v28  ;;  %v1774_v25 = vmul.f32 0.7978846, %v1766_v24 }
 0x6b0   :  { %v1751_v47 = vmul.f32 %v1743_v61, %v11821_v28  ;;  %v1755_v61 = vmul.f32 0.044715, %v1747_v1 }
 0x6b2   :  { %v1759_v16 = vmul.f32 0.044715, %v1751_v47 }
 0x6b3   :  { %v1731_v2 = vpop.f32.mrf.mxu0 }
 0x6b4   :  { %v11818_v56 = vadd.f32 %v1731_v2, %v11675_v6  ;;  %v1767_v60 = vadd.f32 %v1759_v16, %v11821_v28 }
 0x6b6   :  { %v1744_v21 = vmul.f32 %v11818_v56, %v11818_v56 }
 0x6b8   :  { %v1752_v7 = vmul.f32 %v1744_v21, %v11818_v56 }
 0x6ba   :  { %v1760_v36 = vmul.f32 0.044715, %v1752_v7 }
 0x6bb   :  { %v1734_v6 = vpop.f32.mrf.mxu0 }
 0x6bc   :  { %v11840_v30 = vadd.f32 %v1734_v6, %v11669_v62  ;;  %v1768_v55 = vadd.f32 %v1760_v36, %v11818_v56  ;;  %v1775_v6 = vmul.f32 0.7978846, %v1767_v60 }
 0x6be   :  { %v1745_v44 = vmul.f32 %v11840_v30, %v11840_v30  ;;  %v1776_v2 = vmul.f32 0.7978846, %v1768_v55 }
 0x6c0   :  { %v1753_v62 = vmul.f32 %v1745_v44, %v11840_v30  ;;  %v1763_v44 = vadd.f32 %v1755_v61, %v11843_v53 }
 0x6c2   :  { %v1761_v15 = vmul.f32 0.044715, %v1753_v62  ;;  %v1771_v18 = vmul.f32 0.7978846, %v1763_v44 }
 0x6c3   :  { %v1736_v43 = vpop.f32.mrf.mxu0 }
 0x6c4   :  { %v1769_v23 = vadd.f32 %v1761_v15, %v11840_v30  ;;  %v1737_v57 = vadd.f32 %v1736_v43, %v11673_v4  ;;  %v1764_v4 = vadd.f32 %v1756_v37, %v11836_v63 }
 0x6c6   :  { %v1777_v3 = vmul.f32 0.7978846, %v1769_v23  ;;  %v1746_v13 = vmul.f32 %v1737_v57, %v1737_v57  ;;  %v1772_v62 = vmul.f32 0.7978846, %v1764_v4 }
 0x6c8   :  { %v1754_v21 = vmul.f32 %v1746_v13, %v1737_v57  ;;  %9633 = vtanh.f32 %v1777_v3 }
 0x6c9   :  { %9635 = vtanh.f32 %v1776_v2 }
 0x6ca   :  { %v1762_v7 = vmul.f32 0.044715, %v1754_v21  ;;  %9637 = vtanh.f32 %v1775_v6 }
 0x6cb   :  { %9639 = vtanh.f32 %v1774_v25 }
 0x6cc   :  { %v1770_v47 = vadd.f32 %v1762_v7, %v1737_v57 }
 0x6ce   :  { %v1778_v42 = vmul.f32 0.7978846, %v1770_v47  ;;  %v9634_v36 = vpop.eup %9633 }
 0x6cf   :  { %v9636_v26 = vpop.eup %9635  ;;  %v1793_v16 = vadd.f32 1.0, %v9634_v36 }
 0x6d0   :  { %9641 = vtanh.f32 %v1778_v42  ;;  %v9638_v15 = vpop.eup %9637  ;;  %v1792_v43 = vadd.f32 1.0, %v9636_v26 }
 0x6d1   :  { %9643 = vtanh.f32 %v1773_v0  ;;  %v9640_v48 = vpop.eup %9639  ;;  %v1801_v55 = vmul.f32 0.5, %v1793_v16  ;;  %v1791_v1 = vadd.f32 1.0, %v9638_v15  ;;  %v9292_v15 = vld [vmem:[#allocation15] sm:$0xff] }
 0x6d2   :  { %9645 = vtanh.f32 %v1772_v62  ;;  %v1800_v3 = vmul.f32 0.5, %v1792_v43  ;;  %v1790_v13 = vadd.f32 1.0, %v9640_v48  ;;  %v9295_v48 = vld [vmem:[#allocation15 + $0x18] sm:$0xff] }
 0x6d3   :  { %9647 = vtanh.f32 %v1771_v18  ;;  %v1809_v37 = vmul.f32 %v1801_v55, %v11840_v30  ;;  %v1799_v21 = vmul.f32 0.5, %v1791_v1  ;;  %v9299_v43 = vld [vmem:[#allocation34 + $0x18] sm:$0xff]  ;;  %v9298_v55 = vld [vmem:[#allocation34 + $0x10] sm:$0xff] }
 0x6d4   :  { %v1808_v7 = vmul.f32 %v1800_v3, %v11818_v56  ;;  %v1798_v25 = vmul.f32 0.5, %v1790_v13  ;;  %2032 = vmatpush.bf16.msra.mxu3 %v9299_v43  ;;  %v9302_v1 = vld [vmem:[#allocation34 + $0x30] sm:$0xff] }
 0x6d5   :  { %v1807_v47 = vmul.f32 %v1799_v21, %v11821_v28  ;;  %v9293_v28 = vld [vmem:[#allocation15 + $0x8] sm:$0xff] }
 0x6d6   :  { %v9642_v20 = vpop.eup %9641  ;;  %v1806_v36 = vmul.f32 %v1798_v25, %v11824_v39  ;;  %v9294_v39 = vld [vmem:[#allocation15 + $0x10] sm:$0xff] }
 0x6d7   :  { %v1794_v23 = vadd.f32 1.0, %v9642_v20  ;;  %v9644_v32 = vpop.eup %9643  ;;  %v1821_v42 = vpack.c.bf16 %v1808_v7, %v1807_v47  ;;  %v9303_v20 = vld [vmem:[#allocation34 + $0x38] sm:$0xff] }
 0x6d8   :  { %v9646_v24 = vpop.eup %9645  ;;  %v1789_v61 = vadd.f32 1.0, %v9644_v32  ;;  %2033 = vmatpush.bf16.msra.mxu3 %v9298_v55 }
 0x6d9   :  { %v1802_v60 = vmul.f32 0.5, %v1794_v23  ;;  %v9648_v10 = vpop.eup %9647  ;;  %v1788_v4 = vadd.f32 1.0, %v9646_v24  ;;  %v9300_v23 = vld [vmem:[#allocation34 + $0x20] sm:$0xff] }
 0x6da   :  { %v1797_v44 = vmul.f32 0.5, %v1789_v61  ;;  %v1787_v0 = vadd.f32 1.0, %v9648_v10 }
 0x6db   :  { %v1810_v2 = vmul.f32 %v1802_v60, %v1737_v57  ;;  %v1796_v62 = vmul.f32 0.5, %v1788_v4 }
 0x6dc   :  { %v1805_v30 = vmul.f32 %v1797_v44, %v11829_v31  ;;  %v1795_v57 = vmul.f32 0.5, %v1787_v0  ;;  %v9297_v31 = vld [vmem:[#allocation34 + $0x8] sm:$0xff] }
 0x6dd   :  { %v1822_v6 = vpack.c.bf16 %v1810_v2, %v1809_v37  ;;  %v1804_v18 = vmul.f32 %v1796_v62, %v11836_v63  ;;  %v9301_v63 = vld [vmem:[#allocation34 + $0x28] sm:$0xff]  ;;  %1978 = vmatpush.bf16.msra.mxu2 %v9297_v31 }
 0x6de   :  { %v1820_v26 = vpack.c.bf16 %v1806_v36, %v1805_v30  ;;  %v1803_v56 = vmul.f32 %v1795_v57, %v11843_v53  ;;  %2086 = vmatpush.bf16.msra.mxu0 %v9301_v63  ;;  %v9296_v53 = vld [vmem:[#allocation34] sm:$0xff] }
 0x6df   :  { %1907 = vmatpush.bf16.msra.mxu1 %v1822_v6 }
 0x6e0   :  { %v1819_v16 = vpack.c.bf16 %v1804_v18, %v1803_v56 }
 0x6e1   :  { %1979 = vmatpush.bf16.msra.mxu2 %v9296_v53 }
 0x6e2   :  { %2087 = vmatpush.bf16.msra.mxu0 %v9300_v23 }
 0x6e3   :  { %1908 = vmatpush.bf16.msra.mxu1 %v1821_v42 }
 0x6e7   :  { %1909 = vmatpush.bf16.msra.mxu1 %v1820_v26 }
 0x6eb   :  { %1910 = vmatpush.bf16.msra.mxu1 %v1819_v16 }
 0x6ee   :  { %8366 = vmatmul.msk.bf16.vlgmr.msra.gmra.mxu1 %vm1697_vm3, %v9292_v15 }
 0x6ef   :  { %2140 = vmatpush.bf16.msrb.mxu1 %v9303_v20 }
 0x6f3   :  { %2141 = vmatpush.bf16.msrb.mxu1 %v9302_v1 }
 0x6fe   :  { %8367 = vmatmul.msk.bf16.gmra.mxu1 %vm1697_vm3, %v9293_v28 }
 0x70e   :  { %8368 = vmatmul.msk.bf16.gmra.mxu1 %vm1697_vm3, %v9294_v39 }
 0x71e   :  { %8369 = vmatmul.msk.bf16.gmra.mxu1 %vm1697_vm3, %v9295_v48 }
 0x76b   :  { %v1912_v32 = vpop.f32.mrf.mxu1 }
 0x76c   :  { %v1913_v60 = vadd.f32 %v1912_v32, %v11709_v52 }
 0x76e   :  { %v1932_v24 = vadd.f32 %v1913_v60, %v11809_v49 }
 0x773   :  { %v1914_v3 = vpop.f32.mrf.mxu1 }
 0x774   :  { %v1915_v13 = vadd.f32 %v1914_v3, %v11707_v46 }
 0x776   :  { %v1933_v37 = vadd.f32 %v1915_v13, %v11804_v54 }
 0x778   :  { %v11882_v2 = vpack.c.bf16 %v1933_v37, %v1932_v24 }
 0x77a   :  { %14221 = vst [vmem:[#allocation127_spill] sm:$0xff] %v11882_v2  ;;  %8378 = vmatmul.msk.bf16.vlgmr.msra.gmra.mxu2 %vm976_vm2, %v11882_v2  ;;  %8390 = vmatmul.msk.bf16.vlgmr.msra.gmra.mxu3 %vm976_vm2, %v11882_v2 }
 0x77b   :  { %8402 = vmatmul.msk.bf16.vlgmr.msra.gmra.mxu0 %vm976_vm2, %v11882_v2  ;;  %8414 = vmatmul.msk.bf16.vlgmr.msrb.gmra.mxu1 %vm976_vm2, %v11882_v2  ;;  %v1917_v52 = vpop.f32.mrf.mxu1 }
 0x77c   :  { %v1918_v46 = vadd.f32 %v1917_v52, %v11719_v5 }
 0x77e   :  { %v1934_v21 = vadd.f32 %v1918_v46, %v11801_v50 }
 0x783   :  { %v1919_v49 = vpop.f32.mrf.mxu1 }
 0x784   :  { %v1920_v54 = vadd.f32 %v1919_v49, %v11727_v22 }
 0x786   :  { %v1935_v61 = vadd.f32 %v1920_v54, %v11796_v17 }
 0x788   :  { %v11896_v10 = vpack.c.bf16 %v1935_v61, %v1934_v21 }
 0x78a   :  { %14222 = vst [vmem:[#allocation128_spill] sm:$0xff] %v11896_v10  ;;  %8379 = vmatmul.msk.bf16.gmra.mxu2 %vm976_vm2, %v11896_v10  ;;  %8391 = vmatmul.msk.bf16.gmra.mxu3 %vm976_vm2, %v11896_v10 }
 0x78b   :  { %8403 = vmatmul.msk.bf16.gmra.mxu0 %vm976_vm2, %v11896_v10  ;;  %8415 = vmatmul.msk.bf16.gmra.mxu1 %vm976_vm2, %v11896_v10  ;;  %v1922_v5 = vpop.f32.mrf.mxu1 }
 0x78c   :  { %v1923_v22 = vadd.f32 %v1922_v5, %v11721_v12 }
 0x78e   :  { %v1936_v6 = vadd.f32 %v1923_v22, %v11793_v40 }
 0x793   :  { %v1924_v50 = vpop.f32.mrf.mxu1 }
 0x794   :  { %v1925_v17 = vadd.f32 %v1924_v50, %v11729_v27 }
 0x796   :  { %v1937_v7 = vadd.f32 %v1925_v17, %v11788_v14 }
 0x798   :  { %v11910_v25 = vpack.c.bf16 %v1937_v7, %v1936_v6 }
 0x79a   :  { %14223 = vst [vmem:[#allocation129_spill] sm:$0xff] %v11910_v25  ;;  %8380 = vmatmul.msk.bf16.gmra.mxu2 %vm976_vm2, %v11910_v25  ;;  %8392 = vmatmul.msk.bf16.gmra.mxu3 %vm976_vm2, %v11910_v25 }
 0x79b   :  { %8404 = vmatmul.msk.bf16.gmra.mxu0 %vm976_vm2, %v11910_v25  ;;  %8416 = vmatmul.msk.bf16.gmra.mxu1 %vm976_vm2, %v11910_v25  ;;  %v1927_v12 = vpop.f32.mrf.mxu1 }
 0x79c   :  { %v1928_v27 = vadd.f32 %v1927_v12, %v11733_v19 }
 0x79e   :  { %v1938_v4 = vadd.f32 %v1928_v27, %v11782_v58 }
 0x7a3   :  { %v1929_v40 = vpop.f32.mrf.mxu1 }
 0x7a4   :  { %v1930_v14 = vadd.f32 %v1929_v40, %v11731_v29 }
 0x7a6   :  { %v1939_v47 = vadd.f32 %v1930_v14, %v11785_v9 }
 0x7a8   :  { %v11924_v44 = vpack.c.bf16 %v1939_v47, %v1938_v4 }
 0x7aa   :  { %14224 = vst [vmem:[#allocation130_spill] sm:$0xff] %v11924_v44  ;;  %8381 = vmatmul.msk.bf16.gmra.mxu2 %vm976_vm2, %v11924_v44  ;;  %8393 = vmatmul.msk.bf16.gmra.mxu3 %vm976_vm2, %v11924_v44 }
 0x7ab   :  { %8405 = vmatmul.msk.bf16.gmra.mxu0 %vm976_vm2, %v11924_v44  ;;  %8417 = vmatmul.msk.bf16.gmra.mxu1 %vm976_vm2, %v11924_v44 }
 0x7f8   :  { %v11934_v19 = vpop.f32.mrf.mxu0  ;;  %v11936_v29 = vpop.f32.mrf.mxu1 }
 0x7fd   :  { %v11938_v58 = vpop.f32.mrf.mxu2  ;;  %v11940_v9 = vpop.f32.mrf.mxu3 }
 0x800   :  { %v11942_v0 = vpop.f32.mrf.mxu0  ;;  %v2145_v42 = vpop.f32.mrf.mxu1 }
 0x801   :  { %v2164_v14 = vpack.c.bf16 %v2145_v42, %v2145_v42 }
 0x805   :  { %v11944_v36 = vpop.f32.mrf.mxu2  ;;  %v11946_v62 = vpop.f32.mrf.mxu3 }
 0x806   :  { %v2056_v42 = vpack.c.bf16 %v11946_v62, %v11946_v62 }
 0x808   :  { %v11948_v30 = vpop.f32.mrf.mxu0  ;;  %v2148_v57 = vpop.f32.mrf.mxu1 }
 0x809   :  { %v2165_v6 = vpack.c.bf16 %v2148_v57, %v2148_v57  ;;  %v2252_v57 = vunpack.c.l.b16 %v2164_v14  ;;  %v2111_v14 = vpack.c.bf16 %v11948_v30, %v11948_v30  ;;  %v2109_v30 = vpack.c.bf16 %v11934_v19, %v11934_v19 }
 0x80a   :  { %v2001_v19 = vpack.c.bf16 %v11938_v58, %v11938_v58  ;;  %v8428_v58 = vld [vmem:[#allocation33 + $0x10] sm:$0xf] }
 0x80d   :  { %v11950_v26 = vpop.f32.mrf.mxu2  ;;  %v2040_v18 = vpop.f32.mrf.mxu3 }
 0x810   :  { %v2150_v56 = vpop.f32.mrf.mxu1  ;;  %v11952_v16 = vpop.f32.mrf.mxu0 }
 0x811   :  { %v2166_v54 = vpack.c.bf16 %v2150_v56, %v2150_v56  ;;  %v2163_v56 = vpack.c.bf16 %v11936_v29, %v11936_v29  ;;  %v2055_v29 = vpack.c.bf16 %v11940_v9, %v11940_v9  ;;  %v2112_v9 = vpack.c.bf16 %v11952_v16, %v11952_v16 }
 0x812   :  { %v2110_v16 = vpack.c.bf16 %v11942_v0, %v11942_v0  ;;  %v2002_v0 = vpack.c.bf16 %v11944_v36, %v11944_v36  ;;  %v9305_v36 = vld [vmem:[#allocation33 + $0x4] sm:$0xf0] }
 0x813   :  { %v2254_v4 = vunpack.c.l.b16 %v2166_v54 }
 0x815   :  { %v2042_v15 = vpop.f32.mrf.mxu3  ;;  %v11954_v28 = vpop.f32.mrf.mxu2 }
 0x818   :  { %v2153_v39 = vpop.f32.mrf.mxu1  ;;  %v11956_v48 = vpop.f32.mrf.mxu0 }
 0x819   :  { %v2167_v37 = vpack.c.bf16 %v2153_v39, %v2153_v39  ;;  %v2058_v39 = vpack.c.bf16 %v2042_v15, %v2042_v15  ;;  %v2251_v15 = vunpack.c.l.b16 %v2163_v56  ;;  %v2113_v62 = vpack.c.bf16 %v11956_v48, %v11956_v48 }
 0x81b   :  { %v2255_v7 = vunpack.c.l.b16 %v2167_v37 }
 0x81d   :  { %v2045_v31 = vpop.f32.mrf.mxu3  ;;  %v11958_v63 = vpop.f32.mrf.mxu2 }
 0x81e   :  { %v2059_v12 = vpack.c.bf16 %v2045_v31, %v2045_v31  ;;  %v2005_v48 = vpack.c.bf16 %v11958_v63, %v11958_v63  ;;  %v2003_v63 = vpack.c.bf16 %v11950_v26, %v11950_v26  ;;  %v2180_v26 = vunpack.c.l.b16 %v2002_v0  ;;  %v8468_v0 = vld [vmem:[#allocation33 + $0x60] sm:$0xf] }
 0x820   :  { %v2155_v43 = vpop.f32.mrf.mxu1  ;;  %v11960_v53 = vpop.f32.mrf.mxu0  ;;  %v2183_v56 = vunpack.c.l.b16 %v2005_v48  ;;  %v8454_v48 = vld [vmem:[#allocation33 + $0x48] sm:$0xf0] }
 0x821   :  { %v2168_v13 = vpack.c.bf16 %v2155_v43, %v2155_v43 }
 0x823   :  { %v2256_v21 = vunpack.c.l.b16 %v2168_v13 }
 0x825   :  { %v2047_v20 = vpop.f32.mrf.mxu3  ;;  %v11962_v23 = vpop.f32.mrf.mxu2  ;;  %v2261_v47 = vpack.c.b16 %v2256_v21, %v2255_v7  ;;  %v2259_v21 = vpack.c.b16 %v2252_v57, %v2251_v15 }
 0x826   :  { %v2060_v50 = vpack.c.bf16 %v2047_v20, %v2047_v20  ;;  %v2057_v20 = vpack.c.bf16 %v2040_v18, %v2040_v18  ;;  %v2114_v18 = vpack.c.bf16 %v11960_v53, %v11960_v53  ;;  %v2006_v53 = vpack.c.bf16 %v11962_v23, %v11962_v23 }
 0x827   :  { %v2004_v23 = vpack.c.bf16 %v11954_v28, %v11954_v28  ;;  %v2227_v28 = vunpack.c.l.b16 %v2109_v30  ;;  %v8460_v30 = vld [vmem:[#allocation33 + $0x50] sm:$0xf] }
 0x828   :  { %v2158_v55 = vpop.f32.mrf.mxu1  ;;  %v2104_v60 = vpop.f32.mrf.mxu0  ;;  %v2208_v43 = vunpack.c.l.b16 %v2060_v50  ;;  %v2232_v7 = vunpack.c.l.b16 %v2114_v18  ;;  %v9306_v18 = vld [vmem:[#allocation33 + $0x14] sm:$0xf] }
 0x829   :  { %v2169_v32 = vpack.c.bf16 %v2158_v55, %v2158_v55 }
 0x82b   :  { %v2257_v52 = vunpack.c.l.b16 %v2169_v32  ;;  %v2253_v32 = vunpack.c.l.b16 %v2165_v6 }
 0x82d   :  { %v2050_v1 = vpop.f32.mrf.mxu3  ;;  %v1996_v61 = vpop.f32.mrf.mxu2  ;;  %v2260_v31 = vpack.c.b16 %v2254_v4, %v2253_v32  ;;  %v2231_v4 = vunpack.c.l.b16 %v2113_v62  ;;  %v2228_v32 = vunpack.c.l.b16 %v2110_v16  ;;  %v8438_v62 = vld [vmem:[#allocation33 + $0x28] sm:$0xf0]  ;;  %v8452_v16 = vld [vmem:[#allocation33 + $0x40] sm:$0xf] }
 0x82e   :  { %v2061_v49 = vpack.c.bf16 %v2050_v1, %v2050_v1  ;;  %v2007_v6 = vpack.c.bf16 %v1996_v61, %v1996_v61 }
 0x830   :  { %v2160_v3 = vpop.f32.mrf.mxu1  ;;  %v2209_v27 = vunpack.c.l.b16 %v2061_v49  ;;  %v2106_v55 = vpop.f32.mrf.mxu0  ;;  %v2205_v49 = vunpack.c.l.b16 %v2057_v20  ;;  %v2185_v61 = vunpack.c.l.b16 %v2007_v6  ;;  %v9309_v6 = vld [vmem:[#allocation33 + $0x24] sm:$0xf0] }
 0x831   :  { %v2170_v24 = vpack.c.bf16 %v2160_v3, %v2160_v3  ;;  %v2207_v3 = vunpack.c.l.b16 %v2059_v12  ;;  %v2116_v13 = vpack.c.bf16 %v2106_v55, %v2106_v55 }
 0x833   :  { %v2258_v46 = vunpack.c.l.b16 %v2170_v24  ;;  %v2206_v24 = vunpack.c.l.b16 %v2058_v39  ;;  %v2213_v37 = vpack.c.b16 %v2208_v43, %v2207_v3  ;;  %v2234_v54 = vunpack.c.l.b16 %v2116_v13  ;;  %v9304_v13 = vld [vmem:[#allocation33 + $0x4] sm:$0xf] }
 0x834   :  { %v2237_v39 = vpack.c.b16 %v2232_v7, %v2231_v4  ;;  %v2184_v43 = vunpack.c.l.b16 %v2006_v53  ;;  %v2182_v3 = vunpack.c.l.b16 %v2004_v23  ;;  %v9310_v7 = vld [vmem:[#allocation33 + $0x34] sm:$0xf]  ;;  %v9312_v4 = vld [vmem:[#allocation33 + $0x44] sm:$0xf] }
 0x835   :  { %v2262_v5 = vpack.c.b16 %v2258_v46, %v2257_v52  ;;  %v2052_v22 = vpop.f32.mrf.mxu3  ;;  %v2115_v52 = vpack.c.bf16 %v2104_v60, %v2104_v60  ;;  %v1998_v46 = vpop.f32.mrf.mxu2  ;;  %v2212_v50 = vpack.c.b16 %v2206_v24, %v2205_v49  ;;  %v2203_v60 = vunpack.c.l.b16 %v2055_v29  ;;  %v9314_v23 = vld [vmem:[#allocation33 + $0x54] sm:$0xf] }
 0x836   :  { %v2062_v17 = vpack.c.bf16 %v2052_v22, %v2052_v22  ;;  %v2008_v22 = vpack.c.bf16 %v1998_v46, %v1998_v46  ;;  %v2189_v57 = vpack.c.b16 %v2184_v43, %v2183_v56  ;;  %v2235_v24 = vpack.c.b16 %v2228_v32, %v2227_v28  ;;  %v8420_v46 = vld [vmem:[#allocation33] sm:$0xf]  ;;  %v8462_v43 = vld [vmem:[#allocation33 + $0x58] sm:$0xf0]  ;;  %v9316_v56 = vld [vmem:[#allocation33 + $0x64] sm:$0xf] }
 0x837   :  { %2508 = vmatpush.bf16.msrb.mxu3 %v2262_v5  ;;  %v2204_v5 = vunpack.c.l.b16 %v2056_v42  ;;  %v2181_v42 = vunpack.c.l.b16 %v2003_v63  ;;  %v8421_v49 = vor.u32 %v9305_v36, %v8420_v46  ;;  %v8470_v32 = vld [vmem:[#allocation33 + $0x68] sm:$0xf0]  ;;  %v9318_v28 = vld [vmem:[#allocation33 + $0x74] sm:$0xf] }
 0x838   :  { %v2210_v40 = vunpack.c.l.b16 %v2062_v17  ;;  %v2233_v17 = vunpack.c.l.b16 %v2115_v52  ;;  %v2179_v52 = vunpack.c.l.b16 %v2001_v19  ;;  %v8476_v19 = vld [vmem:[#allocation33 + $0x70] sm:$0xf] }
 0x83a   :  { %v2214_v1 = vpack.c.b16 %v2210_v40, %v2209_v27  ;;  %v2238_v12 = vpack.c.b16 %v2234_v54, %v2233_v17  ;;  %v2186_v27 = vunpack.c.l.b16 %v2008_v22  ;;  %v2211_v40 = vpack.c.b16 %v2204_v5, %v2203_v60  ;;  %v8430_v54 = vld [vmem:[#allocation33 + $0x18] sm:$0xf0]  ;;  %v9307_v5 = vld [vmem:[#allocation33 + $0x14] sm:$0xf0]  ;;  %v8436_v60 = vld [vmem:[#allocation33 + $0x20] sm:$0xf] }
 0x83b   :  { %2509 = vmatpush.bf16.msrb.mxu3 %v2261_v47  ;;  %v2230_v47 = vunpack.c.l.b16 %v2112_v9  ;;  %v2187_v29 = vpack.c.b16 %v2180_v26, %v2179_v52  ;;  %v8429_v22 = vor.u32 %v9307_v5, %v8428_v58  ;;  %v8437_v9 = vor.u32 %v9309_v6, %v8436_v60 }
 0x83c   :  { %2459 = vmatpush.bf16.msrb.mxu2 %v2214_v1  ;;  %v2190_v55 = vpack.c.b16 %v2186_v27, %v2185_v61  ;;  %v2229_v1 = vunpack.c.l.b16 %v2111_v14  ;;  %v8444_v27 = vld [vmem:[#allocation33 + $0x30] sm:$0xf]  ;;  %v8457_v61 = vor.u32 %v9312_v4, %v8454_v48 }
 0x83e   :  { %v2236_v20 = vpack.c.b16 %v2230_v47, %v2229_v1  ;;  %v9313_v47 = vld [vmem:[#allocation33 + $0x44] sm:$0xf0]  ;;  %v9315_v1 = vld [vmem:[#allocation33 + $0x54] sm:$0xf0] }
 0x83f   :  { %2510 = vmatpush.bf16.msrb.mxu3 %v2260_v31  ;;  %v8422_v31 = vld [vmem:[#allocation33 + $0x8] sm:$0xf0]  ;;  %v8461_v63 = vor.u32 %v9315_v1, %v8460_v30 }
 0x840   :  { %2460 = vmatpush.bf16.msrb.mxu2 %v2213_v37  ;;  %v2188_v37 = vpack.c.b16 %v2182_v3, %v2181_v42  ;;  %v8425_v15 = vor.u32 %v9304_v13, %v8422_v31  ;;  %v9317_v3 = vld [vmem:[#allocation33 + $0x64] sm:$0xf0]  ;;  %v8478_v13 = vld [vmem:[#allocation33 + $0x78] sm:$0xf0]  ;;  %v9319_v42 = vld [vmem:[#allocation33 + $0x74] sm:$0xf0] }
 0x841   :  { %v8481_v31 = vor.u32 %v9318_v28, %v8478_v13 }
 0x843   :  { %2511 = vmatpush.bf16.msrb.mxu3 %v2259_v21  ;;  %v8433_v21 = vor.u32 %v9306_v18, %v8430_v54 }
 0x844   :  { %2461 = vmatpush.bf16.msrb.mxu2 %v2212_v50  ;;  %v9308_v50 = vld [vmem:[#allocation33 + $0x24] sm:$0xf] }
 0x845   :  { %v8441_v17 = vor.u32 %v9308_v50, %v8438_v62 }
 0x847   :  { %2512 = vmatpush.bf16.msrb.mxu3 %v2238_v12  ;;  %v8446_v12 = vld [vmem:[#allocation33 + $0x38] sm:$0xf0] }
 0x848   :  { %2462 = vmatpush.bf16.msrb.mxu2 %v2211_v40  ;;  %v8449_v53 = vor.u32 %v9310_v7, %v8446_v12  ;;  %v9311_v40 = vld [vmem:[#allocation33 + $0x34] sm:$0xf0] }
 0x849   :  { %v8445_v14 = vor.u32 %v9311_v40, %v8444_v27 }
 0x84b   :  { %2513 = vmatpush.bf16.msrb.mxu3 %v2237_v39  ;;  %v8453_v39 = vor.u32 %v9313_v47, %v8452_v16 }
 0x84c   :  { %2463 = vmatpush.bf16.msrb.mxu2 %v2190_v55  ;;  %v8465_v55 = vor.u32 %v9314_v23, %v8462_v43 }
 0x84f   :  { %2514 = vmatpush.bf16.msrb.mxu3 %v2236_v20  ;;  %v8473_v20 = vor.u32 %v9316_v56, %v8470_v32 }
 0x850   :  { %2464 = vmatpush.bf16.msrb.mxu2 %v2189_v57  ;;  %v8469_v57 = vor.u32 %v9317_v3, %v8468_v0 }
 0x853   :  { %2515 = vmatpush.bf16.msrb.mxu3 %v2235_v24  ;;  %v8477_v24 = vor.u32 %v9319_v42, %v8476_v19 }
 0x854   :  { %2465 = vmatpush.bf16.msrb.mxu2 %v2188_v37  ;;  %v2302_v37 = vpop.permute.xlu2 %2301 }
 0x856   :  { %2516 = vmatmul.bf16.vlgmr.msrb.gmra.mxu3 %v8425_v15 }
 0x858   :  { %2466 = vmatpush.bf16.msrb.mxu2 %v2187_v29 }
 0x85b   :  { %2467 = vmatmul.bf16.vlgmr.msrb.gmra.mxu2 %v8421_v49 }
 0x866   :  { %2521 = vmatmul.bf16.gmra.mxu3 %v8433_v21 }
 0x86b   :  { %2472 = vmatmul.bf16.gmra.mxu2 %v8429_v22 }
 0x876   :  { %2526 = vmatmul.bf16.gmra.mxu3 %v8441_v17 }
 0x87b   :  { %2477 = vmatmul.bf16.gmra.mxu2 %v8437_v9 }
 0x886   :  { %2531 = vmatmul.bf16.gmra.mxu3 %v8449_v53 }
 0x88b   :  { %2482 = vmatmul.bf16.gmra.mxu2 %v8445_v14 }
 0x896   :  { %2536 = vmatmul.bf16.gmra.mxu3 %v8457_v61 }
 0x89b   :  { %2487 = vmatmul.bf16.gmra.mxu2 %v8453_v39 }
 0x8a6   :  { %2541 = vmatmul.bf16.gmra.mxu3 %v8465_v55 }
 0x8ab   :  { %2492 = vmatmul.bf16.gmra.mxu2 %v8461_v63 }
 0x8b6   :  { %2546 = vmatmul.bf16.gmra.mxu3 %v8473_v20 }
 0x8bb   :  { %2497 = vmatmul.bf16.gmra.mxu2 %v8469_v57 }
 0x8c6   :  { %2551 = vmatmul.bf16.gmra.mxu3 %v8481_v31 }
 0x8cb   :  { %2502 = vmatmul.bf16.gmra.mxu2 %v8477_v24 }
 0x8d9   :  { %v2517_v26 = vpop.f32.mrf.mxu3 }
 0x8de   :  { %v2468_v15 = vpop.f32.mrf.mxu2 }
 0x8df   :  { %v2469_v52 = vadd.f32 %v2468_v15, %v2302_v37 }
 0x8e1   :  { %v11994_v46 = vadd.f32 %v2517_v26, %v2469_v52  ;;  %v11996_v36 = vpop.f32.mrf.mxu3  ;;  %v14227_v52 = vld [vmem:[#allocation125_spill] sm:$0xff] }
 0x8e6   :  { %v11998_v29 = vpop.f32.mrf.mxu2 }
 0x8e9   :  { %v2522_v49 = vpop.f32.mrf.mxu3 }
 0x8ee   :  { %v2473_v18 = vpop.f32.mrf.mxu2 }
 0x8ef   :  { %v2474_v54 = vadd.f32 %v2473_v18, %v11779_v11 }
 0x8f1   :  { %v12001_v21 = vadd.f32 %v2522_v49, %v2474_v54  ;;  %v12003_v58 = vpop.f32.mrf.mxu3 }
 0x8f6   :  { %v2475_v5 = vpop.f32.mrf.mxu2 }
 0x8f9   :  { %v2527_v22 = vpop.f32.mrf.mxu3 }
 0x8fe   :  { %v2478_v50 = vpop.f32.mrf.mxu2 }
 0x8ff   :  { %v2479_v62 = vadd.f32 %v2478_v50, %v11773_v38 }
 0x901   :  { %v12006_v17 = vadd.f32 %v2527_v22, %v2479_v62  ;;  %v2529_v60 = vpop.f32.mrf.mxu3  ;;  %v2317_v22 = vpop.permute.xlu1 %2316 }
 0x902   :  { %v2476_v50 = vadd.f32 %v2475_v5, %v2317_v22 }
 0x906   :  { %v2480_v6 = vpop.f32.mrf.mxu2 }
 0x907   :  { %v2481_v49 = vadd.f32 %v2480_v6, %v14227_v52 }
 0x909   :  { %v2532_v9 = vpop.f32.mrf.mxu3  ;;  %v12047_v62 = vadd.f32 %v2529_v60, %v2481_v49 }
 0x90b   :  { %v2559_v6 = vpack.c.bf16 %v12047_v62, %v12006_v17 }
 0x90e   :  { %v2483_v7 = vpop.f32.mrf.mxu2 }
 0x90f   :  { %v2484_v12 = vadd.f32 %v2483_v7, %v11759_v8  ;;  %v2307_v7 = vpop.permute.xlu0 %2306 }
 0x911   :  { %v12009_v53 = vadd.f32 %v2532_v9, %v2484_v12  ;;  %v2534_v11 = vpop.f32.mrf.mxu3  ;;  %v2471_v12 = vadd.f32 %v11998_v29, %v2307_v7  ;;  %v9321_v29 = vld [vmem:[#allocation18 + $0x8] sm:$0xff] }
 0x916   :  { %v2485_v27 = vpop.f32.mrf.mxu2 }
 0x919   :  { %v2537_v40 = vpop.f32.mrf.mxu3 }
 0x91e   :  { %v2488_v14 = vpop.f32.mrf.mxu2 }
 0x91f   :  { %v2489_v4 = vadd.f32 %v2488_v14, %v11757_v41  ;;  %v9323_v14 = vld [vmem:[#allocation18 + $0x18] sm:$0xff] }
 0x921   :  { %v12012_v48 = vadd.f32 %v2537_v40, %v2489_v4  ;;  %v2539_v61 = vpop.f32.mrf.mxu3  ;;  %v9320_v40 = vld [vmem:[#allocation18] sm:$0xff] }
 0x922   :  { %v9324_v4 = vld [vmem:[#allocation18 + $0x20] sm:$0xff] }
 0x926   :  { %v2490_v38 = vpop.f32.mrf.mxu2 }
 0x929   :  { %v2542_v16 = vpop.f32.mrf.mxu3 }
 0x92e   :  { %v2493_v47 = vpop.f32.mrf.mxu2 }
 0x931   :  { %v2544_v39 = vpop.f32.mrf.mxu3 }
 0x936   :  { %v2495_v23 = vpop.f32.mrf.mxu2 }
 0x937   :  { %v2496_v13 = vadd.f32 %v2495_v23, %v11744_v51  ;;  %v14226_v51 = vld [vmem:[#allocation124_spill] sm:$0xff] }
 0x938   :  { %v2486_v37 = vadd.f32 %v2485_v27, %v14226_v51  ;;  %v12053_v27 = vadd.f32 %v12003_v58, %v2476_v50  ;;  %v9322_v58 = vld [vmem:[#allocation18 + $0x10] sm:$0xff] }
 0x939   :  { %v2547_v43 = vpop.f32.mrf.mxu3  ;;  %v12031_v24 = vadd.f32 %v2544_v39, %v2496_v13 }
 0x93a   :  { %v12043_v18 = vadd.f32 %v2534_v11, %v2486_v37  ;;  %v12058_v11 = vadd.f32 %v11996_v36, %v2471_v12  ;;  %v2558_v5 = vpack.c.bf16 %v12053_v27, %v12001_v21  ;;  %v9325_v36 = vld [vmem:[#allocation18 + $0x28] sm:$0xff] }
 0x93c   :  { %v2560_v9 = vpack.c.bf16 %v12043_v18, %v12009_v53  ;;  %v2557_v60 = vpack.c.bf16 %v12058_v11, %v11994_v46 }
 0x93e   :  { %v2498_v55 = vpop.f32.mrf.mxu2 }
 0x93f   :  { %v2499_v3 = vadd.f32 %v2498_v55, %v11737_v34 }
 0x941   :  { %v2549_v30 = vpop.f32.mrf.mxu3  ;;  %v12028_v42 = vadd.f32 %v2547_v43, %v2499_v3  ;;  %v2660_v3 = vpop.permute.xlu0 %2659 }
 0x946   :  { %v2500_v8 = vpop.f32.mrf.mxu2 }
 0x947   :  { %v2501_v20 = vadd.f32 %v2500_v8, %v11741_v45 }
 0x949   :  { %v2552_v1 = vpop.f32.mrf.mxu3  ;;  %v12023_v31 = vadd.f32 %v2549_v30, %v2501_v20  ;;  %v2675_v20 = vpop.permute.xlu2 %2674 }
 0x94b   :  { %v2563_v34 = vpack.c.bf16 %v12023_v31, %v12028_v42 }
 0x94e   :  { %v2503_v63 = vpop.f32.mrf.mxu2 }
 0x94f   :  { %v2504_v56 = vadd.f32 %v2503_v63, %v11735_v33  ;;  %v2494_v33 = vadd.f32 %v2493_v47, %v11747_v59 }
 0x951   :  { %v2554_v0 = vpop.f32.mrf.mxu3  ;;  %v12018_v57 = vadd.f32 %v2552_v1, %v2504_v56  ;;  %v12035_v26 = vadd.f32 %v2542_v16, %v2494_v33  ;;  %v2670_v56 = vpop.permute.xlu1 %2669 }
 0x952   :  { %v2650_v13 = vpop.permute.xlu2 %2649 }
 0x953   :  { %v2562_v59 = vpack.c.bf16 %v12031_v24, %v12035_v26 }
 0x956   :  { %v2505_v32 = vpop.f32.mrf.mxu2 }
 0x957   :  { %v2506_v41 = vadd.f32 %v2505_v32, %v11739_v35  ;;  %v14225_v35 = vld [vmem:[#allocation123_spill] sm:$0xff] }
 0x958   :  { %v2491_v45 = vadd.f32 %v2490_v38, %v14225_v35  ;;  %v9327_v38 = vld [vmem:[#allocation18 + $0x38] sm:$0xff]  ;;  %v2655_v35 = vpop.permute.xlu0 %2654 }
 0x959   :  { %v12020_v28 = vadd.f32 %v2554_v0, %v2506_v41  ;;  %v2665_v41 = vpop.permute.xlu1 %2664 }
 0x95a   :  { %v12038_v15 = vadd.f32 %v2539_v61, %v2491_v45  ;;  %v9326_v61 = vld [vmem:[#allocation18 + $0x30] sm:$0xff]  ;;  %v2645_v45 = vpop.permute.xlu2 %2644 }
 0x95b   :  { %v2564_v19 = vpack.c.bf16 %v12020_v28, %v12018_v57 }
 0x95c   :  { %v2561_v54 = vpack.c.bf16 %v12038_v15, %v12012_v48 }
 0x95d   :  { %2725 = vmatpush.bf16.msrb.mxu0 %v2564_v19 }
 0x960   :  { %v2630_v49 = vpop.permute.xlu0 %2629 }
 0x961   :  { %2726 = vmatpush.bf16.msrb.mxu0 %v2563_v34  ;;  %v2640_v33 = vpop.permute.xlu1 %2639 }
 0x962   :  { %v2620_v12 = vpop.permute.xlu2 %2619 }
 0x965   :  { %2727 = vmatpush.bf16.msrb.mxu0 %v2562_v59 }
 0x969   :  { %2728 = vmatpush.bf16.msrb.mxu0 %v2561_v54  ;;  %v2635_v37 = vpop.permute.xlu1 %2634 }
 0x96d   :  { %2729 = vmatpush.bf16.msrb.mxu0 %v2560_v9 }
 0x971   :  { %2730 = vmatpush.bf16.msrb.mxu0 %v2559_v6 }
 0x975   :  { %2731 = vmatpush.bf16.msrb.mxu0 %v2558_v5 }
 0x979   :  { %2732 = vmatpush.bf16.msrb.mxu0 %v2557_v60 }
 0x97c   :  { %2733 = vmatmul.bf16.vlgmr.msrb.gmra.mxu0 %v9320_v40 }
 0x98c   :  { %2738 = vmatmul.bf16.gmra.mxu0 %v9321_v29 }
 0x99c   :  { %2743 = vmatmul.bf16.gmra.mxu0 %v9322_v58 }
 0x9ac   :  { %2748 = vmatmul.bf16.gmra.mxu0 %v9323_v14 }
 0x9bc   :  { %2753 = vmatmul.bf16.gmra.mxu0 %v9324_v4 }
 0x9cc   :  { %2758 = vmatmul.bf16.gmra.mxu0 %v9325_v36 }
 0x9dc   :  { %2763 = vmatmul.bf16.gmra.mxu0 %v9326_v61  ;;  %v2610_v61 = vpop.permute.xlu1 %2609 }
 0x9ec   :  { %2768 = vmatmul.bf16.gmra.mxu0 %v9327_v38 }
 0x9f9   :  { %v12064_v16 = vpop.f32.mrf.mxu0 }
 0xa01   :  { %v12066_v47 = vpop.f32.mrf.mxu0 }
 0xa09   :  { %v12068_v39 = vpop.f32.mrf.mxu0 }
 0xa11   :  { %v12070_v23 = vpop.f32.mrf.mxu0 }
 0xa19   :  { %v2744_v43 = vpop.f32.mrf.mxu0 }
 0xa21   :  { %v2746_v55 = vpop.f32.mrf.mxu0 }
 0xa29   :  { %v2749_v30 = vpop.f32.mrf.mxu0 }
 0xa31   :  { %v2751_v8 = vpop.f32.mrf.mxu0 }
 0xa32   :  { %v12098_v4 = vadd.f32 %v2751_v8, %v2635_v37 }
 0xa39   :  { %v2754_v1 = vpop.f32.mrf.mxu0 }
 0xa3a   :  { %v12091_v40 = vadd.f32 %v2754_v1, %v2640_v33 }
 0xa41   :  { %v2756_v63 = vpop.f32.mrf.mxu0 }
 0xa42   :  { %v12086_v6 = vadd.f32 %v2756_v63, %v2645_v45 }
 0xa44   :  { %v2783_v38 = vmul.f32 %v12086_v6, %v12086_v6 }
 0xa46   :  { %v2799_v45 = vmul.f32 %v2783_v38, %v12086_v6 }
 0xa49   :  { %v2759_v32 = vpop.f32.mrf.mxu0 }
 0xa4a   :  { %v12080_v22 = vadd.f32 %v2759_v32, %v2650_v13  ;;  %v2782_v32 = vmul.f32 %v12091_v40, %v12091_v40 }
 0xa4c   :  { %v2784_v29 = vmul.f32 %v12080_v22, %v12080_v22 }
 0xa51   :  { %v2761_v0 = vpop.f32.mrf.mxu0 }
 0xa52   :  { %v12076_v52 = vadd.f32 %v2761_v0, %v2655_v35  ;;  %v2800_v0 = vmul.f32 %v2784_v29, %v12080_v22 }
 0xa54   :  { %v2785_v9 = vmul.f32 %v12076_v52, %v12076_v52 }
 0xa56   :  { %v2801_v36 = vmul.f32 %v2785_v9, %v12076_v52  ;;  %v2816_v9 = vmul.f32 0.044715, %v2800_v0 }
 0xa58   :  { %v2817_v33 = vmul.f32 0.044715, %v2801_v36  ;;  %v2832_v0 = vadd.f32 %v2816_v9, %v12080_v22 }
 0xa59   :  { %v2764_v19 = vpop.f32.mrf.mxu0 }
 0xa5a   :  { %v12074_v59 = vadd.f32 %v2764_v19, %v2660_v3  ;;  %v2781_v19 = vmul.f32 %v12098_v4, %v12098_v4 }
 0xa5c   :  { %v2786_v50 = vmul.f32 %v12074_v59, %v12074_v59 }
 0xa5e   :  { %v2802_v58 = vmul.f32 %v2786_v50, %v12074_v59  ;;  %v2615_v50 = vpop.permute.xlu2 %2614 }
 0xa60   :  { %v2818_v3 = vmul.f32 0.044715, %v2802_v58  ;;  %v12127_v58 = vadd.f32 %v12070_v23, %v2615_v50 }
 0xa61   :  { %v2766_v34 = vpop.f32.mrf.mxu0 }
 0xa62   :  { %v12072_v51 = vadd.f32 %v2766_v34, %v2665_v41  ;;  %v2625_v41 = vpop.permute.xlu0 %2624 }
 0xa63   :  { %v12109_v13 = vadd.f32 %v2746_v55, %v2625_v41  ;;  %v2798_v55 = vmul.f32 %v2782_v32, %v12091_v40  ;;  %v2605_v41 = vpop.permute.xlu1 %2604 }
 0xa64   :  { %v2787_v54 = vmul.f32 %v12072_v51, %v12072_v51 }
 0xa65   :  { %v2814_v32 = vmul.f32 0.044715, %v2798_v55 }
 0xa66   :  { %v2803_v5 = vmul.f32 %v2787_v54, %v12072_v51 }
 0xa67   :  { %v2830_v9 = vadd.f32 %v2814_v32, %v12091_v40 }
 0xa68   :  { %v2819_v63 = vmul.f32 0.044715, %v2803_v5 }
 0xa69   :  { %v2769_v7 = vpop.f32.mrf.mxu0 }
 0xa6a   :  { %v12089_v60 = vadd.f32 %v2769_v7, %v2670_v56  ;;  %v12104_v56 = vadd.f32 %v2749_v30, %v2630_v49  ;;  %v2835_v30 = vadd.f32 %v2819_v63, %v12072_v51  ;;  %v12118_v49 = vadd.f32 %v2744_v43, %v2620_v12 }
 0xa6b   :  { %v2834_v7 = vadd.f32 %v2818_v3, %v12074_v59  ;;  %v2779_v43 = vmul.f32 %v12109_v13, %v12109_v13  ;;  %v2797_v12 = vmul.f32 %v2781_v19, %v12098_v4  ;;  %v12135_v63 = vadd.f32 %v12068_v39, %v2610_v61 }
 0xa6c   :  { %v2788_v14 = vmul.f32 %v12089_v60, %v12089_v60  ;;  %v2780_v54 = vmul.f32 %v12104_v56, %v12104_v56  ;;  %v2851_v36 = vmul.f32 0.7978846, %v2835_v30  ;;  %v12142_v19 = vadd.f32 %v12066_v47, %v2605_v41 }
 0xa6d   :  { %v2850_v3 = vmul.f32 0.7978846, %v2834_v7  ;;  %v2795_v39 = vmul.f32 %v2779_v43, %v12109_v13  ;;  %v2776_v47 = vmul.f32 %v12135_v63, %v12135_v63  ;;  %v2848_v7 = vmul.f32 0.7978846, %v2832_v0 }
 0xa6e   :  { %v2804_v1 = vmul.f32 %v2788_v14, %v12089_v60  ;;  %v2815_v14 = vmul.f32 0.044715, %v2799_v45  ;;  %v2796_v23 = vmul.f32 %v2780_v54, %v12104_v56  ;;  %v2813_v45 = vmul.f32 0.044715, %v2797_v12 }
 0xa6f   :  { %v2846_v41 = vmul.f32 0.7978846, %v2830_v9 }
 0xa70   :  { %v2820_v8 = vmul.f32 0.044715, %v2804_v1  ;;  %v2778_v1 = vmul.f32 %v12118_v49, %v12118_v49  ;;  %v2831_v30 = vadd.f32 %v2815_v14, %v12086_v6  ;;  %v2812_v50 = vmul.f32 0.044715, %v2796_v23 }
 0xa71   :  { %v2771_v35 = vpop.f32.mrf.mxu0  ;;  %v2829_v12 = vadd.f32 %v2813_v45, %v12098_v4 }
 0xa72   :  { %v2836_v34 = vadd.f32 %v2820_v8, %v12089_v60  ;;  %v12116_v37 = vadd.f32 %v2771_v35, %v2675_v20  ;;  %v2833_v20 = vadd.f32 %v2817_v33, %v12076_v52  ;;  %v2777_v33 = vmul.f32 %v12127_v58, %v12127_v58  ;;  %v2600_v35 = vpop.permute.xlu0 %2599 }
 0xa73   :  { %v12150_v54 = vadd.f32 %v12064_v16, %v2600_v35  ;;  %v2794_v55 = vmul.f32 %v2778_v1, %v12118_v49  ;;  %v2811_v16 = vmul.f32 0.044715, %v2795_v39  ;;  %v2847_v14 = vmul.f32 0.7978846, %v2831_v30 }
 0xa74   :  { %v2852_v5 = vmul.f32 0.7978846, %v2836_v34  ;;  %v2789_v29 = vmul.f32 %v12116_v37, %v12116_v37  ;;  %v2849_v61 = vmul.f32 0.7978846, %v2833_v20  ;;  %v2793_v43 = vmul.f32 %v2777_v33, %v12127_v58 }
 0xa75   :  { %v2810_v23 = vmul.f32 0.044715, %v2794_v55  ;;  %v2828_v32 = vadd.f32 %v2812_v50, %v12104_v56  ;;  %v2827_v39 = vadd.f32 %v2811_v16, %v12109_v13 }
 0xa76   :  { %v2805_v38 = vmul.f32 %v2789_v29, %v12116_v37  ;;  %9649 = vtanh.f32 %v2852_v5  ;;  %v2775_v29 = vmul.f32 %v12142_v19, %v12142_v19  ;;  %v2809_v33 = vmul.f32 0.044715, %v2793_v43 }
 0xa77   :  { %9651 = vtanh.f32 %v2851_v36  ;;  %v2774_v36 = vmul.f32 %v12150_v54, %v12150_v54  ;;  %v2826_v55 = vadd.f32 %v2810_v23, %v12118_v49  ;;  %v2844_v50 = vmul.f32 0.7978846, %v2828_v32 }
 0xa78   :  { %v2821_v8 = vmul.f32 0.044715, %v2805_v38  ;;  %9653 = vtanh.f32 %v2850_v3  ;;  %v2792_v38 = vmul.f32 %v2776_v47, %v12135_v63  ;;  %v2791_v0 = vmul.f32 %v2775_v29, %v12142_v19 }
 0xa79   :  { %9655 = vtanh.f32 %v2849_v61  ;;  %v2845_v61 = vmul.f32 0.7978846, %v2829_v12  ;;  %v2790_v45 = vmul.f32 %v2774_v36, %v12150_v54  ;;  %v2825_v43 = vadd.f32 %v2809_v33, %v12127_v58 }
 0xa7a   :  { %v2837_v34 = vadd.f32 %v2821_v8, %v12116_v37  ;;  %v2808_v47 = vmul.f32 0.044715, %v2792_v38  ;;  %v2843_v16 = vmul.f32 0.7978846, %v2827_v39  ;;  %v2842_v10 = vmul.f32 0.7978846, %v2826_v55 }
 0xa7b   :  { %v2841_v33 = vmul.f32 0.7978846, %v2825_v43 }
 0xa7c   :  { %v2853_v5 = vmul.f32 0.7978846, %v2837_v34  ;;  %v9650_v20 = vpop.eup %9649  ;;  %v2824_v38 = vadd.f32 %v2808_v47, %v12135_v63 }
 0xa7d   :  { %v9652_v1 = vpop.eup %9651  ;;  %v2884_v3 = vadd.f32 1.0, %v9650_v20  ;;  %v2807_v20 = vmul.f32 0.044715, %v2791_v0 }
 0xa7e   :  { %9657 = vtanh.f32 %v2853_v5  ;;  %v9654_v8 = vpop.eup %9653  ;;  %v2883_v30 = vadd.f32 1.0, %v9652_v1  ;;  %v2806_v1 = vmul.f32 0.044715, %v2790_v45  ;;  %v2840_v47 = vmul.f32 0.7978846, %v2824_v38 }
 0xa7f   :  { %9659 = vtanh.f32 %v2848_v7  ;;  %v9656_v35 = vpop.eup %9655  ;;  %v2900_v9 = vmul.f32 0.5, %v2884_v3  ;;  %v2882_v5 = vadd.f32 1.0, %v9654_v8  ;;  %v2823_v8 = vadd.f32 %v2807_v20, %v12142_v19 }
 0xa80   :  { %9661 = vtanh.f32 %v2847_v14  ;;  %v2899_v14 = vmul.f32 0.5, %v2883_v30  ;;  %v2881_v2 = vadd.f32 1.0, %v9656_v35 }
 0xa81   :  { %9663 = vtanh.f32 %v2846_v41  ;;  %v2916_v23 = vmul.f32 %v2900_v9, %v12089_v60  ;;  %v2898_v41 = vmul.f32 0.5, %v2882_v5  ;;  %v2839_v9 = vmul.f32 0.7978846, %v2823_v8 }
 0xa82   :  { %9665 = vtanh.f32 %v2845_v61  ;;  %v2915_v61 = vmul.f32 %v2899_v14, %v12072_v51  ;;  %v2897_v35 = vmul.f32 0.5, %v2881_v2 }
 0xa83   :  { %9667 = vtanh.f32 %v2844_v50  ;;  %v2914_v60 = vmul.f32 %v2898_v41, %v12074_v59 }
 0xa84   :  { %v9658_v34 = vpop.eup %9657  ;;  %9669 = vtanh.f32 %v2843_v16  ;;  %v2913_v5 = vmul.f32 %v2897_v35, %v12076_v52 }
 0xa85   :  { %v2885_v7 = vadd.f32 1.0, %v9658_v34  ;;  %v9660_v29 = vpop.eup %9659  ;;  %v2822_v34 = vadd.f32 %v2806_v1, %v12150_v54  ;;  %9671 = vtanh.f32 %v2842_v10 }
 0xa86   :  { %v9662_v36 = vpop.eup %9661  ;;  %v2880_v3 = vadd.f32 1.0, %v9660_v29  ;;  %9673 = vtanh.f32 %v2841_v33 }
 0xa87   :  { %v2901_v12 = vmul.f32 0.5, %v2885_v7  ;;  %v9664_v0 = vpop.eup %9663  ;;  %v2879_v45 = vadd.f32 1.0, %v9662_v36  ;;  %v2940_v7 = vpack.c.bf16 %v2915_v61, %v2914_v60  ;;  %v2838_v20 = vmul.f32 0.7978846, %v2822_v34 }
 0xa88   :  { %v9666_v30 = vpop.eup %9665  ;;  %v2878_v55 = vadd.f32 1.0, %v9664_v0  ;;  %9675 = vtanh.f32 %v2840_v47 }
 0xa89   :  { %v2917_v32 = vmul.f32 %v2901_v12, %v12116_v37  ;;  %v2896_v37 = vmul.f32 0.5, %v2880_v3  ;;  %v9668_v50 = vpop.eup %9667  ;;  %v2895_v29 = vmul.f32 0.5, %v2879_v45  ;;  %v2877_v51 = vadd.f32 1.0, %v9666_v30 }
 0xa8a   :  { %v9670_v2 = vpop.eup %9669  ;;  %v2894_v10 = vmul.f32 0.5, %v2878_v55  ;;  %v2876_v16 = vadd.f32 1.0, %v9668_v50  ;;  %9677 = vtanh.f32 %v2839_v9 }
 0xa8b   :  { %v2941_v39 = vpack.c.bf16 %v2917_v32, %v2916_v23  ;;  %v2912_v43 = vmul.f32 %v2896_v37, %v12080_v22  ;;  %v9672_v12 = vpop.eup %9671  ;;  %v2911_v14 = vmul.f32 %v2895_v29, %v12086_v6  ;;  %v2893_v36 = vmul.f32 0.5, %v2877_v51  ;;  %v9328_v51 = vld [vmem:[#allocation21] sm:$0xff] }
 0xa8c   :  { %v2875_v1 = vadd.f32 1.0, %v9670_v2  ;;  %v9674_v38 = vpop.eup %9673  ;;  %9679 = vtanh.f32 %v2838_v20  ;;  %v2910_v52 = vmul.f32 %v2894_v10, %v12091_v40  ;;  %v2892_v23 = vmul.f32 0.5, %v2876_v16  ;;  %v9330_v2 = vld [vmem:[#allocation21 + $0x10] sm:$0xff]  ;;  %v9332_v20 = vld [vmem:[#allocation21 + $0x20] sm:$0xff] }
 0xa8d   :  { %3086 = vmatpush.bf16.msra.mxu1 %v2941_v39  ;;  %v2939_v59 = vpack.c.bf16 %v2913_v5, %v2912_v43  ;;  %v2874_v32 = vadd.f32 1.0, %v9672_v12  ;;  %v2909_v22 = vmul.f32 %v2893_v36, %v12098_v4  ;;  %v2873_v8 = vadd.f32 1.0, %v9674_v38  ;;  %v9334_v43 = vld [vmem:[#allocation21 + $0x30] sm:$0xff]  ;;  %v3255_v10 = vld [vmem:[#allocation36 + $0x4] sm:$0xf] }
 0xa8e   :  { %v9676_v41 = vpop.eup %9675  ;;  %v2938_v3 = vpack.c.bf16 %v2911_v14, %v2910_v52  ;;  %v2891_v0 = vmul.f32 0.5, %v2875_v1  ;;  %v2908_v39 = vmul.f32 %v2892_v23, %v12104_v56  ;;  %v3257_v16 = vsel %vm3185_vm4, %v3255_v10, 0  ;;  %v3325_v12 = vld [vmem:[#allocation36 + $0x8] sm:$0xf]  ;;  %v9335_v1 = vld [vmem:[#allocation21 + $0x38] sm:$0xff]  ;;  %v2961_v52 = vpop.permute.xlu2 %2960 }
 0xa8f   :  { %v2890_v6 = vmul.f32 0.5, %v2874_v32  ;;  %v2872_v61 = vadd.f32 1.0, %v9676_v41  ;;  %v2889_v34 = vmul.f32 0.5, %v2873_v8  ;;  %3266 = vmatpush.bf16.msra.mxu3 %v3257_v16  ;;  %v3327_v14 = vsel %vm3185_vm4, %v3325_v12, 0  ;;  %v2966_v32 = vpop.permute.xlu0 %2965 }
 0xa90   :  { %v9678_v33 = vpop.eup %9677  ;;  %v2937_v45 = vpack.c.bf16 %v2909_v22, %v2908_v39  ;;  %v2907_v30 = vmul.f32 %v2891_v0, %v12109_v13  ;;  %3336 = vmatpush.bf16.msra.mxu0 %v3327_v14  ;;  %v2971_v39 = vpop.permute.xlu1 %2970 }
 0xa91   :  { %3087 = vmatpush.bf16.msra.mxu1 %v2940_v7  ;;  %v2871_v40 = vadd.f32 1.0, %v9678_v33  ;;  %v2906_v47 = vmul.f32 %v2890_v6, %v12118_v49  ;;  %v2888_v60 = vmul.f32 0.5, %v2872_v61  ;;  %v2905_v55 = vmul.f32 %v2889_v34, %v12127_v58  ;;  %v9329_v49 = vld [vmem:[#allocation21 + $0x8] sm:$0xff]  ;;  %v9331_v58 = vld [vmem:[#allocation21 + $0x18] sm:$0xff] }
 0xa92   :  { %v9680_v35 = vpop.eup %9679 }
 0xa93   :  { %v2870_v37 = vadd.f32 1.0, %v9680_v35  ;;  %v2936_v4 = vpack.c.bf16 %v2907_v30, %v2906_v47  ;;  %v2887_v50 = vmul.f32 0.5, %v2871_v40  ;;  %v2904_v56 = vmul.f32 %v2888_v60, %v12135_v63  ;;  %v9333_v63 = vld [vmem:[#allocation21 + $0x28] sm:$0xff] }
 0xa95   :  { %3088 = vmatpush.bf16.msra.mxu1 %v2939_v59  ;;  %v2886_v9 = vmul.f32 0.5, %v2870_v37  ;;  %v2935_v7 = vpack.c.bf16 %v2905_v55, %v2904_v56  ;;  %v2903_v5 = vmul.f32 %v2887_v50, %v12142_v19  ;;  %v3159_v19 = vld [vmem:[#allocation36] sm:$0xf]  ;;  %v3395_v59 = vld [vmem:[#allocation36 + $0xc] sm:$0xf] }
 0xa96   :  { %v3397_v36 = vsel %vm3185_vm4, %v3395_v59, 0  ;;  %v2976_v6 = vpop.permute.xlu2 %2975 }
 0xa97   :  { %v2902_v13 = vmul.f32 %v2886_v9, %v12150_v54  ;;  %v3187_v54 = vsel %vm3185_vm4, %v3159_v19, 0  ;;  %v2981_v40 = vpop.permute.xlu0 %2980 }
 0xa98   :  { %3196 = vmatpush.bf16.msra.mxu2 %v3187_v54 }
 0xa99   :  { %3089 = vmatpush.bf16.msra.mxu1 %v2938_v3  ;;  %v2934_v29 = vpack.c.bf16 %v2903_v5, %v2902_v13 }
 0xa9d   :  { %3090 = vmatpush.bf16.msra.mxu1 %v2937_v45 }
 0xa9e   :  { %v2991_v56 = vpop.permute.xlu2 %2990 }
 0xaa1   :  { %3091 = vmatpush.bf16.msra.mxu1 %v2936_v4 }
 0xaa5   :  { %3092 = vmatpush.bf16.msra.mxu1 %v2935_v7 }
 0xaa9   :  { %3093 = vmatpush.bf16.msra.mxu1 %v2934_v29 }
 0xaac   :  { %3094 = vmatmul.bf16.vlgmr.msra.gmra.mxu1 %v9328_v51 }
 0xaad   :  { %3406 = vmatpush.bf16.msrb.mxu1 %v3397_v36 }
 0xabc   :  { %3099 = vmatmul.bf16.gmra.mxu1 %v9329_v49 }
 0xacc   :  { %3104 = vmatmul.bf16.gmra.mxu1 %v9330_v2 }
 0xadc   :  { %3109 = vmatmul.bf16.gmra.mxu1 %v9331_v58 }
 0xaec   :  { %3114 = vmatmul.bf16.gmra.mxu1 %v9332_v20 }
 0xafc   :  { %3119 = vmatmul.bf16.gmra.mxu1 %v9333_v63 }
 0xb0c   :  { %3124 = vmatmul.bf16.gmra.mxu1 %v9334_v43 }
 0xb1c   :  { %3129 = vmatmul.bf16.gmra.mxu1 %v9335_v1 }
 0xb29   :  { %v3095_v38 = vpop.f32.mrf.mxu1 }
 0xb2a   :  { %v3096_v23 = vadd.f32 %v3095_v38, %v2961_v52 }
 0xb2c   :  { %v3135_v22 = vadd.f32 %v3096_v23, %v11994_v46 }
 0xb31   :  { %v3097_v41 = vpop.f32.mrf.mxu1 }
 0xb32   :  { %v3098_v3 = vadd.f32 %v3097_v41, %v2966_v32 }
 0xb34   :  { %v3136_v0 = vadd.f32 %v3098_v3, %v12058_v11 }
 0xb36   :  { %v12194_v8 = vpack.c.bf16 %v3136_v0, %v3135_v22 }
 0xb38   :  { %14228 = vst [vmem:[#allocation123_spill] sm:$0xff] %v12194_v8  ;;  %8546 = vmatmul.msk.bf16.vlgmr.msra.gmra.mxu2 %vm3160_vm5, %v12194_v8  ;;  %8554 = vmatmul.msk.bf16.vlgmr.msra.gmra.mxu3 %vm3160_vm5, %v12194_v8 }
 0xb39   :  { %8562 = vmatmul.msk.bf16.vlgmr.msra.gmra.mxu0 %vm3160_vm5, %v12194_v8  ;;  %8570 = vmatmul.msk.bf16.vlgmr.msrb.gmra.mxu1 %vm3160_vm5, %v12194_v8  ;;  %v3100_v33 = vpop.f32.mrf.mxu1 }
 0xb3a   :  { %v3101_v46 = vadd.f32 %v3100_v33, %v2971_v39 }
 0xb3c   :  { %v3137_v35 = vadd.f32 %v3101_v46, %v12001_v21  ;;  %v2986_v21 = vpop.permute.xlu1 %2985 }
 0xb41   :  { %v3102_v11 = vpop.f32.mrf.mxu1 }
 0xb42   :  { %v3103_v61 = vadd.f32 %v3102_v11, %v2976_v6 }
 0xb44   :  { %v3138_v45 = vadd.f32 %v3103_v61, %v12053_v27  ;;  %v3001_v49 = vpop.permute.xlu1 %3000 }
 0xb46   :  { %v12206_v30 = vpack.c.bf16 %v3138_v45, %v3137_v35 }
 0xb48   :  { %14229 = vst [vmem:[#allocation124_spill] sm:$0xff] %v12206_v30  ;;  %8547 = vmatmul.msk.bf16.gmra.mxu2 %vm3160_vm5, %v12206_v30  ;;  %8555 = vmatmul.msk.bf16.gmra.mxu3 %vm3160_vm5, %v12206_v30 }
 0xb49   :  { %8563 = vmatmul.msk.bf16.gmra.mxu0 %vm3160_vm5, %v12206_v30  ;;  %8571 = vmatmul.msk.bf16.gmra.mxu1 %vm3160_vm5, %v12206_v30  ;;  %v3105_v34 = vpop.f32.mrf.mxu1 }
 0xb4a   :  { %v3106_v47 = vadd.f32 %v3105_v34, %v2981_v40 }
 0xb4c   :  { %v3139_v37 = vadd.f32 %v3106_v47, %v12006_v17  ;;  %v2996_v17 = vpop.permute.xlu0 %2995 }
 0xb51   :  { %v3107_v60 = vpop.f32.mrf.mxu1 }
 0xb52   :  { %v3108_v27 = vadd.f32 %v3107_v60, %v2986_v21 }
 0xb54   :  { %v3140_v4 = vadd.f32 %v3108_v27, %v12047_v62  ;;  %v3011_v10 = vpop.permute.xlu0 %3010 }
 0xb56   :  { %v12218_v55 = vpack.c.bf16 %v3140_v4, %v3139_v37 }
 0xb58   :  { %14230 = vst [vmem:[#allocation125_spill] sm:$0xff] %v12218_v55  ;;  %8548 = vmatmul.msk.bf16.gmra.mxu2 %vm3160_vm5, %v12218_v55  ;;  %8556 = vmatmul.msk.bf16.gmra.mxu3 %vm3160_vm5, %v12218_v55 }
 0xb59   :  { %8564 = vmatmul.msk.bf16.gmra.mxu0 %vm3160_vm5, %v12218_v55  ;;  %8572 = vmatmul.msk.bf16.gmra.mxu1 %vm3160_vm5, %v12218_v55  ;;  %v3110_v50 = vpop.f32.mrf.mxu1 }
 0xb5a   :  { %v3111_v9 = vadd.f32 %v3110_v50, %v2991_v56 }
 0xb5c   :  { %v3141_v5 = vadd.f32 %v3111_v9, %v12009_v53  ;;  %v3006_v53 = vpop.permute.xlu2 %3005 }
 0xb61   :  { %v3112_v7 = vpop.f32.mrf.mxu1 }
 0xb62   :  { %v3113_v62 = vadd.f32 %v3112_v7, %v2996_v17 }
 0xb64   :  { %v3142_v13 = vadd.f32 %v3113_v62, %v12043_v18  ;;  %v3021_v1 = vpop.permute.xlu2 %3020 }
 0xb66   :  { %v12230_v29 = vpack.c.bf16 %v3142_v13, %v3141_v5 }
 0xb68   :  { %14231 = vst [vmem:[#allocation131_spill] sm:$0xff] %v12230_v29  ;;  %8549 = vmatmul.msk.bf16.gmra.mxu2 %vm3160_vm5, %v12230_v29  ;;  %8557 = vmatmul.msk.bf16.gmra.mxu3 %vm3160_vm5, %v12230_v29 }
 0xb69   :  { %8565 = vmatmul.msk.bf16.gmra.mxu0 %vm3160_vm5, %v12230_v29  ;;  %8573 = vmatmul.msk.bf16.gmra.mxu1 %vm3160_vm5, %v12230_v29  ;;  %v3115_v51 = vpop.f32.mrf.mxu1 }
 0xb6a   :  { %v3116_v2 = vadd.f32 %v3115_v51, %v3001_v49 }
 0xb6c   :  { %v3143_v20 = vadd.f32 %v3116_v2, %v12012_v48  ;;  %v3016_v48 = vpop.permute.xlu1 %3015 }
 0xb71   :  { %v3117_v58 = vpop.f32.mrf.mxu1 }
 0xb72   :  { %v3118_v18 = vadd.f32 %v3117_v58, %v3006_v53 }
 0xb74   :  { %v3144_v63 = vadd.f32 %v3118_v18, %v12038_v15  ;;  %v3031_v22 = vpop.permute.xlu1 %3030 }
 0xb76   :  { %v12242_v43 = vpack.c.bf16 %v3144_v63, %v3143_v20 }
 0xb78   :  { %14232 = vst [vmem:[#allocation132_spill] sm:$0xff] %v12242_v43  ;;  %8550 = vmatmul.msk.bf16.gmra.mxu2 %vm3160_vm5, %v12242_v43  ;;  %8558 = vmatmul.msk.bf16.gmra.mxu3 %vm3160_vm5, %v12242_v43 }
 0xb79   :  { %8566 = vmatmul.msk.bf16.gmra.mxu0 %vm3160_vm5, %v12242_v43  ;;  %8574 = vmatmul.msk.bf16.gmra.mxu1 %vm3160_vm5, %v12242_v43  ;;  %v3120_v19 = vpop.f32.mrf.mxu1 }
 0xb7a   :  { %v3121_v54 = vadd.f32 %v3120_v19, %v3011_v10 }
 0xb7c   :  { %v3145_v12 = vadd.f32 %v3121_v54, %v12035_v26  ;;  %v3026_v26 = vpop.permute.xlu0 %3025 }
 0xb81   :  { %v3122_v16 = vpop.f32.mrf.mxu1 }
 0xb82   :  { %v3123_v15 = vadd.f32 %v3122_v16, %v3016_v48 }
 0xb84   :  { %v3146_v59 = vadd.f32 %v3123_v15, %v12031_v24 }
 0xb86   :  { %v12254_v14 = vpack.c.bf16 %v3146_v59, %v3145_v12 }
 0xb88   :  { %14233 = vst [vmem:[#allocation133_spill] sm:$0xff] %v12254_v14  ;;  %8551 = vmatmul.msk.bf16.gmra.mxu2 %vm3160_vm5, %v12254_v14  ;;  %8559 = vmatmul.msk.bf16.gmra.mxu3 %vm3160_vm5, %v12254_v14 }
 0xb89   :  { %8567 = vmatmul.msk.bf16.gmra.mxu0 %vm3160_vm5, %v12254_v14  ;;  %8575 = vmatmul.msk.bf16.gmra.mxu1 %vm3160_vm5, %v12254_v14  ;;  %v3125_v36 = vpop.f32.mrf.mxu1 }
 0xb8a   :  { %v3126_v38 = vadd.f32 %v3125_v36, %v3021_v1 }
 0xb8c   :  { %v3147_v23 = vadd.f32 %v3126_v38, %v12028_v42  ;;  %v3036_v42 = vpop.permute.xlu2 %3035 }
 0xb91   :  { %v3127_v52 = vpop.f32.mrf.mxu1 }
 0xb92   :  { %v3128_v24 = vadd.f32 %v3127_v52, %v3026_v26 }
 0xb94   :  { %v3148_v32 = vadd.f32 %v3128_v24, %v12023_v31 }
 0xb96   :  { %v12266_v41 = vpack.c.bf16 %v3148_v32, %v3147_v23 }
 0xb98   :  { %14234 = vst [vmem:[#allocation134_spill] sm:$0xff] %v12266_v41  ;;  %8552 = vmatmul.msk.bf16.gmra.mxu2 %vm3160_vm5, %v12266_v41  ;;  %8560 = vmatmul.msk.bf16.gmra.mxu3 %vm3160_vm5, %v12266_v41 }
 0xb99   :  { %8568 = vmatmul.msk.bf16.gmra.mxu0 %vm3160_vm5, %v12266_v41  ;;  %8576 = vmatmul.msk.bf16.gmra.mxu1 %vm3160_vm5, %v12266_v41  ;;  %v3130_v3 = vpop.f32.mrf.mxu1 }
 0xb9a   :  { %v3131_v0 = vadd.f32 %v3130_v3, %v3031_v22 }
 0xb9c   :  { %v3149_v39 = vadd.f32 %v3131_v0, %v12018_v57 }
 0xba1   :  { %v3132_v33 = vpop.f32.mrf.mxu1 }
 0xba2   :  { %v3133_v31 = vadd.f32 %v3132_v33, %v3036_v42 }
 0xba4   :  { %v3150_v46 = vadd.f32 %v3133_v31, %v12020_v28 }
 0xba6   :  { %v12278_v6 = vpack.c.bf16 %v3150_v46, %v3149_v39 }
 0xba8   :  { %14235 = vst [vmem:[#allocation135_spill] sm:$0xff] %v12278_v6  ;;  %8553 = vmatmul.msk.bf16.gmra.mxu2 %vm3160_vm5, %v12278_v6  ;;  %8561 = vmatmul.msk.bf16.gmra.mxu3 %vm3160_vm5, %v12278_v6 }
 0xba9   :  { %8569 = vmatmul.msk.bf16.gmra.mxu0 %vm3160_vm5, %v12278_v6  ;;  %8577 = vmatmul.msk.bf16.gmra.mxu1 %vm3160_vm5, %v12278_v6 }
 0xbb6   :  { %v12288_v11 = vpop.f32.mrf.mxu0  ;;  %v12290_v61 = vpop.f32.mrf.mxu1 }
 0xbb7   :  { %14236 = vst [vmem:[#allocation136_spill] sm:$0xff] %v12288_v11 }
 0xbb8   :  { %14237 = vst [vmem:[#allocation137_spill] sm:$0xff] %v12290_v61 }
 0xbbb   :  { %v12292_v57 = vpop.f32.mrf.mxu2  ;;  %v12294_v28 = vpop.f32.mrf.mxu3 }
 0xbbc   :  { %14238 = vst [vmem:[#allocation138_spill] sm:$0xff] %v12292_v57 }
 0xbbd   :  { %14239 = vst [vmem:[#allocation139_spill] sm:$0xff] %v12294_v28 }
 0xbbe   :  { %v12296_v35 = vpop.f32.mrf.mxu0  ;;  %v12298_v45 = vpop.f32.mrf.mxu1 }
 0xbbf   :  { %14240 = vst [vmem:[#allocation140_spill] sm:$0xff] %v12296_v35 }
 0xbc0   :  { %14241 = vst [vmem:[#allocation141_spill] sm:$0xff] %v12298_v45 }
 0xbc3   :  { %v12300_v34 = vpop.f32.mrf.mxu2  ;;  %v12302_v40 = vpop.f32.mrf.mxu3 }
 0xbc4   :  { %14242 = vst [vmem:[#allocation142_spill] sm:$0xff] %v12300_v34 }
 0xbc5   :  { %14243 = vst [vmem:[#allocation143_spill] sm:$0xff] %v12302_v40 }
 0xbc6   :  { %v12304_v47 = vpop.f32.mrf.mxu0  ;;  %v12306_v21 = vpop.f32.mrf.mxu1 }
 0xbc7   :  { %14244 = vst [vmem:[#allocation144_spill] sm:$0xff] %v12304_v47 }
 0xbc8   :  { %14245 = vst [vmem:[#allocation145_spill] sm:$0xff] %v12306_v21 }
 0xbcb   :  { %v12308_v60 = vpop.f32.mrf.mxu2  ;;  %v12310_v27 = vpop.f32.mrf.mxu3 }
 0xbcc   :  { %14246 = vst [vmem:[#allocation146_spill] sm:$0xff] %v12308_v60 }
 0xbcd   :  { %14247 = vst [vmem:[#allocation147_spill] sm:$0xff] %v12310_v27 }
 0xbce   :  { %v12312_v37 = vpop.f32.mrf.mxu0  ;;  %v12314_v4 = vpop.f32.mrf.mxu1 }
 0xbd3   :  { %v12316_v50 = vpop.f32.mrf.mxu2  ;;  %v12318_v56 = vpop.f32.mrf.mxu3 }
 0xbd4   :  { %14248 = vst [vmem:[#allocation148_spill] sm:$0xff] %v12316_v50 }
 0xbd5   :  { %14249 = vst [vmem:[#allocation149_spill] sm:$0xff] %v12318_v56 }
 0xbd6   :  { %v12320_v9 = vpop.f32.mrf.mxu0  ;;  %v12322_v17 = vpop.f32.mrf.mxu1 }
 0xbdb   :  { %v12324_v7 = vpop.f32.mrf.mxu2  ;;  %v12326_v62 = vpop.f32.mrf.mxu3 }
 0xbde   :  { %v12328_v5 = vpop.f32.mrf.mxu0  ;;  %v12330_v13 = vpop.f32.mrf.mxu1 }
 0xbe3   :  { %v12332_v51 = vpop.f32.mrf.mxu2  ;;  %v12334_v49 = vpop.f32.mrf.mxu3 }
 0xbe6   :  { %v12336_v2 = vpop.f32.mrf.mxu0  ;;  %v12338_v53 = vpop.f32.mrf.mxu1 }
 0xbeb   :  { %v12340_v58 = vpop.f32.mrf.mxu2  ;;  %v12342_v18 = vpop.f32.mrf.mxu3 }
 0xbee   :  { %v12344_v20 = vpop.f32.mrf.mxu0  ;;  %v12346_v63 = vpop.f32.mrf.mxu1 }
 0xbf3   :  { %v12348_v19 = vpop.f32.mrf.mxu2  ;;  %v12350_v10 = vpop.f32.mrf.mxu3 }
 0xbf6   :  { %v12352_v54 = vpop.f32.mrf.mxu0  ;;  %v12354_v48 = vpop.f32.mrf.mxu1 }
 0xbfb   :  { %v12356_v16 = vpop.f32.mrf.mxu2  ;;  %v12358_v15 = vpop.f32.mrf.mxu3 }
 0xbfe   :  { %v12360_v12 = vpop.f32.mrf.mxu0  ;;  %v12362_v59 = vpop.f32.mrf.mxu1 }
 0xbff   :  { %v3387_v28 = vpack.c.bf16 %v12360_v12, %v12360_v12  ;;  %v3457_v55 = vpack.c.bf16 %v12362_v59, %v12362_v59 }
 0xc03   :  { %v12364_v36 = vpop.f32.mrf.mxu2  ;;  %v12366_v1 = vpop.f32.mrf.mxu3 }
 0xc06   :  { %v12368_v38 = vpop.f32.mrf.mxu0  ;;  %v12370_v26 = vpop.f32.mrf.mxu1 }
 0xc07   :  { %v3388_v14 = vpack.c.bf16 %v12368_v38, %v12368_v38 }
 0xc0b   :  { %v12372_v52 = vpop.f32.mrf.mxu2  ;;  %v12374_v24 = vpop.f32.mrf.mxu3 }
 0xc0e   :  { %v3365_v23 = vpop.f32.mrf.mxu0  ;;  %v3435_v32 = vpop.f32.mrf.mxu1 }
 0xc0f   :  { %v3389_v40 = vpack.c.bf16 %v3365_v23, %v3365_v23  ;;  %v3459_v34 = vpack.c.bf16 %v3435_v32, %v3435_v32 }
 0xc13   :  { %v12376_v3 = vpop.f32.mrf.mxu2  ;;  %v12378_v22 = vpop.f32.mrf.mxu3 }
 0xc16   :  { %v12380_v0 = vpop.f32.mrf.mxu0  ;;  %v12382_v42 = vpop.f32.mrf.mxu1 }
 0xc17   :  { %v3460_v12 = vpack.c.bf16 %v12382_v42, %v12382_v42 }
 0xc1b   :  { %v12384_v33 = vpop.f32.mrf.mxu2  ;;  %v12386_v31 = vpop.f32.mrf.mxu3 }
 0xc1e   :  { %v3370_v39 = vpop.f32.mrf.mxu0  ;;  %v3440_v46 = vpop.f32.mrf.mxu1 }
 0xc1f   :  { %v3391_v60 = vpack.c.bf16 %v3370_v39, %v3370_v39  ;;  %v3461_v43 = vpack.c.bf16 %v3440_v46, %v3440_v46  ;;  %v3587_v39 = vunpack.c.l.b16 %v3389_v40  ;;  %v3635_v46 = vunpack.c.l.b16 %v3459_v34 }
 0xc21   :  { %v3589_v45 = vunpack.c.l.b16 %v3391_v60  ;;  %v3637_v35 = vunpack.c.l.b16 %v3461_v43  ;;  %v3320_v43 = vpack.c.bf16 %v12386_v31, %v12386_v31  ;;  %v3633_v31 = vunpack.c.l.b16 %v3457_v55 }
 0xc22   :  { %v3317_v55 = vpack.c.bf16 %v12366_v1, %v12366_v1  ;;  %v14253_v1 = vpack.c.bf16 %v12354_v48, %v12354_v48 }
 0xc23   :  { %v12388_v25 = vpop.f32.mrf.mxu2  ;;  %v12390_v44 = vpop.f32.mrf.mxu3 }
 0xc24   :  { %v3321_v42 = vpack.c.bf16 %v12390_v44, %v12390_v44  ;;  %v3319_v44 = vpack.c.bf16 %v12378_v22, %v12378_v22  ;;  %v3540_v22 = vunpack.c.l.b16 %v3320_v43  ;;  %v3537_v43 = vunpack.c.l.b16 %v3317_v55  ;;  %v14263_v55 = vld [vmem:[#allocation149_spill] sm:$0xff] }
 0xc26   :  { %v3373_v8 = vpop.f32.mrf.mxu0  ;;  %v3443_v30 = vpop.f32.mrf.mxu1 }
 0xc27   :  { %v3392_v61 = vpack.c.bf16 %v3373_v8, %v3373_v8  ;;  %v3462_v11 = vpack.c.bf16 %v3443_v30, %v3443_v30  ;;  %v3458_v8 = vpack.c.bf16 %v12370_v26, %v12370_v26  ;;  %v3390_v30 = vpack.c.bf16 %v12380_v0, %v12380_v0 }
 0xc28   :  { %v3251_v0 = vpack.c.bf16 %v12388_v25, %v12388_v25  ;;  %v3249_v25 = vpack.c.bf16 %v12376_v3, %v12376_v3  ;;  %v3318_v3 = vpack.c.bf16 %v12374_v24, %v12374_v24 }
 0xc29   :  { %v3590_v59 = vunpack.c.l.b16 %v3392_v61  ;;  %v3638_v23 = vunpack.c.l.b16 %v3462_v11 }
 0xc2b   :  { %v3233_v57 = vpop.f32.mrf.mxu2  ;;  %v3303_v6 = vpop.f32.mrf.mxu3 }
 0xc2e   :  { %v3375_v29 = vpop.f32.mrf.mxu0  ;;  %v3445_v27 = vpop.f32.mrf.mxu1 }
 0xc2f   :  { %v3393_v21 = vpack.c.bf16 %v3375_v29, %v3375_v29  ;;  %v3463_v47 = vpack.c.bf16 %v3445_v27, %v3445_v27  ;;  %v3252_v29 = vpack.c.bf16 %v3233_v57, %v3233_v57  ;;  %v3322_v27 = vpack.c.bf16 %v3303_v6, %v3303_v6 }
 0xc30   :  { %v3250_v57 = vpack.c.bf16 %v12384_v33, %v12384_v33 }
 0xc31   :  { %v3591_v32 = vunpack.c.l.b16 %v3393_v21  ;;  %v3639_v41 = vunpack.c.l.b16 %v3463_v47  ;;  %v3588_v21 = vunpack.c.l.b16 %v3390_v30  ;;  %v3636_v47 = vunpack.c.l.b16 %v3460_v12 }
 0xc32   :  { %v3542_v6 = vunpack.c.l.b16 %v3322_v27  ;;  %v3493_v30 = vunpack.c.l.b16 %v3251_v0  ;;  %v3541_v12 = vunpack.c.l.b16 %v3321_v42  ;;  %v3492_v27 = vunpack.c.l.b16 %v3250_v57 }
 0xc33   :  { %v3599_v38 = vpack.c.b16 %v3591_v32, %v3590_v59  ;;  %v3647_v56 = vpack.c.b16 %v3639_v41, %v3638_v23  ;;  %v3235_v50 = vpop.f32.mrf.mxu2  ;;  %v3305_v26 = vpop.f32.mrf.mxu3  ;;  %v3494_v41 = vunpack.c.l.b16 %v3252_v29  ;;  %v3598_v60 = vpack.c.b16 %v3589_v45, %v3588_v21 }
 0xc34   :  { %v3253_v61 = vpack.c.bf16 %v3235_v50, %v3235_v50  ;;  %v3323_v11 = vpack.c.bf16 %v3305_v26, %v3305_v26  ;;  %v3646_v50 = vpack.c.b16 %v3637_v35, %v3636_v47  ;;  %v3585_v23 = vunpack.c.l.b16 %v3387_v28 }
 0xc35   :  { %4410 = vmatpush.bf16.msrb.mxu0 %v3599_v38  ;;  %4499 = vmatpush.bf16.msra.mxu1 %v3647_v56  ;;  %v3586_v32 = vunpack.c.l.b16 %v3388_v14  ;;  %v3634_v56 = vunpack.c.l.b16 %v3458_v8  ;;  %v3248_v29 = vpack.c.bf16 %v12372_v52, %v12372_v52  ;;  %v3247_v35 = vpack.c.bf16 %v12364_v36, %v12364_v36 }
 0xc36   :  { %v3495_v34 = vunpack.c.l.b16 %v3253_v61  ;;  %v3543_v40 = vunpack.c.l.b16 %v3323_v11  ;;  %v3491_v45 = vunpack.c.l.b16 %v3249_v25  ;;  %v3539_v8 = vunpack.c.l.b16 %v3319_v44 }
 0xc37   :  { %v3597_v14 = vpack.c.b16 %v3587_v39, %v3586_v32  ;;  %v3645_v28 = vpack.c.b16 %v3635_v46, %v3634_v56  ;;  %v3502_v38 = vpack.c.b16 %v3493_v30, %v3492_v27  ;;  %v3550_v26 = vpack.c.b16 %v3541_v12, %v3540_v22 }
 0xc38   :  { %v3503_v33 = vpack.c.b16 %v3495_v34, %v3494_v41  ;;  %v3551_v59 = vpack.c.b16 %v3543_v40, %v3542_v6  ;;  %v14250_v52 = vpack.c.bf16 %v12344_v20, %v12344_v20  ;;  %v14251_v0 = vpack.c.bf16 %v12346_v63, %v12346_v63 }
 0xc39   :  { %4411 = vmatpush.bf16.msrb.mxu0 %v3598_v60  ;;  %4500 = vmatpush.bf16.msra.mxu1 %v3646_v50  ;;  %v14252_v36 = vpack.c.bf16 %v12352_v54, %v12352_v54  ;;  %v3632_v39 = vunpack.c.l.b16 %v14253_v1  ;;  %v3246_v46 = vpack.c.bf16 %v12356_v16, %v12356_v16  ;;  %v3316_v20 = vpack.c.bf16 %v12358_v15, %v12358_v15 }
 0xc3a   :  { %4232 = vmatpush.bf16.msrb.mxu2 %v3503_v33  ;;  %4321 = vmatpush.bf16.msrb.mxu3 %v3551_v59  ;;  %v3583_v24 = vunpack.c.l.b16 %v14250_v52  ;;  %v3631_v42 = vunpack.c.l.b16 %v14251_v0  ;;  %v3490_v11 = vunpack.c.l.b16 %v3248_v29  ;;  %v3538_v21 = vunpack.c.l.b16 %v3318_v3 }
 0xc3b   :  { %v3584_v61 = vunpack.c.l.b16 %v14252_v36  ;;  %v3245_v63 = vpack.c.bf16 %v12348_v19, %v12348_v19  ;;  %v3315_v54 = vpack.c.bf16 %v12350_v10, %v12350_v10  ;;  %v3644_v47 = vpack.c.b16 %v3633_v31, %v3632_v39  ;;  %v14268_v36 = vld [vmem:[#allocation144_spill] sm:$0xff]  ;;  %v14270_v39 = vld [vmem:[#allocation145_spill] sm:$0xff] }
 0xc3c   :  { %v3489_v57 = vunpack.c.l.b16 %v3247_v35  ;;  %v3501_v41 = vpack.c.b16 %v3491_v45, %v3490_v11  ;;  %v3549_v6 = vpack.c.b16 %v3539_v8, %v3538_v21  ;;  %v14254_v16 = vpack.c.bf16 %v12328_v5, %v12328_v5  ;;  %v14273_v11 = vld [vmem:[#allocation146_spill] sm:$0xff] }
 0xc3d   :  { %4412 = vmatpush.bf16.msrb.mxu0 %v3597_v14  ;;  %4501 = vmatpush.bf16.msra.mxu1 %v3645_v28  ;;  %v3596_v48 = vpack.c.b16 %v3585_v23, %v3584_v61  ;;  %v14255_v34 = vpack.c.bf16 %v12330_v13, %v12330_v13  ;;  %v14256_v19 = vpack.c.bf16 %v12336_v2, %v12336_v2  ;;  %v3488_v50 = vunpack.c.l.b16 %v3246_v46 }
 0xc3e   :  { %4233 = vmatpush.bf16.msrb.mxu2 %v3502_v38  ;;  %4322 = vmatpush.bf16.msrb.mxu3 %v3550_v26  ;;  %v3581_v15 = vunpack.c.l.b16 %v14254_v16  ;;  %v14257_v10 = vpack.c.bf16 %v12338_v53, %v12338_v53  ;;  %v3244_v60 = vpack.c.bf16 %v12340_v58, %v12340_v58  ;;  %v3314_v5 = vpack.c.bf16 %v12342_v18, %v12342_v18 }
 0xc3f   :  { %v3629_v40 = vunpack.c.l.b16 %v14255_v34  ;;  %v3582_v25 = vunpack.c.l.b16 %v14256_v19  ;;  %v3536_v30 = vunpack.c.l.b16 %v3316_v20  ;;  %v3243_v13 = vpack.c.bf16 %v12332_v51, %v12332_v51 }
 0xc40   :  { %v3630_v44 = vunpack.c.l.b16 %v14257_v10  ;;  %v3313_v2 = vpack.c.bf16 %v12334_v49, %v12334_v49  ;;  %v3487_v33 = vunpack.c.l.b16 %v3245_v63  ;;  %v3535_v59 = vunpack.c.l.b16 %v3315_v54  ;;  %v14274_v63 = vld [vmem:[#allocation147_spill] sm:$0xff]  ;;  %v8588_v10 = vld [vmem:[%s14272_s23 + $0x8] sm:$0xf] }
 0xc41   :  { %4413 = vmatpush.bf16.msrb.mxu0 %v3596_v48  ;;  %4502 = vmatpush.bf16.msra.mxu1 %v3644_v47  ;;  %v3595_v53 = vpack.c.b16 %v3583_v24, %v3582_v25  ;;  %v3500_v23 = vpack.c.b16 %v3489_v57, %v3488_v50  ;;  %v3548_v31 = vpack.c.b16 %v3537_v43, %v3536_v30  ;;  %v3486_v22 = vunpack.c.l.b16 %v3244_v60  ;;  %v14266_v24 = vld [vmem:[#allocation141_spill] sm:$0xff]  ;;  %v14275_v57 = vld [vmem:[#allocation142_spill] sm:$0xff] }
 0xc42   :  { %4234 = vmatpush.bf16.msrb.mxu2 %v3501_v41  ;;  %4323 = vmatpush.bf16.msrb.mxu3 %v3549_v6  ;;  %v3643_v12 = vpack.c.b16 %v3631_v42, %v3630_v44  ;;  %v14258_v58 = vpack.c.bf16 %v12312_v37, %v12312_v37  ;;  %v14259_v32 = vpack.c.bf16 %v12314_v4, %v12314_v4  ;;  %v3534_v35 = vunpack.c.l.b16 %v3314_v5  ;;  %v14262_v4 = vld [vmem:[#allocation148_spill] sm:$0xff]  ;;  %v14276_v41 = vld [vmem:[#allocation143_spill] sm:$0xff]  ;;  %v14279_v50 = vld [vmem:[#allocation137_spill] sm:$0xff] }
 0xc43   :  { %v14260_v51 = vpack.c.bf16 %v12320_v9, %v12320_v9  ;;  %v14261_v49 = vpack.c.bf16 %v12322_v17, %v12322_v17  ;;  %v3242_v27 = vpack.c.bf16 %v12324_v7, %v12324_v7  ;;  %v3312_v37 = vpack.c.bf16 %v12326_v62, %v12326_v62  ;;  %v14264_v7 = vld [vmem:[#allocation140_spill] sm:$0xff] }
 0xc44   :  { %v3579_v18 = vunpack.c.l.b16 %v14258_v58  ;;  %v3627_v56 = vunpack.c.l.b16 %v14259_v32  ;;  %v3241_v9 = vpack.c.bf16 %v14262_v4, %v14262_v4  ;;  %v3311_v14 = vpack.c.bf16 %v14263_v55, %v14263_v55  ;;  %v14277_v44 = vld [vmem:[#allocation136_spill] sm:$0xff] }
 0xc45   :  { %v3580_v29 = vunpack.c.l.b16 %v14260_v51  ;;  %v3628_v3 = vunpack.c.l.b16 %v14261_v49  ;;  %4414 = vmatpush.bf16.msrb.mxu0 %v3595_v53  ;;  %4503 = vmatpush.bf16.msra.mxu1 %v3643_v12  ;;  %v3485_v45 = vunpack.c.l.b16 %v3243_v13  ;;  %v3533_v8 = vunpack.c.l.b16 %v3313_v2  ;;  %v9339_v2 = vld [vmem:[%s14272_s23 + $0x14] sm:$0xf0]  ;;  %v9337_v53 = vld [vmem:[%s14272_s23 + $0xc] sm:$0xf]  ;;  %v8590_v12 = vld [vmem:[%s14272_s23 + $0x18] sm:$0xf0] }
 0xc46   :  { %4235 = vmatpush.bf16.msrb.mxu2 %v3500_v23  ;;  %4324 = vmatpush.bf16.msrb.mxu3 %v3548_v31  ;;  %v3499_v38 = vpack.c.b16 %v3487_v33, %v3486_v22  ;;  %v3547_v26 = vpack.c.b16 %v3535_v59, %v3534_v35  ;;  %v14265_v52 = vpack.c.bf16 %v14264_v7, %v14264_v7  ;;  %v3484_v48 = vunpack.c.l.b16 %v3242_v27  ;;  %v14281_v33 = vld [vmem:[#allocation138_spill] sm:$0xff]  ;;  %v14282_v23 = vld [vmem:[#allocation139_spill] sm:$0xff]  ;;  %v9341_v7 = vld [vmem:[%s14272_s23 + $0x2c] sm:$0xf] }
 0xc47   :  { %v3594_v17 = vpack.c.b16 %v3581_v15, %v3580_v29  ;;  %v3642_v28 = vpack.c.b16 %v3629_v40, %v3628_v3  ;;  %v14267_v0 = vpack.c.bf16 %v14266_v24, %v14266_v24  ;;  %v14269_v61 = vpack.c.bf16 %v14268_v36, %v14268_v36  ;;  %v8580_v22 = vld [vmem:[%s14272_s23] sm:$0xf]  ;;  %v9336_v55 = vld [vmem:[%s14272_s23 + $0x4] sm:$0xf] }
 0xc48   :  { %v3577_v62 = vunpack.c.l.b16 %v14265_v52  ;;  %v14271_v46 = vpack.c.bf16 %v14270_v39, %v14270_v39  ;;  %v3240_v21 = vpack.c.bf16 %v14273_v11, %v14273_v11  ;;  %v3310_v54 = vpack.c.bf16 %v14274_v63, %v14274_v63  ;;  %v8606_v52 = vld [vmem:[%s14272_s23 + $0x38] sm:$0xf0]  ;;  %v9340_v36 = vld [vmem:[%s14272_s23 + $0x24] sm:$0xf]  ;;  %v9345_v11 = vld [vmem:[%s14272_s23 + $0x4c] sm:$0xf] }
 0xc49   :  { %v3625_v42 = vunpack.c.l.b16 %v14267_v0  ;;  %v3578_v1 = vunpack.c.l.b16 %v14269_v61  ;;  %4415 = vmatpush.bf16.msrb.mxu0 %v3594_v17  ;;  %4504 = vmatpush.bf16.msra.mxu1 %v3642_v28  ;;  %v3532_v47 = vunpack.c.l.b16 %v3312_v37  ;;  %v3239_v43 = vpack.c.bf16 %v14275_v57, %v14275_v57  ;;  %v8596_v0 = vld [vmem:[%s14272_s23 + $0x20] sm:$0xf]  ;;  %v8598_v61 = vld [vmem:[%s14272_s23 + $0x30] sm:$0xf0]  ;;  %v9344_v57 = vld [vmem:[%s14272_s23 + $0x44] sm:$0xf] }
 0xc4a   :  { %v3626_v20 = vunpack.c.l.b16 %v14271_v46  ;;  %4236 = vmatpush.bf16.msrb.mxu2 %v3499_v38  ;;  %4325 = vmatpush.bf16.msrb.mxu3 %v3547_v26  ;;  %v3309_v6 = vpack.c.bf16 %v14276_v41, %v14276_v41  ;;  %v3483_v34 = vunpack.c.l.b16 %v3241_v9  ;;  %v3531_v40 = vunpack.c.l.b16 %v3311_v14  ;;  %v9338_v9 = vld [vmem:[%s14272_s23 + $0xc] sm:$0xf0]  ;;  %v8582_v14 = vld [vmem:[%s14272_s23 + $0x10] sm:$0xf0]  ;;  %v8604_v38 = vld [vmem:[%s14272_s23 + $0x28] sm:$0xf] }
 0xc4b   :  { %v3593_v16 = vpack.c.b16 %v3579_v18, %v3578_v1  ;;  %v3498_v19 = vpack.c.b16 %v3485_v45, %v3484_v48  ;;  %v3546_v25 = vpack.c.b16 %v3533_v8, %v3532_v47  ;;  %v14278_v60 = vpack.c.bf16 %v14277_v44, %v14277_v44  ;;  %v9343_v26 = vld [vmem:[%s14272_s23 + $0x34] sm:$0xf0]  ;;  %v8620_v46 = vld [vmem:[%s14272_s23 + $0x48] sm:$0xf]  ;;  %v8612_v48 = vld [vmem:[%s14272_s23 + $0x40] sm:$0xf] }
 0xc4c   :  { %v3641_v15 = vpack.c.b16 %v3627_v56, %v3626_v20  ;;  %v14280_v30 = vpack.c.bf16 %v14279_v50, %v14279_v50  ;;  %v3238_v59 = vpack.c.bf16 %v14281_v33, %v14281_v33  ;;  %v3308_v31 = vpack.c.bf16 %v14282_v23, %v14282_v23  ;;  %v9347_v20 = vld [vmem:[%s14272_s23 + $0x54] sm:$0xf0]  ;;  %v9346_v47 = vld [vmem:[%s14272_s23 + $0x4c] sm:$0xf0]  ;;  %v8628_v44 = vld [vmem:[%s14272_s23 + $0x60] sm:$0xf] }
 0xc4d   :  { %v3576_v5 = vunpack.c.l.b16 %v14278_v60  ;;  %4416 = vmatpush.bf16.msrb.mxu0 %v3593_v16  ;;  %v3482_v58 = vunpack.c.l.b16 %v3240_v21  ;;  %v3530_v18 = vunpack.c.l.b16 %v3310_v54  ;;  %v3481_v32 = vunpack.c.l.b16 %v3239_v43  ;;  %v8622_v21 = vld [vmem:[%s14272_s23 + $0x58] sm:$0xf0]  ;;  %v8614_v43 = vld [vmem:[%s14272_s23 + $0x50] sm:$0xf0]  ;;  %v8636_v16 = vld [vmem:[%s14272_s23 + $0x68] sm:$0xf] }
 0xc4e   :  { %v3624_v13 = vunpack.c.l.b16 %v14280_v30  ;;  %4505 = vmatpush.bf16.msra.mxu1 %v3641_v15  ;;  %4237 = vmatpush.bf16.msrb.mxu2 %v3498_v19  ;;  %v3529_v56 = vunpack.c.l.b16 %v3309_v6  ;;  %v8589_v27 = vor.u32 %v9339_v2, %v8588_v10  ;;  %v8593_v37 = vor.u32 %v9337_v53, %v8590_v12  ;;  %v9351_v15 = vld [vmem:[%s14272_s23 + $0x74] sm:$0xf0]  ;;  %v12578_v19 = vpop.permute.xlu1 %3829  ;;  %v9350_v60 = vld [vmem:[%s14272_s23 + $0x6c] sm:$0xf0]  ;;  %v8630_v50 = vld [vmem:[%s14272_s23 + $0x70] sm:$0xf0]  ;;  %v12584_v2 = vpop.permute.xlu2 %3904 }
 0xc4f   :  { %4326 = vmatpush.bf16.msrb.mxu3 %v3546_v25  ;;  %v3592_v51 = vpack.c.b16 %v3577_v62, %v3576_v5  ;;  %v3497_v49 = vpack.c.b16 %v3483_v34, %v3482_v58  ;;  %v3545_v3 = vpack.c.b16 %v3531_v40, %v3530_v18  ;;  %v3480_v35 = vunpack.c.l.b16 %v3238_v59  ;;  %v9349_v34 = vld [vmem:[%s14272_s23 + $0x6c] sm:$0xf]  ;;  %v8638_v40 = vld [vmem:[%s14272_s23 + $0x78] sm:$0xf0]  ;;  %v9348_v5 = vld [vmem:[%s14272_s23 + $0x64] sm:$0xf] }
 0xc50   :  { %v3640_v29 = vpack.c.b16 %v3625_v42, %v3624_v13  ;;  %v3528_v4 = vunpack.c.l.b16 %v3308_v31  ;;  %v8581_v45 = vor.u32 %v9338_v9, %v8580_v22  ;;  %v8585_v8 = vor.u32 %v9336_v55, %v8582_v14  ;;  %v9342_v42 = vld [vmem:[%s14272_s23 + $0x2c] sm:$0xf0]  ;;  %v8652_v12 = vld [vmem:[%s14272_s23 + $0x88] sm:$0xf]  ;;  %v9355_v33 = vld [vmem:[%s14272_s23 + $0x94] sm:$0xf0] }
 0xc51   :  { %4417 = vmatpush.bf16.msrb.mxu0 %v3592_v51  ;;  %v3496_v17 = vpack.c.b16 %v3481_v32, %v3480_v35  ;;  %v8605_v62 = vor.u32 %v9343_v26, %v8604_v38  ;;  %v8609_v24 = vor.u32 %v9341_v7, %v8606_v52  ;;  %v8597_v1 = vor.u32 %v9342_v42, %v8596_v0  ;;  %v9353_v59 = vld [vmem:[%s14272_s23 + $0x8c] sm:$0xf]  ;;  %v8654_v23 = vld [vmem:[%s14272_s23 + $0x98] sm:$0xf0]  ;;  %v8644_v18 = vld [vmem:[%s14272_s23 + $0x80] sm:$0xf] }
 0xc52   :  { %4506 = vmatpush.bf16.msra.mxu1 %v3640_v29  ;;  %4238 = vmatpush.bf16.msrb.mxu2 %v3497_v49  ;;  %v3544_v28 = vpack.c.b16 %v3529_v56, %v3528_v4  ;;  %v8601_v39 = vor.u32 %v9340_v36, %v8598_v61  ;;  %v8621_v63 = vor.u32 %v9347_v20, %v8620_v46  ;;  %v9354_v56 = vld [vmem:[%s14272_s23 + $0x8c] sm:$0xf0]  ;;  %v9352_v51 = vld [vmem:[%s14272_s23 + $0x84] sm:$0xf]  ;;  %v8646_v29 = vld [vmem:[%s14272_s23 + $0x90] sm:$0xf0] }
 0xc53   :  { %4327 = vmatpush.bf16.msrb.mxu3 %v3545_v3  ;;  %v8625_v54 = vor.u32 %v9345_v11, %v8622_v21  ;;  %v8613_v41 = vor.u32 %v9346_v47, %v8612_v48  ;;  %v8617_v6 = vor.u32 %v9344_v57, %v8614_v43  ;;  %v8637_v25 = vor.u32 %v9351_v15, %v8636_v16  ;;  %v8668_v35 = vld [vmem:[%s14272_s23 + $0xa8] sm:$0xf]  ;;  %v9359_v4 = vld [vmem:[%s14272_s23 + $0xb4] sm:$0xf0]  ;;  %v9357_v9 = vld [vmem:[%s14272_s23 + $0xac] sm:$0xf] }
 0xc54   :  { %4418 = vmatmul.bf16.vlgmr.msrb.gmra.mxu0 %v8589_v27  ;;  %v8641_v10 = vor.u32 %v9349_v34, %v8638_v40  ;;  %v8629_v30 = vor.u32 %v9350_v60, %v8628_v44  ;;  %v8633_v13 = vor.u32 %v9348_v5, %v8630_v50  ;;  %v8653_v31 = vor.u32 %v9355_v33, %v8652_v12  ;;  %v8670_v55 = vld [vmem:[%s14272_s23 + $0xb8] sm:$0xf0]  ;;  %v9356_v38 = vld [vmem:[%s14272_s23 + $0xa4] sm:$0xf]  ;;  %v8662_v26 = vld [vmem:[%s14272_s23 + $0xb0] sm:$0xf0] }
 0xc55   :  { %4507 = vmatmul.bf16.vlgmr.msra.gmra.mxu1 %v8593_v37  ;;  %v8657_v58 = vor.u32 %v9353_v59, %v8654_v23  ;;  %v8645_v3 = vor.u32 %v9354_v56, %v8644_v18  ;;  %v8649_v27 = vor.u32 %v9352_v51, %v8646_v29  ;;  %v12600_v37 = vpop.permute.xlu0 %3824  ;;  %v8684_v42 = vld [vmem:[%s14272_s23 + $0xc8] sm:$0xf]  ;;  %v9363_v36 = vld [vmem:[%s14272_s23 + $0xd4] sm:$0xf0]  ;;  %v9361_v61 = vld [vmem:[%s14272_s23 + $0xcc] sm:$0xf] }
 0xc56   :  { %4239 = vmatpush.bf16.msrb.mxu2 %v3496_v17  ;;  %v12586_v53 = vpop.permute.xlu1 %3814  ;;  %v12593_v32 = vpop.permute.xlu2 %3819  ;;  %v8669_v17 = vor.u32 %v9359_v4, %v8668_v35  ;;  %v8685_v20 = vor.u32 %v9363_v36, %v8684_v42  ;;  %v8676_v21 = vld [vmem:[%s14272_s23 + $0xc0] sm:$0xf]  ;;  %v9360_v48 = vld [vmem:[%s14272_s23 + $0xc4] sm:$0xf]  ;;  %v8678_v47 = vld [vmem:[%s14272_s23 + $0xd0] sm:$0xf0] }
 0xc57   :  { %4328 = vmatpush.bf16.msrb.mxu3 %v3544_v28  ;;  %v8673_v28 = vor.u32 %v9357_v9, %v8670_v55  ;;  %v8681_v43 = vor.u32 %v9360_v48, %v8678_v47  ;;  %v8700_v15 = vld [vmem:[%s14272_s23 + $0xe8] sm:$0xf]  ;;  %v9367_v34 = vld [vmem:[%s14272_s23 + $0xf4] sm:$0xf0]  ;;  %v9365_v40 = vld [vmem:[%s14272_s23 + $0xec] sm:$0xf] }
 0xc58   :  { %v8692_v60 = vld [vmem:[%s14272_s23 + $0xe0] sm:$0xf]  ;;  %v9366_v50 = vld [vmem:[%s14272_s23 + $0xec] sm:$0xf0]  ;;  %v9371_v18 = vld [vmem:[%s14272_s23 + $0x114] sm:$0xf0] }
 0xc59   :  { %4240 = vmatmul.bf16.vlgmr.msrb.gmra.mxu2 %v8581_v45  ;;  %v8660_v45 = vld [vmem:[%s14272_s23 + $0xa0] sm:$0xf]  ;;  %v8693_v33 = vor.u32 %v9366_v50, %v8692_v60  ;;  %v9369_v56 = vld [vmem:[%s14272_s23 + $0x10c] sm:$0xf]  ;;  %v8718_v51 = vld [vmem:[%s14272_s23 + $0x118] sm:$0xf0] }
 0xc5a   :  { %4329 = vmatmul.bf16.vlgmr.msrb.gmra.mxu3 %v8585_v8  ;;  %v9358_v8 = vld [vmem:[%s14272_s23 + $0xac] sm:$0xf0]  ;;  %v8721_v35 = vor.u32 %v9369_v56, %v8718_v51  ;;  %v8708_v9 = vld [vmem:[%s14272_s23 + $0x100] sm:$0xf]  ;;  %v8734_v48 = vld [vmem:[%s14272_s23 + $0x138] sm:$0xf0] }
 0xc5b   :  { %v8661_v52 = vor.u32 %v9358_v8, %v8660_v45  ;;  %v8710_v45 = vld [vmem:[%s14272_s23 + $0x110] sm:$0xf0]  ;;  %v9372_v60 = vld [vmem:[%s14272_s23 + $0x124] sm:$0xf] }
 0xc5c   :  { %v8726_v50 = vld [vmem:[%s14272_s23 + $0x130] sm:$0xf0] }
 0xc5d   :  { %v12614_v7 = vpop.permute.xlu0 %3909  ;;  %v8729_v56 = vor.u32 %v9372_v60, %v8726_v50 }
 0xc5e   :  { %v12598_v49 = vpop.permute.xlu1 %3899  ;;  %v12602_v22 = vpop.permute.xlu2 %3804  ;;  %14284 = vst [vmem:[#allocation149_spill] sm:$0xff] %v12614_v7 }
 0xc64   :  { %4423 = vmatmul.bf16.gmra.mxu0 %v8605_v62  ;;  %v8665_v62 = vor.u32 %v9356_v38, %v8662_v26 }
 0xc65   :  { %4512 = vmatmul.bf16.gmra.mxu1 %v8609_v24 }
 0xc66   :  { %v12608_v14 = vpop.permute.xlu1 %3884  ;;  %v12616_v24 = vpop.permute.xlu2 %3889 }
 0xc67   :  { %14283 = vst [vmem:[#allocation148_spill] sm:$0xff] %v12608_v14 }
 0xc68   :  { %14285 = vst [vmem:[#allocation140_spill] sm:$0xff] %v12616_v24 }
 0xc69   :  { %4245 = vmatmul.bf16.gmra.mxu2 %v8597_v1  ;;  %v8686_v1 = vld [vmem:[%s14272_s23 + $0xd8] sm:$0xf0] }
 0xc6a   :  { %4334 = vmatmul.bf16.gmra.mxu3 %v8601_v39  ;;  %v12624_v39 = vpop.permute.xlu0 %3894  ;;  %v8689_v11 = vor.u32 %v9361_v61, %v8686_v1 }
 0xc6e   :  { %v12618_v0 = vpop.permute.xlu1 %3799  ;;  %v12626_v46 = vpop.permute.xlu2 %3874 }
 0xc74   :  { %4428 = vmatmul.bf16.gmra.mxu0 %v8621_v63 }
 0xc75   :  { %4517 = vmatmul.bf16.gmra.mxu1 %v8625_v54  ;;  %v9362_v54 = vld [vmem:[%s14272_s23 + $0xcc] sm:$0xf0] }
 0xc76   :  { %v12629_v63 = vpop.permute.xlu1 %3784  ;;  %v8677_v57 = vor.u32 %v9362_v54, %v8676_v21  ;;  %v9375_v21 = vld [vmem:[%s14272_s23 + $0x134] sm:$0xf0]  ;;  %v9373_v54 = vld [vmem:[%s14272_s23 + $0x12c] sm:$0xf] }
 0xc79   :  { %4250 = vmatmul.bf16.gmra.mxu2 %v8613_v41  ;;  %v12634_v41 = vpop.permute.xlu0 %3809 }
 0xc7a   :  { %4339 = vmatmul.bf16.gmra.mxu3 %v8617_v6  ;;  %v12636_v6 = vpop.permute.xlu2 %3789 }
 0xc7e   :  { %v12638_v16 = vpop.permute.xlu1 %3869 }
 0xc7f   :  { %14286 = vst [vmem:[#allocation141_spill] sm:$0xff] %v12638_v16 }
 0xc81   :  { %v12645_v5 = vpop.permute.xlu0 %3794 }
 0xc82   :  { %v12650_v12 = vpop.permute.xlu2 %3774 }
 0xc84   :  { %4433 = vmatmul.bf16.gmra.mxu0 %v8637_v25  ;;  %v8702_v25 = vld [vmem:[%s14272_s23 + $0xf8] sm:$0xf0] }
 0xc85   :  { %4522 = vmatmul.bf16.gmra.mxu1 %v8641_v10  ;;  %v8701_v10 = vor.u32 %v9367_v34, %v8700_v15  ;;  %v8705_v44 = vor.u32 %v9365_v40, %v8702_v25  ;;  %v8737_v15 = vor.u32 %v9373_v54, %v8734_v48  ;;  %v8724_v25 = vld [vmem:[%s14272_s23 + $0x120] sm:$0xf] }
 0xc86   :  { %v12652_v23 = vpop.permute.xlu1 %3854  ;;  %v8740_v54 = vld [vmem:[%s14272_s23 + $0x140] sm:$0xf] }
 0xc89   :  { %4255 = vmatmul.bf16.gmra.mxu2 %v8629_v30  ;;  %v9364_v30 = vld [vmem:[%s14272_s23 + $0xe4] sm:$0xf] }
 0xc8a   :  { %4344 = vmatmul.bf16.gmra.mxu3 %v8633_v13  ;;  %v8694_v13 = vld [vmem:[%s14272_s23 + $0xf0] sm:$0xf0]  ;;  %v12660_v29 = vpop.permute.xlu2 %3859 }
 0xc8b   :  { %v8697_v59 = vor.u32 %v9364_v30, %v8694_v13  ;;  %14288 = vst [vmem:[#allocation145_spill] sm:$0xff] %v12660_v29 }
 0xc94   :  { %4438 = vmatmul.bf16.gmra.mxu0 %v8653_v31  ;;  %v12654_v31 = vpop.permute.xlu0 %3879 }
 0xc95   :  { %4527 = vmatmul.bf16.gmra.mxu1 %v8657_v58  ;;  %14287 = vst [vmem:[#allocation144_spill] sm:$0xff] %v12654_v31  ;;  %v8716_v58 = vld [vmem:[%s14272_s23 + $0x108] sm:$0xf] }
 0xc99   :  { %4260 = vmatmul.bf16.gmra.mxu2 %v8645_v3  ;;  %v12662_v3 = vpop.permute.xlu1 %3769 }
 0xc9a   :  { %4349 = vmatmul.bf16.gmra.mxu3 %v8649_v27  ;;  %v8717_v27 = vor.u32 %v9371_v18, %v8716_v58 }
 0xc9c   :  { %v12668_v26 = vpop.permute.xlu0 %3864 }
 0xca1   :  { %v3755_v36 = vpop.permute.xlu1 %3754 }
 0xca4   :  { %4443 = vmatmul.bf16.gmra.mxu0 %v8669_v17  ;;  %v9370_v17 = vld [vmem:[%s14272_s23 + $0x10c] sm:$0xf0] }
 0xca5   :  { %4532 = vmatmul.bf16.gmra.mxu1 %v8673_v28  ;;  %v9368_v28 = vld [vmem:[%s14272_s23 + $0x104] sm:$0xf]  ;;  %v8709_v8 = vor.u32 %v9370_v17, %v8708_v9 }
 0xca6   :  { %v8713_v38 = vor.u32 %v9368_v28, %v8710_v45  ;;  %v8748_v45 = vld [vmem:[%s14272_s23 + $0x148] sm:$0xf] }
 0xca9   :  { %4265 = vmatmul.bf16.gmra.mxu2 %v8661_v52  ;;  %v12670_v52 = vpop.permute.xlu2 %3844 }
 0xcaa   :  { %4354 = vmatmul.bf16.gmra.mxu3 %v8665_v62 }
 0xcb1   :  { %v3760_v30 = vpop.permute.xlu2 %3759 }
 0xcb4   :  { %4448 = vmatmul.bf16.gmra.mxu0 %v8685_v20  ;;  %v8732_v20 = vld [vmem:[%s14272_s23 + $0x128] sm:$0xf] }
 0xcb5   :  { %4537 = vmatmul.bf16.gmra.mxu1 %v8689_v11 }
 0xcb9   :  { %4270 = vmatmul.bf16.gmra.mxu2 %v8677_v57  ;;  %v12676_v57 = vpop.permute.xlu0 %3779 }
 0xcba   :  { %4359 = vmatmul.bf16.gmra.mxu3 %v8681_v43  ;;  %v8733_v43 = vor.u32 %v9375_v21, %v8732_v20 }
 0xcc1   :  { %v3765_v9 = vpop.permute.xlu0 %3764 }
 0xcc4   :  { %4453 = vmatmul.bf16.gmra.mxu0 %v8701_v10 }
 0xcc5   :  { %4542 = vmatmul.bf16.gmra.mxu1 %v8705_v44  ;;  %v9374_v44 = vld [vmem:[%s14272_s23 + $0x12c] sm:$0xf0] }
 0xcc6   :  { %v8725_v18 = vor.u32 %v9374_v44, %v8724_v25 }
 0xcc9   :  { %4275 = vmatmul.bf16.gmra.mxu2 %v8693_v33 }
 0xcca   :  { %4364 = vmatmul.bf16.gmra.mxu3 %v8697_v59 }
 0xcd1   :  { %v4419_v4 = vpop.f32.mrf.mxu0 }
 0xcd2   :  { %v4508_v55 = vpop.f32.mrf.mxu1 }
 0xcd4   :  { %4458 = vmatmul.bf16.gmra.mxu0 %v8717_v27 }
 0xcd5   :  { %4547 = vmatmul.bf16.gmra.mxu1 %v8721_v35 }
 0xcd9   :  { %4280 = vmatmul.bf16.gmra.mxu2 %v8709_v8  ;;  %v4421_v62 = vpop.f32.mrf.mxu0 }
 0xcda   :  { %4369 = vmatmul.bf16.gmra.mxu3 %v8713_v38  ;;  %v4510_v42 = vpop.f32.mrf.mxu1  ;;  %v9379_v38 = vld [vmem:[%s14272_s23 + $0x154] sm:$0xf0] }
 0xcdc   :  { %v4241_v61 = vpop.f32.mrf.mxu2 }
 0xcdd   :  { %v4330_v1 = vpop.f32.mrf.mxu3  ;;  %v4242_v11 = vadd.f32 %v4241_v61, %v3755_v36  ;;  %v9377_v36 = vld [vmem:[%s14272_s23 + $0x14c] sm:$0xf]  ;;  %v8750_v61 = vld [vmem:[%s14272_s23 + $0x158] sm:$0xf0] }
 0xcde   :  { %v8753_v20 = vor.u32 %v9377_v36, %v8750_v61  ;;  %v9382_v61 = vld [vmem:[%s14272_s23 + $0x16c] sm:$0xf0] }
 0xcdf   :  { %v4331_v47 = vadd.f32 %v4330_v1, %v4242_v11 }
 0xce1   :  { %v4420_v34 = vadd.f32 %v4419_v4, %v4331_v47  ;;  %v4424_v40 = vpop.f32.mrf.mxu0  ;;  %v9378_v47 = vld [vmem:[%s14272_s23 + $0x14c] sm:$0xf0] }
 0xce2   :  { %v4513_v10 = vpop.f32.mrf.mxu1  ;;  %v8741_v60 = vor.u32 %v9378_v47, %v8740_v54 }
 0xce3   :  { %v12682_v13 = vadd.f32 %v4508_v55, %v4420_v34 }
 0xce4   :  { %v4243_v33 = vpop.f32.mrf.mxu2  ;;  %4463 = vmatmul.bf16.gmra.mxu0 %v8733_v43  ;;  %v9376_v43 = vld [vmem:[%s14272_s23 + $0x144] sm:$0xf] }
 0xce5   :  { %14289 = vst [vmem:[#allocation146_spill] sm:$0xff] %v12682_v13  ;;  %v4332_v59 = vpop.f32.mrf.mxu3  ;;  %4552 = vmatmul.bf16.gmra.mxu1 %v8737_v15  ;;  %v4244_v58 = vadd.f32 %v4243_v33, %v3760_v30 }
 0xce7   :  { %v4333_v51 = vadd.f32 %v4332_v59, %v4244_v58 }
 0xce9   :  { %v4422_v27 = vadd.f32 %v4421_v62, %v4333_v51  ;;  %4285 = vmatmul.bf16.gmra.mxu2 %v8725_v18  ;;  %v4426_v35 = vpop.f32.mrf.mxu0  ;;  %v8749_v62 = vor.u32 %v9379_v38, %v8748_v45  ;;  %v9383_v51 = vld [vmem:[%s14272_s23 + $0x174] sm:$0xf0]  ;;  %v8756_v38 = vld [vmem:[%s14272_s23 + $0x160] sm:$0xf] }
 0xcea   :  { %4374 = vmatmul.bf16.gmra.mxu3 %v8729_v56  ;;  %v4515_v4 = vpop.f32.mrf.mxu1  ;;  %v8764_v56 = vld [vmem:[%s14272_s23 + $0x168] sm:$0xf]  ;;  %v8757_v54 = vor.u32 %v9382_v61, %v8756_v38 }
 0xceb   :  { %v12684_v55 = vadd.f32 %v4510_v42, %v4422_v27  ;;  %v8742_v42 = vld [vmem:[%s14272_s23 + $0x150] sm:$0xf0]  ;;  %v9381_v27 = vld [vmem:[%s14272_s23 + $0x16c] sm:$0xf] }
 0xcec   :  { %v4246_v17 = vpop.f32.mrf.mxu2 }
 0xced   :  { %14290 = vst [vmem:[#allocation147_spill] sm:$0xff] %v12684_v55  ;;  %v4335_v28 = vpop.f32.mrf.mxu3  ;;  %v4247_v8 = vadd.f32 %v4246_v17, %v3765_v9  ;;  %v8766_v9 = vld [vmem:[%s14272_s23 + $0x178] sm:$0xf0] }
 0xcef   :  { %v4336_v1 = vadd.f32 %v4335_v28, %v4247_v8  ;;  %v8769_v28 = vor.u32 %v9381_v27, %v8766_v9  ;;  %v9386_v9 = vld [vmem:[%s14272_s23 + $0x18c] sm:$0xf0] }
 0xcf1   :  { %v4425_v11 = vadd.f32 %v4424_v40, %v4336_v1  ;;  %v4429_v21 = vpop.f32.mrf.mxu0  ;;  %v8745_v40 = vor.u32 %v9376_v43, %v8742_v42  ;;  %v8758_v1 = vld [vmem:[%s14272_s23 + $0x170] sm:$0xf0] }
 0xcf2   :  { %v4518_v48 = vpop.f32.mrf.mxu1 }
 0xcf3   :  { %v12694_v15 = vadd.f32 %v4513_v10, %v4425_v11 }
 0xcf4   :  { %v4248_v34 = vpop.f32.mrf.mxu2  ;;  %4468 = vmatmul.bf16.gmra.mxu0 %v8749_v62 }
 0xcf5   :  { %14291 = vst [vmem:[#allocation142_spill] sm:$0xff] %v12694_v15  ;;  %v4337_v25 = vpop.f32.mrf.mxu3  ;;  %4557 = vmatmul.bf16.gmra.mxu1 %v8753_v20  ;;  %v4249_v44 = vadd.f32 %v4248_v34, %v12662_v3 }
 0xcf7   :  { %v4338_v50 = vadd.f32 %v4337_v25, %v4249_v44 }
 0xcf9   :  { %v4427_v30 = vadd.f32 %v4426_v35, %v4338_v50  ;;  %4290 = vmatmul.bf16.gmra.mxu2 %v8741_v60  ;;  %v4431_v33 = vpop.f32.mrf.mxu0  ;;  %v8765_v35 = vor.u32 %v9383_v51, %v8764_v56  ;;  %v8780_v60 = vld [vmem:[%s14272_s23 + $0x188] sm:$0xf]  ;;  %v9385_v50 = vld [vmem:[%s14272_s23 + $0x18c] sm:$0xf]  ;;  %v8772_v51 = vld [vmem:[%s14272_s23 + $0x180] sm:$0xf] }
 0xcfa   :  { %4379 = vmatmul.bf16.gmra.mxu3 %v8745_v40  ;;  %v4520_v10 = vpop.f32.mrf.mxu1  ;;  %v9387_v40 = vld [vmem:[%s14272_s23 + $0x194] sm:$0xf0]  ;;  %v8773_v38 = vor.u32 %v9386_v9, %v8772_v51 }
 0xcfb   :  { %v12697_v59 = vadd.f32 %v4515_v4, %v4427_v30  ;;  %v9380_v4 = vld [vmem:[%s14272_s23 + $0x164] sm:$0xf]  ;;  %v8782_v30 = vld [vmem:[%s14272_s23 + $0x198] sm:$0xf0] }
 0xcfc   :  { %v4251_v58 = vpop.f32.mrf.mxu2 }
 0xcfd   :  { %14292 = vst [vmem:[#allocation143_spill] sm:$0xff] %v12697_v59  ;;  %v4340_v18 = vpop.f32.mrf.mxu3  ;;  %v4252_v3 = vadd.f32 %v4251_v58, %v12650_v12 }
 0xcff   :  { %v4341_v17 = vadd.f32 %v4340_v18, %v4252_v3  ;;  %v8785_v18 = vor.u32 %v9385_v50, %v8782_v30  ;;  %v9388_v30 = vld [vmem:[%s14272_s23 + $0x1a4] sm:$0xf] }
 0xd01   :  { %v4430_v45 = vadd.f32 %v4429_v21, %v4341_v17  ;;  %v4434_v8 = vpop.f32.mrf.mxu0  ;;  %v8761_v21 = vor.u32 %v9380_v4, %v8758_v1  ;;  %v8774_v17 = vld [vmem:[%s14272_s23 + $0x190] sm:$0xf0] }
 0xd02   :  { %v4523_v36 = vpop.f32.mrf.mxu1 }
 0xd03   :  { %v12708_v62 = vadd.f32 %v4518_v48, %v4430_v45 }
 0xd04   :  { %v4253_v20 = vpop.f32.mrf.mxu2  ;;  %4473 = vmatmul.bf16.gmra.mxu0 %v8765_v35 }
 0xd05   :  { %14293 = vst [vmem:[#allocation136_spill] sm:$0xff] %v12708_v62  ;;  %v4342_v11 = vpop.f32.mrf.mxu3  ;;  %4562 = vmatmul.bf16.gmra.mxu1 %v8769_v28  ;;  %v4254_v12 = vadd.f32 %v4253_v20, %v12676_v57 }
 0xd07   :  { %v4343_v47 = vadd.f32 %v4342_v11, %v4254_v12 }
 0xd09   :  { %v4432_v43 = vadd.f32 %v4431_v33, %v4343_v47  ;;  %4295 = vmatmul.bf16.gmra.mxu2 %v8757_v54  ;;  %v4436_v42 = vpop.f32.mrf.mxu0  ;;  %v8781_v33 = vor.u32 %v9387_v40, %v8780_v60  ;;  %v9389_v47 = vld [vmem:[%s14272_s23 + $0x1ac] sm:$0xf]  ;;  %v8788_v40 = vld [vmem:[%s14272_s23 + $0x1a0] sm:$0xf] }
 0xd0a   :  { %4384 = vmatmul.bf16.gmra.mxu3 %v8761_v21  ;;  %v4525_v48 = vpop.f32.mrf.mxu1  ;;  %v9391_v21 = vld [vmem:[%s14272_s23 + $0x1b4] sm:$0xf0] }
 0xd0b   :  { %v12711_v34 = vadd.f32 %v4520_v10, %v4432_v43  ;;  %v9384_v10 = vld [vmem:[%s14272_s23 + $0x184] sm:$0xf]  ;;  %v8798_v43 = vld [vmem:[%s14272_s23 + $0x1b8] sm:$0xf0] }
 0xd0c   :  { %v4256_v25 = vpop.f32.mrf.mxu2 }
 0xd0d   :  { %14294 = vst [vmem:[#allocation137_spill] sm:$0xff] %v12711_v34  ;;  %v4345_v44 = vpop.f32.mrf.mxu3  ;;  %v4257_v57 = vadd.f32 %v4256_v25, %v12629_v63 }
 0xd0f   :  { %v4346_v58 = vadd.f32 %v4345_v44, %v4257_v57  ;;  %v8801_v44 = vor.u32 %v9389_v47, %v8798_v43 }
 0xd11   :  { %v4435_v56 = vadd.f32 %v4434_v8, %v4346_v58  ;;  %v4439_v3 = vpop.f32.mrf.mxu0  ;;  %v8777_v8 = vor.u32 %v9384_v10, %v8774_v17  ;;  %v8790_v58 = vld [vmem:[%s14272_s23 + $0x1b0] sm:$0xf0]  ;;  %v8812_v17 = vld [vmem:[%s14272_s23 + $0x1c8] sm:$0xf] }
 0xd12   :  { %v4528_v27 = vpop.f32.mrf.mxu1 }
 0xd13   :  { %v12722_v35 = vadd.f32 %v4523_v36, %v4435_v56 }
 0xd14   :  { %v4258_v28 = vpop.f32.mrf.mxu2  ;;  %4478 = vmatmul.bf16.gmra.mxu0 %v8781_v33 }
 0xd15   :  { %14295 = vst [vmem:[#allocation138_spill] sm:$0xff] %v12722_v35  ;;  %v4347_v45 = vpop.f32.mrf.mxu3  ;;  %4567 = vmatmul.bf16.gmra.mxu1 %v8785_v18  ;;  %v4259_v63 = vadd.f32 %v4258_v28, %v12636_v6  ;;  %v8796_v6 = vld [vmem:[%s14272_s23 + $0x1a8] sm:$0xf]  ;;  %v9395_v28 = vld [vmem:[%s14272_s23 + $0x1d4] sm:$0xf0] }
 0xd16   :  { %v8797_v25 = vor.u32 %v9391_v21, %v8796_v6  ;;  %v9392_v6 = vld [vmem:[%s14272_s23 + $0x1c4] sm:$0xf] }
 0xd17   :  { %v4348_v61 = vadd.f32 %v4347_v45, %v4259_v63  ;;  %v9393_v45 = vld [vmem:[%s14272_s23 + $0x1cc] sm:$0xf]  ;;  %v8814_v63 = vld [vmem:[%s14272_s23 + $0x1d8] sm:$0xf0] }
 0xd19   :  { %v4437_v4 = vadd.f32 %v4436_v42, %v4348_v61  ;;  %4300 = vmatmul.bf16.gmra.mxu2 %v8773_v38  ;;  %v12725_v1 = vpop.f32.mrf.mxu0  ;;  %v8813_v38 = vor.u32 %v9395_v28, %v8812_v17 }
 0xd1a   :  { %4389 = vmatmul.bf16.gmra.mxu3 %v8777_v8  ;;  %v12727_v36 = vpop.f32.mrf.mxu1  ;;  %v8817_v8 = vor.u32 %v9393_v45, %v8814_v63  ;;  %v8820_v45 = vld [vmem:[%s14272_s23 + $0x1e0] sm:$0xf] }
 0xd1b   :  { %v12729_v20 = vadd.f32 %v4525_v48, %v4437_v4  ;;  %v9390_v48 = vld [vmem:[%s14272_s23 + $0x1ac] sm:$0xf0]  ;;  %v8804_v4 = vld [vmem:[%s14272_s23 + $0x1c0] sm:$0xf] }
 0xd1c   :  { %v4261_v11 = vpop.f32.mrf.mxu2  ;;  %v8789_v56 = vor.u32 %v9390_v48, %v8788_v40  ;;  %v8828_v48 = vld [vmem:[%s14272_s23 + $0x1e8] sm:$0xf] }
 0xd1d   :  { %14296 = vst [vmem:[#allocation139_spill] sm:$0xff] %v12729_v20  ;;  %v4350_v12 = vpop.f32.mrf.mxu3  ;;  %v4262_v54 = vadd.f32 %v4261_v11, %v12645_v5 }
 0xd1f   :  { %v4351_v42 = vadd.f32 %v4350_v12, %v4262_v54  ;;  %v9394_v12 = vld [vmem:[%s14272_s23 + $0x1cc] sm:$0xf0]  ;;  %v8806_v54 = vld [vmem:[%s14272_s23 + $0x1d0] sm:$0xf0] }
 0xd20   :  { %v8805_v43 = vor.u32 %v9394_v12, %v8804_v4  ;;  %v8822_v4 = vld [vmem:[%s14272_s23 + $0x1f0] sm:$0xf0] }
 0xd21   :  { %v4440_v60 = vadd.f32 %v4439_v3, %v4351_v42  ;;  %v12736_v57 = vpop.f32.mrf.mxu0  ;;  %v8793_v3 = vor.u32 %v9388_v30, %v8790_v58  ;;  %v8809_v42 = vor.u32 %v9392_v6, %v8806_v54  ;;  %v9399_v30 = vld [vmem:[%s14272_s23 + $0x1f4] sm:$0xf0]  ;;  %v9397_v58 = vld [vmem:[%s14272_s23 + $0x1ec] sm:$0xf] }
 0xd22   :  { %v12739_v50 = vpop.f32.mrf.mxu1 }
 0xd23   :  { %v12744_v33 = vadd.f32 %v4528_v27, %v4440_v60 }
 0xd24   :  { %v12746_v5 = vpop.f32.mrf.mxu2  ;;  %4483 = vmatmul.bf16.gmra.mxu0 %v8797_v25 }
 0xd25   :  { %14297 = vst [vmem:[#allocation150_spill] sm:$0xff] %v12744_v33  ;;  %v12748_v18 = vpop.f32.mrf.mxu3  ;;  %4572 = vmatmul.bf16.gmra.mxu1 %v8801_v44 }
 0xd29   :  { %4305 = vmatmul.bf16.gmra.mxu2 %v8789_v56  ;;  %v12750_v51 = vpop.f32.mrf.mxu0  ;;  %v8830_v56 = vld [vmem:[%s14272_s23 + $0x1f8] sm:$0xf0] }
 0xd2a   :  { %4394 = vmatmul.bf16.gmra.mxu3 %v8793_v3  ;;  %v12752_v9 = vpop.f32.mrf.mxu1  ;;  %v8829_v3 = vor.u32 %v9399_v30, %v8828_v48  ;;  %v8833_v17 = vor.u32 %v9397_v58, %v8830_v56  ;;  %v12777_v30 = vpop.permute.xlu0 %3849 }
 0xd2b   :  { %14298 = vst [vmem:[#allocation151_spill] sm:$0xff] %v12777_v30 }
 0xd2c   :  { %v4266_v27 = vpop.f32.mrf.mxu2 }
 0xd2d   :  { %v12754_v10 = vpop.f32.mrf.mxu3 }
 0xd31   :  { %v12760_v61 = vpop.f32.mrf.mxu0 }
 0xd32   :  { %v12763_v11 = vpop.f32.mrf.mxu1 }
 0xd34   :  { %v4268_v21 = vpop.f32.mrf.mxu2  ;;  %4488 = vmatmul.bf16.gmra.mxu0 %v8813_v38  ;;  %v9398_v38 = vld [vmem:[%s14272_s23 + $0x1ec] sm:$0xf0] }
 0xd35   :  { %v4357_v47 = vpop.f32.mrf.mxu3  ;;  %4577 = vmatmul.bf16.gmra.mxu1 %v8817_v8  ;;  %v9396_v8 = vld [vmem:[%s14272_s23 + $0x1e4] sm:$0xf]  ;;  %v8821_v54 = vor.u32 %v9398_v38, %v8820_v45  ;;  %v4269_v38 = vadd.f32 %v4268_v21, %v12634_v41 }
 0xd39   :  { %4310 = vmatmul.bf16.gmra.mxu2 %v8805_v43  ;;  %v4451_v25 = vpop.f32.mrf.mxu0  ;;  %v8825_v43 = vor.u32 %v9396_v8, %v8822_v4 }
 0xd3a   :  { %4399 = vmatmul.bf16.gmra.mxu3 %v8809_v42  ;;  %v4540_v44 = vpop.f32.mrf.mxu1 }
 0xd3c   :  { %v4271_v60 = vpop.f32.mrf.mxu2 }
 0xd3d   :  { %v4360_v40 = vpop.f32.mrf.mxu3  ;;  %v4272_v7 = vadd.f32 %v4271_v60, %v12586_v53  ;;  %v3835_v60 = vpop.permute.xlu0 %3834 }
 0xd41   :  { %v4454_v28 = vpop.f32.mrf.mxu0 }
 0xd42   :  { %v4543_v63 = vpop.f32.mrf.mxu1 }
 0xd44   :  { %v4273_v12 = vpop.f32.mrf.mxu2  ;;  %4493 = vmatmul.bf16.gmra.mxu0 %v8829_v3 }
 0xd45   :  { %v4362_v6 = vpop.f32.mrf.mxu3  ;;  %4582 = vmatmul.bf16.gmra.mxu1 %v8833_v17  ;;  %v4274_v58 = vadd.f32 %v4273_v12, %v12593_v32  ;;  %v4264_v32 = vadd.f32 %v12746_v5, %v12618_v0  ;;  %v4358_v12 = vadd.f32 %v4357_v47, %v4269_v38 }
 0xd47   :  { %v4363_v8 = vadd.f32 %v4362_v6, %v4274_v58  ;;  %v4447_v5 = vadd.f32 %v12750_v51, %v4358_v12 }
 0xd49   :  { %4315 = vmatmul.bf16.gmra.mxu2 %v8821_v54  ;;  %v4456_v42 = vpop.f32.mrf.mxu0  ;;  %v4267_v54 = vadd.f32 %v4266_v27, %v12602_v22  ;;  %v4452_v30 = vadd.f32 %v4451_v25, %v4363_v8 }
 0xd4a   :  { %4404 = vmatmul.bf16.gmra.mxu3 %v8825_v43  ;;  %v4545_v29 = vpop.f32.mrf.mxu1  ;;  %v4361_v43 = vadd.f32 %v4360_v40, %v4272_v7  ;;  %v4353_v7 = vadd.f32 %v12748_v18, %v4264_v32  ;;  %v4588_v32 = vpack.c.bf16 %v12684_v55, %v12682_v13 }
 0xd4b   :  { %v4356_v41 = vadd.f32 %v12754_v10, %v4267_v54  ;;  %v12798_v47 = vadd.f32 %v4540_v44, %v4452_v30 }
 0xd4c   :  { %v4276_v16 = vpop.f32.mrf.mxu2 }
 0xd4d   :  { %v4365_v31 = vpop.f32.mrf.mxu3  ;;  %v4277_v48 = vadd.f32 %v4276_v16, %v12600_v37  ;;  %14301 = vst [vmem:[#allocation154_spill] sm:$0xff] %v12798_v47  ;;  %v4445_v10 = vadd.f32 %v12736_v57, %v4356_v41 }
 0xd4f   :  { %v4366_v3 = vadd.f32 %v4365_v31, %v4277_v48  ;;  %v12813_v6 = vadd.f32 %v12739_v50, %v4445_v10 }
 0xd51   :  { %v4459_v56 = vpop.f32.mrf.mxu0  ;;  %v4455_v37 = vadd.f32 %v4454_v28, %v4366_v3  ;;  %14304 = vst [vmem:[#allocation157_spill] sm:$0xff] %v12813_v6 }
 0xd52   :  { %v4548_v14 = vpop.f32.mrf.mxu1 }
 0xd53   :  { %v12792_v21 = vadd.f32 %v4543_v63, %v4455_v37  ;;  %v8836_v37 = vld [vmem:[#allocation24] sm:$0xf] }
 0xd54   :  { %v4278_v17 = vpop.f32.mrf.mxu2 }
 0xd55   :  { %v4367_v45 = vpop.f32.mrf.mxu3  ;;  %v4279_v4 = vadd.f32 %v4278_v17, %v12578_v19  ;;  %v4450_v19 = vadd.f32 %v12760_v61, %v4361_v43  ;;  %14299 = vst [vmem:[#allocation152_spill] sm:$0xff] %v12792_v21 }
 0xd57   :  { %v4368_v16 = vadd.f32 %v4367_v45, %v4279_v4  ;;  %v12804_v61 = vadd.f32 %v12763_v11, %v4450_v19  ;;  %v4590_v45 = vpack.c.bf16 %v12711_v34, %v12708_v62  ;;  %v14312_v62 = vld [vmem:[#allocation149_spill] sm:$0xff] }
 0xd59   :  { %v4457_v24 = vadd.f32 %v4456_v42, %v4368_v16  ;;  %v12786_v53 = vpop.f32.mrf.mxu0  ;;  %14302 = vst [vmem:[#allocation155_spill] sm:$0xff] %v12804_v61  ;;  %v4594_v51 = vpack.c.bf16 %v12798_v47, %v12804_v61  ;;  %v9401_v16 = vld [vmem:[#allocation24 + $0x4] sm:$0xf0] }
 0xd5a   :  { %v12788_v31 = vpop.f32.mrf.mxu1  ;;  %v8837_v41 = vor.u32 %v9401_v16, %v8836_v37 }
 0xd5b   :  { %v12794_v22 = vadd.f32 %v4545_v29, %v4457_v24  ;;  %v4442_v24 = vadd.f32 %v12725_v1, %v4353_v7  ;;  %v12808_v29 = vadd.f32 %v12752_v9, %v4447_v5 }
 0xd5c   :  { %v4281_v27 = vpop.f32.mrf.mxu2 }
 0xd5d   :  { %14300 = vst [vmem:[#allocation153_spill] sm:$0xff] %v12794_v22  ;;  %v4370_v0 = vpop.f32.mrf.mxu3  ;;  %v4282_v25 = vadd.f32 %v4281_v27, %v3835_v60  ;;  %v4595_v40 = vpack.c.bf16 %v12794_v22, %v12792_v21  ;;  %v12822_v1 = vadd.f32 %v12727_v36, %v4442_v24  ;;  %v4593_v9 = vpack.c.bf16 %v12808_v29, %v12813_v6 }
 0xd5e   :  { %14303 = vst [vmem:[#allocation156_spill] sm:$0xff] %v12808_v29  ;;  %v4591_v36 = vpack.c.bf16 %v12729_v20, %v12722_v35  ;;  %v14311_v20 = vld [vmem:[#allocation140_spill] sm:$0xff] }
 0xd5f   :  { %v4371_v28 = vadd.f32 %v4370_v0, %v4282_v25  ;;  %4988 = vmatpush.bf16.msra.mxu2 %v4595_v40  ;;  %14306 = vst [vmem:[#allocation159_spill] sm:$0xff] %v12822_v1  ;;  %v4592_v48 = vpack.c.bf16 %v12822_v1, %v12744_v33 }
 0xd61   :  { %v4460_v18 = vadd.f32 %v4459_v56, %v4371_v28  ;;  %v4464_v44 = vpop.f32.mrf.mxu0 }
 0xd62   :  { %v4553_v63 = vpop.f32.mrf.mxu1 }
 0xd63   :  { %v12815_v57 = vadd.f32 %v4548_v14, %v4460_v18  ;;  %4989 = vmatpush.bf16.msra.mxu2 %v4594_v51  ;;  %v8844_v18 = vld [vmem:[#allocation24 + $0x10] sm:$0xf]  ;;  %v9403_v51 = vld [vmem:[#allocation24 + $0x14] sm:$0xf0] }
 0xd64   :  { %v12817_v11 = vpop.f32.mrf.mxu2 }
 0xd65   :  { %14305 = vst [vmem:[#allocation158_spill] sm:$0xff] %v12815_v57  ;;  %v12819_v42 = vpop.f32.mrf.mxu3  ;;  %v8884_v57 = vld [vmem:[#allocation24 + $0x60] sm:$0xf] }
 0xd67   :  { %4990 = vmatpush.bf16.msra.mxu2 %v4593_v9  ;;  %v8845_v9 = vor.u32 %v9403_v51, %v8844_v18  ;;  %v8860_v51 = vld [vmem:[#allocation24 + $0x30] sm:$0xf] }
 0xd69   :  { %v12828_v30 = vpop.f32.mrf.mxu0 }
 0xd6a   :  { %v12830_v50 = vpop.f32.mrf.mxu1 }
 0xd6b   :  { %4991 = vmatpush.bf16.msra.mxu2 %v4592_v48 }
 0xd6c   :  { %v4286_v14 = vpop.f32.mrf.mxu2 }
 0xd6d   :  { %v4375_v58 = vpop.f32.mrf.mxu3  ;;  %v4287_v56 = vadd.f32 %v4286_v14, %v12670_v52  ;;  %v4589_v52 = vpack.c.bf16 %v12697_v59, %v12694_v15 }
 0xd6f   :  { %v4376_v3 = vadd.f32 %v4375_v58, %v4287_v56  ;;  %4992 = vmatpush.bf16.msra.mxu2 %v4591_v36 }
 0xd71   :  { %v4465_v17 = vadd.f32 %v4464_v44, %v4376_v3  ;;  %v4469_v38 = vpop.f32.mrf.mxu0 }
 0xd72   :  { %v4558_v8 = vpop.f32.mrf.mxu1 }
 0xd73   :  { %v12837_v4 = vadd.f32 %v4553_v63, %v4465_v17  ;;  %4993 = vmatpush.bf16.msra.mxu2 %v4590_v45 }
 0xd74   :  { %v12839_v54 = vpop.f32.mrf.mxu2 }
 0xd75   :  { %14307 = vst [vmem:[#allocation160_spill] sm:$0xff] %v12837_v4  ;;  %v12841_v43 = vpop.f32.mrf.mxu3  ;;  %v14314_v4 = vld [vmem:[#allocation144_spill] sm:$0xff] }
 0xd77   :  { %4994 = vmatpush.bf16.msra.mxu2 %v4589_v52  ;;  %v9405_v52 = vld [vmem:[#allocation24 + $0x24] sm:$0xf0] }
 0xd79   :  { %v12847_v12 = vpop.f32.mrf.mxu0 }
 0xd7a   :  { %v12849_v60 = vpop.f32.mrf.mxu1 }
 0xd7b   :  { %4995 = vmatpush.bf16.msra.mxu2 %v4588_v32 }
 0xd7c   :  { %v4291_v19 = vpop.f32.mrf.mxu2 }
 0xd7d   :  { %v4380_v7 = vpop.f32.mrf.mxu3  ;;  %v4292_v27 = vadd.f32 %v4291_v19, %v12652_v23 }
 0xd7e   :  { %4996 = vmatmul.bf16.vlgmr.msra.gmra.mxu2 %v8837_v41 }
 0xd7f   :  { %v4381_v0 = vadd.f32 %v4380_v7, %v4292_v27 }
 0xd81   :  { %v4470_v5 = vadd.f32 %v4469_v38, %v4381_v0  ;;  %v4474_v25 = vpop.f32.mrf.mxu0 }
 0xd82   :  { %v4563_v40 = vpop.f32.mrf.mxu1 }
 0xd83   :  { %v12852_v10 = vadd.f32 %v4558_v8, %v4470_v5  ;;  %v8852_v8 = vld [vmem:[#allocation24 + $0x20] sm:$0xf] }
 0xd84   :  { %v12854_v28 = vpop.f32.mrf.mxu2  ;;  %v8853_v37 = vor.u32 %v9405_v52, %v8852_v8  ;;  %v8868_v52 = vld [vmem:[#allocation24 + $0x40] sm:$0xf] }
 0xd85   :  { %14308 = vst [vmem:[#allocation161_spill] sm:$0xff] %v12852_v10  ;;  %v12856_v24 = vpop.f32.mrf.mxu3 }
 0xd89   :  { %v12858_v44 = vpop.f32.mrf.mxu0 }
 0xd8a   :  { %v12860_v63 = vpop.f32.mrf.mxu1 }
 0xd8c   :  { %v4296_v48 = vpop.f32.mrf.mxu2 }
 0xd8d   :  { %v4385_v23 = vpop.f32.mrf.mxu3  ;;  %v4297_v14 = vadd.f32 %v4296_v48, %v12668_v26 }
 0xd8e   :  { %5001 = vmatmul.bf16.gmra.mxu2 %v8845_v9  ;;  %v9407_v9 = vld [vmem:[#allocation24 + $0x34] sm:$0xf0] }
 0xd8f   :  { %v4386_v58 = vadd.f32 %v4385_v23, %v4297_v14  ;;  %v8861_v48 = vor.u32 %v9407_v9, %v8860_v51  ;;  %v8876_v51 = vld [vmem:[#allocation24 + $0x50] sm:$0xf]  ;;  %v9411_v9 = vld [vmem:[#allocation24 + $0x54] sm:$0xf0] }
 0xd90   :  { %v8877_v6 = vor.u32 %v9411_v9, %v8876_v51  ;;  %v14313_v51 = vld [vmem:[#allocation148_spill] sm:$0xff] }
 0xd91   :  { %v4475_v56 = vadd.f32 %v4474_v25, %v4386_v58  ;;  %v4479_v36 = vpop.f32.mrf.mxu0 }
 0xd92   :  { %v4568_v17 = vpop.f32.mrf.mxu1 }
 0xd93   :  { %v12863_v3 = vadd.f32 %v4563_v40, %v4475_v56 }
 0xd94   :  { %v12865_v45 = vpop.f32.mrf.mxu2 }
 0xd95   :  { %14309 = vst [vmem:[#allocation162_spill] sm:$0xff] %v12863_v3  ;;  %v12867_v38 = vpop.f32.mrf.mxu3 }
 0xd99   :  { %v12869_v16 = vpop.f32.mrf.mxu0 }
 0xd9a   :  { %v12872_v19 = vpop.f32.mrf.mxu1 }
 0xd9c   :  { %v4301_v32 = vpop.f32.mrf.mxu2 }
 0xd9d   :  { %v4390_v41 = vpop.f32.mrf.mxu3  ;;  %v4302_v26 = vadd.f32 %v4301_v32, %v12626_v46 }
 0xd9e   :  { %5006 = vmatmul.bf16.gmra.mxu2 %v8853_v37 }
 0xd9f   :  { %v4391_v7 = vadd.f32 %v4390_v41, %v4302_v26 }
 0xda1   :  { %v4480_v27 = vadd.f32 %v4479_v36, %v4391_v7  ;;  %v12876_v40 = vpop.f32.mrf.mxu0  ;;  %v9409_v36 = vld [vmem:[#allocation24 + $0x44] sm:$0xf0] }
 0xda2   :  { %v12878_v18 = vpop.f32.mrf.mxu1  ;;  %v8869_v37 = vor.u32 %v9409_v36, %v8868_v52 }
 0xda3   :  { %v12874_v0 = vadd.f32 %v4568_v17, %v4480_v27 }
 0xda4   :  { %v4303_v5 = vpop.f32.mrf.mxu2 }
 0xda5   :  { %14310 = vst [vmem:[#allocation163_spill] sm:$0xff] %v12874_v0  ;;  %v4392_v25 = vpop.f32.mrf.mxu3 }
 0xda9   :  { %v4486_v46 = vpop.f32.mrf.mxu0 }
 0xdaa   :  { %v4575_v58 = vpop.f32.mrf.mxu1 }
 0xdac   :  { %v4306_v23 = vpop.f32.mrf.mxu2 }
 0xdad   :  { %v4395_v14 = vpop.f32.mrf.mxu3  ;;  %v4307_v9 = vadd.f32 %v4306_v23, %v14313_v51  ;;  %v14315_v23 = vld [vmem:[#allocation141_spill] sm:$0xff]  ;;  %v8838_v51 = vld [vmem:[#allocation24 + $0x8] sm:$0xf0] }
 0xdae   :  { %5011 = vmatmul.bf16.gmra.mxu2 %v8861_v48 }
 0xdb1   :  { %v4489_v17 = vpop.f32.mrf.mxu0 }
 0xdb2   :  { %v4578_v32 = vpop.f32.mrf.mxu1 }
 0xdb4   :  { %v4308_v56 = vpop.f32.mrf.mxu2 }
 0xdb5   :  { %v4397_v8 = vpop.f32.mrf.mxu3  ;;  %v4309_v35 = vadd.f32 %v4308_v56, %v14311_v20  ;;  %v4396_v20 = vadd.f32 %v4395_v14, %v4307_v9  ;;  %v14324_v9 = vld [vmem:[#allocation158_spill] sm:$0xff] }
 0xdb9   :  { %v4491_v7 = vpop.f32.mrf.mxu0 }
 0xdba   :  { %v4580_v1 = vpop.f32.mrf.mxu1 }
 0xdbc   :  { %v4311_v41 = vpop.f32.mrf.mxu2 }
 0xdbd   :  { %v4400_v26 = vpop.f32.mrf.mxu3  ;;  %v4312_v36 = vadd.f32 %v4311_v41, %v12624_v39 }
 0xdbe   :  { %5016 = vmatmul.bf16.gmra.mxu2 %v8869_v37 }
 0xdbf   :  { %v4401_v55 = vadd.f32 %v4400_v26, %v4312_v36  ;;  %v9417_v36 = vld [vmem:[#allocation24 + $0x84] sm:$0xf0] }
 0xdc1   :  { %v4494_v61 = vpop.f32.mrf.mxu0 }
 0xdc2   :  { %v4583_v22 = vpop.f32.mrf.mxu1 }
 0xdc4   :  { %v4313_v27 = vpop.f32.mrf.mxu2 }
 0xdc5   :  { %v4402_v33 = vpop.f32.mrf.mxu3  ;;  %v4314_v52 = vadd.f32 %v4313_v27, %v12598_v49  ;;  %v4304_v49 = vadd.f32 %v4303_v5, %v14314_v4  ;;  %v4398_v27 = vadd.f32 %v4397_v8, %v4309_v35  ;;  %v9415_v8 = vld [vmem:[#allocation24 + $0x74] sm:$0xf0] }
 0xdc7   :  { %v4403_v34 = vadd.f32 %v4402_v33, %v4314_v52  ;;  %v4490_v33 = vadd.f32 %v4489_v17, %v4401_v55  ;;  %v8900_v52 = vld [vmem:[#allocation24 + $0x80] sm:$0xf] }
 0xdc9   :  { %v4492_v39 = vadd.f32 %v4491_v7, %v4403_v34  ;;  %v4485_v34 = vadd.f32 %v12876_v40, %v4396_v20 }
 0xdcb   :  { %v12909_v5 = vadd.f32 %v12878_v18, %v4485_v34  ;;  %v8854_v34 = vld [vmem:[#allocation24 + $0x28] sm:$0xf0] }
 0xdcc   :  { %v4316_v48 = vpop.f32.mrf.mxu2 }
 0xdcd   :  { %v4405_v29 = vpop.f32.mrf.mxu3  ;;  %v4317_v47 = vadd.f32 %v4316_v48, %v12584_v2  ;;  %v9413_v2 = vld [vmem:[#allocation24 + $0x64] sm:$0xf0]  ;;  %v4496_v48 = vpop.f32.mrf.mxu0 }
 0xdce   :  { %5021 = vmatmul.bf16.gmra.mxu2 %v8877_v6  ;;  %v8885_v41 = vor.u32 %v9413_v2, %v8884_v57  ;;  %v12898_v57 = vadd.f32 %v4578_v32, %v4490_v33  ;;  %v14325_v2 = vld [vmem:[#allocation135_spill] sm:$0xff] }
 0xdcf   :  { %v4406_v21 = vadd.f32 %v4405_v29, %v4317_v47  ;;  %v4585_v29 = vpop.f32.mrf.mxu1  ;;  %v14329_v33 = vld [vmem:[#allocation131_spill] sm:$0xff] }
 0xdd1   :  { %v4495_v13 = vadd.f32 %v4494_v61, %v4406_v21  ;;  %v4299_v21 = vadd.f32 %v12865_v45, %v14315_v23  ;;  %v12893_v61 = vadd.f32 %v4580_v1, %v4492_v39  ;;  %v9402_v39 = vld [vmem:[#allocation24 + $0x14] sm:$0xf]  ;;  %v14330_v23 = vld [vmem:[#allocation125_spill] sm:$0xff] }
 0xdd3   :  { %v12887_v56 = vadd.f32 %v4583_v22, %v4495_v13  ;;  %v14316_v13 = vld [vmem:[#allocation145_spill] sm:$0xff]  ;;  %v4388_v22 = vadd.f32 %v12867_v38, %v4299_v21  ;;  %v4602_v1 = vpack.c.bf16 %v12893_v61, %v12898_v57  ;;  %v14331_v21 = vld [vmem:[#allocation124_spill] sm:$0xff] }
 0xdd4   :  { %v4318_v37 = vpop.f32.mrf.mxu2  ;;  %v4294_v55 = vadd.f32 %v12854_v28, %v14316_v13  ;;  %v14332_v13 = vld [vmem:[#allocation123_spill] sm:$0xff] }
 0xdd5   :  { %v4319_v59 = vadd.f32 %v4318_v37, %v14312_v62  ;;  %v4407_v15 = vpop.f32.mrf.mxu3  ;;  %v4477_v28 = vadd.f32 %v12858_v44, %v4388_v22  ;;  %v9400_v37 = vld [vmem:[#allocation24 + $0x4] sm:$0xf] }
 0xdd6   :  { %v4383_v14 = vadd.f32 %v12856_v24, %v4294_v55  ;;  %v14333_v55 = vld [vmem:[#allocation126_spill] sm:$0xff] }
 0xdd7   :  { %v4408_v6 = vadd.f32 %v4407_v15, %v4319_v59  ;;  %v4393_v15 = vadd.f32 %v4392_v25, %v4304_v49  ;;  %v4487_v59 = vadd.f32 %v4486_v46, %v4398_v27  ;;  %v14317_v25 = vld [vmem:[#allocation151_spill] sm:$0xff]  ;;  %v3840_v46 = vpop.permute.xlu1 %3839  ;;  %v12924_v24 = vadd.f32 %v12860_v63, %v4477_v28  ;;  %v9419_v27 = vld [vmem:[#allocation24 + $0x94] sm:$0xf0] }
 0xdd8   :  { %v4289_v40 = vadd.f32 %v12839_v54, %v14317_v25  ;;  %v4284_v18 = vadd.f32 %v12817_v11, %v3840_v46  ;;  %v4472_v54 = vadd.f32 %v12847_v12, %v4383_v14  ;;  %v8908_v49 = vld [vmem:[#allocation24 + $0x90] sm:$0xf]  ;;  %v12958_v25 = vpop.permute.xlu0 %4745  ;;  %v9423_v14 = vld [vmem:[#allocation24 + $0xb4] sm:$0xf0]  ;;  %v9406_v28 = vld [vmem:[#allocation24 + $0x34] sm:$0xf] }
 0xdd9   :  { %v4497_v47 = vadd.f32 %v4496_v48, %v4408_v6  ;;  %v4482_v4 = vadd.f32 %v12869_v16, %v4393_v15  ;;  %v12904_v45 = vadd.f32 %v4575_v58, %v4487_v59  ;;  %v8892_v58 = vld [vmem:[#allocation24 + $0x70] sm:$0xf]  ;;  %14319 = vst [vmem:[#allocation149_spill] sm:$0xff] %v12924_v24  ;;  %v4599_v11 = vpack.c.bf16 %v12924_v24, %v12863_v3  ;;  %v14327_v48 = vld [vmem:[#allocation133_spill] sm:$0xff]  ;;  %v9421_v59 = vld [vmem:[#allocation24 + $0xa4] sm:$0xf0] }
 0xdda   :  { %v4378_v17 = vadd.f32 %v12841_v43, %v4289_v40  ;;  %v4373_v32 = vadd.f32 %v12819_v42, %v4284_v18  ;;  %v12931_v7 = vadd.f32 %v12849_v60, %v4472_v54  ;;  %v8841_v6 = vor.u32 %v9400_v37, %v8838_v51  ;;  %v8916_v15 = vld [vmem:[#allocation24 + $0xa0] sm:$0xf]  ;;  %v8924_v40 = vld [vmem:[#allocation24 + $0xb0] sm:$0xf] }
 0xddb   :  { %v12889_v62 = vadd.f32 %v4585_v29, %v4497_v47  ;;  %v12916_v38 = vadd.f32 %v12872_v19, %v4482_v4  ;;  %v4601_v16 = vpack.c.bf16 %v12904_v45, %v12909_v5  ;;  %v8893_v19 = vor.u32 %v9415_v8, %v8892_v58  ;;  %v8846_v47 = vld [vmem:[#allocation24 + $0x18] sm:$0xf0] }
 0xddc   :  { %v4467_v26 = vadd.f32 %v12828_v30, %v4378_v17  ;;  %14320 = vst [vmem:[#allocation148_spill] sm:$0xff] %v12931_v7  ;;  %v4462_v43 = vadd.f32 %v12786_v53, %v4373_v32  ;;  %v4598_v63 = vpack.c.bf16 %v12931_v7, %v12852_v10  ;;  %v14323_v30 = vld [vmem:[#allocation160_spill] sm:$0xff]  ;;  %v8849_v20 = vor.u32 %v9402_v39, %v8846_v47  ;;  %v9425_v32 = vld [vmem:[#allocation24 + $0xc4] sm:$0xf0] }
 0xddd   :  { %v4603_v35 = vpack.c.bf16 %v12889_v62, %v12887_v56  ;;  %14318 = vst [vmem:[#allocation140_spill] sm:$0xff] %v12916_v38  ;;  %v4600_v44 = vpack.c.bf16 %v12916_v38, %v12874_v0  ;;  %v14328_v29 = vld [vmem:[#allocation132_spill] sm:$0xff]  ;;  %v8917_v22 = vor.u32 %v9421_v59, %v8916_v15  ;;  %v8925_v58 = vor.u32 %v9423_v14, %v8924_v40  ;;  %v9412_v15 = vld [vmem:[#allocation24 + $0x64] sm:$0xf]  ;;  %v8886_v59 = vld [vmem:[#allocation24 + $0x68] sm:$0xf0] }
 0xdde   :  { %5026 = vmatmul.bf16.gmra.mxu2 %v8885_v41  ;;  %v12937_v12 = vadd.f32 %v12830_v50, %v4467_v26  ;;  %v12942_v42 = vadd.f32 %v12788_v31, %v4462_v43  ;;  %v8901_v50 = vor.u32 %v9417_v36, %v8900_v52  ;;  %v14326_v31 = vld [vmem:[#allocation134_spill] sm:$0xff]  ;;  %v8909_v41 = vor.u32 %v9419_v27, %v8908_v49  ;;  %v12974_v36 = vpop.permute.xlu2 %4740  ;;  %v8956_v40 = vld [vmem:[#allocation24 + $0xf0] sm:$0xf] }
 0xddf   :  { %5077 = vmatpush.bf16.msra.mxu3 %v4603_v35  ;;  %v9404_v35 = vld [vmem:[#allocation24 + $0x24] sm:$0xf]  ;;  %v12962_v18 = vpop.permute.xlu1 %4820 }
 0xde0   :  { %14321 = vst [vmem:[#allocation144_spill] sm:$0xff] %v12937_v12  ;;  %v4597_v60 = vpack.c.bf16 %v12937_v12, %v14323_v30  ;;  %v4596_v53 = vpack.c.bf16 %v12942_v42, %v14324_v9  ;;  %v8857_v4 = vor.u32 %v9404_v35, %v8854_v34  ;;  %v12964_v17 = vpop.permute.xlu0 %4730  ;;  %v9408_v26 = vld [vmem:[#allocation24 + $0x44] sm:$0xf] }
 0xde1   :  { %14322 = vst [vmem:[#allocation141_spill] sm:$0xff] %v12942_v42 }
 0xde3   :  { %5078 = vmatpush.bf16.msra.mxu3 %v4602_v1  ;;  %v14334_v1 = vld [vmem:[#allocation122_spill] sm:$0xff] }
 0xde7   :  { %5079 = vmatpush.bf16.msra.mxu3 %v4601_v16  ;;  %v8862_v16 = vld [vmem:[#allocation24 + $0x38] sm:$0xf0] }
 0xde8   :  { %v8865_v8 = vor.u32 %v9406_v28, %v8862_v16  ;;  %v12970_v43 = vpop.permute.xlu0 %4815  ;;  %v9431_v28 = vld [vmem:[#allocation24 + $0xf4] sm:$0xf0]  ;;  %v9414_v16 = vld [vmem:[#allocation24 + $0x74] sm:$0xf] }
 0xdeb   :  { %5080 = vmatpush.bf16.msra.mxu3 %v4600_v44  ;;  %v8932_v44 = vld [vmem:[#allocation24 + $0xc0] sm:$0xf] }
 0xdee   :  { %5031 = vmatmul.bf16.gmra.mxu2 %v8893_v19  ;;  %v12968_v19 = vpop.permute.xlu1 %4735 }
 0xdef   :  { %5081 = vmatpush.bf16.msra.mxu3 %v4599_v11  ;;  %v8870_v11 = vld [vmem:[#allocation24 + $0x48] sm:$0xf0] }
 0xdf0   :  { %v12978_v51 = vpop.permute.xlu0 %4800 }
 0xdf3   :  { %5082 = vmatpush.bf16.msra.mxu3 %v4598_v63  ;;  %v8933_v63 = vor.u32 %v9425_v32, %v8932_v44  ;;  %v8957_v44 = vor.u32 %v9431_v28, %v8956_v40 }
 0xdf6   :  { %v12976_v37 = vpop.permute.xlu1 %4720 }
 0xdf7   :  { %5083 = vmatpush.bf16.msra.mxu3 %v4597_v60  ;;  %v8873_v60 = vor.u32 %v9408_v26, %v8870_v11 }
 0xdf8   :  { %v12986_v47 = vpop.permute.xlu0 %4715 }
 0xdfb   :  { %5084 = vmatpush.bf16.msra.mxu3 %v4596_v53 }
 0xdfe   :  { %5036 = vmatmul.bf16.gmra.mxu2 %v8901_v50  ;;  %5085 = vmatmul.bf16.vlgmr.msra.gmra.mxu3 %v8841_v6  ;;  %v8940_v50 = vld [vmem:[#allocation24 + $0xd0] sm:$0xf]  ;;  %v9427_v6 = vld [vmem:[#allocation24 + $0xd4] sm:$0xf0]  ;;  %v12984_v39 = vpop.permute.xlu1 %4805 }
 0xdff   :  { %6208 = vmatpush.bf16.msrb.mxu3 %v14325_v2  ;;  %v9410_v2 = vld [vmem:[#allocation24 + $0x54] sm:$0xf]  ;;  %v8941_v49 = vor.u32 %v9427_v6, %v8940_v50  ;;  %v9416_v6 = vld [vmem:[#allocation24 + $0x84] sm:$0xf] }
 0xe01   :  { %v12960_v46 = vpop.f32.mrf.mxu2 }
 0xe03   :  { %6209 = vmatpush.bf16.msrb.mxu3 %v14326_v31  ;;  %v8878_v31 = vld [vmem:[#allocation24 + $0x58] sm:$0xf0] }
 0xe04   :  { %v8881_v27 = vor.u32 %v9410_v2, %v8878_v31  ;;  %v8902_v2 = vld [vmem:[#allocation24 + $0x88] sm:$0xf0] }
 0xe05   :  { %v8905_v31 = vor.u32 %v9416_v6, %v8902_v2 }
 0xe07   :  { %6210 = vmatpush.bf16.msrb.mxu3 %v14327_v48  ;;  %v12982_v48 = vpop.permute.xlu2 %4825 }
 0xe09   :  { %v12966_v54 = vpop.f32.mrf.mxu2 }
 0xe0b   :  { %6211 = vmatpush.bf16.msrb.mxu3 %v14328_v29 }
 0xe0e   :  { %5041 = vmatmul.bf16.gmra.mxu2 %v8909_v41  ;;  %5090 = vmatmul.bf16.gmra.mxu3 %v8849_v20  ;;  %v12992_v20 = vpop.permute.xlu1 %4790 }
 0xe0f   :  { %6212 = vmatpush.bf16.msrb.mxu3 %v14329_v33  ;;  %v12990_v41 = vpop.permute.xlu2 %4810  ;;  %v8948_v33 = vld [vmem:[#allocation24 + $0xe0] sm:$0xf] }
 0xe11   :  { %v12972_v52 = vpop.f32.mrf.mxu2 }
 0xe13   :  { %6213 = vmatpush.bf16.msrb.mxu3 %v14330_v23  ;;  %v12994_v23 = vpop.permute.xlu0 %4700 }
 0xe17   :  { %6214 = vmatpush.bf16.msrb.mxu3 %v14331_v21  ;;  %v9429_v21 = vld [vmem:[#allocation24 + $0xe4] sm:$0xf0] }
 0xe18   :  { %v8949_v34 = vor.u32 %v9429_v21, %v8948_v33 }
 0xe19   :  { %v12980_v53 = vpop.f32.mrf.mxu2 }
 0xe1b   :  { %6215 = vmatpush.bf16.msrb.mxu3 %v14332_v13  ;;  %v8889_v13 = vor.u32 %v9412_v15, %v8886_v59 }
 0xe1e   :  { %5046 = vmatmul.bf16.gmra.mxu2 %v8917_v22  ;;  %5095 = vmatmul.bf16.gmra.mxu3 %v8857_v4  ;;  %v13000_v22 = vpop.permute.xlu1 %4705  ;;  %v13002_v4 = vpop.permute.xlu0 %4785 }
 0xe1f   :  { %6426 = vmatpush.bf16.msra.mxu3 %v14333_v55  ;;  %v12998_v55 = vpop.permute.xlu2 %4725 }
 0xe21   :  { %v12988_v29 = vpop.f32.mrf.mxu2 }
 0xe23   :  { %6427 = vmatpush.bf16.msra.mxu3 %v14334_v1 }
 0xe26   :  { %v13010_v26 = vpop.permute.xlu0 %4770 }
 0xe27   :  { %v13006_v14 = vpop.permute.xlu2 %4710 }
 0xe29   :  { %v12996_v35 = vpop.f32.mrf.mxu2 }
 0xe2e   :  { %5051 = vmatmul.bf16.gmra.mxu2 %v8925_v58  ;;  %5100 = vmatmul.bf16.gmra.mxu3 %v8865_v8  ;;  %v8894_v58 = vld [vmem:[#allocation24 + $0x78] sm:$0xf0]  ;;  %v13008_v8 = vpop.permute.xlu1 %4690  ;;  %v4686_v50 = vpop.permute.xlu0 %4685 }
 0xe2f   :  { %v8897_v32 = vor.u32 %v9414_v16, %v8894_v58  ;;  %v9418_v16 = vld [vmem:[#allocation24 + $0x94] sm:$0xf]  ;;  %v8910_v58 = vld [vmem:[#allocation24 + $0x98] sm:$0xf0] }
 0xe30   :  { %v8913_v42 = vor.u32 %v9418_v16, %v8910_v58  ;;  %v9420_v16 = vld [vmem:[#allocation24 + $0xa4] sm:$0xf]  ;;  %v8918_v58 = vld [vmem:[#allocation24 + $0xa8] sm:$0xf0] }
 0xe31   :  { %v13004_v1 = vpop.f32.mrf.mxu2 }
 0xe36   :  { %v4671_v33 = vpop.permute.xlu0 %4670 }
 0xe37   :  { %v4998_v21 = vadd.f32 %v12960_v46, %v4671_v33 }
 0xe39   :  { %v13012_v11 = vpop.f32.mrf.mxu2 }
 0xe3e   :  { %5056 = vmatmul.bf16.gmra.mxu2 %v8933_v63  ;;  %5105 = vmatmul.bf16.gmra.mxu3 %v8873_v60  ;;  %v13014_v63 = vpop.permute.xlu2 %4795  ;;  %v13016_v60 = vpop.permute.xlu1 %4775 }
 0xe41   :  { %v13026_v33 = vpop.f32.mrf.mxu2 }
 0xe4e   :  { %5061 = vmatmul.bf16.gmra.mxu2 %v8941_v49  ;;  %5110 = vmatmul.bf16.gmra.mxu3 %v8881_v27  ;;  %v13018_v49 = vpop.permute.xlu2 %4780  ;;  %v13020_v27 = vpop.permute.xlu1 %4760 }
 0xe56   :  { %v4676_v28 = vpop.permute.xlu1 %4675 }
 0xe5e   :  { %5066 = vmatmul.bf16.gmra.mxu2 %v8949_v34  ;;  %5115 = vmatmul.bf16.gmra.mxu3 %v8889_v13  ;;  %v13023_v13 = vpop.permute.xlu2 %4695 }
 0xe66   :  { %v4681_v46 = vpop.permute.xlu2 %4680 }
 0xe6e   :  { %5071 = vmatmul.bf16.gmra.mxu2 %v8957_v44  ;;  %5120 = vmatmul.bf16.gmra.mxu3 %v8897_v32  ;;  %v5000_v44 = vadd.f32 %v12966_v54, %v4676_v28 }
 0xe7e   :  { %5125 = vmatmul.bf16.gmra.mxu3 %v8905_v31 }
 0xe81   :  { %v5086_v15 = vpop.f32.mrf.mxu3 }
 0xe82   :  { %v5087_v59 = vadd.f32 %v5086_v15, %v4998_v21  ;;  %v5003_v21 = vadd.f32 %v12972_v52, %v4681_v46 }
 0xe84   :  { %v5166_v34 = vmul.f32 %v5087_v59, %v5087_v59 }
 0xe86   :  { %v5198_v40 = vmul.f32 %v5166_v34, %v5087_v59 }
 0xe88   :  { %v5230_v32 = vmul.f32 0.044715, %v5198_v40 }
 0xe89   :  { %v5088_v6 = vpop.f32.mrf.mxu3 }
 0xe8a   :  { %v5262_v2 = vadd.f32 %v5230_v32, %v5087_v59  ;;  %v5089_v9 = vadd.f32 %v5088_v6, %v5000_v44  ;;  %v13030_v44 = vpop.f32.mrf.mxu2 }
 0xe8c   :  { %v5294_v31 = vmul.f32 0.7978846, %v5262_v2  ;;  %v5167_v30 = vmul.f32 %v5089_v9, %v5089_v9 }
 0xe8e   :  { %v5199_v12 = vmul.f32 %v5167_v30, %v5089_v9  ;;  %5130 = vmatmul.bf16.gmra.mxu3 %v8913_v42  ;;  %9681 = vtanh.f32 %v5294_v31  ;;  %v5005_v30 = vadd.f32 %v12980_v53, %v4686_v50 }
 0xe90   :  { %v5231_v15 = vmul.f32 0.044715, %v5199_v12  ;;  %v8921_v12 = vor.u32 %v9420_v16, %v8918_v58 }
 0xe91   :  { %v5091_v34 = vpop.f32.mrf.mxu3 }
 0xe92   :  { %v5263_v10 = vadd.f32 %v5231_v15, %v5089_v9  ;;  %v5092_v7 = vadd.f32 %v5091_v34, %v5003_v21  ;;  %v13040_v58 = vpop.f32.mrf.mxu2 }
 0xe94   :  { %v5295_v54 = vmul.f32 0.7978846, %v5263_v10  ;;  %v5168_v40 = vmul.f32 %v5092_v7, %v5092_v7  ;;  %v9682_v28 = vpop.eup %9681 }
 0xe95   :  { %v5358_v2 = vadd.f32 1.0, %v9682_v28 }
 0xe96   :  { %v5200_v32 = vmul.f32 %v5168_v40, %v5092_v7  ;;  %9683 = vtanh.f32 %v5295_v54  ;;  %v5008_v40 = vadd.f32 %v12988_v29, %v13008_v8  ;;  %v9422_v8 = vld [vmem:[#allocation24 + $0xb4] sm:$0xf] }
 0xe97   :  { %v5390_v34 = vmul.f32 0.5, %v5358_v2 }
 0xe98   :  { %v5232_v42 = vmul.f32 0.044715, %v5200_v32 }
 0xe99   :  { %v5093_v6 = vpop.f32.mrf.mxu3  ;;  %v13034_v32 = vmul.f32 %v5390_v34, %v5087_v59  ;;  %v8926_v59 = vld [vmem:[#allocation24 + $0xb8] sm:$0xf0] }
 0xe9a   :  { %v5264_v52 = vadd.f32 %v5232_v42, %v5092_v7  ;;  %v5094_v31 = vadd.f32 %v5093_v6, %v5005_v30 }
 0xe9c   :  { %v9684_v46 = vpop.eup %9683  ;;  %v5296_v15 = vmul.f32 0.7978846, %v5264_v52  ;;  %v5169_v21 = vmul.f32 %v5094_v31, %v5094_v31 }
 0xe9d   :  { %v5359_v10 = vadd.f32 1.0, %v9684_v46 }
 0xe9e   :  { %v5201_v3 = vmul.f32 %v5169_v21, %v5094_v31  ;;  %5135 = vmatmul.bf16.gmra.mxu3 %v8921_v12  ;;  %9685 = vtanh.f32 %v5296_v15 }
 0xe9f   :  { %v5391_v54 = vmul.f32 0.5, %v5359_v10  ;;  %v8929_v10 = vor.u32 %v9422_v8, %v8926_v59 }
 0xea0   :  { %v5233_v53 = vmul.f32 0.044715, %v5201_v3 }
 0xea1   :  { %v5096_v50 = vpop.f32.mrf.mxu3  ;;  %v13036_v28 = vmul.f32 %v5391_v54, %v5089_v9  ;;  %v5010_v9 = vadd.f32 %v12996_v35, %v13023_v13  ;;  %v5013_v35 = vadd.f32 %v13004_v1, %v12994_v23  ;;  %v8934_v23 = vld [vmem:[#allocation24 + $0xc8] sm:$0xf0]  ;;  %v5015_v1 = vadd.f32 %v13012_v11, %v13000_v22 }
 0xea2   :  { %v5265_v30 = vadd.f32 %v5233_v53, %v5094_v31  ;;  %v13038_v16 = vadd.f32 %v5096_v50, %v5008_v40  ;;  %v13050_v53 = vpop.f32.mrf.mxu2 }
 0xea4   :  { %v5297_v6 = vmul.f32 0.7978846, %v5265_v30  ;;  %v5170_v2 = vmul.f32 %v13038_v16, %v13038_v16  ;;  %v9686_v29 = vpop.eup %9685 }
 0xea5   :  { %v5360_v46 = vadd.f32 1.0, %v9686_v29 }
 0xea6   :  { %v5202_v3 = vmul.f32 %v5170_v2, %v13038_v16  ;;  %9687 = vtanh.f32 %v5297_v6 }
 0xea7   :  { %v5392_v30 = vmul.f32 0.5, %v5360_v46 }
 0xea8   :  { %v5234_v52 = vmul.f32 0.044715, %v5202_v3 }
 0xea9   :  { %v5098_v12 = vpop.f32.mrf.mxu3  ;;  %v13054_v3 = vmul.f32 %v5392_v30, %v5092_v7 }
 0xeaa   :  { %v5266_v15 = vadd.f32 %v5234_v52, %v13038_v16  ;;  %v5099_v21 = vadd.f32 %v5098_v12, %v5010_v9 }
 0xeac   :  { %v9688_v34 = vpop.eup %9687  ;;  %v5298_v54 = vmul.f32 0.7978846, %v5266_v15  ;;  %v5171_v40 = vmul.f32 %v5099_v21, %v5099_v21 }
 0xead   :  { %v5361_v50 = vadd.f32 1.0, %v9688_v34  ;;  %v5027_v34 = vpop.f32.mrf.mxu2 }
 0xeae   :  { %v5203_v6 = vmul.f32 %v5171_v40, %v5099_v21  ;;  %5140 = vmatmul.bf16.gmra.mxu3 %v8929_v10  ;;  %9689 = vtanh.f32 %v5298_v54  ;;  %v9424_v40 = vld [vmem:[#allocation24 + $0xc4] sm:$0xf] }
 0xeaf   :  { %v5393_v2 = vmul.f32 0.5, %v5361_v50 }
 0xeb0   :  { %v5235_v13 = vmul.f32 0.044715, %v5203_v6  ;;  %v8937_v6 = vor.u32 %v9424_v40, %v8934_v23 }
 0xeb1   :  { %v5101_v29 = vpop.f32.mrf.mxu3  ;;  %v13056_v9 = vmul.f32 %v5393_v2, %v5094_v31 }
 0xeb2   :  { %v5267_v8 = vadd.f32 %v5235_v13, %v5099_v21  ;;  %v5102_v59 = vadd.f32 %v5101_v29, %v5013_v35 }
 0xeb4   :  { %v5299_v12 = vmul.f32 0.7978846, %v5267_v8  ;;  %v5172_v46 = vmul.f32 %v5102_v59, %v5102_v59  ;;  %v9690_v15 = vpop.eup %9689 }
 0xeb5   :  { %v5362_v31 = vadd.f32 1.0, %v9690_v15  ;;  %v5029_v22 = vpop.f32.mrf.mxu2 }
 0xeb6   :  { %v5204_v10 = vmul.f32 %v5172_v46, %v5102_v59  ;;  %9691 = vtanh.f32 %v5299_v12  ;;  %v5018_v46 = vadd.f32 %v13026_v33, %v13006_v14  ;;  %v8942_v14 = vld [vmem:[#allocation24 + $0xd8] sm:$0xf0] }
 0xeb7   :  { %v5394_v8 = vmul.f32 0.5, %v5362_v31  ;;  %v9426_v31 = vld [vmem:[#allocation24 + $0xd4] sm:$0xf] }
 0xeb8   :  { %v5236_v7 = vmul.f32 0.044715, %v5204_v10 }
 0xeb9   :  { %v5103_v54 = vpop.f32.mrf.mxu3  ;;  %v13065_v15 = vmul.f32 %v5394_v8, %v13038_v16 }
 0xeba   :  { %v5268_v50 = vadd.f32 %v5236_v7, %v5102_v59  ;;  %v5104_v30 = vadd.f32 %v5103_v54, %v5015_v1 }
 0xebc   :  { %v9692_v2 = vpop.eup %9691  ;;  %v5300_v35 = vmul.f32 0.7978846, %v5268_v50  ;;  %v5173_v13 = vmul.f32 %v5104_v30, %v5104_v30  ;;  %v8945_v50 = vor.u32 %v9426_v31, %v8942_v14  ;;  %v9430_v14 = vld [vmem:[#allocation24 + $0xf4] sm:$0xf] }
 0xebd   :  { %v5363_v29 = vadd.f32 1.0, %v9692_v2 }
 0xebe   :  { %v5205_v42 = vmul.f32 %v5173_v13, %v5104_v30  ;;  %5145 = vmatmul.bf16.gmra.mxu3 %v8937_v6  ;;  %9693 = vtanh.f32 %v5300_v35  ;;  %v5032_v6 = vpop.f32.mrf.mxu2 }
 0xebf   :  { %v5395_v12 = vmul.f32 0.5, %v5363_v29 }
 0xec0   :  { %v5237_v52 = vmul.f32 0.044715, %v5205_v42 }
 0xec1   :  { %v5106_v11 = vpop.f32.mrf.mxu3  ;;  %v13067_v10 = vmul.f32 %v5395_v12, %v5099_v21 }
 0xec2   :  { %v5269_v40 = vadd.f32 %v5237_v52, %v5104_v30  ;;  %v13069_v23 = vadd.f32 %v5106_v11, %v5018_v46  ;;  %v9428_v46 = vld [vmem:[#allocation24 + $0xe4] sm:$0xf]  ;;  %v8950_v11 = vld [vmem:[#allocation24 + $0xe8] sm:$0xf0] }
 0xec4   :  { %v5301_v7 = vmul.f32 0.7978846, %v5269_v40  ;;  %v9694_v54 = vpop.eup %9693 }
 0xec5   :  { %v5364_v42 = vadd.f32 1.0, %v9694_v54 }
 0xec6   :  { %9695 = vtanh.f32 %v5301_v7  ;;  %v5034_v12 = vpop.f32.mrf.mxu2  ;;  %v8953_v7 = vor.u32 %v9428_v46, %v8950_v11  ;;  %v5023_v11 = vadd.f32 %v13040_v58, %v12976_v37 }
 0xec7   :  { %v5396_v35 = vmul.f32 0.5, %v5364_v42  ;;  %v8958_v42 = vld [vmem:[#allocation24 + $0xf8] sm:$0xf0] }
 0xec9   :  { %v5108_v33 = vpop.f32.mrf.mxu3  ;;  %v13073_v13 = vmul.f32 %v5396_v35, %v5102_v59  ;;  %v8961_v35 = vor.u32 %v9430_v14, %v8958_v42 }
 0xecc   :  { %v9696_v2 = vpop.eup %9695 }
 0xecd   :  { %v5365_v16 = vadd.f32 1.0, %v9696_v2 }
 0xece   :  { %5150 = vmatmul.bf16.gmra.mxu3 %v8945_v50  ;;  %v5037_v54 = vpop.f32.mrf.mxu2  ;;  %v5030_v50 = vadd.f32 %v5029_v22, %v12968_v19 }
 0xecf   :  { %v5397_v21 = vmul.f32 0.5, %v5365_v16 }
 0xed1   :  { %v5111_v52 = vpop.f32.mrf.mxu3  ;;  %v13075_v29 = vmul.f32 %v5397_v21, %v5104_v30  ;;  %v5028_v30 = vadd.f32 %v5027_v34, %v12964_v17  ;;  %v5025_v21 = vadd.f32 %v13050_v53, %v12998_v55  ;;  %v5020_v17 = vadd.f32 %v13030_v44, %v12986_v47  ;;  %v13111_v47 = vpop.permute.xlu2 %4765 }
 0xed2   :  { %v5033_v34 = vadd.f32 %v5032_v6, %v12974_v36  ;;  %v13098_v22 = vadd.f32 %v5111_v52, %v5023_v11 }
 0xed4   :  { %v5176_v36 = vmul.f32 %v13098_v22, %v13098_v22 }
 0xed6   :  { %v13080_v2 = vpop.f32.mrf.mxu2 }
 0xed9   :  { %v5113_v40 = vpop.f32.mrf.mxu3 }
 0xeda   :  { %v13089_v46 = vadd.f32 %v5113_v40, %v5025_v21 }
 0xedc   :  { %v5177_v53 = vmul.f32 %v13089_v46, %v13089_v46 }
 0xede   :  { %5155 = vmatmul.bf16.gmra.mxu3 %v8953_v7  ;;  %v13104_v7 = vadd.f32 %v5108_v33, %v5020_v17  ;;  %v5209_v52 = vmul.f32 %v5177_v53, %v13089_v46 }
 0xee0   :  { %v5175_v33 = vmul.f32 %v13104_v7, %v13104_v7  ;;  %v5241_v11 = vmul.f32 0.044715, %v5209_v52  ;;  %v4751_v52 = vpop.permute.xlu2 %4750 }
 0xee1   :  { %v5116_v31 = vpop.f32.mrf.mxu3 }
 0xee2   :  { %v13087_v1 = vadd.f32 %v5116_v31, %v5028_v30  ;;  %v13109_v31 = vpop.f32.mrf.mxu2  ;;  %v5208_v30 = vmul.f32 %v5176_v36, %v13098_v22  ;;  %v5207_v17 = vmul.f32 %v5175_v33, %v13104_v7 }
 0xee4   :  { %v5178_v55 = vmul.f32 %v13087_v1, %v13087_v1 }
 0xee6   :  { %v5210_v44 = vmul.f32 %v5178_v55, %v13087_v1 }
 0xee9   :  { %v5118_v59 = vpop.f32.mrf.mxu3 }
 0xeea   :  { %v13083_v16 = vadd.f32 %v5118_v59, %v5030_v50  ;;  %v5174_v50 = vmul.f32 %v13069_v23, %v13069_v23  ;;  %v5035_v59 = vadd.f32 %v5034_v12, %v12958_v25  ;;  %v13131_v36 = vpop.f32.mrf.mxu2 }
 0xeec   :  { %v5179_v19 = vmul.f32 %v13083_v16, %v13083_v16 }
 0xeee   :  { %5160 = vmatmul.bf16.gmra.mxu3 %v8961_v35  ;;  %v5211_v37 = vmul.f32 %v5179_v19, %v13083_v16  ;;  %v5242_v35 = vmul.f32 0.044715, %v5210_v44  ;;  %v5273_v44 = vadd.f32 %v5241_v11, %v13089_v46 }
 0xef0   :  { %v5243_v14 = vmul.f32 0.044715, %v5211_v37  ;;  %v5206_v37 = vmul.f32 %v5174_v50, %v13069_v23  ;;  %v5274_v8 = vadd.f32 %v5242_v35, %v13087_v1 }
 0xef1   :  { %v5121_v40 = vpop.f32.mrf.mxu3 }
 0xef2   :  { %v13107_v58 = vadd.f32 %v5121_v40, %v5033_v34  ;;  %v5275_v34 = vadd.f32 %v5243_v14, %v13083_v16  ;;  %v9468_v40 = vld [vmem:[#allocation52] sm:$0xff]  ;;  %v5038_v14 = vadd.f32 %v5037_v54, %v4751_v52 }
 0xef4   :  { %v5180_v6 = vmul.f32 %v13107_v58, %v13107_v58  ;;  %v5307_v33 = vmul.f32 0.7978846, %v5275_v34 }
 0xef6   :  { %v5212_v42 = vmul.f32 %v5180_v6, %v13107_v58  ;;  %v5240_v6 = vmul.f32 0.044715, %v5208_v30  ;;  %v5305_v30 = vmul.f32 0.7978846, %v5273_v44  ;;  %v9469_v44 = vld [vmem:[#allocation52 + $0x8] sm:$0xff] }
 0xef8   :  { %v5244_v21 = vmul.f32 0.044715, %v5212_v42  ;;  %v5239_v42 = vmul.f32 0.044715, %v5207_v17 }
 0xef9   :  { %v5123_v19 = vpop.f32.mrf.mxu3 }
 0xefa   :  { %v5276_v55 = vadd.f32 %v5244_v21, %v13107_v58  ;;  %v5124_v53 = vadd.f32 %v5123_v19, %v5035_v59  ;;  %v5238_v21 = vmul.f32 0.044715, %v5206_v37  ;;  %v5272_v59 = vadd.f32 %v5240_v6, %v13098_v22 }
 0xefb   :  { %v5306_v19 = vmul.f32 0.7978846, %v5274_v8  ;;  %v5047_v8 = vpop.f32.mrf.mxu2 }
 0xefc   :  { %v5308_v25 = vmul.f32 0.7978846, %v5276_v55  ;;  %v5181_v12 = vmul.f32 %v5124_v53, %v5124_v53  ;;  %v5271_v55 = vadd.f32 %v5239_v42, %v13104_v7  ;;  %v5270_v11 = vadd.f32 %v5238_v21, %v13069_v23 }
 0xefd   :  { %v5304_v17 = vmul.f32 0.7978846, %v5272_v59 }
 0xefe   :  { %v5213_v24 = vmul.f32 %v5181_v12, %v5124_v53  ;;  %6216 = vmatmul.bf16.vlgmr.msrb.gmra.mxu3 %v9468_v40  ;;  %9697 = vtanh.f32 %v5308_v25  ;;  %v5303_v40 = vmul.f32 0.7978846, %v5271_v55  ;;  %v5043_v55 = vadd.f32 %v13109_v31, %v13020_v27 }
 0xeff   :  { %9699 = vtanh.f32 %v5307_v33 }
 0xf00   :  { %v5245_v50 = vmul.f32 0.044715, %v5213_v24  ;;  %9701 = vtanh.f32 %v5306_v19  ;;  %v5302_v24 = vmul.f32 0.7978846, %v5270_v11 }
 0xf01   :  { %v5126_v35 = vpop.f32.mrf.mxu3  ;;  %9703 = vtanh.f32 %v5305_v30 }
 0xf02   :  { %v5277_v0 = vadd.f32 %v5245_v50, %v5124_v53  ;;  %v13136_v38 = vadd.f32 %v5126_v35, %v5038_v14 }
 0xf03   :  { %v13143_v11 = vpop.f32.mrf.mxu2 }
 0xf04   :  { %v5309_v34 = vmul.f32 0.7978846, %v5277_v0  ;;  %v9698_v54 = vpop.eup %9697 }
 0xf05   :  { %v9700_v37 = vpop.eup %9699  ;;  %v5372_v6 = vadd.f32 1.0, %v9698_v54 }
 0xf06   :  { %9705 = vtanh.f32 %v5309_v34  ;;  %v9702_v12 = vpop.eup %9701  ;;  %v5371_v42 = vadd.f32 1.0, %v9700_v37 }
 0xf07   :  { %9707 = vtanh.f32 %v5304_v17  ;;  %v9704_v52 = vpop.eup %9703  ;;  %v5404_v14 = vmul.f32 0.5, %v5372_v6  ;;  %v5370_v21 = vadd.f32 1.0, %v9702_v12 }
 0xf08   :  { %9709 = vtanh.f32 %v5303_v40  ;;  %v5403_v50 = vmul.f32 0.5, %v5371_v42  ;;  %v5369_v30 = vadd.f32 1.0, %v9704_v52 }
 0xf09   :  { %v13139_v25 = vpop.f32.mrf.mxu3  ;;  %9711 = vtanh.f32 %v5302_v24  ;;  %v5436_v17 = vmul.f32 %v5404_v14, %v13107_v58  ;;  %v5402_v40 = vmul.f32 0.5, %v5370_v21 }
 0xf0a   :  { %v5401_v42 = vmul.f32 0.5, %v5369_v30 }
 0xf0c   :  { %v9706_v33 = vpop.eup %9705  ;;  %v5433_v58 = vmul.f32 %v5401_v42, %v13089_v46  ;;  %v5048_v46 = vadd.f32 %v5047_v8, %v13010_v26  ;;  %v14337_v26 = vpack.c.bf16 %v13056_v9, %v13054_v3  ;;  %v8964_v8 = vld [vmem:[#allocation27] sm:$0xf]  ;;  %v8972_v3 = vld [vmem:[#allocation27 + $0x10] sm:$0xf]  ;;  %v9435_v9 = vld [vmem:[#allocation27 + $0x14] sm:$0xf0] }
 0xf0d   :  { %v5373_v0 = vadd.f32 1.0, %v9706_v33  ;;  %v9708_v59 = vpop.eup %9707  ;;  %v5434_v33 = vmul.f32 %v5402_v40, %v13087_v1  ;;  %v9433_v40 = vld [vmem:[#allocation27 + $0x4] sm:$0xf0] }
 0xf0e   :  { %6221 = vmatmul.bf16.gmra.mxu3 %v9469_v44  ;;  %v9710_v35 = vpop.eup %9709  ;;  %v5368_v37 = vadd.f32 1.0, %v9708_v59  ;;  %v5435_v44 = vmul.f32 %v5403_v50, %v13083_v16 }
 0xf0f   :  { %v5405_v19 = vmul.f32 0.5, %v5373_v0  ;;  %v9712_v24 = vpop.eup %9711  ;;  %v5367_v52 = vadd.f32 1.0, %v9710_v35 }
 0xf10   :  { %v5400_v27 = vmul.f32 0.5, %v5368_v37  ;;  %v5366_v31 = vadd.f32 1.0, %v9712_v24  ;;  %v5492_v0 = vpack.c.bf16 %v5435_v44, %v5434_v33 }
 0xf11   :  { %v5131_v34 = vpop.f32.mrf.mxu3  ;;  %v5437_v54 = vmul.f32 %v5405_v19, %v5124_v53  ;;  %v5399_v14 = vmul.f32 0.5, %v5367_v52  ;;  %v9472_v19 = vld [vmem:[#allocation37] sm:$0xff]  ;;  %v8973_v52 = vor.u32 %v9435_v9, %v8972_v3 }
 0xf12   :  { %v13146_v6 = vadd.f32 %v5131_v34, %v5043_v55  ;;  %v5432_v21 = vmul.f32 %v5400_v27, %v13098_v22  ;;  %v5398_v59 = vmul.f32 0.5, %v5366_v31  ;;  %v5052_v55 = vpop.f32.mrf.mxu2  ;;  %v14335_v22 = vpack.c.bf16 %v13075_v29, %v13073_v13 }
 0xf13   :  { %v5493_v12 = vpack.c.bf16 %v5437_v54, %v5436_v17  ;;  %v5431_v50 = vmul.f32 %v5399_v14, %v13104_v7  ;;  %v9473_v7 = vld [vmem:[#allocation37 + $0x8] sm:$0xff]  ;;  %v5053_v24 = vadd.f32 %v5052_v55, %v13018_v49  ;;  %v8965_v13 = vor.u32 %v9433_v40, %v8964_v8  ;;  %v8996_v40 = vld [vmem:[#allocation27 + $0x40] sm:$0xf] }
 0xf14   :  { %v5491_v16 = vpack.c.bf16 %v5433_v58, %v5432_v21  ;;  %v5430_v1 = vmul.f32 %v5398_v59, %v13069_v23  ;;  %v14336_v23 = vpack.c.bf16 %v13067_v10, %v13065_v15  ;;  %v8980_v58 = vld [vmem:[#allocation27 + $0x20] sm:$0xf]  ;;  %v9439_v55 = vld [vmem:[#allocation27 + $0x34] sm:$0xf0] }
 0xf15   :  { %5854 = vmatpush.bf16.msra.mxu0 %v5493_v12  ;;  %v14338_v12 = vpack.c.bf16 %v13036_v28, %v13034_v32  ;;  %v9437_v32 = vld [vmem:[#allocation27 + $0x24] sm:$0xf0] }
 0xf16   :  { %v5490_v30 = vpack.c.bf16 %v5431_v50, %v5430_v1  ;;  %v8981_v28 = vor.u32 %v9437_v32, %v8980_v58 }
 0xf19   :  { %v13151_v53 = vpop.f32.mrf.mxu3  ;;  %5855 = vmatpush.bf16.msra.mxu0 %v5492_v0 }
 0xf1a   :  { %v13160_v34 = vpop.f32.mrf.mxu2 }
 0xf1d   :  { %5856 = vmatpush.bf16.msra.mxu0 %v5491_v16 }
 0xf1e   :  { %9136 = vmatmul.msk.bf16.vlgmr.msra.gmra.mxu3 %vm976_vm2, %v9472_v19  ;;  %v8988_v19 = vld [vmem:[#allocation27 + $0x30] sm:$0xf] }
 0xf1f   :  { %v8989_v16 = vor.u32 %v9439_v55, %v8988_v19 }
 0xf21   :  { %v5136_v35 = vpop.f32.mrf.mxu3  ;;  %5857 = vmatpush.bf16.msra.mxu0 %v5490_v30 }
 0xf22   :  { %v13158_v17 = vadd.f32 %v5136_v35, %v5048_v46  ;;  %v5057_v37 = vpop.f32.mrf.mxu2 }
 0xf23   :  { %v5058_v42 = vadd.f32 %v5057_v37, %v12992_v20  ;;  %v9441_v37 = vld [vmem:[#allocation27 + $0x44] sm:$0xf0] }
 0xf25   :  { %5858 = vmatpush.bf16.msra.mxu0 %v14335_v22 }
 0xf29   :  { %v13165_v54 = vpop.f32.mrf.mxu3  ;;  %5859 = vmatpush.bf16.msra.mxu0 %v14336_v23 }
 0xf2a   :  { %v5059_v10 = vpop.f32.mrf.mxu2 }
 0xf2d   :  { %5860 = vmatpush.bf16.msra.mxu0 %v14337_v26 }
 0xf2e   :  { %9137 = vmatmul.msk.bf16.gmra.mxu3 %vm976_vm2, %v9473_v7 }
 0xf31   :  { %v5141_v29 = vpop.f32.mrf.mxu3  ;;  %5861 = vmatpush.bf16.msra.mxu0 %v14338_v12 }
 0xf32   :  { %v13178_v15 = vadd.f32 %v5141_v29, %v5053_v24  ;;  %v5062_v49 = vpop.f32.mrf.mxu2  ;;  %v8997_v29 = vor.u32 %v9441_v37, %v8996_v40 }
 0xf33   :  { %v5063_v26 = vadd.f32 %v5062_v49, %v12978_v51 }
 0xf34   :  { %5862 = vmatmul.bf16.vlgmr.msra.gmra.mxu0 %v8965_v13 }
 0xf39   :  { %v5143_v44 = vpop.f32.mrf.mxu3 }
 0xf3a   :  { %v5064_v0 = vpop.f32.mrf.mxu2 }
 0xf3b   :  { %v5065_v22 = vadd.f32 %v5064_v0, %v12984_v39 }
 0xf41   :  { %v5146_v33 = vpop.f32.mrf.mxu3 }
 0xf42   :  { %v13181_v27 = vadd.f32 %v5146_v33, %v5058_v42  ;;  %v5067_v21 = vpop.f32.mrf.mxu2 }
 0xf43   :  { %v5068_v46 = vadd.f32 %v5067_v21, %v12990_v41  ;;  %v5060_v41 = vadd.f32 %v5059_v10, %v13014_v63 }
 0xf44   :  { %5867 = vmatmul.bf16.gmra.mxu0 %v8973_v52  ;;  %v5055_v52 = vadd.f32 %v13160_v34, %v13002_v4  ;;  %v5050_v34 = vadd.f32 %v13143_v11, %v13016_v60  ;;  %v5190_v32 = vmul.f32 %v13181_v27, %v13181_v27 }
 0xf46   :  { %v13215_v49 = vadd.f32 %v5143_v44, %v5055_v52 }
 0xf48   :  { %v5189_v19 = vmul.f32 %v13215_v49, %v13215_v49 }
 0xf49   :  { %v5148_v31 = vpop.f32.mrf.mxu3 }
 0xf4a   :  { %v5069_v50 = vpop.f32.mrf.mxu2  ;;  %v13203_v3 = vadd.f32 %v5148_v31, %v5060_v41  ;;  %v9443_v41 = vld [vmem:[#allocation27 + $0x54] sm:$0xf0] }
 0xf4b   :  { %v5070_v1 = vadd.f32 %v5069_v50, %v12970_v43 }
 0xf4c   :  { %v5191_v0 = vmul.f32 %v13203_v3, %v13203_v3 }
 0xf4e   :  { %v5223_v50 = vmul.f32 %v5191_v0, %v13203_v3 }
 0xf51   :  { %v5151_v14 = vpop.f32.mrf.mxu3 }
 0xf52   :  { %v5072_v23 = vpop.f32.mrf.mxu2  ;;  %v13195_v43 = vadd.f32 %v5151_v14, %v5063_v26 }
 0xf53   :  { %v5073_v13 = vadd.f32 %v5072_v23, %v12962_v18 }
 0xf54   :  { %5872 = vmatmul.bf16.gmra.mxu0 %v8981_v28  ;;  %v5192_v18 = vmul.f32 %v13195_v43, %v13195_v43 }
 0xf56   :  { %v5224_v28 = vmul.f32 %v5192_v18, %v13195_v43 }
 0xf59   :  { %v5153_v59 = vpop.f32.mrf.mxu3 }
 0xf5a   :  { %v13191_v8 = vadd.f32 %v5153_v59, %v5065_v22  ;;  %v5074_v33 = vpop.f32.mrf.mxu2  ;;  %v13228_v59 = vadd.f32 %v13165_v54, %v5050_v34  ;;  %v5188_v54 = vmul.f32 %v13178_v15, %v13178_v15 }
 0xf5b   :  { %v5075_v14 = vadd.f32 %v5074_v33, %v12982_v48  ;;  %v5045_v48 = vadd.f32 %v13131_v36, %v13111_v47 }
 0xf5c   :  { %v5193_v51 = vmul.f32 %v13191_v8, %v13191_v8  ;;  %v5187_v47 = vmul.f32 %v13228_v59, %v13228_v59 }
 0xf5d   :  { %v13247_v37 = vadd.f32 %v13151_v53, %v5045_v48  ;;  %v5182_v48 = vmul.f32 %v13136_v38, %v13136_v38 }
 0xf5e   :  { %v5225_v31 = vmul.f32 %v5193_v51, %v13191_v8 }
 0xf5f   :  { %v5185_v33 = vmul.f32 %v13247_v37, %v13247_v37 }
 0xf60   :  { %v5257_v55 = vmul.f32 0.044715, %v5225_v31  ;;  %v5219_v31 = vmul.f32 %v5187_v47, %v13228_v59 }
 0xf61   :  { %v5156_v20 = vpop.f32.mrf.mxu3 }
 0xf62   :  { %v13188_v7 = vadd.f32 %v5156_v20, %v5068_v46  ;;  %v4756_v46 = vpop.permute.xlu0 %4755  ;;  %v5289_v36 = vadd.f32 %v5257_v55, %v13191_v8  ;;  %v5217_v55 = vmul.f32 %v5185_v33, %v13247_v37 }
 0xf63   :  { %v5040_v40 = vadd.f32 %v13080_v2, %v4756_v46  ;;  %v5220_v2 = vmul.f32 %v5188_v54, %v13178_v15 }
 0xf64   :  { %5877 = vmatmul.bf16.gmra.mxu0 %v8989_v16  ;;  %v5194_v39 = vmul.f32 %v13188_v7, %v13188_v7  ;;  %v5321_v0 = vmul.f32 0.7978846, %v5289_v36  ;;  %v5249_v47 = vmul.f32 0.044715, %v5217_v55 }
 0xf66   :  { %v5226_v63 = vmul.f32 %v5194_v39, %v13188_v7  ;;  %v5255_v39 = vmul.f32 0.044715, %v5223_v50  ;;  %v5251_v50 = vmul.f32 0.044715, %v5219_v31 }
 0xf68   :  { %v5258_v44 = vmul.f32 0.044715, %v5226_v63  ;;  %v5283_v36 = vadd.f32 %v5251_v50, %v13228_v59 }
 0xf69   :  { %v5158_v30 = vpop.f32.mrf.mxu3 }
 0xf6a   :  { %v13185_v35 = vadd.f32 %v5158_v30, %v5070_v1  ;;  %v5222_v1 = vmul.f32 %v5190_v32, %v13181_v27  ;;  %v5256_v30 = vmul.f32 0.044715, %v5224_v28  ;;  %v5290_v22 = vadd.f32 %v5258_v44, %v13188_v7 }
 0xf6b   :  { %v5184_v32 = vmul.f32 %v13146_v6, %v13146_v6 }
 0xf6c   :  { %v5195_v24 = vmul.f32 %v13185_v35, %v13185_v35  ;;  %v5254_v53 = vmul.f32 0.044715, %v5222_v1  ;;  %v5322_v52 = vmul.f32 0.7978846, %v5290_v22 }
 0xf6d   :  { %v5216_v54 = vmul.f32 %v5184_v32, %v13146_v6 }
 0xf6e   :  { %v5227_v9 = vmul.f32 %v5195_v24, %v13185_v35  ;;  %v9004_v24 = vld [vmem:[#allocation27 + $0x50] sm:$0xf] }
 0xf6f   :  { %v9005_v63 = vor.u32 %v9443_v41, %v9004_v24 }
 0xf70   :  { %v5259_v58 = vmul.f32 0.044715, %v5227_v9  ;;  %v5288_v9 = vadd.f32 %v5256_v30, %v13195_v43 }
 0xf71   :  { %v5161_v12 = vpop.f32.mrf.mxu3 }
 0xf72   :  { %v13206_v42 = vadd.f32 %v5161_v12, %v5073_v13  ;;  %v5291_v60 = vadd.f32 %v5259_v58, %v13185_v35  ;;  %v5221_v13 = vmul.f32 %v5189_v19, %v13215_v49  ;;  %v5186_v12 = vmul.f32 %v13158_v17, %v13158_v17 }
 0xf73   :  { %v5320_v44 = vmul.f32 0.7978846, %v5288_v9 }
 0xf74   :  { %v5196_v10 = vmul.f32 %v13206_v42, %v13206_v42  ;;  %5882 = vmatmul.bf16.gmra.mxu0 %v8997_v29  ;;  %v5323_v29 = vmul.f32 0.7978846, %v5291_v60  ;;  %v5253_v58 = vmul.f32 0.044715, %v5221_v13  ;;  %v5218_v28 = vmul.f32 %v5186_v12, %v13158_v17 }
 0xf75   :  { %v5214_v13 = vmul.f32 %v5182_v48, %v13136_v38 }
 0xf76   :  { %v5228_v4 = vmul.f32 %v5196_v10, %v13206_v42  ;;  %v13259_v10 = vadd.f32 %v13139_v25, %v5040_v40  ;;  %v5286_v25 = vadd.f32 %v5254_v53, %v13181_v27  ;;  %v5285_v60 = vadd.f32 %v5253_v58, %v13215_v49  ;;  %v9012_v53 = vld [vmem:[#allocation27 + $0x60] sm:$0xf] }
 0xf77   :  { %v5250_v30 = vmul.f32 0.044715, %v5218_v28  ;;  %v5315_v58 = vmul.f32 0.7978846, %v5283_v36 }
 0xf78   :  { %v5260_v21 = vmul.f32 0.044715, %v5228_v4  ;;  %v5287_v4 = vadd.f32 %v5255_v39, %v13203_v3  ;;  %v5183_v19 = vmul.f32 %v13259_v10, %v13259_v10  ;;  %v5318_v22 = vmul.f32 0.7978846, %v5286_v25 }
 0xf79   :  { %v5163_v16 = vpop.f32.mrf.mxu3  ;;  %v5317_v24 = vmul.f32 0.7978846, %v5285_v60  ;;  %v5282_v12 = vadd.f32 %v5250_v30, %v13158_v17 }
 0xf7a   :  { %v5292_v11 = vadd.f32 %v5260_v21, %v13206_v42  ;;  %v13235_v20 = vadd.f32 %v5163_v16, %v5075_v14  ;;  %v5252_v14 = vmul.f32 0.044715, %v5220_v2 }
 0xf7c   :  { %v5324_v23 = vmul.f32 0.7978846, %v5292_v11  ;;  %v5197_v26 = vmul.f32 %v13235_v20, %v13235_v20  ;;  %v5319_v11 = vmul.f32 0.7978846, %v5287_v4  ;;  %v5284_v46 = vadd.f32 %v5252_v14, %v13178_v15 }
 0xf7d   :  { %v5246_v4 = vmul.f32 0.044715, %v5214_v13 }
 0xf7e   :  { %v5229_v51 = vmul.f32 %v5197_v26, %v13235_v20  ;;  %9713 = vtanh.f32 %v5324_v23  ;;  %v5215_v23 = vmul.f32 %v5183_v19, %v13259_v10  ;;  %v5316_v2 = vmul.f32 0.7978846, %v5284_v46 }
 0xf7f   :  { %9715 = vtanh.f32 %v5323_v29 }
 0xf80   :  { %v5261_v18 = vmul.f32 0.044715, %v5229_v51  ;;  %9717 = vtanh.f32 %v5322_v52  ;;  %v5248_v51 = vmul.f32 0.044715, %v5216_v54  ;;  %v5247_v31 = vmul.f32 0.044715, %v5215_v23 }
 0xf81   :  { %9719 = vtanh.f32 %v5321_v0  ;;  %v5281_v0 = vadd.f32 %v5249_v47, %v13247_v37  ;;  %v5278_v23 = vadd.f32 %v5246_v4, %v13136_v38 }
 0xf82   :  { %v5293_v34 = vadd.f32 %v5261_v18, %v13235_v20  ;;  %v9445_v18 = vld [vmem:[#allocation27 + $0x64] sm:$0xf0]  ;;  %v5280_v25 = vadd.f32 %v5248_v51, %v13146_v6 }
 0xf83   :  { %v5313_v48 = vmul.f32 0.7978846, %v5281_v0 }
 0xf84   :  { %v5325_v21 = vmul.f32 0.7978846, %v5293_v34  ;;  %5887 = vmatmul.bf16.gmra.mxu0 %v9005_v63  ;;  %v9714_v16 = vpop.eup %9713 }
 0xf85   :  { %v9716_v1 = vpop.eup %9715  ;;  %v5388_v26 = vadd.f32 1.0, %v9714_v16 }
 0xf86   :  { %9721 = vtanh.f32 %v5325_v21  ;;  %v9718_v40 = vpop.eup %9717  ;;  %v5387_v39 = vadd.f32 1.0, %v9716_v1  ;;  %v9013_v21 = vor.u32 %v9445_v18, %v9012_v53 }
 0xf87   :  { %9723 = vtanh.f32 %v5320_v44  ;;  %v9720_v41 = vpop.eup %9719  ;;  %v5420_v9 = vmul.f32 0.5, %v5388_v26  ;;  %v5386_v63 = vadd.f32 1.0, %v9718_v40  ;;  %v5314_v44 = vmul.f32 0.7978846, %v5282_v12 }
 0xf88   :  { %9725 = vtanh.f32 %v5319_v11  ;;  %v5419_v32 = vmul.f32 0.5, %v5387_v39  ;;  %v5385_v28 = vadd.f32 1.0, %v9720_v41  ;;  %v5279_v11 = vadd.f32 %v5247_v31, %v13259_v10  ;;  %v9447_v31 = vld [vmem:[#allocation27 + $0x74] sm:$0xf0] }
 0xf89   :  { %9727 = vtanh.f32 %v5318_v22  ;;  %v5452_v19 = vmul.f32 %v5420_v9, %v13206_v42  ;;  %v5418_v16 = vmul.f32 0.5, %v5386_v63  ;;  %v5312_v26 = vmul.f32 0.7978846, %v5280_v25 }
 0xf8a   :  { %9729 = vtanh.f32 %v5317_v24  ;;  %v5451_v1 = vmul.f32 %v5419_v32, %v13185_v35  ;;  %v5417_v30 = vmul.f32 0.5, %v5385_v28  ;;  %v5311_v36 = vmul.f32 0.7978846, %v5279_v11 }
 0xf8b   :  { %9731 = vtanh.f32 %v5316_v2  ;;  %v5450_v42 = vmul.f32 %v5418_v16, %v13188_v7 }
 0xf8c   :  { %v9722_v29 = vpop.eup %9721  ;;  %9733 = vtanh.f32 %v5315_v58  ;;  %v5449_v41 = vmul.f32 %v5417_v30, %v13191_v8 }
 0xf8d   :  { %v5389_v52 = vadd.f32 1.0, %v9722_v29  ;;  %v9724_v33 = vpop.eup %9723  ;;  %9735 = vtanh.f32 %v5314_v44  ;;  %v5500_v24 = vpack.c.bf16 %v5451_v1, %v5450_v42  ;;  %v5310_v29 = vmul.f32 0.7978846, %v5278_v23  ;;  %v9432_v42 = vld [vmem:[#allocation27 + $0x4] sm:$0xf] }
 0xf8e   :  { %v9726_v14 = vpop.eup %9725  ;;  %v5384_v50 = vadd.f32 1.0, %v9724_v33  ;;  %9737 = vtanh.f32 %v5313_v48  ;;  %v9020_v33 = vld [vmem:[#allocation27 + $0x70] sm:$0xf] }
 0xf8f   :  { %v5421_v34 = vmul.f32 0.5, %v5389_v52  ;;  %v9728_v60 = vpop.eup %9727  ;;  %v5383_v46 = vadd.f32 1.0, %v9726_v14  ;;  %9739 = vtanh.f32 %v5312_v26  ;;  %v9021_v25 = vor.u32 %v9447_v31, %v9020_v33  ;;  %v9449_v26 = vld [vmem:[#allocation27 + $0x84] sm:$0xf0] }
 0xf90   :  { %v9730_v22 = vpop.eup %9729  ;;  %v5382_v40 = vadd.f32 1.0, %v9728_v60  ;;  %9741 = vtanh.f32 %v5311_v36  ;;  %v14341_v36 = vld [vmem:[#allocation128_spill] sm:$0xff] }
 0xf91   :  { %v5453_v55 = vmul.f32 %v5421_v34, %v13235_v20  ;;  %v5416_v20 = vmul.f32 0.5, %v5384_v50  ;;  %v9732_v47 = vpop.eup %9731  ;;  %v5415_v35 = vmul.f32 0.5, %v5383_v46  ;;  %v5381_v13 = vadd.f32 1.0, %v9730_v22 }
 0xf92   :  { %v9734_v39 = vpop.eup %9733  ;;  %v5414_v12 = vmul.f32 0.5, %v5382_v40  ;;  %v5380_v2 = vadd.f32 1.0, %v9732_v47  ;;  %9743 = vtanh.f32 %v5310_v29  ;;  %v9044_v29 = vld [vmem:[#allocation27 + $0xa0] sm:$0xf] }
 0xf93   :  { %v5501_v54 = vpack.c.bf16 %v5453_v55, %v5452_v19  ;;  %v5448_v51 = vmul.f32 %v5416_v20, %v13195_v43  ;;  %v9736_v53 = vpop.eup %9735  ;;  %v5447_v9 = vmul.f32 %v5415_v35, %v13203_v3  ;;  %v5413_v52 = vmul.f32 0.5, %v5381_v13  ;;  %v8974_v35 = vld [vmem:[#allocation27 + $0x18] sm:$0xf0] }
 0xf94   :  { %5892 = vmatmul.bf16.gmra.mxu0 %v9013_v21  ;;  %v5379_v18 = vadd.f32 1.0, %v9734_v39  ;;  %v9738_v63 = vpop.eup %9737  ;;  %v5446_v8 = vmul.f32 %v5414_v12, %v13181_v27  ;;  %v5412_v0 = vmul.f32 0.5, %v5380_v2  ;;  %v5378_v58 = vadd.f32 1.0, %v9736_v53  ;;  %v9436_v12 = vld [vmem:[#allocation27 + $0x24] sm:$0xf] }
 0xf95   :  { %5943 = vmatpush.bf16.msrb.mxu1 %v5501_v54  ;;  %v5499_v7 = vpack.c.bf16 %v5449_v41, %v5448_v51  ;;  %v9740_v4 = vpop.eup %9739  ;;  %v5445_v34 = vmul.f32 %v5413_v52, %v13215_v49  ;;  %v5377_v28 = vadd.f32 1.0, %v9738_v63  ;;  %v9434_v41 = vld [vmem:[#allocation27 + $0x14] sm:$0xf]  ;;  %v9453_v51 = vld [vmem:[#allocation27 + $0xa4] sm:$0xf0] }
 0xf96   :  { %v5498_v43 = vpack.c.bf16 %v5447_v9, %v5446_v8  ;;  %v5411_v32 = vmul.f32 0.5, %v5379_v18  ;;  %v9742_v14 = vpop.eup %9741  ;;  %v5444_v3 = vmul.f32 %v5412_v0, %v13178_v15  ;;  %v5410_v44 = vmul.f32 0.5, %v5378_v58  ;;  %v8982_v2 = vld [vmem:[#allocation27 + $0x28] sm:$0xf0]  ;;  %v9052_v9 = vld [vmem:[#allocation27 + $0xb0] sm:$0xf] }
 0xf97   :  { %v5376_v21 = vadd.f32 1.0, %v9740_v4  ;;  %v5409_v16 = vmul.f32 0.5, %v5377_v28  ;;  %v5375_v50 = vadd.f32 1.0, %v9742_v14  ;;  %v8977_v39 = vor.u32 %v9434_v41, %v8974_v35  ;;  %v9455_v52 = vld [vmem:[#allocation27 + $0xb4] sm:$0xf0] }
 0xf98   :  { %v9744_v19 = vpop.eup %9743  ;;  %v5497_v55 = vpack.c.bf16 %v5445_v34, %v5444_v3  ;;  %v5443_v27 = vmul.f32 %v5411_v32, %v13228_v59  ;;  %v5442_v60 = vmul.f32 %v5410_v44, %v13158_v17  ;;  %v9028_v59 = vld [vmem:[#allocation27 + $0x80] sm:$0xf]  ;;  %v8966_v17 = vld [vmem:[#allocation27 + $0x8] sm:$0xf0]  ;;  %v9045_v53 = vor.u32 %v9453_v51, %v9044_v29  ;;  %v9438_v18 = vld [vmem:[#allocation27 + $0x34] sm:$0xf] }
 0xf99   :  { %5944 = vmatpush.bf16.msrb.mxu1 %v5500_v24  ;;  %v5408_v49 = vmul.f32 0.5, %v5376_v21  ;;  %v5374_v11 = vadd.f32 1.0, %v9744_v19  ;;  %v5441_v54 = vmul.f32 %v5409_v16, %v13247_v37  ;;  %v5407_v1 = vmul.f32 0.5, %v5375_v50  ;;  %v14339_v37 = vld [vmem:[#allocation130_spill] sm:$0xff]  ;;  %v9451_v24 = vld [vmem:[#allocation27 + $0x94] sm:$0xf0]  ;;  %v13310_v16 = vpop.permute.xlu1 %5606 }
 0xf9a   :  { %v5496_v48 = vpack.c.bf16 %v5443_v27, %v5442_v60  ;;  %v9029_v40 = vor.u32 %v9449_v26, %v9028_v59  ;;  %v8969_v47 = vor.u32 %v9432_v42, %v8966_v17  ;;  %v8990_v63 = vld [vmem:[#allocation27 + $0x38] sm:$0xf0]  ;;  %v9053_v33 = vor.u32 %v9455_v52, %v9052_v9  ;;  %v9060_v58 = vld [vmem:[#allocation27 + $0xc0] sm:$0xf]  ;;  %v9457_v4 = vld [vmem:[#allocation27 + $0xc4] sm:$0xf0]  ;;  %v13314_v60 = vpop.permute.xlu0 %5596 }
 0xf9b   :  { %v5440_v15 = vmul.f32 %v5408_v49, %v13146_v6  ;;  %v5406_v30 = vmul.f32 0.5, %v5374_v11  ;;  %v5439_v22 = vmul.f32 %v5407_v1, %v13259_v10  ;;  %v14340_v6 = vld [vmem:[#allocation129_spill] sm:$0xff]  ;;  %v9036_v10 = vld [vmem:[#allocation27 + $0x90] sm:$0xf]  ;;  %v8993_v31 = vor.u32 %v9438_v18, %v8990_v63  ;;  %v8998_v34 = vld [vmem:[#allocation27 + $0x48] sm:$0xf0] }
 0xf9c   :  { %v9037_v13 = vor.u32 %v9451_v24, %v9036_v10  ;;  %v9061_v32 = vor.u32 %v9457_v4, %v9060_v58  ;;  %v9068_v3 = vld [vmem:[#allocation27 + $0xd0] sm:$0xf]  ;;  %v9459_v44 = vld [vmem:[#allocation27 + $0xd4] sm:$0xf0]  ;;  %v9442_v21 = vld [vmem:[#allocation27 + $0x54] sm:$0xf] }
 0xf9d   :  { %5945 = vmatpush.bf16.msrb.mxu1 %v5499_v7  ;;  %v5495_v46 = vpack.c.bf16 %v5441_v54, %v5440_v15  ;;  %v5438_v23 = vmul.f32 %v5406_v30, %v13136_v38  ;;  %v14342_v38 = vld [vmem:[#allocation127_spill] sm:$0xff]  ;;  %v8985_v7 = vor.u32 %v9436_v12, %v8982_v2  ;;  %v9006_v19 = vld [vmem:[#allocation27 + $0x58] sm:$0xf0]  ;;  %v9076_v49 = vld [vmem:[#allocation27 + $0xe0] sm:$0xf] }
 0xf9e   :  { %v9009_v27 = vor.u32 %v9442_v21, %v9006_v19  ;;  %v9461_v11 = vld [vmem:[#allocation27 + $0xe4] sm:$0xf0]  ;;  %v9014_v54 = vld [vmem:[#allocation27 + $0x68] sm:$0xf0]  ;;  %v9084_v42 = vld [vmem:[#allocation27 + $0xf0] sm:$0xf] }
 0xf9f   :  { %v5494_v20 = vpack.c.bf16 %v5439_v22, %v5438_v23  ;;  %v9077_v30 = vor.u32 %v9461_v11, %v9076_v49  ;;  %v9463_v17 = vld [vmem:[#allocation27 + $0xf4] sm:$0xf0]  ;;  %v14343_v63 = vld [vmem:[#allocation146_spill] sm:$0xff] }
 0xfa0   :  { %v14345_v11 = vld [vmem:[#allocation142_spill] sm:$0xff] }
 0xfa1   :  { %5946 = vmatpush.bf16.msrb.mxu1 %v5498_v43  ;;  %v9440_v43 = vld [vmem:[#allocation27 + $0x44] sm:$0xf]  ;;  %v13316_v1 = vpop.permute.xlu1 %5601 }
 0xfa2   :  { %v9001_v28 = vor.u32 %v9440_v43, %v8998_v34  ;;  %v13320_v22 = vpop.permute.xlu0 %5591  ;;  %v9450_v43 = vld [vmem:[#allocation27 + $0x94] sm:$0xf]  ;;  %v9038_v34 = vld [vmem:[#allocation27 + $0x98] sm:$0xf0] }
 0xfa4   :  { %5897 = vmatmul.bf16.gmra.mxu0 %v9021_v25 }
 0xfa5   :  { %5947 = vmatpush.bf16.msrb.mxu1 %v5497_v55  ;;  %v9069_v55 = vor.u32 %v9459_v44, %v9068_v3  ;;  %v9041_v3 = vor.u32 %v9450_v43, %v9038_v34  ;;  %v14349_v43 = vld [vmem:[#allocation138_spill] sm:$0xff] }
 0xfa9   :  { %5948 = vmatpush.bf16.msrb.mxu1 %v5496_v48  ;;  %v9444_v48 = vld [vmem:[#allocation27 + $0x64] sm:$0xf]  ;;  %v13322_v59 = vpop.permute.xlu1 %5576 }
 0xfaa   :  { %v13326_v26 = vpop.permute.xlu0 %5566 }
 0xfad   :  { %5949 = vmatpush.bf16.msrb.mxu1 %v5495_v46  ;;  %v9017_v46 = vor.u32 %v9444_v48, %v9014_v54  ;;  %v14346_v54 = vld [vmem:[#allocation143_spill] sm:$0xff] }
 0xfb1   :  { %5950 = vmatpush.bf16.msrb.mxu1 %v5494_v20  ;;  %v5863_v8 = vpop.f32.mrf.mxu0  ;;  %v9446_v20 = vld [vmem:[#allocation27 + $0x74] sm:$0xf] }
 0xfb2   :  { %v5562_v24 = vpop.permute.xlu0 %5561 }
 0xfb4   :  { %5902 = vmatmul.bf16.gmra.mxu0 %v9029_v40  ;;  %5951 = vmatmul.bf16.vlgmr.msrb.gmra.mxu1 %v8969_v47  ;;  %v9022_v40 = vld [vmem:[#allocation27 + $0x78] sm:$0xf0]  ;;  %v13328_v47 = vpop.permute.xlu2 %5611 }
 0xfb5   :  { %6314 = vmatpush.bf16.msra.mxu1 %v14339_v37  ;;  %v9085_v37 = vor.u32 %v9463_v17, %v9084_v42  ;;  %v9046_v42 = vld [vmem:[#allocation27 + $0xa8] sm:$0xf0] }
 0xfb9   :  { %6315 = vmatpush.bf16.msra.mxu1 %v14340_v6  ;;  %v5865_v0 = vpop.f32.mrf.mxu0  ;;  %v9025_v6 = vor.u32 %v9446_v20, %v9022_v40 }
 0xfbc   :  { %v13332_v41 = vpop.permute.xlu2 %5586 }
 0xfbd   :  { %6316 = vmatpush.bf16.msra.mxu1 %v14341_v36  ;;  %v13330_v36 = vpop.permute.xlu1 %5571 }
 0xfc1   :  { %6317 = vmatpush.bf16.msra.mxu1 %v14342_v38  ;;  %v13306_v14 = vpop.f32.mrf.mxu0  ;;  %v9448_v38 = vld [vmem:[#allocation27 + $0x84] sm:$0xf] }
 0xfc4   :  { %5907 = vmatmul.bf16.gmra.mxu0 %v9037_v13  ;;  %5956 = vmatmul.bf16.gmra.mxu1 %v8977_v39  ;;  %v9030_v13 = vld [vmem:[#allocation27 + $0x88] sm:$0xf0]  ;;  %v5537_v39 = vpop.permute.xlu0 %5536 }
 0xfc5   :  { %v5547_v35 = vpop.permute.xlu1 %5546  ;;  %v5864_v29 = vadd.f32 %v5863_v8, %v5537_v39  ;;  %v9033_v51 = vor.u32 %v9448_v38, %v9030_v13  ;;  %v14347_v13 = vld [vmem:[#allocation136_spill] sm:$0xff] }
 0xfc9   :  { %v13308_v25 = vpop.f32.mrf.mxu0 }
 0xfd1   :  { %v13312_v50 = vpop.f32.mrf.mxu0 }
 0xfd4   :  { %5912 = vmatmul.bf16.gmra.mxu0 %v9045_v53  ;;  %5961 = vmatmul.bf16.gmra.mxu1 %v8985_v7  ;;  %v13334_v53 = vpop.permute.xlu2 %5581  ;;  %v5542_v7 = vpop.permute.xlu1 %5541 }
 0xfd5   :  { %v5866_v9 = vadd.f32 %v5865_v0, %v5542_v7  ;;  %v9054_v7 = vld [vmem:[#allocation27 + $0xb8] sm:$0xf0] }
 0xfd9   :  { %v13318_v15 = vpop.f32.mrf.mxu0 }
 0xfdc   :  { %v5557_v4 = vpop.permute.xlu2 %5556 }
 0xfdd   :  { %v5874_v17 = vadd.f32 %v13312_v50, %v5557_v4 }
 0xfe1   :  { %v13324_v23 = vpop.f32.mrf.mxu0 }
 0xfe4   :  { %5917 = vmatmul.bf16.gmra.mxu0 %v9053_v33  ;;  %5966 = vmatmul.bf16.gmra.mxu1 %v8993_v31  ;;  %v14344_v31 = vld [vmem:[#allocation147_spill] sm:$0xff]  ;;  %v5552_v21 = vpop.permute.xlu2 %5551 }
 0xfe5   :  { %v5871_v19 = vadd.f32 %v13308_v25, %v5552_v21 }
 0xfe9   :  { %v5880_v10 = vpop.f32.mrf.mxu0 }
 0xff4   :  { %5922 = vmatmul.bf16.gmra.mxu0 %v9061_v32  ;;  %5971 = vmatmul.bf16.gmra.mxu1 %v9001_v28  ;;  %v5883_v32 = vpop.f32.mrf.mxu0  ;;  %v5869_v28 = vadd.f32 %v13306_v14, %v5547_v35 }
0x1004   :  { %5927 = vmatmul.bf16.gmra.mxu0 %v9069_v55  ;;  %5976 = vmatmul.bf16.gmra.mxu1 %v9009_v27  ;;  %v13346_v55 = vpop.f32.mrf.mxu0 }
0x1014   :  { %5932 = vmatmul.bf16.gmra.mxu0 %v9077_v30  ;;  %5981 = vmatmul.bf16.gmra.mxu1 %v9017_v46  ;;  %v9452_v46 = vld [vmem:[#allocation27 + $0xa4] sm:$0xf] }
0x1015   :  { %v9049_v20 = vor.u32 %v9452_v46, %v9046_v42 }
0x1024   :  { %5937 = vmatmul.bf16.gmra.mxu0 %v9085_v37  ;;  %5986 = vmatmul.bf16.gmra.mxu1 %v9025_v6  ;;  %v13357_v37 = vpop.f32.mrf.mxu0  ;;  %v5876_v6 = vadd.f32 %v13318_v15, %v5562_v24 }
0x1031   :  { %v5952_v12 = vpop.f32.mrf.mxu1 }
0x1032   :  { %v5953_v2 = vadd.f32 %v5952_v12, %v5864_v29  ;;  %v14348_v29 = vld [vmem:[#allocation137_spill] sm:$0xff]  ;;  %v5890_v12 = vpop.f32.mrf.mxu0 }
0x1034   :  { %5991 = vmatmul.bf16.gmra.mxu1 %v9033_v51  ;;  %v13337_v33 = vadd.f32 %v5953_v2, %v14343_v63  ;;  %v9454_v2 = vld [vmem:[#allocation27 + $0xb4] sm:$0xf]  ;;  %v5881_v63 = vadd.f32 %v5880_v10, %v13330_v36 }
0x1039   :  { %v5954_v52 = vpop.f32.mrf.mxu1 }
0x103a   :  { %v5955_v18 = vadd.f32 %v5954_v52, %v5866_v9  ;;  %v5879_v9 = vadd.f32 %v13324_v23, %v13326_v26  ;;  %v9057_v52 = vor.u32 %v9454_v2, %v9054_v7  ;;  %v5893_v24 = vpop.f32.mrf.mxu0  ;;  %v5884_v26 = vadd.f32 %v5883_v32, %v13322_v59 }
0x103c   :  { %v13340_v58 = vadd.f32 %v5955_v18, %v14344_v31 }
0x103e   :  { %v6064_v8 = vpack.c.bf16 %v13340_v58, %v13337_v33 }
0x1041   :  { %v5957_v44 = vpop.f32.mrf.mxu1 }
0x1042   :  { %v5958_v0 = vadd.f32 %v5957_v44, %v5869_v28  ;;  %v14350_v28 = vld [vmem:[#allocation139_spill] sm:$0xff]  ;;  %v9456_v44 = vld [vmem:[#allocation27 + $0xc4] sm:$0xf] }
0x1044   :  { %5996 = vmatmul.bf16.gmra.mxu1 %v9041_v3  ;;  %v13349_v48 = vadd.f32 %v5958_v0, %v14345_v11  ;;  %v9062_v0 = vld [vmem:[#allocation27 + $0xc8] sm:$0xf0]  ;;  %v9458_v11 = vld [vmem:[#allocation27 + $0xd4] sm:$0xf] }
0x1045   :  { %v9065_v21 = vor.u32 %v9456_v44, %v9062_v0 }
0x1049   :  { %v5959_v27 = vpop.f32.mrf.mxu1 }
0x104a   :  { %v5960_v49 = vadd.f32 %v5959_v27, %v5871_v19  ;;  %v5895_v19 = vpop.f32.mrf.mxu0 }
0x104c   :  { %v13352_v30 = vadd.f32 %v5960_v49, %v14346_v54  ;;  %v9070_v54 = vld [vmem:[#allocation27 + $0xd8] sm:$0xf0] }
0x104d   :  { %v9073_v46 = vor.u32 %v9458_v11, %v9070_v54 }
0x104e   :  { %v6065_v14 = vpack.c.bf16 %v13352_v30, %v13349_v48  ;;  %v9467_v48 = vld [vmem:[#allocation58 + $0x14] sm:$0xf0] }
0x1051   :  { %v5962_v40 = vpop.f32.mrf.mxu1 }
0x1052   :  { %v5963_v25 = vadd.f32 %v5962_v40, %v5874_v17  ;;  %v5898_v10 = vpop.f32.mrf.mxu0 }
0x1054   :  { %6001 = vmatmul.bf16.gmra.mxu1 %v9049_v20  ;;  %v13361_v39 = vadd.f32 %v5963_v25, %v14347_v13  ;;  %v13382_v20 = vpop.permute.xlu1 %5676  ;;  %v9460_v25 = vld [vmem:[#allocation27 + $0xe4] sm:$0xf]  ;;  %v13386_v13 = vpop.permute.xlu2 %5686 }
0x1059   :  { %v5964_v35 = vpop.f32.mrf.mxu1 }
0x105a   :  { %v5965_v38 = vadd.f32 %v5964_v35, %v5876_v6  ;;  %v5900_v17 = vpop.f32.mrf.mxu0  ;;  %v9078_v6 = vld [vmem:[#allocation27 + $0xe8] sm:$0xf0] }
0x105b   :  { %v9081_v32 = vor.u32 %v9460_v25, %v9078_v6  ;;  %v5901_v44 = vadd.f32 %v5900_v17, %v13328_v47  ;;  %v14351_v6 = vld [vmem:[#allocation152_spill] sm:$0xff]  ;;  %v5886_v17 = vadd.f32 %v13346_v55, %v13334_v53  ;;  %v14357_v55 = vld [vmem:[#allocation159_spill] sm:$0xff] }
0x105c   :  { %v13364_v51 = vadd.f32 %v5965_v38, %v14348_v29  ;;  %v13384_v35 = vpop.permute.xlu1 %5671 }
0x105e   :  { %v6066_v50 = vpack.c.bf16 %v13364_v51, %v13361_v39 }
0x1061   :  { %v5967_v18 = vpop.f32.mrf.mxu1 }
0x1062   :  { %v5968_v15 = vadd.f32 %v5967_v18, %v5879_v9  ;;  %v5903_v59 = vpop.f32.mrf.mxu0  ;;  %v9462_v9 = vld [vmem:[#allocation27 + $0xf4] sm:$0xf] }
0x1064   :  { %6006 = vmatmul.bf16.gmra.mxu1 %v9057_v52  ;;  %v13372_v34 = vadd.f32 %v5968_v15, %v14349_v43  ;;  %v13390_v7 = vpop.permute.xlu1 %5646  ;;  %v9086_v52 = vld [vmem:[#allocation27 + $0xf8] sm:$0xf0]  ;;  %v13392_v15 = vpop.permute.xlu2 %5681  ;;  %v5899_v43 = vadd.f32 %v5898_v10, %v13310_v16 }
0x1065   :  { %v9089_v18 = vor.u32 %v9462_v9, %v9086_v52  ;;  %v14352_v9 = vld [vmem:[#allocation153_spill] sm:$0xff] }
0x1069   :  { %v5969_v31 = vpop.f32.mrf.mxu1 }
0x106a   :  { %v5970_v4 = vadd.f32 %v5969_v31, %v5881_v63  ;;  %v13388_v29 = vpop.f32.mrf.mxu0 }
0x106c   :  { %v13375_v3 = vadd.f32 %v5970_v4, %v14350_v28  ;;  %v13394_v4 = vpop.permute.xlu1 %5641  ;;  %v5896_v28 = vadd.f32 %v5895_v19, %v13316_v1  ;;  %v13400_v54 = vpop.permute.xlu2 %5656  ;;  %v5889_v1 = vadd.f32 %v13357_v37, %v13332_v41  ;;  %v14353_v19 = vld [vmem:[#allocation154_spill] sm:$0xff] }
0x106e   :  { %v6067_v23 = vpack.c.bf16 %v13375_v3, %v13372_v34  ;;  %v9465_v34 = vld [vmem:[#allocation58 + $0x4] sm:$0xf0] }
0x1071   :  { %v5972_v27 = vpop.f32.mrf.mxu1 }
0x1072   :  { %v13380_v49 = vadd.f32 %v5972_v27, %v5884_v26  ;;  %v5908_v31 = vpop.f32.mrf.mxu0 }
0x1074   :  { %6011 = vmatmul.bf16.gmra.mxu1 %v9065_v21  ;;  %v5894_v21 = vadd.f32 %v5893_v24, %v13314_v60  ;;  %v5617_v24 = vpop.permute.xlu1 %5616  ;;  %v13420_v53 = vpop.permute.xlu2 %5651 }
0x1079   :  { %v5974_v36 = vpop.f32.mrf.mxu1 }
0x107a   :  { %v13405_v16 = vpop.f32.mrf.mxu0 }
0x1081   :  { %v5977_v42 = vpop.f32.mrf.mxu1 }
0x1084   :  { %6016 = vmatmul.bf16.gmra.mxu1 %v9073_v46  ;;  %v5891_v46 = vadd.f32 %v5890_v12, %v13320_v22  ;;  %v5978_v22 = vadd.f32 %v5977_v42, %v5889_v1  ;;  %v14354_v12 = vld [vmem:[#allocation155_spill] sm:$0xff] }
0x1089   :  { %v5979_v40 = vpop.f32.mrf.mxu1 }
0x108a   :  { %v5980_v47 = vadd.f32 %v5979_v40, %v5891_v46 }
0x1091   :  { %v5982_v38 = vpop.f32.mrf.mxu1 }
0x1092   :  { %v5983_v25 = vadd.f32 %v5982_v38, %v5894_v21  ;;  %v5913_v21 = vpop.f32.mrf.mxu0 }
0x1094   :  { %6021 = vmatmul.bf16.gmra.mxu1 %v9081_v32  ;;  %v6044_v38 = vadd.f32 %v5983_v25, %v14354_v12 }
0x1099   :  { %v5984_v2 = vpop.f32.mrf.mxu1 }
0x109a   :  { %v5985_v27 = vadd.f32 %v5984_v2, %v5896_v28  ;;  %v5904_v2 = vadd.f32 %v5903_v59, %v5617_v24  ;;  %v5975_v28 = vadd.f32 %v5974_v36, %v5886_v17  ;;  %v9100_v24 = vld [vmem:[#allocation58 + $0x10] sm:$0xf] }
0x109c   :  { %v6045_v10 = vadd.f32 %v5985_v27, %v14353_v19  ;;  %v6041_v42 = vadd.f32 %v5975_v28, %v14357_v55  ;;  %v14358_v27 = vld [vmem:[#allocation150_spill] sm:$0xff] }
0x109e   :  { %v6070_v40 = vpack.c.bf16 %v6045_v10, %v6044_v38 }
0x10a1   :  { %v5987_v63 = vpop.f32.mrf.mxu1 }
0x10a2   :  { %v5988_v0 = vadd.f32 %v5987_v63, %v5899_v43  ;;  %v13413_v63 = vpop.permute.xlu0 %5691 }
0x10a4   :  { %6026 = vmatmul.bf16.gmra.mxu1 %v9089_v18  ;;  %v6046_v32 = vadd.f32 %v5988_v0, %v14351_v6  ;;  %v9470_v18 = vld [vmem:[#allocation45] sm:$0xff]  ;;  %v5627_v6 = vpop.permute.xlu2 %5626 }
0x10a5   :  { %v14356_v0 = vld [vmem:[#allocation157_spill] sm:$0xff] }
0x10a9   :  { %v5989_v26 = vpop.f32.mrf.mxu1 }
0x10aa   :  { %v5990_v11 = vadd.f32 %v5989_v26, %v5901_v44  ;;  %v14355_v44 = vld [vmem:[#allocation156_spill] sm:$0xff]  ;;  %v6042_v26 = vadd.f32 %v5978_v22, %v14356_v0  ;;  %v13427_v25 = vpop.permute.xlu0 %5666 }
0x10ab   :  { %v6043_v41 = vadd.f32 %v5980_v47, %v14355_v44 }
0x10ac   :  { %v6047_v52 = vadd.f32 %v5990_v11, %v14352_v9  ;;  %v6040_v11 = vadd.f32 %v13380_v49, %v14358_v27  ;;  %v9471_v9 = vld [vmem:[#allocation45 + $0x8] sm:$0xff] }
0x10ad   :  { %v6069_v59 = vpack.c.bf16 %v6043_v41, %v6042_v26 }
0x10ae   :  { %v6071_v60 = vpack.c.bf16 %v6047_v52, %v6046_v32  ;;  %v6068_v46 = vpack.c.bf16 %v6041_v42, %v6040_v11  ;;  %v5909_v32 = vadd.f32 %v5908_v31, %v5627_v6  ;;  %v13432_v52 = vpop.f32.mrf.mxu0  ;;  %v9092_v31 = vld [vmem:[#allocation58] sm:$0xf] }
0x10af   :  { %v9093_v19 = vor.u32 %v9465_v34, %v9092_v31 }
0x10b0   :  { %6128 = vmatpush.bf16.msrb.mxu2 %v6071_v60 }
0x10b1   :  { %v5992_v43 = vpop.f32.mrf.mxu1 }
0x10b2   :  { %v13416_v37 = vadd.f32 %v5992_v43, %v5904_v2  ;;  %v5662_v49 = vpop.permute.xlu0 %5661 }
0x10b4   :  { %6129 = vmatpush.bf16.msrb.mxu2 %v6070_v40  ;;  %9124 = vmatmul.msk.bf16.vlgmr.msra.gmra.mxu1 %vm1697_vm3, %v9470_v18 }
0x10b8   :  { %6130 = vmatpush.bf16.msrb.mxu2 %v6069_v59 }
0x10b9   :  { %v13425_v36 = vpop.f32.mrf.mxu1 }
0x10ba   :  { %v5637_v10 = vpop.permute.xlu0 %5636 }
0x10bb   :  { %v5914_v39 = vadd.f32 %v5913_v21, %v5637_v10 }
0x10bc   :  { %6131 = vmatpush.bf16.msrb.mxu2 %v6068_v46 }
0x10c0   :  { %6132 = vmatpush.bf16.msrb.mxu2 %v6067_v23  ;;  %v5918_v23 = vpop.f32.mrf.mxu0 }
0x10c1   :  { %v5997_v1 = vpop.f32.mrf.mxu1  ;;  %v5919_v2 = vadd.f32 %v5918_v23, %v13390_v7 }
0x10c2   :  { %v13434_v47 = vadd.f32 %v5997_v1, %v5909_v32 }
0x10c4   :  { %6133 = vmatpush.bf16.msrb.mxu2 %v6066_v50  ;;  %9125 = vmatmul.msk.bf16.gmra.mxu1 %vm1697_vm3, %v9471_v9  ;;  %vm7152_vm3 = vcmask 228352  }
0x10c8   :  { %6134 = vmatpush.bf16.msrb.mxu2 %v6065_v14  ;;  %v5920_v60 = vpop.f32.mrf.mxu0  ;;  %v9101_v14 = vor.u32 %v9467_v48, %v9100_v24 }
0x10c9   :  { %v13443_v3 = vpop.f32.mrf.mxu1 }
0x10cc   :  { %6135 = vmatpush.bf16.msrb.mxu2 %v6064_v8 }
0x10cf   :  { %6136 = vmatmul.bf16.vlgmr.msrb.gmra.mxu2 %v9093_v19 }
0x10d0   :  { %v5923_v17 = vpop.f32.mrf.mxu0 }
0x10d1   :  { %v6002_v51 = vpop.f32.mrf.mxu1  ;;  %v5924_v58 = vadd.f32 %v5923_v17, %v13400_v54 }
0x10d2   :  { %v13448_v50 = vadd.f32 %v6002_v51, %v5914_v39 }
0x10d8   :  { %v5925_v38 = vpop.f32.mrf.mxu0 }
0x10d9   :  { %v6004_v30 = vpop.f32.mrf.mxu1 }
0x10df   :  { %6141 = vmatmul.bf16.gmra.mxu2 %v9101_v14  ;;  %v5921_v14 = vadd.f32 %v5920_v60, %v13420_v53  ;;  %v14362_v60 = vld [vmem:[#allocation162_spill] sm:$0xff] }
0x10e0   :  { %v5928_v43 = vpop.f32.mrf.mxu0 }
0x10e1   :  { %v6007_v22 = vpop.f32.mrf.mxu1  ;;  %v5929_v10 = vadd.f32 %v5928_v43, %v13427_v25  ;;  %v14359_v25 = vld [vmem:[#allocation140_spill] sm:$0xff] }
0x10e2   :  { %v6008_v12 = vadd.f32 %v6007_v22, %v5919_v2  ;;  %v14363_v43 = vld [vmem:[#allocation148_spill] sm:$0xff] }
0x10e8   :  { %v5930_v44 = vpop.f32.mrf.mxu0 }
0x10e9   :  { %v6009_v33 = vpop.f32.mrf.mxu1  ;;  %v5931_v31 = vadd.f32 %v5930_v44, %v13384_v35 }
0x10f0   :  { %v5933_v40 = vpop.f32.mrf.mxu0 }
0x10f1   :  { %v6012_v8 = vpop.f32.mrf.mxu1  ;;  %v5934_v32 = vadd.f32 %v5933_v40, %v13382_v20  ;;  %v14365_v40 = vld [vmem:[#allocation144_spill] sm:$0xff] }
0x10f2   :  { %v6013_v18 = vadd.f32 %v6012_v8, %v5924_v58  ;;  %v5632_v8 = vpop.permute.xlu0 %5631 }
0x10f3   :  { %v5911_v53 = vadd.f32 %v13405_v16, %v5632_v8 }
0x10f8   :  { %v5935_v26 = vpop.f32.mrf.mxu0 }
0x10f9   :  { %v6014_v28 = vpop.f32.mrf.mxu1  ;;  %v5936_v11 = vadd.f32 %v5935_v26, %v13392_v15  ;;  %v14366_v26 = vld [vmem:[#allocation160_spill] sm:$0xff] }
0x1100   :  { %v5938_v59 = vpop.f32.mrf.mxu0 }
0x1101   :  { %v6017_v41 = vpop.f32.mrf.mxu1  ;;  %v5939_v27 = vadd.f32 %v5938_v59, %v13386_v13  ;;  %v14368_v59 = vld [vmem:[#allocation158_spill] sm:$0xff] }
0x1102   :  { %v6018_v51 = vadd.f32 %v6017_v41, %v5929_v10  ;;  %v5622_v41 = vpop.permute.xlu2 %5621 }
0x1108   :  { %v5940_v7 = vpop.f32.mrf.mxu0 }
0x1109   :  { %v6019_v0 = vpop.f32.mrf.mxu1  ;;  %v5941_v54 = vadd.f32 %v5940_v7, %v13413_v63  ;;  %v5926_v63 = vadd.f32 %v5925_v38, %v5662_v49  ;;  %v14360_v49 = vld [vmem:[#allocation163_spill] sm:$0xff]  ;;  %v14361_v38 = vld [vmem:[#allocation149_spill] sm:$0xff] }
0x110a   :  { %v6020_v13 = vadd.f32 %v6019_v0, %v5931_v31  ;;  %v6056_v22 = vadd.f32 %v6013_v18, %v14360_v49  ;;  %v9094_v7 = vld [vmem:[#allocation58 + $0x8] sm:$0xf0]  ;;  %v6091_v31 = vpop.permute.xlu0 %6090 }
0x110b   :  { %v6015_v20 = vadd.f32 %v6014_v28, %v5926_v63 }
0x110c   :  { %v6059_v48 = vadd.f32 %v6020_v13, %v12904_v45 }
0x110d   :  { %v6057_v17 = vadd.f32 %v6015_v20, %v14359_v25  ;;  %v6329_v25 = vld [vmem:[%s11163_s9] sm:$0xf]  ;;  %s10899_s9 = smov 120  }
0x110f   :  { %v6076_v45 = vpack.c.bf16 %v6057_v17, %v6056_v22  ;;  %v6347_v17 = vsel %vm3185_vm4, %v6329_v25, 0  ;;  %vm6974_vm4 = vcmask 39936  }
0x1111   :  { %v6022_v55 = vpop.f32.mrf.mxu1 }
0x1112   :  { %v6023_v34 = vadd.f32 %v6022_v55, %v5934_v32 }
0x1114   :  { %v6060_v24 = vadd.f32 %v6023_v34, %v12898_v57  ;;  %v6096_v34 = vpop.permute.xlu1 %6095 }
0x1119   :  { %v6024_v42 = vpop.f32.mrf.mxu1 }
0x111a   :  { %v6025_v9 = vadd.f32 %v6024_v42, %v5936_v11  ;;  %v6227_v11 = vld [vmem:[#allocation64] sm:$0x1] }
0x111c   :  { %v6061_v15 = vadd.f32 %v6025_v9, %v12893_v61  ;;  %v5916_v61 = vadd.f32 %v13432_v52, %v13394_v4  ;;  %v5906_v4 = vadd.f32 %v13388_v29, %v5622_v41  ;;  %v14364_v52 = vld [vmem:[#allocation161_spill] sm:$0xff]  ;;  %v9464_v29 = vld [vmem:[#allocation58 + $0x4] sm:$0xf]  ;;  %v6179_v22 = vpop.permute.xlu1 %6178 }
0x111e   :  { %v6078_v35 = vpack.c.bf16 %v6061_v15, %v6060_v24  ;;  %v6005_v57 = vadd.f32 %v6004_v30, %v5916_v61  ;;  %v6052_v30 = vadd.f32 %v13448_v50, %v14364_v52  ;;  %v5995_v18 = vadd.f32 %v13425_v36, %v5906_v4  ;;  %v6106_v24 = vpop.permute.xlu0 %6105 }
0x111f   :  { %v6237_v36 = vsel %vm6235_vm6, %v6227_v11, 0 }
0x1120   :  { %v6053_v28 = vadd.f32 %v6005_v57, %v14363_v43  ;;  %6246 = vmatpush.bf16.msrb.mxu0 %v6237_v36 }
0x1121   :  { %v6027_v21 = vpop.f32.mrf.mxu1 }
0x1122   :  { %v6028_v46 = vadd.f32 %v6027_v21, %v5939_v27  ;;  %v6074_v16 = vpack.c.bf16 %v6053_v28, %v6052_v30  ;;  %v6048_v21 = vadd.f32 %v13416_v37, %v14368_v59  ;;  %v9097_v27 = vor.u32 %v9464_v29, %v9094_v7  ;;  %v9474_v29 = vld [vmem:[#allocation63] sm:$0xff] }
0x1124   :  { %v6062_v23 = vadd.f32 %v6028_v46, %v12887_v56  ;;  %v6058_v56 = vadd.f32 %v6018_v51, %v12909_v5  ;;  %v6054_v5 = vadd.f32 %v6008_v12, %v14362_v60  ;;  %v6050_v12 = vadd.f32 %v13434_v47, %v14366_v26  ;;  %v9466_v47 = vld [vmem:[#allocation58 + $0x14] sm:$0xf]  ;;  %v6101_v51 = vpop.permute.xlu2 %6100 }
0x1126   :  { %v6077_v2 = vpack.c.bf16 %v6059_v48, %v6058_v56  ;;  %v6189_v4 = vpop.permute.xlu0 %6188 }
0x1129   :  { %v6029_v6 = vpop.f32.mrf.mxu1 }
0x112a   :  { %v6030_v1 = vadd.f32 %v6029_v6, %v5941_v54  ;;  %v9102_v54 = vld [vmem:[#allocation58 + $0x18] sm:$0xf0] }
0x112b   :  { %v9105_v46 = vor.u32 %v9466_v47, %v9102_v54 }
0x112c   :  { %v6063_v19 = vadd.f32 %v6030_v1, %v12889_v62  ;;  %v6010_v62 = vadd.f32 %v6009_v33, %v5921_v14  ;;  %v6000_v33 = vadd.f32 %v13443_v3, %v5911_v53  ;;  %v14367_v3 = vld [vmem:[#allocation141_spill] sm:$0xff] }
0x112d   :  { %v6049_v55 = vadd.f32 %v5995_v18, %v14367_v3 }
0x112e   :  { %v6079_v39 = vpack.c.bf16 %v6063_v19, %v6062_v23  ;;  %v6055_v58 = vadd.f32 %v6010_v62, %v14361_v38  ;;  %v6051_v0 = vadd.f32 %v6000_v33, %v14365_v40  ;;  %v6194_v40 = vpop.permute.xlu1 %6193  ;;  %v6282_v54 = vpop.permute.xlu0 %6281 }
0x112f   :  { %v6072_v50 = vpack.c.bf16 %v6049_v55, %v6048_v21  ;;  %v9475_v21 = vld [vmem:[#allocation63 + $0x8] sm:$0xff] }
0x1130   :  { %6147 = vmatpush.bf16.msra.mxu2 %v6079_v39  ;;  %v6075_v44 = vpack.c.bf16 %v6055_v58, %v6054_v5  ;;  %v6073_v42 = vpack.c.bf16 %v6051_v0, %v6050_v12  ;;  %v6184_v58 = vpop.permute.xlu2 %6183  ;;  %6477 = vmatpush.bf16.msra.mxu0 %v9475_v21 }
0x1131   :  { %v6319_v7 = vpop.f32.mrf.mxu1 }
0x1134   :  { %6148 = vmatpush.bf16.msra.mxu2 %v6078_v35  ;;  %6478 = vmatpush.bf16.msra.mxu0 %v9474_v29 }
0x1138   :  { %6149 = vmatpush.bf16.msra.mxu2 %v6077_v2  ;;  %v6217_v2 = vpop.f32.mrf.mxu3  ;;  %v6277_v11 = vpop.permute.xlu2 %6276 }
0x1139   :  { %v6218_v57 = vadd.f32 %v6217_v2, %v6179_v22  ;;  %v6320_v36 = vadd.f32 %v6319_v7, %v6277_v11 }
0x113c   :  { %6150 = vmatpush.bf16.msra.mxu2 %v6076_v45 }
0x1140   :  { %6151 = vmatpush.bf16.msra.mxu2 %v6075_v44  ;;  %v6219_v61 = vpop.f32.mrf.mxu3 }
0x1141   :  { %v6220_v45 = vadd.f32 %v6219_v61, %v6184_v58  ;;  %v6397_v61 = vpop.permute.xlu0 %6396 }
0x1144   :  { %6152 = vmatpush.bf16.msra.mxu2 %v6074_v16 }
0x1148   :  { %6153 = vmatpush.bf16.msra.mxu2 %v6073_v42  ;;  %v6222_v5 = vpop.f32.mrf.mxu3 }
0x1149   :  { %v6223_v52 = vadd.f32 %v6222_v5, %v6189_v4 }
0x114c   :  { %6154 = vmatpush.bf16.msra.mxu2 %v6072_v50  ;;  %v6321_v50 = vpop.f32.mrf.mxu1 }
0x114f   :  { %6155 = vmatmul.bf16.vlgmr.msra.gmra.mxu2 %v9097_v27 }
0x1150   :  { %6356 = vmatpush.bf16.msrb.mxu2 %v6347_v17  ;;  %v6224_v30 = vpop.f32.mrf.mxu3 }
0x1151   :  { %v6225_v0 = vadd.f32 %v6224_v30, %v6194_v40 }
0x1152   :  { %v6137_v6 = vpop.f32.mrf.mxu2 }
0x1153   :  { %v6138_v23 = vadd.f32 %v6137_v6, %v6091_v31 }
0x1158   :  { %v6429_v2 = vpop.f32.mrf.mxu3 }
0x115a   :  { %v6139_v32 = vpop.f32.mrf.mxu2 }
0x115b   :  { %v6140_v19 = vadd.f32 %v6139_v32, %v6096_v34 }
0x115f   :  { %6160 = vmatmul.bf16.gmra.mxu2 %v9105_v46  ;;  %v6322_v46 = vadd.f32 %v6321_v50, %v6282_v54  ;;  %v6699_v50 = vld [vmem:[#allocation43 + $0x7] sm:$0x1] }
0x1162   :  { %v6142_v9 = vpop.f32.mrf.mxu2 }
0x1163   :  { %v6143_v20 = vadd.f32 %v6142_v9, %v6101_v51  ;;  %v6292_v51 = vpop.permute.xlu2 %6291 }
0x116a   :  { %v6144_v37 = vpop.f32.mrf.mxu2 }
0x116b   :  { %v6145_v48 = vadd.f32 %v6144_v37, %v6106_v24  ;;  %v6324_v37 = vpop.f32.mrf.mxu1 }
0x11d2   :  { %v6156_v1 = vpop.f32.mrf.mxu2 }
0x11d3   :  { %v6157_v13 = vadd.f32 %v6156_v1, %v6138_v23 }
0x11da   :  { %v6158_v10 = vpop.f32.mrf.mxu2 }
0x11db   :  { %v6159_v15 = vadd.f32 %v6158_v10, %v6140_v19  ;;  %v6287_v10 = vpop.permute.xlu1 %6286 }
0x11dd   :  { %v13485_v39 = vpack.c.bf16 %v6159_v15, %v6157_v13  ;;  %v6325_v13 = vadd.f32 %v6324_v37, %v6287_v10  ;;  %v6326_v15 = vpop.f32.mrf.mxu1  ;;  %v7190_v37 = vld [vmem:[#allocation51 + $0x8] sm:$0x1] }
0x11de   :  { %v6327_v24 = vadd.f32 %v6326_v15, %v6292_v51  ;;  %v6549_v15 = vld [vmem:[#allocation43 + $0x1] sm:$0x1] }
0x11df   :  { %9114 = vmatmul.msk.bf16.vlgmr.msrb.gmra.mxu0 %vm6228_vm7, %v13485_v39 }
0x11e2   :  { %v6161_v63 = vpop.f32.mrf.mxu2 }
0x11e3   :  { %v6162_v14 = vadd.f32 %v6161_v63, %v6143_v20 }
0x11ea   :  { %v6163_v35 = vpop.f32.mrf.mxu2 }
0x11eb   :  { %v6164_v56 = vadd.f32 %v6163_v35, %v6145_v48 }
0x11ed   :  { %v13489_v62 = vpack.c.bf16 %v6164_v56, %v6162_v14 }
0x11ef   :  { %9115 = vmatmul.msk.bf16.gmra.mxu0 %vm6228_vm7, %v13489_v62 }
0x125c   :  { %v6248_v49 = vpop.f32.mrf.mxu0 }
0x125d   :  { %v6258_v38 = vadd.f32 %v6248_v49, %v6218_v57  ;;  %v6431_v49 = vpop.f32.mrf.mxu3  ;;  %v6387_v57 = vpop.permute.xlu2 %6386 }
0x125f   :  { %v6262_v53 = vpack.c.bf16 %v6258_v38, %v6258_v38  ;;  %v6430_v38 = vadd.f32 %v6429_v2, %v6387_v57  ;;  %v6729_v2 = vld [vmem:[#allocation43 + $0x8] sm:$0x1]  ;;  %v6579_v57 = vld [vmem:[#allocation43 + $0x2] sm:$0x1] }
0x1261   :  { %v6334_v43 = vunpack.c.l.b16 %v6262_v53 }
0x1264   :  { %v6250_v8 = vpop.f32.mrf.mxu0 }
0x1265   :  { %v6259_v60 = vadd.f32 %v6250_v8, %v6220_v45  ;;  %v6392_v45 = vpop.permute.xlu0 %6391 }
0x1266   :  { %v6432_v8 = vadd.f32 %v6431_v49, %v6392_v45 }
0x1267   :  { %v6263_v33 = vpack.c.bf16 %v6259_v60, %v6259_v60 }
0x1269   :  { %v6335_v28 = vunpack.c.l.b16 %v6263_v33  ;;  %v6434_v33 = vpop.f32.mrf.mxu3 }
0x126a   :  { %v6435_v30 = vadd.f32 %v6434_v33, %v6397_v61  ;;  %v6731_v33 = vpack.i.b16 %v6729_v2, %v6729_v2 }
0x126b   :  { %v13495_v44 = vpack.c.b16 %v6335_v28, %v6334_v43 }
0x126c   :  { %v6253_v41 = vpop.f32.mrf.mxu0 }
0x126d   :  { %9126 = vmatmul.msk.bf16.vlgmr.msrb.gmra.mxu2 %vm3160_vm5, %v13495_v44  ;;  %v6260_v18 = vadd.f32 %v6253_v41, %v6223_v52 }
0x126f   :  { %v6264_v26 = vpack.c.bf16 %v6260_v18, %v6260_v18 }
0x1271   :  { %v6336_v55 = vunpack.c.l.b16 %v6264_v26  ;;  %v6436_v18 = vpop.f32.mrf.mxu3 }
0x1274   :  { %v6255_v16 = vpop.f32.mrf.mxu0 }
0x1275   :  { %v6261_v12 = vadd.f32 %v6255_v16, %v6225_v0  ;;  %v6402_v0 = vpop.permute.xlu1 %6401 }
0x1276   :  { %v6437_v16 = vadd.f32 %v6436_v18, %v6402_v0 }
0x1277   :  { %v6265_v3 = vpack.c.bf16 %v6261_v12, %v6261_v12 }
0x1279   :  { %v6337_v42 = vunpack.c.l.b16 %v6265_v3 }
0x127b   :  { %v13499_v59 = vpack.c.b16 %v6337_v42, %v6336_v55 }
0x127d   :  { %9127 = vmatmul.msk.bf16.gmra.mxu2 %vm3160_vm5, %v13499_v59 }
0x12f0   :  { %v6358_v27 = vpop.f32.mrf.mxu2 }
0x12f1   :  { %v6368_v47 = vadd.f32 %v6358_v27, %v6320_v36  ;;  %v6701_v27 = vpack.i.b16 %v6699_v50, %v6699_v50  ;;  %v6639_v36 = vld [vmem:[#allocation43 + $0x5] sm:$0x1] }
0x12f3   :  { %v6372_v32 = vpack.c.bf16 %v6368_v47, %v6368_v47  ;;  %v6703_v47 = vperm.slane %v6701_v27, 0 }
0x12f5   :  { %v6447_v31 = vunpack.c.l.b16 %v6372_v32 }
0x12f8   :  { %v6360_v6 = vpop.f32.mrf.mxu2 }
0x12f9   :  { %v6369_v9 = vadd.f32 %v6360_v6, %v6322_v46  ;;  %v6641_v46 = vpack.i.b16 %v6639_v36, %v6639_v36  ;;  %v13572_v6 = vunpack.c.l.bf16 %v6703_v47 }
0x12fb   :  { %v6373_v1 = vpack.c.bf16 %v6369_v9, %v6369_v9 }
0x12fd   :  { %v6448_v34 = vunpack.c.l.b16 %v6373_v1 }
0x12ff   :  { %v13503_v23 = vpack.c.b16 %v6448_v34, %v6447_v31  ;;  %v6643_v31 = vperm.slane %v6641_v46, 0 }
0x1300   :  { %v6363_v19 = vpop.f32.mrf.mxu2 }
0x1301   :  { %9146 = vmatmul.msk.bf16.vlgmr.msra.gmra.mxu0 %vm976_vm2, %v13503_v23  ;;  %v6370_v63 = vadd.f32 %v6363_v19, %v6325_v13  ;;  %v7192_v19 = vpack.i.b16 %v7190_v37, %v7190_v37 }
0x1303   :  { %v6374_v48 = vpack.c.bf16 %v6370_v63, %v6370_v63  ;;  %v13578_v63 = vunpack.c.l.bf16 %v6643_v31 }
0x1305   :  { %v6449_v56 = vunpack.c.l.b16 %v6374_v48  ;;  %v7194_v48 = vperm.slane %v7192_v19, 0 }
0x1308   :  { %v6365_v20 = vpop.f32.mrf.mxu2 }
0x1309   :  { %v6371_v35 = vadd.f32 %v6365_v20, %v6327_v24  ;;  %v6669_v24 = vld [vmem:[#allocation43 + $0x6] sm:$0x1] }
0x130a   :  { %v6671_v61 = vpack.i.b16 %v6669_v24, %v6669_v24 }
0x130b   :  { %v6375_v14 = vpack.c.bf16 %v6371_v35, %v6371_v35 }
0x130d   :  { %v6450_v25 = vunpack.c.l.b16 %v6375_v14 }
0x130f   :  { %v13507_v17 = vpack.c.b16 %v6450_v25, %v6449_v56  ;;  %v6551_v56 = vpack.i.b16 %v6549_v15, %v6549_v15  ;;  %v6854_v15 = vld [vmem:[#allocation42 + $0x8] sm:$0xff] }
0x1311   :  { %9147 = vmatmul.msk.bf16.gmra.mxu0 %vm976_vm2, %v13507_v17 }
0x137e   :  { %v6480_v22 = vpop.f32.mrf.mxu0 }
0x137f   :  { %v6490_v58 = vadd.f32 %v6480_v22, %v6430_v38 }
0x1381   :  { %v6494_v60 = vpack.c.bf16 %v6490_v58, %v6490_v58  ;;  %v13588_v58 = vunpack.c.l.bf16 %v7194_v48  ;;  %v7863_v48 = vld [vmem:[%s14369_s3 + $0x8] sm:$0xff] }
0x1383   :  { %v6502_v28 = vunpack.c.l.b16 %v6494_v60  ;;  %v7864_v60 = vld [vmem:[%s14369_s3 + $0x10] sm:$0xff] }
0x1386   :  { %v6482_v53 = vpop.f32.mrf.mxu0 }
0x1387   :  { %v6491_v5 = vadd.f32 %v6482_v53, %v6432_v8  ;;  %v6553_v53 = vperm.slane %v6551_v56, 0 }
0x1389   :  { %v6495_v43 = vpack.c.bf16 %v6491_v5, %v6491_v5  ;;  %v7862_v5 = vld [vmem:[%s14369_s3] sm:$0xff] }
0x138b   :  { %v6503_v41 = vunpack.c.l.b16 %v6495_v43  ;;  %v9201_v43 = vld [vmem:[%s14370_s13 + $0x2] sm:$0x1] }
0x138d   :  { %v13511_v4 = vpack.c.b16 %v6503_v41, %v6502_v28 }
0x138e   :  { %v6485_v52 = vpop.f32.mrf.mxu0 }
0x138f   :  { %6687 = vrot.lane.b32.xlu2 %v13511_v4, %s10899_s9  ;;  %v6492_v40 = vadd.f32 %v6485_v52, %v6435_v30  ;;  %v6673_v52 = vperm.slane %v6671_v61, 0  ;;  %v6581_v30 = vpack.i.b16 %v6579_v57, %v6579_v57 }
0x1391   :  { %v6496_v12 = vpack.c.bf16 %v6492_v40, %v6492_v40  ;;  %v13607_v50 = vunpack.c.l.bf16 %v6673_v52 }
0x1393   :  { %v6504_v42 = vunpack.c.l.b16 %v6496_v12  ;;  %v13599_v12 = vunpack.c.l.bf16 %v6553_v53 }
0x1396   :  { %v6487_v26 = vpop.f32.mrf.mxu0 }
0x1397   :  { %v6493_v3 = vadd.f32 %v6487_v26, %v6437_v16  ;;  %v7501_v16 = vpack.i.b16 %v9201_v43, %v9201_v43  ;;  %v9202_v26 = vld [vmem:[%s14370_s13 + $0x3] sm:$0x1] }
0x1399   :  { %v6497_v55 = vpack.c.bf16 %v6493_v3, %v6493_v3  ;;  %v6733_v3 = vperm.slane %v6731_v33, 0 }
0x139b   :  { %v6505_v21 = vunpack.c.l.b16 %v6497_v55  ;;  %v13614_v19 = vunpack.c.l.bf16 %v6733_v3 }
0x139d   :  { %v13514_v29 = vpack.c.b16 %v6505_v21, %v6504_v42 }
0x139f   :  { %6629 = vrot.lane.b32.xlu2 %v13514_v29, %s10900_s21  ;;  %6659 = vrot.lane.b32.xlu0 %v13514_v29, %s10901_s0 }
0x13a0   :  { %6689 = vrot.lane.b32.xlu1 %v13514_v29, %s10899_s9 }
0x13a7   :  { %7178 = vrot.lane.b32.xlu2 %v13503_v23, %s10902_s8  ;;  %6627 = vrot.lane.b32.xlu0 %v13511_v4, %s10900_s21 }
0x13a8   :  { %6657 = vrot.lane.b32.xlu1 %v13511_v4, %s10901_s0 }
0x13af   :  { %6538 = vrot.lane.b32.xlu2 %v13511_v4, %s10850_s10  ;;  %6567 = vrot.lane.b32.xlu0 %v13511_v4, %s10903_s14 }
0x13b0   :  { %7180 = vrot.lane.b32.xlu1 %v13507_v17, %s10902_s8 }
0x13b7   :  { %6717 = vrot.lane.b32.xlu2 %v13511_v4, %s10904_s25  ;;  %6508 = vrot.lane.b32.xlu0 %v13511_v4, %s10905_s19 }
0x13b8   :  { %6597 = vrot.lane.b32.xlu1 %v13511_v4, %s10869_s1 }
0x13bf   :  { %6569 = vrot.lane.b32.xlu2 %v13514_v29, %s10903_s14  ;;  %6599 = vrot.lane.b32.xlu0 %v13514_v29, %s10869_s1 }
0x13c0   :  { %7061 = vrot.lane.b32.xlu1 %v13507_v17, %s10869_s1 }
0x13c7   :  { %7490 = vrot.lane.b32.xlu2 %v13499_v59, %s10869_s1  ;;  %7150 = vrot.lane.b32.xlu0 %v13507_v17, %s10906_s2 }
0x13c8   :  { %7059 = vrot.lane.b32.xlu1 %v13503_v23, %s10869_s1 }
0x13cf   :  { %7488 = vrot.lane.b32.xlu2 %v13495_v44, %s10869_s1  ;;  %7148 = vrot.lane.b32.xlu0 %v13503_v23, %s10906_s2  ;;  %s10910_s1 = smov 5  }
0x13d0   :  { %6540 = vrot.lane.b32.xlu1 %v13514_v29, %s10850_s10  ;;  %s10909_s10 = smov 2  }
0x13d7   :  { %7120 = vrot.lane.b32.xlu2 %v13507_v17, %s10907_s27  ;;  %6719 = vrot.lane.b32.xlu0 %v13514_v29, %s10904_s25 }
0x13d8   :  { %6510 = vrot.lane.b32.xlu1 %v13514_v29, %s10905_s19 }
0x13df   :  { %7001 = vrot.lane.b32.xlu2 %v13507_v17, %s10862_s28  ;;  %7029 = vrot.lane.b32.xlu0 %v13503_v23, %s10908_s26 }
0x13e0   :  { %7031 = vrot.lane.b32.xlu1 %v13507_v17, %s10908_s26 }
0x13e7   :  { %6999 = vrot.lane.b32.xlu2 %v13503_v23, %s10862_s28  ;;  %7461 = vrot.lane.b32.xlu0 %v13499_v59, %s10909_s10  ;;  %s10911_s28 = smov 126  }
0x13e8   :  { %7118 = vrot.lane.b32.xlu1 %v13503_v23, %s10907_s27 }
0x13e9   :  { %v6688_v7 = vpop.permute.xlu2 %6687 }
0x13ea   :  { %v6693_v54 = vsel %vm6691_vm8, %v6688_v7, 0 }
0x13eb   :  { %v6704_v32 = vunpack.c.l.bf16 %v6693_v54  ;;  %v6705_v9 = vunpack.c.h.bf16 %v6693_v54 }
0x13ed   :  { %v6709_v10 = vmul.f32 %v13572_v6, %v6704_v32  ;;  %v6710_v13 = vmul.f32 %v13572_v6, %v6705_v9  ;;  %v7520_v32 = vpack.i.b16 %v9202_v26, %v9202_v26  ;;  %v6520_v9 = vld [vmem:[#allocation43] sm:$0x1] }
0x13ef   :  { %6972 = vrot.lane.b32.xlu2 %v13507_v17, %s10910_s1  ;;  %7459 = vrot.lane.b32.xlu0 %v13495_v44, %s10909_s10  ;;  %v6713_v35 = vpack.c.bf16 %v6709_v10, %v6709_v10  ;;  %v6714_v14 = vpack.c.bf16 %v6710_v13, %v6710_v13  ;;  %v7522_v61 = vperm.slane %v7520_v32, 0  ;;  %v7741_v32 = vld [vmem:[#allocation57] sm:$0xff] }
0x13f0   :  { %7090 = vrot.lane.b32.xlu1 %v13507_v17, %s10900_s21 }
0x13f1   :  { %v13590_v45 = vunpack.c.l.b16 %v6713_v35  ;;  %v13592_v8 = vunpack.c.l.b16 %v6714_v14  ;;  %v6522_v14 = vpack.i.b16 %v6520_v9, %v6520_v9 }
0x13f3   :  { %v6829_v55 = vpack.c.b16 %v13592_v8, %v13590_v45 }
0x13f7   :  { %7431 = vrot.lane.b32.xlu2 %v13495_v44, %s10908_s26  ;;  %7433 = vrot.lane.b32.xlu0 %v13499_v59, %s10908_s26 }
0x13f8   :  { %7088 = vrot.lane.b32.xlu1 %v13503_v23, %s10900_s21 }
0x13f9   :  { %v6630_v11 = vpop.permute.xlu2 %6629 }
0x13fa   :  { %v6636_v34 = vsel %vm6631_vm9, %v6630_v11, 0  ;;  %v6583_v11 = vperm.slane %v6581_v30, 0 }
0x13fb   :  { %v6646_v51 = vunpack.c.l.bf16 %v6636_v34  ;;  %v6647_v20 = vunpack.c.h.bf16 %v6636_v34  ;;  %v7503_v34 = vperm.slane %v7501_v16, 0 }
0x13fc   :  { %v13619_v35 = vunpack.c.l.bf16 %v6583_v11 }
0x13fd   :  { %v6651_v49 = vmul.f32 %v13578_v63, %v6646_v51  ;;  %v6652_v38 = vmul.f32 %v13578_v63, %v6647_v20  ;;  %v7865_v20 = vld [vmem:[%s14369_s3 + $0x18] sm:$0xff] }
0x13ff   :  { %7534 = vrot.lane.b32.xlu2 %v13499_v59, %s10900_s21  ;;  %7578 = vrot.lane.b32.xlu0 %v13499_v59, %s10911_s28  ;;  %v6655_v18 = vpack.c.bf16 %v6651_v49, %v6651_v49  ;;  %v6656_v40 = vpack.c.bf16 %v6652_v38, %v6652_v38  ;;  %v6609_v49 = vld [vmem:[#allocation43 + $0x3] sm:$0x1]  ;;  %v13624_v38 = vunpack.c.l.bf16 %v7503_v34 }
0x1400   :  { %6970 = vrot.lane.b32.xlu1 %v13503_v23, %s10910_s1 }
0x1401   :  { %v7179_v1 = vpop.permute.xlu2 %7178  ;;  %v13609_v36 = vunpack.c.l.b16 %v6655_v18  ;;  %v13612_v37 = vunpack.c.l.b16 %v6656_v40  ;;  %v6524_v18 = vperm.slane %v6522_v14, 0  ;;  %v6611_v40 = vpack.i.b16 %v6609_v49, %v6609_v49 }
0x1402   :  { %v7184_v22 = vsel %vm7182_vm10, %v7179_v1, 0 }
0x1403   :  { %v7195_v28 = vunpack.c.l.bf16 %v7184_v22  ;;  %v7196_v41 = vunpack.c.h.bf16 %v7184_v22  ;;  %v6806_v53 = vpack.c.b16 %v13612_v37, %v13609_v36  ;;  %v6613_v34 = vperm.slane %v6611_v40, 0 }
0x1405   :  { %v7200_v42 = vmul.f32 %v13588_v58, %v7195_v28  ;;  %v7201_v21 = vmul.f32 %v13588_v58, %v7196_v41 }
0x1407   :  { %7606 = vrot.lane.b32.xlu2 %v13495_v44, %s10907_s27  ;;  %7532 = vrot.lane.b32.xlu0 %v13495_v44, %s10900_s21  ;;  %v7204_v51 = vpack.c.bf16 %v7200_v42, %v7200_v42  ;;  %v7205_v24 = vpack.c.bf16 %v7201_v21, %v7201_v21  ;;  %v13636_v42 = vunpack.c.l.bf16 %v7522_v61 }
0x1408   :  { %7576 = vrot.lane.b32.xlu1 %v13495_v44, %s10911_s28 }
0x1409   :  { %v6539_v25 = vpop.permute.xlu2 %6538  ;;  %v13632_v28 = vunpack.c.l.b16 %v7204_v51  ;;  %v13634_v41 = vunpack.c.l.b16 %v7205_v24 }
0x140a   :  { %v6543_v0 = vsel %vm3160_vm5, 0, %v6539_v25 }
0x140b   :  { %v6554_v47 = vunpack.c.l.bf16 %v6543_v0  ;;  %v6555_v1 = vunpack.c.h.bf16 %v6543_v0 }
0x140d   :  { %v6559_v56 = vmul.f32 %v13599_v12, %v6554_v47  ;;  %v6560_v22 = vmul.f32 %v13599_v12, %v6555_v1  ;;  %v6855_v1 = vld [vmem:[#allocation42 + $0x10] sm:$0xff] }
0x140f   :  { %7878 = vperm.xlu2 %9624, %v7864_v60   ;;  %7868 = vperm.xlu0 %9622, %v7862_v5   ;;  %v6563_v0 = vpack.c.bf16 %v6559_v56, %v6559_v56  ;;  %v6564_v21 = vpack.c.bf16 %v6560_v22, %v6560_v22 }
0x1410   :  { %7608 = vrot.lane.b32.xlu1 %v13499_v59, %s10907_s27 }
0x1411   :  { %v6718_v7 = vpop.permute.xlu2 %6717  ;;  %v6660_v27 = vpop.permute.xlu0 %6659  ;;  %v13647_v14 = vunpack.c.l.b16 %v6564_v21 }
0x1412   :  { %v6666_v54 = vsel %vm6661_vm11, %v6660_v27, 0  ;;  %v6690_v46 = vpop.permute.xlu1 %6689  ;;  %v6723_v60 = vsel %vm6721_vm12, %v6718_v7, 0 }
0x1413   :  { %v6676_v31 = vunpack.c.l.bf16 %v6666_v54  ;;  %v6677_v10 = vunpack.c.h.bf16 %v6666_v54  ;;  %v6696_v13 = vsel %vm6691_vm8, %v6690_v46, 0  ;;  %v6734_v7 = vunpack.c.l.bf16 %v6723_v60 }
0x1414   :  { %v6706_v25 = vunpack.c.l.bf16 %v6696_v13  ;;  %v6707_v2 = vunpack.c.h.bf16 %v6696_v13  ;;  %v6735_v27 = vunpack.c.h.bf16 %v6723_v60  ;;  %vm7092_vm8 = vcmask 252928  }
0x1415   :  { %v6681_v57 = vmul.f32 %v13607_v50, %v6676_v31  ;;  %v6682_v5 = vmul.f32 %v13607_v50, %v6677_v10  ;;  %v13640_v31 = vunpack.c.l.bf16 %v6524_v18  ;;  %v7302_v10 = vpack.c.b16 %v13634_v41, %v13632_v28 }
0x1416   :  { %v6711_v33 = vmul.f32 %v13572_v6, %v6706_v25  ;;  %v6712_v43 = vmul.f32 %v13572_v6, %v6707_v2  ;;  %v6739_v56 = vmul.f32 %v13614_v19, %v6734_v7  ;;  %v6740_v25 = vmul.f32 %v13614_v19, %v6735_v27  ;;  %v7130_v2 = vld [vmem:[#allocation51 + $0x6] sm:$0x1] }
0x1417   :  { %6864 = vperm.xlu2 %9624, %v6854_v15   ;;  %7883 = vperm.xlu0 %9622, %v7865_v20   ;;  %v6685_v6 = vpack.c.bf16 %v6681_v57, %v6681_v57  ;;  %v6686_v11 = vpack.c.bf16 %v6682_v5, %v6682_v5  ;;  %v6853_v20 = vld [vmem:[#allocation42] sm:$0xff] }
0x1418   :  { %7873 = vperm.xlu1 %9623, %v7863_v48   ;;  %v6715_v16 = vpack.c.bf16 %v6711_v33, %v6711_v33  ;;  %v6716_v26 = vpack.c.bf16 %v6712_v43, %v6712_v43  ;;  %v13645_v48 = vunpack.c.l.b16 %v6563_v0  ;;  %v6743_v27 = vpack.c.bf16 %v6739_v56, %v6739_v56 }
0x1419   :  { %v6570_v52 = vpop.permute.xlu2 %6569  ;;  %v6628_v30 = vpop.permute.xlu0 %6627  ;;  %v6815_v61 = vunpack.c.l.b16 %v6685_v6  ;;  %v6816_v49 = vunpack.c.l.b16 %v6686_v11  ;;  %v6744_v6 = vpack.c.bf16 %v6740_v25, %v6740_v25 }
0x141a   :  { %v6658_v3 = vpop.permute.xlu1 %6657  ;;  %v6827_v47 = vunpack.c.l.b16 %v6715_v16  ;;  %v6828_v54 = vunpack.c.l.b16 %v6716_v26  ;;  %v6576_v9 = vsel %vm6571_vm13, 0, %v6570_v52  ;;  %v6633_v15 = vsel %vm6631_vm9, %v6628_v30, 0 }
0x141b   :  { %v6663_v46 = vsel %vm6661_vm11, %v6658_v3, 0  ;;  %v6586_v60 = vunpack.c.l.bf16 %v6576_v9  ;;  %v6587_v5 = vunpack.c.h.bf16 %v6576_v9  ;;  %v6644_v33 = vunpack.c.l.bf16 %v6633_v15 }
0x141c   :  { %v6830_v13 = vpack.c.b16 %v6828_v54, %v6827_v47  ;;  %v6674_v51 = vunpack.c.l.bf16 %v6663_v46  ;;  %v6675_v24 = vunpack.c.h.bf16 %v6663_v46  ;;  %v6645_v43 = vunpack.c.h.bf16 %v6633_v15  ;;  %v7744_v54 = vld [vmem:[#allocation57 + $0x18] sm:$0xff] }
0x141d   :  { %v13654_v16 = vunpack.c.l.bf16 %v6613_v34  ;;  %v7132_v26 = vpack.i.b16 %v7130_v2, %v7130_v2  ;;  %v6818_v47 = vpack.c.b16 %v6816_v49, %v6815_v61  ;;  %v6591_v46 = vmul.f32 %v13619_v35, %v6586_v60 }
0x141e   :  { %v6679_v22 = vmul.f32 %v13607_v50, %v6674_v51  ;;  %v6680_v57 = vmul.f32 %v13607_v50, %v6675_v24  ;;  %6932 = vmatpush.bf16.msra.mxu2 %v6830_v13  ;;  %v6649_v9 = vmul.f32 %v13578_v63, %v6644_v33  ;;  %v7742_v51 = vld [vmem:[#allocation57 + $0x8] sm:$0xff]  ;;  %v13667_v25 = vunpack.c.l.b16 %v6743_v27 }
0x141f   :  { %7747 = vperm.xlu2 %9624, %v7741_v32   ;;  %6869 = vperm.xlu0 %9622, %v6855_v1   ;;  %v6592_v32 = vmul.f32 %v13619_v35, %v6587_v5  ;;  %v6650_v1 = vmul.f32 %v13578_v63, %v6645_v43  ;;  %v6856_v24 = vld [vmem:[#allocation42 + $0x18] sm:$0xff]  ;;  %v7134_v45 = vperm.slane %v7132_v26, 0  ;;  %v13669_v2 = vunpack.c.l.b16 %v6744_v6  ;;  %v7070_v43 = vld [vmem:[#allocation51 + $0x3] sm:$0x1] }
0x1420   :  { %6859 = vperm.xlu1 %9623, %v6853_v20   ;;  %v6683_v18 = vpack.c.bf16 %v6679_v22, %v6679_v22  ;;  %v6684_v3 = vpack.c.bf16 %v6680_v57, %v6680_v57  ;;  %v6595_v49 = vpack.c.bf16 %v6591_v46, %v6591_v46  ;;  %v6653_v22 = vpack.c.bf16 %v6649_v9, %v6649_v9 }
0x1421   :  { %v7491_v52 = vpop.permute.xlu2 %7490  ;;  %v6568_v30 = vpop.permute.xlu0 %6567  ;;  %v6654_v57 = vpack.c.bf16 %v6650_v1, %v6650_v1  ;;  %v13676_v27 = vunpack.c.l.bf16 %v7134_v45  ;;  %vm7580_vm9 = vcmask 48128  }
0x1422   :  { %v7496_v40 = vsel %vm6601_vm14, 0, %v7491_v52  ;;  %v7181_v0 = vpop.permute.xlu1 %7180  ;;  %v6573_v50 = vsel %vm6571_vm13, 0, %v6568_v30  ;;  %6933 = vmatpush.bf16.msra.mxu2 %v6829_v55  ;;  %v6813_v8 = vunpack.c.l.b16 %v6683_v18  ;;  %v6814_v55 = vunpack.c.l.b16 %v6684_v3 }
0x1423   :  { %v7506_v21 = vunpack.c.l.bf16 %v7496_v40  ;;  %v7507_v7 = vunpack.c.h.bf16 %v7496_v40  ;;  %v7187_v11 = vsel %vm7182_vm10, %v7181_v0, 0  ;;  %v6584_v34 = vunpack.c.l.bf16 %v6573_v50 }
0x1424   :  { %v7197_v13 = vunpack.c.l.bf16 %v7187_v11  ;;  %v7198_v15 = vunpack.c.h.bf16 %v7187_v11  ;;  %v6585_v60 = vunpack.c.h.bf16 %v6573_v50  ;;  %v6596_v52 = vpack.c.bf16 %v6592_v32, %v6592_v32 }
0x1425   :  { %v7526_v20 = vmul.f32 %v13636_v42, %v7506_v21  ;;  %v7527_v56 = vmul.f32 %v13636_v42, %v7507_v7  ;;  %v7511_v30 = vmul.f32 %v13624_v38, %v7506_v21  ;;  %v7512_v18 = vmul.f32 %v13624_v38, %v7507_v7 }
0x1426   :  { %v7202_v61 = vmul.f32 %v13588_v58, %v7197_v13  ;;  %v7203_v63 = vmul.f32 %v13588_v58, %v7198_v15  ;;  %6934 = vmatpush.bf16.msra.mxu2 %v6818_v47  ;;  %v6589_v40 = vmul.f32 %v13619_v35, %v6584_v34  ;;  %v6817_v3 = vpack.c.b16 %v6814_v55, %v6813_v8  ;;  %v7316_v47 = vld [vmem:[#allocation49 + $0x10] sm:$0xff]  ;;  %v7314_v8 = vld [vmem:[#allocation49] sm:$0xff] }
0x1427   :  { %7762 = vperm.xlu2 %9624, %v7744_v54   ;;  %7752 = vperm.xlu0 %9622, %v7742_v51   ;;  %v7530_v26 = vpack.c.bf16 %v7526_v20, %v7526_v20  ;;  %v7531_v58 = vpack.c.bf16 %v7527_v56, %v7527_v56  ;;  %v7072_v54 = vpack.i.b16 %v7070_v43, %v7070_v43  ;;  %v13679_v46 = vunpack.c.l.b16 %v6595_v49  ;;  %v7743_v55 = vld [vmem:[#allocation57 + $0x10] sm:$0xff] }
0x1428   :  { %6874 = vperm.xlu1 %9623, %v6856_v24   ;;  %v7206_v6 = vpack.c.bf16 %v7202_v61, %v7202_v61  ;;  %v7207_v50 = vpack.c.bf16 %v7203_v63, %v7203_v63  ;;  %v6801_v32 = vunpack.c.l.b16 %v6653_v22  ;;  %v6802_v21 = vunpack.c.l.b16 %v6654_v57 }
0x1429   :  { %v7489_v5 = vpop.permute.xlu2 %7488  ;;  %v6509_v33 = vpop.permute.xlu0 %6508  ;;  %v13682_v7 = vmul.f32 %v13619_v35, %v6585_v60  ;;  %v7515_v9 = vpack.c.bf16 %v7511_v30, %v7511_v30  ;;  %v7516_v1 = vpack.c.bf16 %v7512_v18, %v7512_v18  ;;  %v6593_v34 = vpack.c.bf16 %v6589_v40, %v6589_v40 }
0x142a   :  { %v6598_v0 = vpop.permute.xlu1 %6597  ;;  %v7493_v11 = vsel %vm6601_vm14, 0, %v7489_v5  ;;  %6935 = vmatpush.bf16.msra.mxu2 %v6817_v3  ;;  %v13685_v15 = vunpack.c.l.b16 %v7530_v26  ;;  %v13687_v51 = vunpack.c.l.b16 %v7531_v58  ;;  %v6515_v45 = vsel %vm6512_vm15, 0, %v6509_v33 }
0x142b   :  { %v6603_v13 = vsel %vm6601_vm14, 0, %v6598_v0  ;;  %v7504_v24 = vunpack.c.l.bf16 %v7493_v11  ;;  %v13690_v20 = vunpack.c.l.b16 %v6596_v52  ;;  %v13692_v35 = vunpack.c.l.b16 %v7206_v6 }
0x142c   :  { %v13694_v56 = vunpack.c.l.b16 %v7207_v50  ;;  %v7505_v61 = vunpack.c.h.bf16 %v7493_v11  ;;  %v6594_v63 = vpack.c.bf16 %v13682_v7, %v13682_v7  ;;  %v6614_v49 = vunpack.c.l.bf16 %v6603_v13  ;;  %v7011_v7 = vld [vmem:[#allocation51 + $0x1] sm:$0x1] }
0x142d   :  { %v6805_v60 = vpack.c.b16 %v6802_v21, %v6801_v32  ;;  %v7074_v5 = vperm.slane %v7072_v54, 0  ;;  %v13701_v33 = vunpack.c.l.b16 %v7515_v9  ;;  %v13703_v43 = vunpack.c.l.b16 %v7516_v1 }
0x142e   :  { %6936 = vmatpush.bf16.msra.mxu2 %v6806_v53  ;;  %v6525_v52 = vunpack.c.l.bf16 %v6515_v45  ;;  %v6615_v30 = vunpack.c.h.bf16 %v6603_v13  ;;  %v7680_v40 = vpack.c.b16 %v13687_v51, %v13685_v15  ;;  %v13707_v0 = vunpack.c.l.b16 %v6593_v34  ;;  %v7317_v13 = vld [vmem:[#allocation49 + $0x18] sm:$0xff] }
0x142f   :  { %7330 = vperm.xlu2 %9624, %v7316_v47   ;;  %7320 = vperm.xlu0 %9622, %v7314_v8   ;;  %v13710_v36 = vmul.f32 %v13624_v38, %v7504_v24  ;;  %v6526_v37 = vunpack.c.h.bf16 %v6515_v45  ;;  %v7303_v53 = vpack.c.b16 %v13694_v56, %v13692_v35  ;;  %v13715_v26 = vmul.f32 %v13624_v38, %v7505_v61 }
0x1430   :  { %7757 = vperm.xlu1 %9623, %v7743_v55   ;;  %v13718_v58 = vmul.f32 %v13636_v42, %v7504_v24  ;;  %v13722_v6 = vmul.f32 %v13636_v42, %v7505_v61  ;;  %v6619_v50 = vmul.f32 %v13654_v16, %v6614_v49  ;;  %v13725_v47 = vunpack.c.l.bf16 %v7074_v5  ;;  %v7315_v24 = vld [vmem:[#allocation49 + $0x8] sm:$0xff] }
0x1431   :  { %v7121_v22 = vpop.permute.xlu2 %7120  ;;  %v6600_v57 = vpop.permute.xlu0 %6599  ;;  %v13728_v54 = vmul.f32 %v13640_v31, %v6525_v52  ;;  %v6620_v38 = vmul.f32 %v13654_v16, %v6615_v30  ;;  %v7513_v9 = vpack.c.bf16 %v13710_v36, %v13710_v36  ;;  %v13735_v42 = vmul.f32 %v13640_v31, %v6526_v37 }
0x1432   :  { %v7062_v18 = vpop.permute.xlu1 %7061  ;;  %v6606_v3 = vsel %vm6601_vm14, 0, %v6600_v57  ;;  %6937 = vmatpush.bf16.msra.mxu2 %v6805_v60  ;;  %v7514_v45 = vpack.c.bf16 %v13715_v26, %v13715_v26  ;;  %v7127_v8 = vsel %vm7122_vm0, %v7121_v22, 0  ;;  %v6623_v56 = vpack.c.bf16 %v6619_v50, %v6619_v50  ;;  %v7160_v22 = vld [vmem:[#allocation51 + $0x7] sm:$0x1] }
0x1433   :  { %v6616_v11 = vunpack.c.l.bf16 %v6606_v3  ;;  %v6617_v32 = vunpack.c.h.bf16 %v6606_v3  ;;  %v7067_v21 = vsel %vm6601_vm14, 0, %v7062_v18  ;;  %v7013_v57 = vpack.i.b16 %v7011_v7, %v7011_v7 }
0x1434   :  { %v7077_v34 = vunpack.c.l.bf16 %v7067_v21  ;;  %v7078_v35 = vunpack.c.h.bf16 %v7067_v21  ;;  %v13744_v52 = vunpack.c.l.b16 %v6594_v63  ;;  %v6624_v30 = vpack.c.bf16 %v6620_v38, %v6620_v38 }
0x1435   :  { %v6621_v1 = vmul.f32 %v13654_v16, %v6616_v11  ;;  %v6622_v55 = vmul.f32 %v13654_v16, %v6617_v32  ;;  %v7528_v3 = vpack.c.bf16 %v13718_v58, %v13718_v58  ;;  %v7137_v50 = vunpack.c.l.bf16 %v7127_v8  ;;  %v9152_v58 = vld [vmem:[#allocation40 + $0xc] sm:$0xf0] }
0x1436   :  { %v7082_v49 = vmul.f32 %v13725_v47, %v7077_v34  ;;  %6938 = vmatpush.bf16.msra.mxu2 %v13514_v29  ;;  %v7083_v37 = vmul.f32 %v13725_v47, %v7078_v35  ;;  %v7138_v63 = vunpack.c.h.bf16 %v7127_v8  ;;  %v7015_v38 = vperm.slane %v7013_v57, 0  ;;  %v9476_v35 = vld [vmem:[#allocation40 + $0x4] sm:$0xf] }
0x1437   :  { %v6625_v61 = vpack.c.bf16 %v6621_v1, %v6621_v1  ;;  %v6626_v18 = vpack.c.bf16 %v6622_v55, %v6622_v55  ;;  %7335 = vperm.xlu0 %9622, %v7317_v13   ;;  %v7162_v1 = vpack.i.b16 %v7160_v22, %v7160_v22  ;;  %v6787_v34 = vunpack.c.l.b16 %v6623_v56 }
0x1438   :  { %7325 = vperm.xlu1 %9623, %v7315_v24   ;;  %v7086_v32 = vpack.c.bf16 %v7082_v49, %v7082_v49  ;;  %v7087_v21 = vpack.c.bf16 %v7083_v37, %v7083_v37  ;;  %v6788_v13 = vunpack.c.l.b16 %v6624_v30  ;;  %v7142_v56 = vmul.f32 %v13676_v27, %v7137_v50 }
0x1439   :  { %v7002_v60 = vpop.permute.xlu2 %7001  ;;  %v7151_v5 = vpop.permute.xlu0 %7150  ;;  %v6789_v11 = vunpack.c.l.b16 %v6625_v61  ;;  %v6790_v29 = vunpack.c.l.b16 %v6626_v18  ;;  %v7529_v61 = vpack.c.bf16 %v13722_v6, %v13722_v6  ;;  %v7164_v37 = vperm.slane %v7162_v1, 0 }
0x143a   :  { %v7060_v16 = vpop.permute.xlu1 %7059  ;;  %v7250_v7 = vunpack.c.l.b16 %v7086_v32  ;;  %6939 = vmatpush.bf16.msra.mxu2 %v13511_v4  ;;  %v7251_v55 = vunpack.c.l.b16 %v7087_v21  ;;  %v7008_v49 = vsel %vm7003_vm1, 0, %v7002_v60  ;;  %v7157_v18 = vsel %vm7152_vm3, %v7151_v5, 0 }
0x143b   :  { %v6792_v24 = vpack.c.b16 %v6790_v29, %v6789_v11  ;;  %v7064_v8 = vsel %vm6601_vm14, 0, %v7060_v16  ;;  %v13757_v30 = vunpack.c.l.bf16 %v7015_v38  ;;  %v9155_v11 = vor.u32 %v9476_v35, %v9152_v58 }
0x143c   :  { %v7253_v57 = vpack.c.b16 %v7251_v55, %v7250_v7  ;;  %v7075_v22 = vunpack.c.l.bf16 %v7064_v8  ;;  %v7076_v4 = vunpack.c.h.bf16 %v7064_v8  ;;  %v7018_v29 = vunpack.c.l.bf16 %v7008_v49 }
0x143d   :  { %6913 = vmatpush.bf16.msrb.mxu1 %v6792_v24  ;;  %v6791_v16 = vpack.c.b16 %v6788_v13, %v6787_v34  ;;  %v6534_v50 = vpack.c.bf16 %v13728_v54, %v13728_v54  ;;  %v7019_v7 = vunpack.c.h.bf16 %v7008_v49  ;;  %v7167_v38 = vunpack.c.l.bf16 %v7157_v18  ;;  %6940 = vmatmul.bf16.vlgmr.msra.gmra.mxu2 %v9155_v11 }
0x143e   :  { %7418 = vmatpush.bf16.msrb.mxu2 %v7303_v53  ;;  %v7143_v53 = vmul.f32 %v13676_v27, %v7138_v63  ;;  %v7080_v60 = vmul.f32 %v13725_v47, %v7075_v22  ;;  %v7081_v5 = vmul.f32 %v13725_v47, %v7076_v4  ;;  %7374 = vmatpush.bf16.msrb.mxu0 %v7253_v57  ;;  %v13768_v1 = vunpack.c.l.bf16 %v7164_v37 }
0x143f   :  { %v6535_v63 = vpack.c.bf16 %v13735_v42, %v13735_v42  ;;  %v7168_v24 = vunpack.c.h.bf16 %v7157_v18  ;;  %v13774_v28 = vunpack.c.l.b16 %v7513_v9  ;;  %v13779_v41 = vunpack.c.l.b16 %v7514_v45 }
0x1440   :  { %v7084_v47 = vpack.c.bf16 %v7080_v60, %v7080_v60  ;;  %v7085_v55 = vpack.c.bf16 %v7081_v5, %v7081_v5  ;;  %v7147_v54 = vpack.c.bf16 %v7143_v53, %v7143_v53  ;;  %v13782_v42 = vmul.f32 %v13757_v30, %v7018_v29 }
0x1441   :  { %v7000_v32 = vpop.permute.xlu2 %6999  ;;  %v7149_v6 = vpop.permute.xlu0 %7148  ;;  %6914 = vmatpush.bf16.msrb.mxu1 %v6791_v16  ;;  %v13785_v35 = vunpack.c.l.b16 %v7528_v3  ;;  %v13787_v58 = vunpack.c.l.b16 %v7529_v61  ;;  %v13789_v36 = vunpack.c.l.b16 %v6534_v50  ;;  %v13792_v9 = vmul.f32 %v13757_v30, %v7019_v7  ;;  %v9164_v7 = vld [vmem:[#allocation40 + $0x24] sm:$0xf0] }
0x1442   :  { %7419 = vmatpush.bf16.msrb.mxu2 %v7302_v10  ;;  %v6541_v21 = vpop.permute.xlu1 %6540  ;;  %v7146_v10 = vpack.c.bf16 %v7142_v56, %v7142_v56  ;;  %v7248_v34 = vunpack.c.l.b16 %v7084_v47  ;;  %v7249_v13 = vunpack.c.l.b16 %v7085_v55  ;;  %v13795_v26 = vmul.f32 %v13768_v1, %v7167_v38 }
0x1443   :  { %v13798_v45 = vmul.f32 %v13768_v1, %v7168_v24  ;;  %v6546_v49 = vsel %vm3160_vm5, 0, %v6541_v21  ;;  %v6780_v3 = vpack.c.b16 %v13690_v20, %v13679_v46  ;;  %v13804_v61 = vunpack.c.l.b16 %v6535_v63  ;;  %v9479_v63 = vld [vmem:[#allocation40 + $0x1c] sm:$0xf] }
0x1444   :  { %v13806_v18 = vunpack.c.l.b16 %v7146_v10  ;;  %v6556_v57 = vunpack.c.l.bf16 %v6546_v49  ;;  %v13808_v4 = vunpack.c.l.b16 %v7147_v54  ;;  %v7027_v56 = vpack.c.bf16 %v13782_v42, %v13782_v42  ;;  %v9200_v42 = vld [vmem:[%s14370_s13 + $0x1] sm:$0x1] }
0x1445   :  { %v6557_v53 = vunpack.c.h.bf16 %v6546_v49  ;;  %6915 = vmatpush.bf16.msrb.mxu1 %v6780_v3  ;;  %v7252_v11 = vpack.c.b16 %v7249_v13, %v7248_v34  ;;  %v7028_v46 = vpack.c.bf16 %v13792_v9, %v13792_v9  ;;  %v7154_v29 = vsel %vm7152_vm3, %v7149_v6, 0 }
0x1446   :  { %7908 = vmatpush.bf16.msra.mxu2 %v13489_v62  ;;  %v7005_v62 = vsel %vm7003_vm1, 0, %v7000_v32  ;;  %v6561_v60 = vmul.f32 %v13599_v12, %v6556_v57  ;;  %v7176_v5 = vpack.c.bf16 %v13795_v26, %v13795_v26  ;;  %v7177_v16 = vpack.c.bf16 %v13798_v45, %v13798_v45 }
0x1447   :  { %v7016_v8 = vunpack.c.l.bf16 %v7005_v62  ;;  %v7017_v20 = vunpack.c.h.bf16 %v7005_v62  ;;  %v6562_v21 = vmul.f32 %v13599_v12, %v6557_v53  ;;  %7375 = vmatpush.bf16.msrb.mxu0 %v7252_v11  ;;  %v6779_v54 = vpack.c.b16 %v13744_v52, %v13707_v0 }
0x1448   :  { %v6565_v24 = vpack.c.bf16 %v6561_v60, %v6561_v60  ;;  %v7165_v34 = vunpack.c.l.bf16 %v7154_v29  ;;  %v9167_v62 = vor.u32 %v9479_v63, %v9164_v7  ;;  %vm7033_vm5 = vcmask 23552  }
0x1449   :  { %v6973_v37 = vpop.permute.xlu2 %6972  ;;  %v6720_v22 = vpop.permute.xlu0 %6719  ;;  %v13823_v38 = vmul.f32 %v13757_v30, %v7016_v8  ;;  %v6566_v47 = vpack.c.bf16 %v6562_v21, %v6562_v21  ;;  %6916 = vmatpush.bf16.msrb.mxu1 %v6779_v54  ;;  %v7441_v8 = vld [vmem:[%s14370_s13] sm:$0x1]  ;;  %v13832_v57 = vmul.f32 %v13757_v30, %v7017_v20  ;;  %v13837_v30 = vunpack.c.l.b16 %v7176_v5 }
0x144a   :  { %7909 = vmatpush.bf16.msra.mxu2 %v13485_v39  ;;  %v6981_v39 = vld [vmem:[#allocation51] sm:$0x1]  ;;  %v6511_v32 = vpop.permute.xlu1 %6510  ;;  %v6726_v50 = vsel %vm6721_vm12, %v6720_v22, 0  ;;  %v6765_v12 = vunpack.c.l.b16 %v6565_v24  ;;  %v6979_v53 = vsel %vm6974_vm4, 0, %v6973_v37  ;;  %v7443_v63 = vpack.i.b16 %v7441_v8, %v7441_v8 }
0x144b   :  { %v6983_v6 = vpack.i.b16 %v6981_v39, %v6981_v39  ;;  %v6736_v55 = vunpack.c.l.bf16 %v6726_v50  ;;  %v6737_v10 = vunpack.c.h.bf16 %v6726_v50  ;;  %v6518_v13 = vsel %vm6512_vm15, 0, %v6511_v32 }
0x144c   :  { %v6766_v26 = vunpack.c.l.b16 %v6566_v47  ;;  %v6527_v3 = vunpack.c.l.bf16 %v6518_v13  ;;  %v6528_v0 = vunpack.c.h.bf16 %v6518_v13  ;;  %v7166_v50 = vunpack.c.h.bf16 %v7154_v29 }
0x144d   :  { %v6741_v45 = vmul.f32 %v13614_v19, %v6736_v55  ;;  %v6742_v49 = vmul.f32 %v13614_v19, %v6737_v10  ;;  %v6985_v22 = vperm.slane %v6983_v6, 0  ;;  %6945 = vmatmul.bf16.gmra.mxu2 %v9167_v62  ;;  %v7041_v6 = vld [vmem:[#allocation51 + $0x2] sm:$0x1]  ;;  %v6988_v55 = vunpack.c.l.bf16 %v6979_v53 }
0x144e   :  { %v6532_v32 = vmul.f32 %v13640_v31, %v6527_v3  ;;  %v6768_v60 = vpack.c.b16 %v6766_v26, %v6765_v12  ;;  %v6533_v19 = vmul.f32 %v13640_v31, %v6528_v0  ;;  %v6989_v10 = vunpack.c.h.bf16 %v6979_v53 }
0x144f   :  { %v6745_v11 = vpack.c.bf16 %v6741_v45, %v6741_v45  ;;  %v6746_v39 = vpack.c.bf16 %v6742_v49, %v6742_v49  ;;  %v13839_v47 = vunpack.c.l.bf16 %v6985_v22  ;;  %v7445_v13 = vperm.slane %v7443_v63, 0 }
0x1450   :  { %v6536_v37 = vpack.c.bf16 %v6532_v32, %v6532_v32  ;;  %6917 = vmatpush.bf16.msrb.mxu1 %v6768_v60  ;;  %v6537_v54 = vpack.c.bf16 %v6533_v19, %v6533_v19  ;;  %v13842_v62 = vunpack.c.l.b16 %v7177_v16  ;;  %v7170_v5 = vmul.f32 %v13768_v1, %v7165_v34 }
0x1451   :  { %v7030_v52 = vpop.permute.xlu0 %7029  ;;  %v7432_v7 = vpop.permute.xlu2 %7431  ;;  %v6839_v20 = vunpack.c.l.b16 %v6745_v11  ;;  %v6840_v24 = vunpack.c.l.b16 %v6746_v39  ;;  %v7043_v45 = vpack.i.b16 %v7041_v6, %v7041_v6  ;;  %v7171_v49 = vmul.f32 %v13768_v1, %v7166_v50 }
0x1452   :  { %v7032_v21 = vpop.permute.xlu1 %7031  ;;  %v6753_v29 = vunpack.c.l.b16 %v6536_v37  ;;  %v7436_v31 = vsel %vm7033_vm5, 0, %v7432_v7  ;;  %v6754_v26 = vunpack.c.l.b16 %v6537_v54  ;;  %v7035_v3 = vsel %vm7033_vm5, 0, %v7030_v52 }
0x1453   :  { %v6842_v12 = vpack.c.b16 %v6840_v24, %v6839_v20  ;;  %v6767_v8 = vpack.c.b16 %v13647_v14, %v13645_v48  ;;  %v7038_v22 = vsel %vm7033_vm5, 0, %v7032_v21  ;;  %v6993_v53 = vmul.f32 %v13839_v47, %v6988_v55 }
0x1454   :  { %v6994_v0 = vmul.f32 %v13839_v47, %v6989_v10  ;;  %v7446_v16 = vunpack.c.l.bf16 %v7436_v31  ;;  %v7045_v11 = vperm.slane %v7043_v45, 0  ;;  %v13852_v39 = vunpack.c.l.bf16 %v7445_v13 }
0x1455   :  { %6957 = vmatpush.bf16.msrb.mxu3 %v6842_v12  ;;  %6918 = vmatpush.bf16.msrb.mxu1 %v6767_v8  ;;  %v7048_v1 = vunpack.c.l.bf16 %v7038_v22  ;;  %v7049_v32 = vunpack.c.h.bf16 %v7038_v22  ;;  %v6756_v52 = vpack.c.b16 %v6754_v26, %v6753_v29  ;;  %v13857_v48 = vunpack.c.l.b16 %v7027_v56  ;;  %v9204_v12 = vld [vmem:[%s14370_s13 + $0x6] sm:$0x1]  ;;  %v9150_v8 = vld [vmem:[#allocation40] sm:$0xf] }
0x1456   :  { %v7447_v14 = vunpack.c.h.bf16 %v7436_v31  ;;  %v7050_v21 = vunpack.c.l.bf16 %v7045_v11  ;;  %v7046_v50 = vunpack.c.l.bf16 %v7035_v3  ;;  %v13862_v19 = vunpack.c.l.b16 %v7028_v46  ;;  %v9477_v11 = vld [vmem:[#allocation40 + $0x8] sm:$0xf0] }
0x1457   :  { %v7025_v63 = vpack.c.bf16 %v13823_v38, %v13823_v38  ;;  %v7026_v7 = vpack.c.bf16 %v13832_v57, %v13832_v57  ;;  %v7047_v20 = vunpack.c.h.bf16 %v7035_v3  ;;  %v7291_v56 = vpack.c.b16 %v13842_v62, %v13837_v30  ;;  %v9203_v57 = vld [vmem:[%s14370_s13 + $0x5] sm:$0x1] }
0x1458   :  { %v7174_v24 = vpack.c.bf16 %v7170_v5, %v7170_v5  ;;  %v7175_v37 = vpack.c.bf16 %v7171_v49, %v7171_v49  ;;  %v6997_v6 = vpack.c.bf16 %v6993_v53, %v6993_v53  ;;  %v6998_v55 = vpack.c.bf16 %v6994_v0, %v6994_v0 }
0x1459   :  { %v7462_v34 = vpop.permute.xlu0 %7461  ;;  %v13872_v9 = vmul.f32 %v13852_v39, %v7446_v16  ;;  %v7053_v46 = vmul.f32 %v7050_v21, %v7048_v1  ;;  %v7054_v10 = vmul.f32 %v7050_v21, %v7049_v32  ;;  %6919 = vmatpush.bf16.msrb.mxu1 %v6756_v52  ;;  %v13875_v38 = vmul.f32 %v13852_v39, %v7447_v14  ;;  %v7535_v16 = vpop.permute.xlu2 %7534  ;;  %v9158_v1 = vld [vmem:[#allocation40 + $0x8] sm:$0xf]  ;;  %v9478_v32 = vld [vmem:[#allocation40 + $0x10] sm:$0xf0] }
0x145a   :  { %v7119_v60 = vpop.permute.xlu1 %7118  ;;  %v7051_v54 = vmul.f32 %v7050_v21, %v7046_v50  ;;  %v6841_v29 = vpack.c.b16 %v13669_v2, %v13667_v25  ;;  %v7472_v30 = vpack.i.b16 %v9200_v42, %v9200_v42  ;;  %v13881_v13 = vunpack.c.l.b16 %v7025_v63 }
0x145b   :  { %v7052_v31 = vmul.f32 %v7050_v21, %v7047_v20  ;;  %v7057_v62 = vpack.c.bf16 %v7053_v46, %v7053_v46  ;;  %v7058_v5 = vpack.c.bf16 %v7054_v10, %v7054_v10  ;;  %v13883_v26 = vunpack.c.l.b16 %v7026_v7  ;;  %v9184_v7 = vld [vmem:[#allocation48 + $0x8] sm:$0xf]  ;;  %v9484_v20 = vld [vmem:[#allocation48 + $0x10] sm:$0xf0] }
0x145c   :  { %v13885_v45 = vunpack.c.l.b16 %v7174_v24  ;;  %v13887_v49 = vunpack.c.l.b16 %v7175_v37  ;;  %v13889_v3 = vunpack.c.l.b16 %v6997_v6  ;;  %6958 = vmatpush.bf16.msrb.mxu3 %v6841_v29  ;;  %v13891_v53 = vunpack.c.l.b16 %v6998_v55 }
0x145d   :  { %v7455_v25 = vpack.c.bf16 %v13872_v9, %v13872_v9  ;;  %v7545_v2 = vpack.i.b16 %v9203_v57, %v9203_v57  ;;  %v7564_v0 = vpack.i.b16 %v9204_v12, %v9204_v12  ;;  %v7456_v14 = vpack.c.bf16 %v13875_v38, %v13875_v38 }
0x145e   :  { %v7055_v21 = vpack.c.bf16 %v7051_v54, %v7051_v54  ;;  %v7474_v50 = vperm.slane %v7472_v30, 0  ;;  %v7467_v63 = vsel %vm6228_vm7, 0, %v7462_v34  ;;  %v7056_v42 = vpack.c.bf16 %v7052_v31, %v7052_v31 }
0x145f   :  { %v7238_v24 = vunpack.c.l.b16 %v7057_v62  ;;  %v7239_v37 = vunpack.c.l.b16 %v7058_v5  ;;  %v7477_v6 = vunpack.c.l.bf16 %v7467_v63  ;;  %v13902_v15 = vsel %vm6571_vm13, %v7535_v16, 0 }
0x1460   :  { %7801 = vmatpush.bf16.msra.mxu3 %v7680_v40  ;;  %v7479_v51 = vunpack.c.l.bf16 %v7474_v50  ;;  %v7478_v40 = vunpack.c.h.bf16 %v7467_v63  ;;  %v6755_v55 = vpack.c.b16 %v13804_v61, %v13789_v36  ;;  %v7124_v9 = vsel %vm7122_vm0, %v7119_v60, 0 }
0x1461   :  { %v7460_v22 = vpop.permute.xlu0 %7459  ;;  %v9151_v46 = vor.u32 %v9477_v11, %v9150_v8  ;;  %v9159_v10 = vor.u32 %v9478_v32, %v9158_v1  ;;  %v9185_v54 = vor.u32 %v9484_v20, %v9184_v7  ;;  %v13907_v34 = vperm.slane %v7545_v2, 0  ;;  %v7100_v1 = vld [vmem:[#allocation51 + $0x5] sm:$0x1] }
0x1462   :  { %v7091_v52 = vpop.permute.xlu1 %7090  ;;  %v7566_v57 = vperm.slane %v7564_v0, 0  ;;  %6920 = vmatpush.bf16.msrb.mxu1 %v6755_v55  ;;  %v7135_v12 = vunpack.c.l.bf16 %v7124_v9  ;;  %v7136_v29 = vunpack.c.h.bf16 %v7124_v9  ;;  %v7236_v30 = vunpack.c.l.b16 %v7055_v21 }
0x1463   :  { %v7237_v31 = vunpack.c.l.b16 %v7056_v42  ;;  %v7482_v62 = vmul.f32 %v7479_v51, %v7477_v6  ;;  %9172 = vmatmul.msk.bf16.vlgmr.msrb.gmra.mxu3 %vm976_vm2, %v9159_v10  ;;  %v7241_v5 = vpack.c.b16 %v7239_v37, %v7238_v24  ;;  %v7550_v36 = vunpack.c.l.bf16 %v13902_v15  ;;  %9198 = vmatmul.msk.bf16.vlgmr.msrb.gmra.mxu2 %vm976_vm2, %v9185_v54  ;;  %v13926_v6 = vld [vmem:[%s14370_s13 + $0x8] sm:$0x1] }
0x1464   :  { %v7140_v61 = vmul.f32 %v13676_v27, %v7135_v12  ;;  %v7141_v60 = vmul.f32 %v13676_v27, %v7136_v29  ;;  %v7679_v8 = vpack.c.b16 %v13787_v58, %v13785_v35  ;;  %v7551_v0 = vunpack.c.h.bf16 %v13902_v15 }
0x1465   :  { %v7483_v16 = vmul.f32 %v7479_v51, %v7478_v40  ;;  %6921 = vmatmul.bf16.vlgmr.msrb.gmra.mxu1 %v9151_v46  ;;  %7376 = vmatpush.bf16.msrb.mxu0 %v7241_v5  ;;  %v7464_v11 = vsel %vm6228_vm7, 0, %v7460_v22  ;;  %v13920_v21 = vunpack.c.l.b16 %v7455_v25  ;;  %v13922_v27 = vunpack.c.l.bf16 %v7566_v57  ;;  %v7607_v40 = vpop.permute.xlu2 %7606 }
0x1466   :  { %7393 = vmatpush.bf16.msra.mxu1 %v7291_v56  ;;  %v7290_v56 = vpack.c.b16 %v13887_v49, %v13885_v45  ;;  %v7144_v50 = vpack.c.bf16 %v7140_v61, %v7140_v61  ;;  %v7145_v63 = vpack.c.bf16 %v7141_v60, %v7141_v60  ;;  %7802 = vmatpush.bf16.msra.mxu3 %v7679_v8  ;;  %v7475_v58 = vunpack.c.l.bf16 %v7464_v11 }
0x1467   :  { %v7486_v35 = vpack.c.bf16 %v7482_v62, %v7482_v62  ;;  %v7476_v7 = vunpack.c.h.bf16 %v7464_v11  ;;  %v7240_v20 = vpack.c.b16 %v7237_v31, %v7236_v30  ;;  %v7102_v45 = vpack.i.b16 %v7100_v1, %v7100_v1  ;;  %v9480_v11 = vld [vmem:[#allocation40 + $0x20] sm:$0xf0] }
0x1468   :  { %v7274_v42 = vunpack.c.l.b16 %v7144_v50  ;;  %v7275_v24 = vunpack.c.l.b16 %v7145_v63  ;;  %v7487_v49 = vpack.c.bf16 %v7483_v16, %v7483_v16  ;;  %v7480_v22 = vmul.f32 %v7479_v51, %v7475_v58  ;;  %v9170_v58 = vld [vmem:[#allocation40 + $0x20] sm:$0xf] }
0x1469   :  { %v7434_v2 = vpop.permute.xlu0 %7433  ;;  %v7481_v37 = vmul.f32 %v7479_v51, %v7476_v7  ;;  %7377 = vmatpush.bf16.msrb.mxu0 %v7240_v20  ;;  %v7097_v25 = vsel %vm7092_vm8, %v7091_v52, 0  ;;  %v7104_v55 = vperm.slane %v7102_v45, 0  ;;  %v7279_v10 = vpack.c.b16 %v13808_v4, %v13806_v18 }
0x146a   :  { %v7089_v32 = vpop.permute.xlu1 %7088  ;;  %7394 = vmatpush.bf16.msra.mxu1 %v7290_v56  ;;  %v7107_v9 = vunpack.c.l.bf16 %v7097_v25  ;;  %v7108_v46 = vunpack.c.h.bf16 %v7097_v25  ;;  %v13933_v54 = vunpack.c.l.b16 %v7456_v14  ;;  %v13938_v51 = vmul.f32 %v13922_v27, %v7550_v36  ;;  %v9162_v56 = vld [vmem:[#allocation40 + $0x18] sm:$0xf] }
0x146b   :  { %v7484_v52 = vpack.c.bf16 %v7480_v22, %v7480_v22  ;;  %v7485_v57 = vpack.c.bf16 %v7481_v37, %v7481_v37  ;;  %v7109_v12 = vunpack.c.l.bf16 %v7104_v55  ;;  %v7668_v29 = vpack.c.b16 %v13703_v43, %v13701_v33 }
0x146c   :  { %v7229_v18 = vpack.c.b16 %v13862_v19, %v13857_v48  ;;  %v7278_v4 = vpack.c.b16 %v7275_v24, %v7274_v42  ;;  %v7653_v30 = vunpack.c.l.b16 %v7486_v35  ;;  %v7654_v38 = vunpack.c.l.b16 %v7487_v49  ;;  %v9196_v42 = vld [vmem:[#allocation48 + $0x20] sm:$0xf]  ;;  %v9487_v24 = vld [vmem:[#allocation48 + $0x28] sm:$0xf0] }
0x146d   :  { %v7619_v14 = vpack.i.b16 %v13926_v6, %v13926_v6  ;;  %v13947_v31 = vsel %vm6974_vm4, %v7607_v40, 0  ;;  %v13949_v61 = vunpack.c.l.b16 %v7484_v52  ;;  %v7112_v60 = vmul.f32 %v7109_v12, %v7107_v9  ;;  %7803 = vmatpush.bf16.msra.mxu3 %v7668_v29  ;;  %v9205_v40 = vld [vmem:[%s14370_s13 + $0x7] sm:$0x1] }
0x146e   :  { %7395 = vmatpush.bf16.msra.mxu1 %v7279_v10  ;;  %v7113_v8 = vmul.f32 %v7109_v12, %v7108_v46  ;;  %7378 = vmatpush.bf16.msrb.mxu0 %v7229_v18  ;;  %v7439_v33 = vsel %vm7033_vm5, 0, %v7434_v2  ;;  %v7652_v43 = vunpack.c.l.b16 %v7485_v57  ;;  %v7667_v48 = vpack.c.b16 %v13779_v41, %v13774_v28  ;;  %v9481_v41 = vld [vmem:[#allocation40 + $0x28] sm:$0xf0] }
0x146f   :  { %v7448_v19 = vunpack.c.l.bf16 %v7439_v33  ;;  %v7449_v16 = vunpack.c.h.bf16 %v7439_v33  ;;  %v7116_v1 = vpack.c.bf16 %v7112_v60, %v7112_v60  ;;  %v7228_v63 = vpack.c.b16 %v13883_v26, %v13881_v13 }
0x1470   :  { %v7117_v50 = vpack.c.bf16 %v7113_v8, %v7113_v8  ;;  %v7094_v35 = vsel %vm7092_vm8, %v7089_v32, 0  ;;  %v7656_v22 = vpack.c.b16 %v7654_v38, %v7653_v30  ;;  %v9163_v37 = vor.u32 %v9480_v11, %v9162_v56 }
0x1471   :  { %v7579_v62 = vpop.permute.xlu0 %7578  ;;  %v7453_v7 = vmul.f32 %v13852_v39, %v7448_v19  ;;  %v7454_v2 = vmul.f32 %v13852_v39, %v7449_v16  ;;  %v7105_v20 = vunpack.c.l.bf16 %v7094_v35  ;;  %v7106_v28 = vunpack.c.h.bf16 %v7094_v35  ;;  %7804 = vmatpush.bf16.msra.mxu3 %v7667_v48 }
0x1472   :  { %v6971_v5 = vpop.permute.xlu1 %6970  ;;  %7396 = vmatpush.bf16.msra.mxu1 %v7278_v4  ;;  %v7264_v45 = vunpack.c.l.b16 %v7116_v1  ;;  %v7265_v49 = vunpack.c.l.b16 %v7117_v50  ;;  %7379 = vmatpush.bf16.msrb.mxu0 %v7228_v63  ;;  %v9171_v55 = vor.u32 %v9481_v41, %v9170_v58  ;;  %v9197_v9 = vor.u32 %v9487_v24, %v9196_v42 }
0x1473   :  { %v7457_v13 = vpack.c.bf16 %v7453_v7, %v7453_v7  ;;  %v7458_v26 = vpack.c.bf16 %v7454_v2, %v7454_v2  ;;  %v7110_v32 = vmul.f32 %v7109_v12, %v7105_v20  ;;  %v7111_v25 = vmul.f32 %v7109_v12, %v7106_v28 }
0x1474   :  { %v7217_v39 = vpack.c.b16 %v13891_v53, %v13889_v3  ;;  %v7267_v46 = vpack.c.b16 %v7265_v49, %v7264_v45  ;;  %9199 = vmatmul.msk.bf16.gmra.mxu2 %vm976_vm2, %v9197_v9  ;;  %v7655_v18 = vpack.c.b16 %v7652_v43, %v13949_v61  ;;  %v7590_v4 = vpack.i.b16 %v9205_v40, %v9205_v40 }
0x1475   :  { %v7641_v10 = vunpack.c.l.b16 %v7457_v13  ;;  %v7642_v52 = vunpack.c.l.b16 %v7458_v26  ;;  %v7114_v57 = vpack.c.bf16 %v7110_v32, %v7110_v32  ;;  %v7115_v29 = vpack.c.bf16 %v7111_v25, %v7111_v25  ;;  %6926 = vmatmul.bf16.gmra.mxu1 %v9163_v37  ;;  %7805 = vmatpush.bf16.msra.mxu3 %v7656_v22  ;;  %v9209_v32 = vld [vmem:[#allocation55] sm:$0xf]  ;;  %v9489_v25 = vld [vmem:[#allocation55 + $0x8] sm:$0xf0] }
0x1476   :  { %v6976_v12 = vsel %vm6974_vm4, 0, %v6971_v5  ;;  %9173 = vmatmul.msk.bf16.gmra.mxu3 %vm976_vm2, %v9171_v55  ;;  %7380 = vmatpush.bf16.msrb.mxu0 %v7217_v39  ;;  %v7585_v3 = vsel %vm7580_vm9, %v7579_v62, 0  ;;  %v7592_v33 = vperm.slane %v7590_v4, 0  ;;  %v7621_v61 = vperm.slane %v7619_v14, 0  ;;  %v9483_v39 = vld [vmem:[#allocation48 + $0x8] sm:$0xf0] }
0x1477   :  { %v7262_v38 = vunpack.c.l.b16 %v7114_v57  ;;  %v7263_v60 = vunpack.c.l.b16 %v7115_v29  ;;  %v6986_v53 = vunpack.c.l.bf16 %v6976_v12  ;;  %7397 = vmatpush.bf16.msra.mxu1 %v7267_v46  ;;  %v7595_v48 = vunpack.c.l.bf16 %v7585_v3  ;;  %v9178_v4 = vld [vmem:[#allocation48 + $0xc] sm:$0xf0] }
0x1478   :  { %v7596_v19 = vunpack.c.h.bf16 %v7585_v3  ;;  %v6987_v16 = vunpack.c.h.bf16 %v6976_v12  ;;  %v7644_v56 = vpack.c.b16 %v7642_v52, %v7641_v10  ;;  %v7597_v11 = vunpack.c.l.bf16 %v7592_v33 }
0x1479   :  { %v7533_v8 = vpop.permute.xlu0 %7532  ;;  %v6991_v5 = vmul.f32 %v13839_v47, %v6986_v53  ;;  %v7266_v43 = vpack.c.b16 %v7263_v60, %v7262_v38  ;;  %7806 = vmatpush.bf16.msra.mxu3 %v7655_v18  ;;  %v13977_v63 = vunpack.c.l.bf16 %v13907_v34  ;;  %v7571_v6 = vmul.f32 %v13922_v27, %v7551_v0  ;;  %v9482_v18 = vld [vmem:[#allocation48 + $0x4] sm:$0xf] }
0x147a   :  { %v7577_v30 = vpop.permute.xlu1 %7576  ;;  %v6992_v1 = vmul.f32 %v13839_v47, %v6987_v16  ;;  %v13973_v62 = vsel %vm6571_vm13, %v7533_v8, 0  ;;  %v7600_v58 = vmul.f32 %v7597_v11, %v7595_v48  ;;  %v7601_v7 = vmul.f32 %v7597_v11, %v7596_v19 }
0x147b   :  { %v7582_v50 = vsel %vm7580_vm9, %v7577_v30, 0  ;;  %v6995_v14 = vpack.c.bf16 %v6991_v5, %v6991_v5  ;;  %7398 = vmatpush.bf16.msra.mxu1 %v7266_v43  ;;  %v7626_v47 = vunpack.c.l.bf16 %v7621_v61  ;;  %v7622_v28 = vunpack.c.l.bf16 %v13947_v31  ;;  %v9494_v30 = vld [vmem:[#allocation61] sm:$0xff] }
0x147c   :  { %v7593_v35 = vunpack.c.l.bf16 %v7582_v50  ;;  %v6996_v2 = vpack.c.bf16 %v6992_v1, %v6992_v1  ;;  %v7594_v20 = vunpack.c.h.bf16 %v7582_v50  ;;  %v7623_v41 = vunpack.c.h.bf16 %v13947_v31 }
0x147d   :  { %v7548_v42 = vunpack.c.l.bf16 %v13973_v62  ;;  %v7574_v34 = vpack.c.bf16 %v13938_v51, %v13938_v51  ;;  %v7604_v24 = vpack.c.bf16 %v7600_v58, %v7600_v58  ;;  %v7605_v45 = vpack.c.bf16 %v7601_v7, %v7601_v7  ;;  %7807 = vmatpush.bf16.msra.mxu3 %v7644_v56  ;;  %v9176_v51 = vld [vmem:[#allocation48] sm:$0xf] }
0x147e   :  { %v7549_v49 = vunpack.c.h.bf16 %v13973_v62  ;;  %v7575_v22 = vpack.c.bf16 %v7571_v6, %v7571_v6  ;;  %v7212_v37 = vunpack.c.l.b16 %v6995_v14  ;;  %v7213_v13 = vunpack.c.l.b16 %v6996_v2  ;;  %v9486_v62 = vld [vmem:[#allocation48 + $0x20] sm:$0xf0] }
0x147f   :  { %v7598_v26 = vmul.f32 %v7597_v11, %v7593_v35  ;;  %v7715_v40 = vunpack.c.l.b16 %v7604_v24  ;;  %v7716_v55 = vunpack.c.l.b16 %v7605_v45  ;;  %v7643_v31 = vpack.c.b16 %v13933_v54, %v13920_v21  ;;  %7399 = vmatpush.bf16.msra.mxu1 %v13507_v17 }
0x1480   :  { %v7599_v9 = vmul.f32 %v7597_v11, %v7594_v20  ;;  %v7627_v10 = vmul.f32 %v7626_v47, %v7622_v28  ;;  %v7628_v52 = vmul.f32 %v7626_v47, %v7623_v41  ;;  %v7568_v57 = vmul.f32 %v13922_v27, %v7548_v42 }
0x1481   :  { %v7602_v29 = vpack.c.bf16 %v7598_v26, %v7598_v26  ;;  %v7718_v12 = vpack.c.b16 %v7716_v55, %v7715_v40  ;;  %7808 = vmatpush.bf16.msra.mxu3 %v7643_v31  ;;  %v7569_v21 = vmul.f32 %v13922_v27, %v7549_v49  ;;  %v9210_v54 = vor.u32 %v9489_v25, %v9209_v32  ;;  %v9492_v32 = vld [vmem:[#allocation55 + $0x20] sm:$0xf0]  ;;  %v9485_v55 = vld [vmem:[#allocation48 + $0x1c] sm:$0xf]  ;;  %v9188_v31 = vld [vmem:[#allocation48 + $0x18] sm:$0xf] }
0x1482   :  { %v7609_v46 = vpop.permute.xlu1 %7608  ;;  %v7603_v17 = vpack.c.bf16 %v7599_v9, %v7599_v9  ;;  %v7216_v60 = vpack.c.b16 %v7213_v13, %v7212_v37  ;;  %v9177_v3 = vor.u32 %v9483_v39, %v9176_v51  ;;  %v9181_v19 = vor.u32 %v9482_v18, %v9178_v4  ;;  %v9221_v37 = vld [vmem:[#allocation55 + $0x18] sm:$0xf]  ;;  %v9488_v18 = vld [vmem:[#allocation55 + $0x4] sm:$0xf]  ;;  %v9211_v4 = vld [vmem:[#allocation55 + $0xc] sm:$0xf0] }
0x1483   :  { %v7713_v38 = vunpack.c.l.b16 %v7602_v29  ;;  %v7614_v53 = vsel %vm6974_vm4, %v7609_v46, 0  ;;  %7400 = vmatpush.bf16.msra.mxu1 %v13503_v23  ;;  %v7555_v16 = vmul.f32 %v13977_v63, %v7550_v36  ;;  %v7556_v27 = vmul.f32 %v13977_v63, %v7551_v0  ;;  %v9495_v9 = vld [vmem:[#allocation61 + $0x8] sm:$0xff]  ;;  %v9490_v29 = vld [vmem:[#allocation55 + $0x10] sm:$0xf0] }
0x1484   :  { %v7714_v8 = vunpack.c.l.b16 %v7603_v17  ;;  %v7624_v33 = vunpack.c.l.bf16 %v7614_v53  ;;  %v7625_v48 = vunpack.c.h.bf16 %v7614_v53  ;;  %7381 = vmatpush.bf16.msrb.mxu0 %v7216_v60  ;;  %9241 = vmatmul.msk.bf16.vlgmr.msra.gmra.mxu2 %vm976_vm2, %v9494_v30  ;;  %v7703_v56 = vunpack.c.l.b16 %v7574_v34  ;;  %v9229_v17 = vld [vmem:[#allocation55 + $0x20] sm:$0xf]  ;;  %v9491_v30 = vld [vmem:[#allocation55 + $0x1c] sm:$0xf] }
0x1485   :  { %v7704_v23 = vunpack.c.l.b16 %v7575_v22  ;;  %v7631_v11 = vpack.c.bf16 %v7627_v10, %v7627_v10  ;;  %v7632_v1 = vpack.c.bf16 %v7628_v52, %v7628_v52  ;;  %v7572_v50 = vpack.c.bf16 %v7568_v57, %v7568_v57  ;;  %v9217_v57 = vld [vmem:[#allocation55 + $0x8] sm:$0xf] }
0x1486   :  { %v7629_v61 = vmul.f32 %v7626_v47, %v7624_v33  ;;  %v7630_v5 = vmul.f32 %v7626_v47, %v7625_v48  ;;  %v7717_v43 = vpack.c.b16 %v7714_v8, %v7713_v38  ;;  %7809 = vmatmul.bf16.vlgmr.msra.gmra.mxu3 %v9210_v54  ;;  %7401 = vmatmul.bf16.vlgmr.msra.gmra.mxu1 %v9181_v19  ;;  %v9493_v54 = vld [vmem:[#allocation55 + $0x28] sm:$0xf0]  ;;  %v9223_v38 = vld [vmem:[#allocation55 + $0x24] sm:$0xf0]  ;;  %v14017_v19 = vpop.permute.xlu2 %7878  ;;  %vm8014_vm10 = vcmask 359424  }
0x1487   :  { %v7573_v6 = vpack.c.bf16 %v7569_v21, %v7569_v21  ;;  %7382 = vmatmul.bf16.vlgmr.msrb.gmra.mxu0 %v9177_v3  ;;  %v7559_v14 = vpack.c.bf16 %v7555_v16, %v7555_v16  ;;  %v7560_v0 = vpack.c.bf16 %v7556_v27, %v7556_v27  ;;  %v7725_v7 = vunpack.c.l.b16 %v7631_v11 }
0x1488   :  { %7820 = vmatpush.bf16.msra.mxu0 %v7718_v12  ;;  %v7633_v36 = vpack.c.bf16 %v7629_v61, %v7629_v61  ;;  %v7634_v15 = vpack.c.bf16 %v7630_v5, %v7630_v5  ;;  %v7726_v2 = vunpack.c.l.b16 %v7632_v1  ;;  %v7553_v20 = vmul.f32 %v13977_v63, %v7548_v42  ;;  %v9190_v42 = vld [vmem:[#allocation48 + $0x24] sm:$0xf0] }
0x1489   :  { %v7554_v47 = vmul.f32 %v13977_v63, %v7549_v49  ;;  %v7701_v28 = vunpack.c.l.b16 %v7572_v50  ;;  %v7702_v41 = vunpack.c.l.b16 %v7573_v6  ;;  %v7706_v24 = vpack.c.b16 %v7704_v23, %v7703_v56 }
0x148a   :  { %v7727_v35 = vunpack.c.l.b16 %v7633_v36  ;;  %v7728_v58 = vunpack.c.l.b16 %v7634_v15  ;;  %v7691_v45 = vunpack.c.l.b16 %v7559_v14  ;;  %v7692_v22 = vunpack.c.l.b16 %v7560_v0  ;;  %v7874_v33 = vpop.permute.xlu1 %7873 }
0x148b   :  { %v7557_v13 = vpack.c.bf16 %v7553_v20, %v7553_v20  ;;  %v7558_v26 = vpack.c.bf16 %v7554_v47, %v7554_v47  ;;  %v7705_v25 = vpack.c.b16 %v7702_v41, %v7701_v28  ;;  %v7729_v40 = vpack.c.b16 %v7726_v2, %v7725_v7  ;;  %v7923_v7 = vld [vmem:[%s11173_s17] sm:$0x1]  ;;  %s10912_s17 = smov 40  }
0x148c   :  { %7821 = vmatpush.bf16.msra.mxu0 %v7717_v43  ;;  %v7730_v34 = vpack.c.b16 %v7728_v58, %v7727_v35  ;;  %v9222_v63 = vor.u32 %v9492_v32, %v9221_v37  ;;  %v9193_v49 = vor.u32 %v9485_v55, %v9190_v42  ;;  %v9189_v46 = vor.u32 %v9486_v62, %v9188_v31 }
0x148d   :  { %v7689_v51 = vunpack.c.l.b16 %v7557_v13  ;;  %v7690_v39 = vunpack.c.l.b16 %v7558_v26  ;;  %v7694_v10 = vpack.c.b16 %v7692_v22, %v7691_v45  ;;  %v9218_v12 = vor.u32 %v9490_v29, %v9217_v57 }
0x148e   :  { %7845 = vmatpush.bf16.msrb.mxu1 %v7730_v34  ;;  %v9214_v21 = vor.u32 %v9488_v18, %v9211_v4  ;;  %v9230_v60 = vor.u32 %v9493_v54, %v9229_v17  ;;  %v9226_v3 = vor.u32 %v9491_v30, %v9223_v38  ;;  %v6865_v1 = vpop.permute.xlu2 %6864  ;;  %v7931_v20 = vsel %vm6235_vm6, %v7923_v7, 0 }
0x148f   :  { %v7693_v52 = vpack.c.b16 %v7690_v39, %v7689_v51  ;;  %7940 = vmatpush.bf16.msrb.mxu3 %v7931_v20  ;;  %vm8009_vm6 = vcmask 343040  }
0x1490   :  { %7822 = vmatpush.bf16.msra.mxu0 %v7706_v24 }
0x1492   :  { %7846 = vmatpush.bf16.msrb.mxu1 %v7729_v40  ;;  %v6860_v16 = vpop.permute.xlu1 %6859 }
0x1494   :  { %7823 = vmatpush.bf16.msra.mxu0 %v7705_v25  ;;  %9242 = vmatmul.msk.bf16.gmra.mxu2 %vm976_vm2, %v9495_v9 }
0x1496   :  { %7814 = vmatmul.bf16.gmra.mxu3 %v9222_v63  ;;  %7406 = vmatmul.bf16.gmra.mxu1 %v9193_v49  ;;  %v7748_v13 = vpop.permute.xlu2 %7747 }
0x1497   :  { %7387 = vmatmul.bf16.gmra.mxu0 %v9189_v46 }
0x1498   :  { %7824 = vmatpush.bf16.msra.mxu0 %v7694_v10 }
0x149a   :  { %v6875_v47 = vpop.permute.xlu1 %6874 }
0x149c   :  { %7825 = vmatpush.bf16.msra.mxu0 %v7693_v52 }
0x149e   :  { %v7763_v46 = vpop.permute.xlu2 %7762 }
0x14a0   :  { %7826 = vmatpush.bf16.msra.mxu0 %v13499_v59 }
0x14a2   :  { %v7758_v40 = vpop.permute.xlu1 %7757 }
0x14a4   :  { %7827 = vmatpush.bf16.msra.mxu0 %v13495_v44  ;;  %v7869_v44 = vpop.permute.xlu0 %7868 }
0x14a6   :  { %9231 = vmatmul.msk.bf16.vlgmr.msrb.gmra.mxu1 %vm976_vm2, %v9218_v12  ;;  %v7331_v30 = vpop.permute.xlu2 %7330 }
0x14a7   :  { %7828 = vmatmul.bf16.vlgmr.msra.gmra.mxu0 %v9214_v21 }
0x14aa   :  { %v7326_v52 = vpop.permute.xlu1 %7325 }
0x14ac   :  { %v14019_v56 = vpop.permute.xlu0 %7883 }
0x14b4   :  { %v6870_v35 = vpop.permute.xlu0 %6869 }
0x14b6   :  { %9232 = vmatmul.msk.bf16.gmra.mxu1 %vm976_vm2, %v9230_v60 }
0x14b7   :  { %7833 = vmatmul.bf16.gmra.mxu0 %v9226_v3 }
0x14bc   :  { %v7753_v45 = vpop.permute.xlu0 %7752 }
0x14c0   :  { %v6941_v59 = vpop.f32.mrf.mxu2 }
0x14c4   :  { %v7321_v31 = vpop.permute.xlu0 %7320 }
0x14c8   :  { %v6943_v53 = vpop.f32.mrf.mxu2 }
0x14d0   :  { %v6946_v8 = vpop.f32.mrf.mxu2 }
0x14d8   :  { %v6948_v48 = vpop.f32.mrf.mxu2 }
0x14e2   :  { %v6922_v27 = vpop.f32.mrf.mxu1 }
0x14e3   :  { %v6923_v61 = vadd.f32 %v6922_v27, %v6860_v16 }
0x14e5   :  { %v6942_v5 = vadd.f32 %v6941_v59, %v6923_v61 }
0x14e6   :  { %v6960_v43 = vpop.f32.mrf.mxu3  ;;  %v7421_v11 = vpop.f32.mrf.mxu2 }
0x14e7   :  { %v6961_v23 = vadd.f32 %v6960_v43, %v6942_v5 }
0x14e9   :  { %8019 = vst [vmem:[%s11178_s20] sm:$0xff] %v6961_v23 }
0x14ea   :  { %v6924_v50 = vpop.f32.mrf.mxu1 }
0x14eb   :  { %v6925_v6 = vadd.f32 %v6924_v50, %v6865_v1 }
0x14ed   :  { %v6944_v36 = vadd.f32 %v6943_v53, %v6925_v6 }
0x14ee   :  { %v6962_v15 = vpop.f32.mrf.mxu3  ;;  %v7423_v0 = vpop.f32.mrf.mxu2 }
0x14ef   :  { %v6963_v14 = vadd.f32 %v6962_v15, %v6944_v36 }
0x14f1   :  { %8021 = vst [vmem:[%s11178_s20 + $0x10] sm:$0xff] %v6963_v14 }
0x14f2   :  { %v6927_v58 = vpop.f32.mrf.mxu1 }
0x14f3   :  { %v6928_v2 = vadd.f32 %v6927_v58, %v6870_v35 }
0x14f5   :  { %v6947_v28 = vadd.f32 %v6946_v8, %v6928_v2 }
0x14f7   :  { %v7426_v41 = vpop.f32.mrf.mxu2 }
0x14f9   :  { %v6965_v34 = vpop.f32.mrf.mxu3 }
0x14fa   :  { %v6929_v24 = vpop.f32.mrf.mxu1  ;;  %v6966_v22 = vadd.f32 %v6965_v34, %v6947_v28 }
0x14fb   :  { %v6930_v37 = vadd.f32 %v6929_v24, %v6875_v47 }
0x14fc   :  { %8023 = vst [vmem:[%s11178_s20 + $0x20] sm:$0xff] %v6966_v22 }
0x14fd   :  { %v6949_v26 = vadd.f32 %v6948_v48, %v6930_v37  ;;  %v7336_v48 = vpop.permute.xlu0 %7335 }
0x14ff   :  { %v7428_v32 = vpop.f32.mrf.mxu2 }
0x1501   :  { %v6967_v25 = vpop.f32.mrf.mxu3 }
0x1502   :  { %v6968_v55 = vadd.f32 %v6967_v25, %v6949_v26 }
0x1503   :  { %v7402_v42 = vpop.f32.mrf.mxu1 }
0x1504   :  { %8025 = vst [vmem:[%s11178_s20 + $0x30] sm:$0xff] %v6968_v55  ;;  %v7383_v62 = vpop.f32.mrf.mxu0 }
0x1505   :  { %v7384_v9 = vadd.f32 %v7383_v62, %v7321_v31 }
0x1507   :  { %v7403_v63 = vadd.f32 %v7402_v42, %v7384_v9  ;;  %v7911_v49 = vpop.f32.mrf.mxu2 }
0x1508   :  { %v7912_v39 = vadd.f32 %v7911_v49, %v7869_v44 }
0x1509   :  { %v14027_v51 = vadd.f32 %v7421_v11, %v7403_v63  ;;  %v7810_v8 = vpop.f32.mrf.mxu3 }
0x150a   :  { %7972 = vrot.lane.b32.xlu2 %v7912_v39, %s10912_s17  ;;  %v7811_v11 = vadd.f32 %v7810_v8, %v7748_v13 }
0x150b   :  { %v7404_v10 = vpop.f32.mrf.mxu1 }
0x150c   :  { %v7385_v57 = vpop.f32.mrf.mxu0 }
0x150d   :  { %v7386_v29 = vadd.f32 %v7385_v57, %v7326_v52 }
0x150f   :  { %v7405_v18 = vadd.f32 %v7404_v10, %v7386_v29  ;;  %v7913_v4 = vpop.f32.mrf.mxu2 }
0x1510   :  { %v7914_v21 = vadd.f32 %v7913_v4, %v7874_v33 }
0x1511   :  { %v14030_v12 = vadd.f32 %v7423_v0, %v7405_v18  ;;  %v7812_v6 = vpop.f32.mrf.mxu3 }
0x1512   :  { %v7921_v17 = vpack.c.bf16 %v7914_v21, %v7912_v39  ;;  %7974 = vrot.lane.b32.xlu0 %v7914_v21, %s10912_s17  ;;  %v7813_v0 = vadd.f32 %v7812_v6, %v7753_v45 }
0x1513   :  { %v7407_v54 = vpop.f32.mrf.mxu1 }
0x1514   :  { %v7388_v38 = vpop.f32.mrf.mxu0  ;;  %9243 = vmatmul.msk.bf16.vlgmr.msrb.gmra.mxu3 %vm6228_vm7, %v7921_v17 }
0x1515   :  { %v7389_v60 = vadd.f32 %v7388_v38, %v7331_v30 }
0x1517   :  { %v7408_v3 = vadd.f32 %v7407_v54, %v7389_v60  ;;  %v7916_v59 = vpop.f32.mrf.mxu2 }
0x1518   :  { %v7917_v33 = vadd.f32 %v7916_v59, %v14017_v19 }
0x1519   :  { %v7427_v53 = vadd.f32 %v7426_v41, %v7408_v3  ;;  %v7815_v19 = vpop.f32.mrf.mxu3 }
0x151b   :  { %v7409_v44 = vpop.f32.mrf.mxu1 }
0x151c   :  { %v7390_v16 = vpop.f32.mrf.mxu0 }
0x151d   :  { %v7391_v27 = vadd.f32 %v7390_v16, %v7336_v48 }
0x151f   :  { %v7410_v61 = vadd.f32 %v7409_v44, %v7391_v27  ;;  %v7918_v5 = vpop.f32.mrf.mxu2 }
0x1520   :  { %v7919_v23 = vadd.f32 %v7918_v5, %v14019_v56  ;;  %v7816_v56 = vadd.f32 %v7815_v19, %v7758_v40 }
0x1521   :  { %v14035_v43 = vadd.f32 %v7428_v32, %v7410_v61  ;;  %v7817_v34 = vpop.f32.mrf.mxu3 }
0x1522   :  { %v7922_v1 = vpack.c.bf16 %v7919_v23, %v7917_v33  ;;  %v7818_v24 = vadd.f32 %v7817_v34, %v7763_v46 }
0x1523   :  { %v7848_v50 = vpop.f32.mrf.mxu1 }
0x1524   :  { %v7829_v36 = vpop.f32.mrf.mxu0  ;;  %9244 = vmatmul.msk.bf16.gmra.mxu3 %vm6228_vm7, %v7922_v1  ;;  %vm8004_vm7 = vcmask 326656  }
0x1525   :  { %v7830_v15 = vadd.f32 %v7829_v36, %v7811_v11 }
0x1527   :  { %v7849_v14 = vadd.f32 %v7848_v50, %v7830_v15 }
0x1529   :  { %7956 = vrot.lane.b32.xlu1 %v7849_v14, %s10913_s5 }
0x152b   :  { %v7850_v35 = vpop.f32.mrf.mxu1 }
0x152c   :  { %v7831_v58 = vpop.f32.mrf.mxu0 }
0x152d   :  { %v7832_v7 = vadd.f32 %v7831_v58, %v7813_v0 }
0x152f   :  { %v7851_v2 = vadd.f32 %v7850_v35, %v7832_v7 }
0x1531   :  { %7958 = vrot.lane.b32.xlu2 %v7851_v2, %s10913_s5  ;;  %7976 = vrot.lane.b32.xlu1 %v7917_v33, %s10912_s17 }
0x1533   :  { %v7853_v20 = vpop.f32.mrf.mxu1 }
0x1534   :  { %v7834_v47 = vpop.f32.mrf.mxu0 }
0x1535   :  { %v7835_v28 = vadd.f32 %v7834_v47, %v7816_v56 }
0x1537   :  { %v7854_v41 = vadd.f32 %v7853_v20, %v7835_v28 }
0x1539   :  { %7978 = vrot.lane.b32.xlu2 %v7919_v23, %s10912_s17  ;;  %7960 = vrot.lane.b32.xlu0 %v7854_v41, %s10913_s5 }
0x153b   :  { %v7855_v45 = vpop.f32.mrf.mxu1 }
0x153c   :  { %v7836_v22 = vpop.f32.mrf.mxu0 }
0x153d   :  { %v7837_v37 = vadd.f32 %v7836_v22, %v7818_v24 }
0x153f   :  { %v7856_v13 = vadd.f32 %v7855_v45, %v7837_v37 }
0x1541   :  { %7962 = vrot.lane.b32.xlu1 %v7856_v13, %s10913_s5 }
0x1564   :  { %v7973_v55 = vpop.permute.xlu2 %7972 }
0x1584   :  { %v7975_v31 = vpop.permute.xlu0 %7974 }
0x158b   :  { %v7959_v42 = vpop.permute.xlu2 %7958 }
0x158c   :  { %v8001_v30 = vsel %vm976_vm2, %v14030_v12, %v7959_v42 }
0x158d   :  { %v8006_v38 = vsel %vm8004_vm7, %v8001_v30, %v7975_v31 }
0x1593   :  { %v7979_v9 = vpop.permute.xlu2 %7978 }
0x1597   :  { %v7942_v26 = vpop.f32.mrf.mxu3 }
0x1598   :  { %7988 = vrot.lane.b32.xlu0 %v7942_v26, %s10914_s11 }
0x159b   :  { %v7957_v62 = vpop.permute.xlu1 %7956 }
0x159c   :  { %v8000_v29 = vsel %vm976_vm2, %v14027_v51, %v7957_v62 }
0x159d   :  { %v8005_v21 = vsel %vm8004_vm7, %v8000_v29, %v7973_v55 }
0x159f   :  { %v7944_v32 = vpop.f32.mrf.mxu3 }
0x15a0   :  { %7990 = vrot.lane.b32.xlu1 %v7944_v32, %s10914_s11 }
0x15a3   :  { %v7977_v39 = vpop.permute.xlu1 %7976 }
0x15a7   :  { %v7947_v25 = vpop.f32.mrf.mxu3 }
0x15a8   :  { %7992 = vrot.lane.b32.xlu2 %v7947_v25, %s10914_s11 }
0x15ab   :  { %v7961_v63 = vpop.permute.xlu0 %7960 }
0x15ac   :  { %v8002_v49 = vsel %vm976_vm2, %v7427_v53, %v7961_v63 }
0x15ad   :  { %v8007_v10 = vsel %vm8004_vm7, %v8002_v49, %v7977_v39 }
0x15af   :  { %v7949_v40 = vpop.f32.mrf.mxu3 }
0x15b0   :  { %7994 = vrot.lane.b32.xlu0 %v7949_v40, %s10914_s11 }
0x15b3   :  { %v7963_v18 = vpop.permute.xlu1 %7962 }
0x15b4   :  { %v8003_v59 = vsel %vm976_vm2, %v14035_v43, %v7963_v18 }
0x15b5   :  { %v8008_v8 = vsel %vm8004_vm7, %v8003_v59, %v7979_v9 }
0x1602   :  { %v7993_v46 = vpop.permute.xlu2 %7992 }
0x1603   :  { %v8012_v52 = vsel %vm8009_vm6, %v8007_v10, %v7993_v46 }
0x1604   :  { %v8017_v57 = vsel %vm8014_vm10, %v8012_v52, 0.0 }
0x1605   :  { %8024 = vst [vmem:[%s11178_s20 + $0x28] sm:$0xff] %v8017_v57 }
0x160a   :  { %v7989_v4 = vpop.permute.xlu0 %7988 }
0x160b   :  { %v8010_v17 = vsel %vm8009_vm6, %v8005_v21, %v7989_v4 }
0x160c   :  { %v8015_v54 = vsel %vm8014_vm10, %v8010_v17, 0.0 }
0x160d   :  { %8020 = vst [vmem:[%s11178_s20 + $0x8] sm:$0xff] %v8015_v54 }
0x1612   :  { %v7991_v60 = vpop.permute.xlu1 %7990 }
0x1613   :  { %v8011_v3 = vsel %vm8009_vm6, %v8006_v38, %v7991_v60 }
0x1614   :  { %v8016_v51 = vsel %vm8014_vm10, %v8011_v3, 0.0 }
0x1615   :  { %8022 = vst [vmem:[%s11178_s20 + $0x18] sm:$0xff] %v8016_v51 }
0x1622   :  { %v7995_v53 = vpop.permute.xlu0 %7994 }
0x1623   :  { %v8013_v44 = vsel %vm8009_vm6, %v8008_v8, %v7995_v53 }
0x1624   :  { %v8018_v48 = vsel %vm8014_vm10, %v8013_v44, 0.0 }
0x1625   :  { %8026 = vst [vmem:[%s11178_s20 + $0x38] sm:$0xff] %v8018_v48 }
0x1626   :  { %8031 = vsyncpa [#allocation3], 1 }
0x1627   :  { %8032 = vsyncpa [#allocation5], 1 }
0x1628   :  { %8033 = vsyncpa [#allocation8], 1 }
0x1629   :  { %8034 = vsyncpa [#allocation11], 1 }
0x162a   :  { %8035 = vsyncpa [#allocation14], 1 }
0x162b   :  { %8036 = vsyncpa [#allocation17], 1 }
0x162c   :  { %8037 = vsyncpa [#allocation20], 1 }
0x162d   :  { %8038 = vsyncpa [#allocation23], 1 }
0x162e   :  { %8039 = vsyncpa [#allocation26], 1 }
0x162f   :  { %8040 = vsyncpa [#allocation29], 1 }
0x1630   :  { %8041 = vsyncpa [#allocation32], 1 }
0x1631   :  { %8042 = vsyncpa [#allocation35], 1 }
0x1632   :  { %8043 = vsyncpa [#allocation38], 1 }
0x1633   :  { %8044 = vsyncpa [#allocation41], 1 }
0x1634   :  { %8045 = vsyncpa [#allocation44], 1 }
0x1635   :  { %8046 = vsyncpa [#allocation47], 1 }
0x1636   :  { %8047 = vsyncpa [#allocation50], 1 }
0x1637   :  { %8048 = vsyncpa [#allocation53], 1 }
0x1638   :  { %8049 = vsyncpa [#allocation56], 1 }
0x1639   :  { %8050 = vsyncpa [#allocation59], 1 }
0x163a   :  { %8051 = vsyncpa [#allocation62], 1 }
0x163b   :  { %8052 = vsyncpa [#allocation65], 1 }

</bundles_post_ra>
